<compile_context>
chip_gen: v7x
topology: tpu7x:2x2x1
jax: 0.10.0
libtpu: 0.0.40
codegen_flags: <defaults>
</compile_context>

<pallas_src>
import numpy as np
import jax
import jax.numpy as jnp
from jax.experimental import pallas as pl
from jax.experimental.pallas import tpu as pltpu


# ---------------------------------------------------------------------------
# Softplus(beta=100) exactly as torch.nn.Softplus(beta=100, threshold=20):
#   out = (1/beta) * log(1 + exp(beta*x))   if beta*x <= 20
#   out = x                                  otherwise
# ---------------------------------------------------------------------------
def softplus_beta100(x):
    z = 100.0 * x
    safe = jnp.where(z > 20.0, 0.0, z)           # avoid overflow in exp
    return jnp.where(z > 20.0, x, jnp.log1p(jnp.exp(safe)) * (1.0 / 100.0))


# ---------------------------------------------------------------------------
# Deterministic parameter construction mirroring UDFNetwork.__init__
# (geometric_init=True, weight_norm=True, multires=0).
# Returns PyTorch-layout params: list of (W[out,in], b[out]) in float32.
# ---------------------------------------------------------------------------
def make_udf_params(key, d_in_lat, d_in_spatial, d_hidden, n_layers, d_out,
                    skip_in, bias):
    d_in_total = d_in_lat + d_in_spatial
    dims = [d_in_total] + [d_hidden] * n_layers + [d_out]
    num_layers = len(dims)
    params = []
    for l in range(num_layers - 1):
        if (l + 1) in skip_in:
            out_dim = dims[l + 1] - dims[0]
        else:
            out_dim = dims[l + 1]
        key, sub = jax.random.split(key)
        if l == num_layers - 2:
            # last layer: normal(mean=sqrt(pi)/sqrt(dims[l]), std=1e-4), bias=-bias
            w = (np.sqrt(np.pi) / np.sqrt(dims[l])
                 + 1e-4 * jax.random.normal(sub, (out_dim, dims[l]), jnp.float32))
            b = jnp.full((out_dim,), -bias, jnp.float32)
        else:
            # hidden layers: normal(0, sqrt(2)/sqrt(out_dim)), bias=0
            w = (np.sqrt(2.0) / np.sqrt(out_dim)
                 * jax.random.normal(sub, (out_dim, dims[l]), jnp.float32))
            b = jnp.zeros((out_dim,), jnp.float32)
        params.append((jnp.asarray(w, jnp.float32), jnp.asarray(b, jnp.float32)))
    return params, dims


# ---------------------------------------------------------------------------
# Offline transform of the PyTorch-layout params into the kernel layout:
#  * biases become (out, 1) columns (broadcast over the lane/point axis)
#  * the skip layer's weight is split into (W_h, W_in) acting on the running
#    activation and the raw input respectively, with 1/sqrt(2) folded in.
# ---------------------------------------------------------------------------
def prepare_kernel_params(params, dims, skip_in):
    d_in_total = dims[0]
    inv_sqrt2 = np.float32(1.0 / np.sqrt(2.0))
    kparams = []
    for l, (w, b) in enumerate(params):
        b_col = b.reshape(-1, 1)
        if l in skip_in:
            split = w.shape[1] - d_in_total      # width of previous activation
            w_h = w[:, :split] * inv_sqrt2
            w_in = w[:, split:] * inv_sqrt2
            kparams.append((w_h, w_in, b_col))
        else:
            kparams.append((w, b_col))
    return kparams


# ---------------------------------------------------------------------------
# Pallas kernel: full MLP forward for one tile of points (feature-major).
# refs = (x_ref, <weights/biases...>, out_ref)
#   x_ref   : (d_in, TN)
#   out_ref : (d_out, TN)   lane-dense
# ---------------------------------------------------------------------------
def make_udf_kernel(num_layers, skip_in):
    def kernel(*refs):
        x_ref = refs[0]
        out_ref = refs[-1]
        wb = refs[1:-1]

        inputs = x_ref[...]                      # (d_in, TN), points on lanes
        h = inputs
        idx = 0
        for l in range(num_layers - 1):
            if l in skip_in:
                # skip connection without concat: W_h @ h + W_in @ inputs
                w_h = wb[idx][...]
                w_in = wb[idx + 1][...]
                b = wb[idx + 2][...]
                idx += 3
                z = (jnp.dot(w_h, h, preferred_element_type=jnp.float32)
                     + jnp.dot(w_in, inputs, preferred_element_type=jnp.float32)
                     + b)
            else:
                w = wb[idx][...]
                b = wb[idx + 1][...]
                idx += 2
                z = jnp.dot(w, h, preferred_element_type=jnp.float32) + b
            h = softplus_beta100(z) if l < num_layers - 2 else z
        out_ref[...] = jnp.abs(h)                # udf_type='abs'
    return kernel


# ---------------------------------------------------------------------------
# Wrapper: (N, d_in) -> (N, d_out).  Transposes to feature-major, pads N up to
# a multiple of tile_n, runs the kernel over a 1-D "parallel" grid, then slices
# and transposes back.
# ---------------------------------------------------------------------------
def udf_forward(x, params, dims, skip_in, tile_n=1024):
    N, d_in_total = x.shape
    assert d_in_total == dims[0]
    num_layers = len(dims)
    d_out = dims[-1]

    kparams = prepare_kernel_params(params, dims, skip_in)

    n_tiles = pl.cdiv(N, tile_n)
    n_pad = n_tiles * tile_n

    xT = x.T                                     # (d_in, N) feature-major
    if n_pad != N:
        xT = jnp.pad(xT, ((0, 0), (0, n_pad - N)))

    flat = []
    in_specs = [pl.BlockSpec((d_in_total, tile_n), lambda i: (0, i))]
    for p in kparams:
        for a in p:
            flat.append(a)
            # tiny weights/biases: full block, constant index (stay resident)
            in_specs.append(pl.BlockSpec(a.shape, lambda i: (0, 0)))

    kernel = make_udf_kernel(num_layers, tuple(skip_in))

    outT = pl.pallas_call(
        kernel,
        out_shape=jax.ShapeDtypeStruct((d_out, n_pad), jnp.float32),
        grid_spec=pltpu.PrefetchScalarGridSpec(
            num_scalar_prefetch=0,
            grid=(n_tiles,),
            in_specs=in_specs,
            out_specs=pl.BlockSpec((d_out, tile_n), lambda i: (0, i)),
        ),
        compiler_params=pltpu.CompilerParams(
            dimension_semantics=("parallel",)),
    )(xT, *flat)

    return outT[:, :N].T                         # back to (N, d_out)


# ---------------------------------------------------------------------------
# Pure-JAX reference (mirrors the PyTorch forward exactly) for validation.
# ---------------------------------------------------------------------------
def udf_forward_ref(x, params, skip_in):
    num_layers = len(params) + 1
    inputs = x
    h = x
    for l, (w, b) in enumerate(params):
        if l in skip_in:
            h = jnp.concatenate([h, inputs], axis=-1) / np.sqrt(2.0)
        h = h @ w.T + b
        if l < num_layers - 2:
            h = softplus_beta100(h)
    return jnp.abs(h)


if __name__ == "__main__":
    # Module hyperparameters (consistent with UDFNetwork defaults):
    # d_in (latent) = 6, d_in_spatial = 2 -> input feature dim 8
    # d_hidden = 32, n_layers = 6 -> 7 linear layers, skip at layer 4
    d_in_lat, d_in_spatial = 6, 2
    d_hidden, n_layers, d_out = 32, 6, 1
    skip_in = (4,)
    bias = 0.5

    key = jax.random.PRNGKey(0)
    kp, kx = jax.random.split(key)
    params, dims = make_udf_params(kp, d_in_lat, d_in_spatial, d_hidden,
                                   n_layers, d_out, skip_in, bias)

    # N not a multiple of tile_n on purpose (exercises cdiv + padding);
    # 2 grid steps so v7x's two TensorCores both get work.
    N = 2000
    tile_n = 1024
    x = jax.random.normal(kx, (N, d_in_lat + d_in_spatial), jnp.float32)

    out = udf_forward(x, params, dims, skip_in, tile_n=tile_n)
    out = jax.block_until_ready(out)

    ref = jax.block_until_ready(udf_forward_ref(x, params, skip_in))
    np.testing.assert_allclose(np.asarray(out), np.asarray(ref),
                               rtol=1e-4, atol=1e-5)

    print("KERNEL_OK")
</pallas_src>

<mosaic_0001>
module attributes {stable_mosaic.version = 11 : i64} {
  func.func @kernel(%arg0: i32, %arg1: memref<8x1024xf32, #tpu.memory_space<vmem>>, %arg2: memref<32x8xf32, #tpu.memory_space<vmem>>, %arg3: memref<32x1xf32, #tpu.memory_space<vmem>>, %arg4: memref<32x32xf32, #tpu.memory_space<vmem>>, %arg5: memref<32x1xf32, #tpu.memory_space<vmem>>, %arg6: memref<32x32xf32, #tpu.memory_space<vmem>>, %arg7: memref<32x1xf32, #tpu.memory_space<vmem>>, %arg8: memref<24x32xf32, #tpu.memory_space<vmem>>, %arg9: memref<24x1xf32, #tpu.memory_space<vmem>>, %arg10: memref<32x24xf32, #tpu.memory_space<vmem>>, %arg11: memref<32x8xf32, #tpu.memory_space<vmem>>, %arg12: memref<32x1xf32, #tpu.memory_space<vmem>>, %arg13: memref<32x32xf32, #tpu.memory_space<vmem>>, %arg14: memref<32x1xf32, #tpu.memory_space<vmem>>, %arg15: memref<1x32xf32, #tpu.memory_space<vmem>>, %arg16: memref<1x1xf32, #tpu.memory_space<vmem>>, %arg17: memref<1x1024xf32, #tpu.memory_space<vmem>>) attributes {dimension_semantics = [#tpu.dimension_semantics<parallel>], iteration_bounds = array<i64: 2>, scalar_prefetch = 0 : i64, scratch_operands = 0 : i64, tpu.core_type = #tpu.core_type<tc>, window_params = [{transform_indices = @transform_0, window_bounds = array<i64: 8, 1024>}, {pipeline_mode = #tpu.pipeline_mode<synchronous>, transform_indices = @transform_1, window_bounds = array<i64: 32, 8>}, {pipeline_mode = #tpu.pipeline_mode<synchronous>, transform_indices = @transform_2, window_bounds = array<i64: 32, 1>}, {pipeline_mode = #tpu.pipeline_mode<synchronous>, transform_indices = @transform_3, window_bounds = array<i64: 32, 32>}, {pipeline_mode = #tpu.pipeline_mode<synchronous>, transform_indices = @transform_4, window_bounds = array<i64: 32, 1>}, {pipeline_mode = #tpu.pipeline_mode<synchronous>, transform_indices = @transform_5, window_bounds = array<i64: 32, 32>}, {pipeline_mode = #tpu.pipeline_mode<synchronous>, transform_indices = @transform_6, window_bounds = array<i64: 32, 1>}, {pipeline_mode = #tpu.pipeline_mode<synchronous>, transform_indices = @transform_7, window_bounds = array<i64: 24, 32>}, {pipeline_mode = #tpu.pipeline_mode<synchronous>, transform_indices = @transform_8, window_bounds = array<i64: 24, 1>}, {pipeline_mode = #tpu.pipeline_mode<synchronous>, transform_indices = @transform_9, window_bounds = array<i64: 32, 24>}, {pipeline_mode = #tpu.pipeline_mode<synchronous>, transform_indices = @transform_10, window_bounds = array<i64: 32, 8>}, {pipeline_mode = #tpu.pipeline_mode<synchronous>, transform_indices = @transform_11, window_bounds = array<i64: 32, 1>}, {pipeline_mode = #tpu.pipeline_mode<synchronous>, transform_indices = @transform_12, window_bounds = array<i64: 32, 32>}, {pipeline_mode = #tpu.pipeline_mode<synchronous>, transform_indices = @transform_13, window_bounds = array<i64: 32, 1>}, {pipeline_mode = #tpu.pipeline_mode<synchronous>, transform_indices = @transform_14, window_bounds = array<i64: 1, 32>}, {pipeline_mode = #tpu.pipeline_mode<synchronous>, transform_indices = @transform_15, window_bounds = array<i64: 1, 1>}, {transform_indices = @transform_16, window_bounds = array<i64: 1, 1024>}]} {
    %c0 = arith.constant 0 : index
    %c0_0 = arith.constant 0 : index
    %0 = vector.load %arg1[%c0, %c0_0] : memref<8x1024xf32, #tpu.memory_space<vmem>>, vector<8x1024xf32>
    %c0_1 = arith.constant 0 : index
    %c0_2 = arith.constant 0 : index
    %1 = vector.load %arg2[%c0_1, %c0_2] : memref<32x8xf32, #tpu.memory_space<vmem>>, vector<32x8xf32>
    %c0_3 = arith.constant 0 : index
    %c0_4 = arith.constant 0 : index
    %2 = vector.load %arg3[%c0_3, %c0_4] : memref<32x1xf32, #tpu.memory_space<vmem>>, vector<32x1xf32>
    %cst = arith.constant dense<0.000000e+00> : vector<32x1024xf32>
    %3 = tpu.matmul %1, %0, %cst {dimension_numbers = #tpu.dot_dimension_numbers<[1], [0], [0], [1], [0, 0, 1, 1], [], []>} : vector<32x8xf32>, vector<8x1024xf32>, vector<32x1024xf32> -> vector<32x1024xf32>
    %4 = vector.broadcast %2 : vector<32x1xf32> to vector<32x1024xf32>
    %5 = arith.addf %3, %4 : vector<32x1024xf32>
    %cst_5 = arith.constant 1.000000e+02 : f32
    %6 = vector.broadcast %cst_5 : f32 to vector<32x1024xf32>
    %7 = arith.mulf %6, %5 : vector<32x1024xf32>
    %cst_6 = arith.constant 2.000000e+01 : f32
    %8 = vector.broadcast %cst_6 : f32 to vector<32x1024xf32>
    %9 = arith.cmpf ogt, %7, %8 : vector<32x1024xf32>
    %cst_7 = arith.constant 0.000000e+00 : f32
    %10 = vector.broadcast %cst_7 : f32 to vector<32x1024xf32>
    %11 = arith.select %9, %10, %7 : vector<32x1024xi1>, vector<32x1024xf32>
    %cst_8 = arith.constant 2.000000e+01 : f32
    %12 = vector.broadcast %cst_8 : f32 to vector<32x1024xf32>
    %13 = arith.cmpf ogt, %7, %12 : vector<32x1024xf32>
    %14 = math.exp %11 : vector<32x1024xf32>
    %15 = math.log1p %14 : vector<32x1024xf32>
    %cst_9 = arith.constant 0.00999999977 : f32
    %16 = vector.broadcast %cst_9 : f32 to vector<32x1024xf32>
    %17 = arith.mulf %15, %16 : vector<32x1024xf32>
    %18 = arith.select %13, %5, %17 : vector<32x1024xi1>, vector<32x1024xf32>
    %c0_10 = arith.constant 0 : index
    %c0_11 = arith.constant 0 : index
    %19 = vector.load %arg4[%c0_10, %c0_11] : memref<32x32xf32, #tpu.memory_space<vmem>>, vector<32x32xf32>
    %c0_12 = arith.constant 0 : index
    %c0_13 = arith.constant 0 : index
    %20 = vector.load %arg5[%c0_12, %c0_13] : memref<32x1xf32, #tpu.memory_space<vmem>>, vector<32x1xf32>
    %cst_14 = arith.constant dense<0.000000e+00> : vector<32x1024xf32>
    %21 = tpu.matmul %19, %18, %cst_14 {dimension_numbers = #tpu.dot_dimension_numbers<[1], [0], [0], [1], [0, 0, 1, 1], [], []>} : vector<32x32xf32>, vector<32x1024xf32>, vector<32x1024xf32> -> vector<32x1024xf32>
    %22 = vector.broadcast %20 : vector<32x1xf32> to vector<32x1024xf32>
    %23 = arith.addf %21, %22 : vector<32x1024xf32>
    %cst_15 = arith.constant 1.000000e+02 : f32
    %24 = vector.broadcast %cst_15 : f32 to vector<32x1024xf32>
    %25 = arith.mulf %24, %23 : vector<32x1024xf32>
    %cst_16 = arith.constant 2.000000e+01 : f32
    %26 = vector.broadcast %cst_16 : f32 to vector<32x1024xf32>
    %27 = arith.cmpf ogt, %25, %26 : vector<32x1024xf32>
    %cst_17 = arith.constant 0.000000e+00 : f32
    %28 = vector.broadcast %cst_17 : f32 to vector<32x1024xf32>
    %29 = arith.select %27, %28, %25 : vector<32x1024xi1>, vector<32x1024xf32>
    %cst_18 = arith.constant 2.000000e+01 : f32
    %30 = vector.broadcast %cst_18 : f32 to vector<32x1024xf32>
    %31 = arith.cmpf ogt, %25, %30 : vector<32x1024xf32>
    %32 = math.exp %29 : vector<32x1024xf32>
    %33 = math.log1p %32 : vector<32x1024xf32>
    %cst_19 = arith.constant 0.00999999977 : f32
    %34 = vector.broadcast %cst_19 : f32 to vector<32x1024xf32>
    %35 = arith.mulf %33, %34 : vector<32x1024xf32>
    %36 = arith.select %31, %23, %35 : vector<32x1024xi1>, vector<32x1024xf32>
    %c0_20 = arith.constant 0 : index
    %c0_21 = arith.constant 0 : index
    %37 = vector.load %arg6[%c0_20, %c0_21] : memref<32x32xf32, #tpu.memory_space<vmem>>, vector<32x32xf32>
    %c0_22 = arith.constant 0 : index
    %c0_23 = arith.constant 0 : index
    %38 = vector.load %arg7[%c0_22, %c0_23] : memref<32x1xf32, #tpu.memory_space<vmem>>, vector<32x1xf32>
    %cst_24 = arith.constant dense<0.000000e+00> : vector<32x1024xf32>
    %39 = tpu.matmul %37, %36, %cst_24 {dimension_numbers = #tpu.dot_dimension_numbers<[1], [0], [0], [1], [0, 0, 1, 1], [], []>} : vector<32x32xf32>, vector<32x1024xf32>, vector<32x1024xf32> -> vector<32x1024xf32>
    %40 = vector.broadcast %38 : vector<32x1xf32> to vector<32x1024xf32>
    %41 = arith.addf %39, %40 : vector<32x1024xf32>
    %cst_25 = arith.constant 1.000000e+02 : f32
    %42 = vector.broadcast %cst_25 : f32 to vector<32x1024xf32>
    %43 = arith.mulf %42, %41 : vector<32x1024xf32>
    %cst_26 = arith.constant 2.000000e+01 : f32
    %44 = vector.broadcast %cst_26 : f32 to vector<32x1024xf32>
    %45 = arith.cmpf ogt, %43, %44 : vector<32x1024xf32>
    %cst_27 = arith.constant 0.000000e+00 : f32
    %46 = vector.broadcast %cst_27 : f32 to vector<32x1024xf32>
    %47 = arith.select %45, %46, %43 : vector<32x1024xi1>, vector<32x1024xf32>
    %cst_28 = arith.constant 2.000000e+01 : f32
    %48 = vector.broadcast %cst_28 : f32 to vector<32x1024xf32>
    %49 = arith.cmpf ogt, %43, %48 : vector<32x1024xf32>
    %50 = math.exp %47 : vector<32x1024xf32>
    %51 = math.log1p %50 : vector<32x1024xf32>
    %cst_29 = arith.constant 0.00999999977 : f32
    %52 = vector.broadcast %cst_29 : f32 to vector<32x1024xf32>
    %53 = arith.mulf %51, %52 : vector<32x1024xf32>
    %54 = arith.select %49, %41, %53 : vector<32x1024xi1>, vector<32x1024xf32>
    %c0_30 = arith.constant 0 : index
    %c0_31 = arith.constant 0 : index
    %55 = vector.load %arg8[%c0_30, %c0_31] : memref<24x32xf32, #tpu.memory_space<vmem>>, vector<24x32xf32>
    %c0_32 = arith.constant 0 : index
    %c0_33 = arith.constant 0 : index
    %56 = vector.load %arg9[%c0_32, %c0_33] : memref<24x1xf32, #tpu.memory_space<vmem>>, vector<24x1xf32>
    %cst_34 = arith.constant dense<0.000000e+00> : vector<24x1024xf32>
    %57 = tpu.matmul %55, %54, %cst_34 {dimension_numbers = #tpu.dot_dimension_numbers<[1], [0], [0], [1], [0, 0, 1, 1], [], []>} : vector<24x32xf32>, vector<32x1024xf32>, vector<24x1024xf32> -> vector<24x1024xf32>
    %58 = vector.broadcast %56 : vector<24x1xf32> to vector<24x1024xf32>
    %59 = arith.addf %57, %58 : vector<24x1024xf32>
    %cst_35 = arith.constant 1.000000e+02 : f32
    %60 = vector.broadcast %cst_35 : f32 to vector<24x1024xf32>
    %61 = arith.mulf %60, %59 : vector<24x1024xf32>
    %cst_36 = arith.constant 2.000000e+01 : f32
    %62 = vector.broadcast %cst_36 : f32 to vector<24x1024xf32>
    %63 = arith.cmpf ogt, %61, %62 : vector<24x1024xf32>
    %cst_37 = arith.constant 0.000000e+00 : f32
    %64 = vector.broadcast %cst_37 : f32 to vector<24x1024xf32>
    %65 = arith.select %63, %64, %61 : vector<24x1024xi1>, vector<24x1024xf32>
    %cst_38 = arith.constant 2.000000e+01 : f32
    %66 = vector.broadcast %cst_38 : f32 to vector<24x1024xf32>
    %67 = arith.cmpf ogt, %61, %66 : vector<24x1024xf32>
    %68 = math.exp %65 : vector<24x1024xf32>
    %69 = math.log1p %68 : vector<24x1024xf32>
    %cst_39 = arith.constant 0.00999999977 : f32
    %70 = vector.broadcast %cst_39 : f32 to vector<24x1024xf32>
    %71 = arith.mulf %69, %70 : vector<24x1024xf32>
    %72 = arith.select %67, %59, %71 : vector<24x1024xi1>, vector<24x1024xf32>
    %c0_40 = arith.constant 0 : index
    %c0_41 = arith.constant 0 : index
    %73 = vector.load %arg10[%c0_40, %c0_41] : memref<32x24xf32, #tpu.memory_space<vmem>>, vector<32x24xf32>
    %c0_42 = arith.constant 0 : index
    %c0_43 = arith.constant 0 : index
    %74 = vector.load %arg11[%c0_42, %c0_43] : memref<32x8xf32, #tpu.memory_space<vmem>>, vector<32x8xf32>
    %c0_44 = arith.constant 0 : index
    %c0_45 = arith.constant 0 : index
    %75 = vector.load %arg12[%c0_44, %c0_45] : memref<32x1xf32, #tpu.memory_space<vmem>>, vector<32x1xf32>
    %cst_46 = arith.constant dense<0.000000e+00> : vector<32x1024xf32>
    %76 = tpu.matmul %73, %72, %cst_46 {dimension_numbers = #tpu.dot_dimension_numbers<[1], [0], [0], [1], [0, 0, 1, 1], [], []>} : vector<32x24xf32>, vector<24x1024xf32>, vector<32x1024xf32> -> vector<32x1024xf32>
    %cst_47 = arith.constant dense<0.000000e+00> : vector<32x1024xf32>
    %77 = tpu.matmul %74, %0, %cst_47 {dimension_numbers = #tpu.dot_dimension_numbers<[1], [0], [0], [1], [0, 0, 1, 1], [], []>} : vector<32x8xf32>, vector<8x1024xf32>, vector<32x1024xf32> -> vector<32x1024xf32>
    %78 = arith.addf %76, %77 : vector<32x1024xf32>
    %79 = vector.broadcast %75 : vector<32x1xf32> to vector<32x1024xf32>
    %80 = arith.addf %78, %79 : vector<32x1024xf32>
    %cst_48 = arith.constant 1.000000e+02 : f32
    %81 = vector.broadcast %cst_48 : f32 to vector<32x1024xf32>
    %82 = arith.mulf %81, %80 : vector<32x1024xf32>
    %cst_49 = arith.constant 2.000000e+01 : f32
    %83 = vector.broadcast %cst_49 : f32 to vector<32x1024xf32>
    %84 = arith.cmpf ogt, %82, %83 : vector<32x1024xf32>
    %cst_50 = arith.constant 0.000000e+00 : f32
    %85 = vector.broadcast %cst_50 : f32 to vector<32x1024xf32>
    %86 = arith.select %84, %85, %82 : vector<32x1024xi1>, vector<32x1024xf32>
    %cst_51 = arith.constant 2.000000e+01 : f32
    %87 = vector.broadcast %cst_51 : f32 to vector<32x1024xf32>
    %88 = arith.cmpf ogt, %82, %87 : vector<32x1024xf32>
    %89 = math.exp %86 : vector<32x1024xf32>
    %90 = math.log1p %89 : vector<32x1024xf32>
    %cst_52 = arith.constant 0.00999999977 : f32
    %91 = vector.broadcast %cst_52 : f32 to vector<32x1024xf32>
    %92 = arith.mulf %90, %91 : vector<32x1024xf32>
    %93 = arith.select %88, %80, %92 : vector<32x1024xi1>, vector<32x1024xf32>
    %c0_53 = arith.constant 0 : index
    %c0_54 = arith.constant 0 : index
    %94 = vector.load %arg13[%c0_53, %c0_54] : memref<32x32xf32, #tpu.memory_space<vmem>>, vector<32x32xf32>
    %c0_55 = arith.constant 0 : index
    %c0_56 = arith.constant 0 : index
    %95 = vector.load %arg14[%c0_55, %c0_56] : memref<32x1xf32, #tpu.memory_space<vmem>>, vector<32x1xf32>
    %cst_57 = arith.constant dense<0.000000e+00> : vector<32x1024xf32>
    %96 = tpu.matmul %94, %93, %cst_57 {dimension_numbers = #tpu.dot_dimension_numbers<[1], [0], [0], [1], [0, 0, 1, 1], [], []>} : vector<32x32xf32>, vector<32x1024xf32>, vector<32x1024xf32> -> vector<32x1024xf32>
    %97 = vector.broadcast %95 : vector<32x1xf32> to vector<32x1024xf32>
    %98 = arith.addf %96, %97 : vector<32x1024xf32>
    %cst_58 = arith.constant 1.000000e+02 : f32
    %99 = vector.broadcast %cst_58 : f32 to vector<32x1024xf32>
    %100 = arith.mulf %99, %98 : vector<32x1024xf32>
    %cst_59 = arith.constant 2.000000e+01 : f32
    %101 = vector.broadcast %cst_59 : f32 to vector<32x1024xf32>
    %102 = arith.cmpf ogt, %100, %101 : vector<32x1024xf32>
    %cst_60 = arith.constant 0.000000e+00 : f32
    %103 = vector.broadcast %cst_60 : f32 to vector<32x1024xf32>
    %104 = arith.select %102, %103, %100 : vector<32x1024xi1>, vector<32x1024xf32>
    %cst_61 = arith.constant 2.000000e+01 : f32
    %105 = vector.broadcast %cst_61 : f32 to vector<32x1024xf32>
    %106 = arith.cmpf ogt, %100, %105 : vector<32x1024xf32>
    %107 = math.exp %104 : vector<32x1024xf32>
    %108 = math.log1p %107 : vector<32x1024xf32>
    %cst_62 = arith.constant 0.00999999977 : f32
    %109 = vector.broadcast %cst_62 : f32 to vector<32x1024xf32>
    %110 = arith.mulf %108, %109 : vector<32x1024xf32>
    %111 = arith.select %106, %98, %110 : vector<32x1024xi1>, vector<32x1024xf32>
    %c0_63 = arith.constant 0 : index
    %c0_64 = arith.constant 0 : index
    %112 = vector.load %arg15[%c0_63, %c0_64] : memref<1x32xf32, #tpu.memory_space<vmem>>, vector<1x32xf32>
    %c0_65 = arith.constant 0 : index
    %c0_66 = arith.constant 0 : index
    %113 = vector.load %arg16[%c0_65, %c0_66] : memref<1x1xf32, #tpu.memory_space<vmem>>, vector<1x1xf32>
    %cst_67 = arith.constant dense<0.000000e+00> : vector<1x1024xf32>
    %114 = tpu.matmul %112, %111, %cst_67 {dimension_numbers = #tpu.dot_dimension_numbers<[1], [0], [0], [1], [0, 0, 1, 1], [], []>} : vector<1x32xf32>, vector<32x1024xf32>, vector<1x1024xf32> -> vector<1x1024xf32>
    %115 = vector.broadcast %113 : vector<1x1xf32> to vector<1x1024xf32>
    %116 = arith.addf %114, %115 : vector<1x1024xf32>
    %117 = math.absf %116 : vector<1x1024xf32>
    %c0_68 = arith.constant 0 : index
    %c0_69 = arith.constant 0 : index
    %118 = vector.load %arg17[%c0_68, %c0_69] : memref<1x1024xf32, #tpu.memory_space<vmem>>, vector<1x1024xf32>
    tpu.vector_store %arg17[%c0_68, %c0_69], %117 {strides = array<i32>} : memref<1x1024xf32, #tpu.memory_space<vmem>>, vector<1x1024xf32>,
    return
  }
  func.func @transform_0(%arg0: i32) -> (i32, i32) {
    %c0_i32 = arith.constant 0 : i32
    %c0_i32_0 = arith.constant 0 : i32
    return %c0_i32, %arg0 : i32, i32
  }
  func.func @transform_1(%arg0: i32) -> (i32, i32) {
    %c0_i32 = arith.constant 0 : i32
    %c0_i32_0 = arith.constant 0 : i32
    %c0_i32_1 = arith.constant 0 : i32
    return %c0_i32, %c0_i32_0 : i32, i32
  }
  func.func @transform_2(%arg0: i32) -> (i32, i32) {
    %c0_i32 = arith.constant 0 : i32
    %c0_i32_0 = arith.constant 0 : i32
    %c0_i32_1 = arith.constant 0 : i32
    return %c0_i32, %c0_i32_0 : i32, i32
  }
  func.func @transform_3(%arg0: i32) -> (i32, i32) {
    %c0_i32 = arith.constant 0 : i32
    %c0_i32_0 = arith.constant 0 : i32
    %c0_i32_1 = arith.constant 0 : i32
    return %c0_i32, %c0_i32_0 : i32, i32
  }
  func.func @transform_4(%arg0: i32) -> (i32, i32) {
    %c0_i32 = arith.constant 0 : i32
    %c0_i32_0 = arith.constant 0 : i32
    %c0_i32_1 = arith.constant 0 : i32
    return %c0_i32, %c0_i32_0 : i32, i32
  }
  func.func @transform_5(%arg0: i32) -> (i32, i32) {
    %c0_i32 = arith.constant 0 : i32
    %c0_i32_0 = arith.constant 0 : i32
    %c0_i32_1 = arith.constant 0 : i32
    return %c0_i32, %c0_i32_0 : i32, i32
  }
  func.func @transform_6(%arg0: i32) -> (i32, i32) {
    %c0_i32 = arith.constant 0 : i32
    %c0_i32_0 = arith.constant 0 : i32
    %c0_i32_1 = arith.constant 0 : i32
    return %c0_i32, %c0_i32_0 : i32, i32
  }
  func.func @transform_7(%arg0: i32) -> (i32, i32) {
    %c0_i32 = arith.constant 0 : i32
    %c0_i32_0 = arith.constant 0 : i32
    %c0_i32_1 = arith.constant 0 : i32
    return %c0_i32, %c0_i32_0 : i32, i32
  }
  func.func @transform_8(%arg0: i32) -> (i32, i32) {
    %c0_i32 = arith.constant 0 : i32
    %c0_i32_0 = arith.constant 0 : i32
    %c0_i32_1 = arith.constant 0 : i32
    return %c0_i32, %c0_i32_0 : i32, i32
  }
  func.func @transform_9(%arg0: i32) -> (i32, i32) {
    %c0_i32 = arith.constant 0 : i32
    %c0_i32_0 = arith.constant 0 : i32
    %c0_i32_1 = arith.constant 0 : i32
    return %c0_i32, %c0_i32_0 : i32, i32
  }
  func.func @transform_10(%arg0: i32) -> (i32, i32) {
    %c0_i32 = arith.constant 0 : i32
    %c0_i32_0 = arith.constant 0 : i32
    %c0_i32_1 = arith.constant 0 : i32
    return %c0_i32, %c0_i32_0 : i32, i32
  }
  func.func @transform_11(%arg0: i32) -> (i32, i32) {
    %c0_i32 = arith.constant 0 : i32
    %c0_i32_0 = arith.constant 0 : i32
    %c0_i32_1 = arith.constant 0 : i32
    return %c0_i32, %c0_i32_0 : i32, i32
  }
  func.func @transform_12(%arg0: i32) -> (i32, i32) {
    %c0_i32 = arith.constant 0 : i32
    %c0_i32_0 = arith.constant 0 : i32
    %c0_i32_1 = arith.constant 0 : i32
    return %c0_i32, %c0_i32_0 : i32, i32
  }
  func.func @transform_13(%arg0: i32) -> (i32, i32) {
    %c0_i32 = arith.constant 0 : i32
    %c0_i32_0 = arith.constant 0 : i32
    %c0_i32_1 = arith.constant 0 : i32
    return %c0_i32, %c0_i32_0 : i32, i32
  }
  func.func @transform_14(%arg0: i32) -> (i32, i32) {
    %c0_i32 = arith.constant 0 : i32
    %c0_i32_0 = arith.constant 0 : i32
    %c0_i32_1 = arith.constant 0 : i32
    return %c0_i32, %c0_i32_0 : i32, i32
  }
  func.func @transform_15(%arg0: i32) -> (i32, i32) {
    %c0_i32 = arith.constant 0 : i32
    %c0_i32_0 = arith.constant 0 : i32
    %c0_i32_1 = arith.constant 0 : i32
    return %c0_i32, %c0_i32_0 : i32, i32
  }
  func.func @transform_16(%arg0: i32) -> (i32, i32) {
    %c0_i32 = arith.constant 0 : i32
    %c0_i32_0 = arith.constant 0 : i32
    return %c0_i32, %arg0 : i32, i32
  }
}

</mosaic_0001>

<bundles_post_ra>
// kernel: tpu_custom_call.1
= control target key start
LH: loop header
LB: loop body
LE: loop exit
PB: predicated region body
PF: predicated region fallthrough
CT: control target
= control target key end

     0   :  { %s13292_s0 = inlined_call_operand.vmem [shape: f32[8,2048], index: 0, kind: input, shape index: {}]   ;;  %s13293_s1 = inlined_call_operand.vmem [shape: f32[32,8], index: 1, kind: input, shape index: {}]   ;;  %s13294_s2 = inlined_call_operand.vmem [shape: f32[32,1], index: 2, kind: input, shape index: {}]   ;;  %s13295_s3 = inlined_call_operand.vmem [shape: f32[32,32], index: 3, kind: input, shape index: {}]   ;;  %s13296_s4 = inlined_call_operand.vmem [shape: f32[32,1], index: 4, kind: input, shape index: {}]   ;;  %s13297_s5 = inlined_call_operand.vmem [shape: f32[32,32], index: 5, kind: input, shape index: {}]   ;;  %s13298_s6 = inlined_call_operand.vmem [shape: f32[32,1], index: 6, kind: input, shape index: {}]   ;;  %s13299_s7 = inlined_call_operand.vmem [shape: f32[24,32], index: 7, kind: input, shape index: {}]   ;;  %s13300_s8 = inlined_call_operand.vmem [shape: f32[24,1], index: 8, kind: input, shape index: {}]   ;;  %s13301_s9 = inlined_call_operand.vmem [shape: f32[32,24], index: 9, kind: input, shape index: {}]   ;;  %s13302_s10 = inlined_call_operand.vmem [shape: f32[32,8], index: 10, kind: input, shape index: {}]   ;;  %s13303_s11 = inlined_call_operand.vmem [shape: f32[32,1], index: 11, kind: input, shape index: {}]   ;;  %s13304_s12 = inlined_call_operand.vmem [shape: f32[32,32], index: 12, kind: input, shape index: {}]   ;;  %s13305_s13 = inlined_call_operand.vmem [shape: f32[32,1], index: 13, kind: input, shape index: {}]   ;;  %s13306_s14 = inlined_call_operand.vmem [shape: f32[1,32], index: 14, kind: input, shape index: {}]   ;;  %s13307_s15 = inlined_call_operand.<no memory space> [shape: f32[1,1], index: 15, kind: input, shape index: {}]   ;;  %s13308_s16 = inlined_call_operand.hbm [shape: f32[1,2048], index: 16, kind: output, shape index: {}]  }
   0x1   :  { %13543 = sst [smem:[#allocation43_spill]] %s13292_s0  ;;  %v21_v0 = vstv %s13307_s15 }
   0x2   :  { %22 = vst [vmem:[#allocation2] sm:$0x1] %v21_v0 }
   0x3   :  { %23 = vsyncpa [#allocation4], 0 }
   0x4   :  { %25 = vsyncpa [#allocation4 + $0x1], 0  ;;  %s7942_s23 = smov 0   ;;  %s7944_s24 = smov 0  }
   0x5   :  { %s7946_s25 = smov 0   ;;  %s7948_s26 = smov 0  }
   0x6 LB: > { %13544 = sst [smem:[#allocation6_spill]] %s7836_s23  ;;  %s7963_s15 = sadd.s32 4294967295, %s7848_s26   ;;  %s7848_s26 = sphi %s7948_s26, %s14344_s26   ;;  %s7844_s25 = sphi %s7946_s25, %s14346_s25   ;;  %s7840_s24 = sphi %s7944_s24, %s14348_s24   ;;  %s7836_s23 = sphi %s7942_s23, %s14347_s23  }
   0x7   : > { %13545 = sst [smem:[#allocation7_spill]] %s7844_s25  ;;  %s6665_s27 = sadd.s32 4294967294, %s7848_s26  }
   0x8   : > { %s7967_s28 = sadd.s32 1, %s7848_s26   ;;  %s379_s29 = sadd.s32 1, %s7844_s25 }
   0x9   : > { %13546 = sst [smem:[#allocation8_spill]] %s7967_s28  ;;  %s376_s30 = ssub.s32 %s7848_s26, %s7967_s28 }
   0xa   : > { %p389_p0 = scmp.ne.s32.totalorder %s7844_s25, %s7840_s24  ;;  %p377_p1 = scmp.eq.s32.totalorder %s376_s30, 0 }
   0xb   : > { %p390_p2 = scmp.eq.s32.totalorder %s7963_s15, 1  ;;  %p395_p3 = scmp.ne.s32.totalorder %s7840_s24, %s7836_s23 }
   0xc   : > { %p396_p4 = scmp.eq.s32.totalorder %s6665_s27, 1  ;;  %p6668_p7 = scmp.ge.s32.totalorder %s7848_s26, 1 }
   0xd   : > { %s7978_s0 = scalar_select %p377_p1, %s7844_s25, %s379_s29  }
   0xe   : > { %p7980_p5 = por %p390_p2, %p389_p0  ;;  %p7984_p6 = por %p396_p4, %p395_p3 }
   0xf   : > { %13547 = sst [smem:[#allocation9_spill]] %s7978_s0  ;;  %p468_p8 = scmp.lt.s32.totalorder %s7848_s26, 3 }
  0x10   : > { %s13549_s18 = scalar_select %p7984_p6, 1, 0 }
  0x11   : > { %p469_p9 = pnand %p6668_p7, %p468_p8 }
  0x12   : > { %13550 = sst [smem:[#allocation10_spill]] %s13549_s18 }
  0x13   : > { %472 = sbr.rel (%p469_p9) target bundleno = 2325 (0x915), region = 84 }
  0x1a   : > { %s6670_s19 = sshll.u32 %s7963_s15, 3  ;;  %v13314_v1 = vmov 0.0   ;;  %v537_v2 = vld [vmem:[%s13294_s2] sm:$0xff]  ;;  %v539_v3 = vld [vmem:[%s13294_s2 + $0x10] sm:$0xff]  ;;  %v7851_v4 = vmov 0   ;;  %v538_v5 = vld [vmem:[%s13294_s2 + $0x8] sm:$0xff] }
  0x1b   : > { %p519_p10 = scmp.lt.s32.totalorder %s6670_s19, 15  ;;  %638 = vmatprep.mubr.f32.mxu0 %v13314_v1  ;;  %727 = vmatprep.mubr.f32.mxu1 %v13314_v1  ;;  %v540_v6 = vld [vmem:[%s13294_s2 + $0x18] sm:$0xff]  ;;  %s13551_s18 = sld [smem:[#allocation43_spill]]  ;;  %v533_v7 = vld [vmem:[%s13293_s1] sm:$0xff]  ;;  %vm13323_vm0 = vcmask 64512   ;;  %v534_v16 = vld [vmem:[%s13293_s1 + $0x8] sm:$0xff] }
  0x1c   : > { %7040 = vset.pattern.permute.xlu0 %v7851_v4  ;;  %7041 = vset.pattern.permute.xlu1 %v7851_v4  ;;  %v1446_v17 = vld [vmem:[%s13296_s4] sm:$0xff]  ;;  %v1447_v18 = vld [vmem:[%s13296_s4 + $0x8] sm:$0xff]  ;;  %v535_v19 = vld [vmem:[%s13293_s1 + $0x10] sm:$0xff]  ;;  %s515_s28 = sand.u32 1, %s7840_s24  }
  0x1d   : > { %s14350_s19 = smov (!%p519_p10, %s6670_s19), 15  ;;  %543 = vperm.xlu0 %7040, %v537_v2   ;;  %553 = vperm.xlu1 %7041, %v539_v3   ;;  %v1448_v20 = vld [vmem:[%s13296_s4 + $0x10] sm:$0xff]  ;;  %v1449_v21 = vld [vmem:[%s13296_s4 + $0x18] sm:$0xff]  ;;  %v2355_v23 = vld [vmem:[%s13298_s6] sm:$0xff]  ;;  %s6669_s0 = sshll.u32 %s515_s28, 3 }
  0x1e   : > { %s6671_s20 = sshll.u32 %s14350_s19, 3  ;;  %v536_v22 = vld [vmem:[%s13293_s1 + $0x18] sm:$0xff]  ;;  %v2356_v24 = vld [vmem:[%s13298_s6 + $0x8] sm:$0xff]  ;;  %v2357_v25 = vld [vmem:[%s13298_s6 + $0x10] sm:$0xff]  ;;  %s517_s19 = scalar_lea.vmem [#allocation3], %s6669_s0 }
  0x1f   : > { %v2358_v26 = vld [vmem:[%s13298_s6 + $0x18] sm:$0xff]  ;;  %v3262_v27 = vld [vmem:[%s13300_s8] sm:$0xff]  ;;  %v3263_v28 = vld [vmem:[%s13300_s8 + $0x8] sm:$0xff]  ;;  %s6592_s21 = scalar_lea.sflag [#allocation4], %s515_s28 }
  0x20   : > { %v3264_v29 = vld [vmem:[%s13300_s8 + $0x10] sm:$0xff]  ;;  %v4013_v30 = vld [vmem:[%s13303_s11] sm:$0xff]  ;;  %v4014_v31 = vld [vmem:[%s13303_s11 + $0x8] sm:$0xff] }
  0x21   : > { %s8008_s22 = scalar_lea.vmem %s13551_s18, %s6671_s20  ;;  %548 = vperm.xlu0 %7040, %v538_v5   ;;  %558 = vperm.xlu1 %7041, %v540_v6   ;;  %v4015_v32 = vld [vmem:[%s13303_s11 + $0x10] sm:$0xff]  ;;  %v4016_v33 = vld [vmem:[%s13303_s11 + $0x18] sm:$0xff]  ;;  %v5322_v34 = vld [vmem:[%s13305_s13] sm:$0xff]  ;;  %s6789_s18 = sshll.u32 %s7963_s15, 7 }
  0x22   : > { %v526_v8 = vld [vmem:[%s8008_s22 + $0x8] sm:$0xff]  ;;  %v528_v9 = vld [vmem:[%s8008_s22 + $0x18] sm:$0xff]  ;;  %v525_v10 = vld [vmem:[%s8008_s22] sm:$0xff]  ;;  %s13250_s20 = scalar_lea.hbm %s13308_s16, %s6789_s18  ;;  %s7853_s15 = smov [#allocation3]  }
  0x23   : > { %574 = vmatprep.subr.mxu0 %v526_v8  ;;  %663 = vmatprep.subr.mxu1 %v528_v9  ;;  %v527_v11 = vld [vmem:[%s8008_s22 + $0x10] sm:$0xff]  ;;  %v530_v12 = vld [vmem:[%s8008_s22 + $0x28] sm:$0xff]  ;;  %v532_v13 = vld [vmem:[%s8008_s22 + $0x38] sm:$0xff]  ;;  %s7790_s23 = sshll.u32 %s7853_s15, 4  ;;  %s7791_s23 = int_to_ptr.vmem [resolvable:$false] %s7790_s23 }
  0x24   : > { %575 = vmatpush1.msra.mxu0 %v525_v10  ;;  %664 = vmatpush1.msra.mxu1 %v527_v11  ;;  %v529_v14 = vld [vmem:[%s8008_s22 + $0x20] sm:$0xff]  ;;  %v531_v15 = vld [vmem:[%s8008_s22 + $0x30] sm:$0xff]  ;;  %v5323_v35 = vld [vmem:[%s13305_s13 + $0x8] sm:$0xff]  ;;  %s7792_s25 = scalar_lea.vmem %s7791_s23, 256 }
  0x25   : > { %6672 = vmatmul.mubr.msk.f32.vlgmr.msra.gmra.mrb[0].mxu0 %vm13323_vm0, %v533_v7  ;;  %6676 = vmatmul.mubr.msk.f32.vlgmr.msra.gmra.mrb[0].mxu1 %vm13323_vm0, %v533_v7  ;;  %v5324_v36 = vld [vmem:[%s13305_s13 + $0x10] sm:$0xff]  ;;  %v5325_v37 = vld [vmem:[%s13305_s13 + $0x18] sm:$0xff]  ;;  %v6227_v38 = vld [vmem:[#allocation2] sm:$0x1] }
  0x26   : > { %644 = vmatprep.mubr.f32.mxu0 %v13314_v1  ;;  %733 = vmatprep.mubr.f32.mxu1 %v13314_v1 }
  0x27   : > { %752 = vmatprep.subr.mxu0 %v530_v12  ;;  %841 = vmatprep.subr.mxu1 %v532_v13 }
  0x28   : > { %753 = vmatpush1.msra.mxu0 %v529_v14  ;;  %842 = vmatpush1.msra.mxu1 %v531_v15 }
  0x29   : > { %6673 = vmatmul.mubr.msk.f32.gmra.mrb[2].mxu0 %vm13323_vm0, %v534_v16  ;;  %6677 = vmatmul.mubr.msk.f32.gmra.mrb[2].mxu1 %vm13323_vm0, %v534_v16 }
  0x2a   : > { %650 = vmatprep.mubr.f32.mxu0 %v13314_v1  ;;  %739 = vmatprep.mubr.f32.mxu1 %v13314_v1 }
  0x2b   : > { %1452 = vperm.xlu0 %7040, %v1446_v17   ;;  %1457 = vperm.xlu1 %7041, %v1447_v18  }
  0x2d   : > { %6674 = vmatmul.mubr.msk.f32.gmra.mrb[4].mxu0 %vm13323_vm0, %v535_v19  ;;  %6678 = vmatmul.mubr.msk.f32.gmra.mrb[4].mxu1 %vm13323_vm0, %v535_v19 }
  0x2e   : > { %656 = vmatprep.mubr.f32.mxu0 %v13314_v1  ;;  %745 = vmatprep.mubr.f32.mxu1 %v13314_v1 }
  0x2f   : > { %1462 = vperm.xlu0 %7040, %v1448_v20   ;;  %1467 = vperm.xlu1 %7041, %v1449_v21  }
  0x31   : > { %6675 = vmatmul.mubr.msk.f32.gmra.mrb[6].mxu0 %vm13323_vm0, %v536_v22  ;;  %6679 = vmatmul.mubr.msk.f32.gmra.mrb[6].mxu1 %vm13323_vm0, %v536_v22 }
  0x32   : > { %816 = vmatprep.mubr.f32.mxu0 %v13314_v1  ;;  %905 = vmatprep.mubr.f32.mxu1 %v13314_v1 }
  0x33   : > { %2361 = vperm.xlu0 %7040, %v2355_v23   ;;  %2366 = vperm.xlu1 %7041, %v2356_v24  }
  0x35   : > { %6680 = vmatmul.mubr.msk.f32.vlgmr.msra.gmra.mrb[8].mxu0 %vm13323_vm0, %v533_v7  ;;  %6684 = vmatmul.mubr.msk.f32.vlgmr.msra.gmra.mrb[8].mxu1 %vm13323_vm0, %v533_v7 }
  0x36   : > { %822 = vmatprep.mubr.f32.mxu0 %v13314_v1  ;;  %911 = vmatprep.mubr.f32.mxu1 %v13314_v1 }
  0x37   : > { %2371 = vperm.xlu0 %7040, %v2357_v25   ;;  %2376 = vperm.xlu1 %7041, %v2358_v26  }
  0x39   : > { %6681 = vmatmul.mubr.msk.f32.gmra.mrb[10].mxu0 %vm13323_vm0, %v534_v16  ;;  %6685 = vmatmul.mubr.msk.f32.gmra.mrb[10].mxu1 %vm13323_vm0, %v534_v16 }
  0x3a   : > { %828 = vmatprep.mubr.f32.mxu0 %v13314_v1  ;;  %917 = vmatprep.mubr.f32.mxu1 %v13314_v1 }
  0x3b   : > { %3267 = vperm.xlu0 %7040, %v3262_v27   ;;  %3272 = vperm.xlu1 %7041, %v3263_v28  }
  0x3d   : > { %6682 = vmatmul.mubr.msk.f32.gmra.mrb[12].mxu0 %vm13323_vm0, %v535_v19  ;;  %6686 = vmatmul.mubr.msk.f32.gmra.mrb[12].mxu1 %vm13323_vm0, %v535_v19 }
  0x3e   : > { %834 = vmatprep.mubr.f32.mxu0 %v13314_v1  ;;  %923 = vmatprep.mubr.f32.mxu1 %v13314_v1 }
  0x3f   : > { %3277 = vperm.xlu0 %7040, %v3264_v29   ;;  %4756 = vperm.xlu1 %7041, %v4013_v30  }
  0x41   : > { %6683 = vmatmul.mubr.msk.f32.gmra.mrb[14].mxu0 %vm13323_vm0, %v536_v22  ;;  %6687 = vmatmul.mubr.msk.f32.gmra.mrb[14].mxu1 %vm13323_vm0, %v536_v22 }
  0x42   : > { %1547 = vmatprep.mubr.f32.mxu0 %v13314_v1  ;;  %1636 = vmatprep.mubr.f32.mxu1 %v13314_v1 }
  0x43   : > { %4761 = vperm.xlu0 %7040, %v4014_v31   ;;  %4766 = vperm.xlu1 %7041, %v4015_v32  }
  0x47   : > { %4771 = vperm.xlu0 %7040, %v4016_v33   ;;  %5328 = vperm.xlu1 %7041, %v5322_v34  }
  0x4b   : > { %5333 = vperm.xlu0 %7040, %v5323_v35   ;;  %5338 = vperm.xlu1 %7041, %v5324_v36  }
  0x4f   : > { %5343 = vperm.xlu0 %7040, %v5325_v37   ;;  %6230 = vperm.xlu1 %7041, %v6227_v38  }
  0x9c   : > { %v8119_v39 = vpop.permute.xlu0 %543  ;;  %v8166_v0 = vpop.permute.xlu1 %553 }
  0xa0   : > { %v8133_v48 = vpop.permute.xlu0 %548  ;;  %v8240_v38 = vpop.permute.xlu1 %558 }
  0xf8   : > { %v640_v40 = vpop.f32.mrb[0].mxu0  ;;  %v729_v41 = vpop.f32.mrb[0].mxu1 }
  0xf9   : > { %v8122_v42 = vadd.f32 %v640_v40, %v8119_v39  ;;  %v8125_v43 = vadd.f32 %v729_v41, %v8119_v39  ;;  %v642_v44 = vpop.f32.mrb[1].mxu0  ;;  %v731_v45 = vpop.f32.mrb[1].mxu1 }
  0xfa   : > { %v8128_v46 = vadd.f32 %v642_v44, %v8119_v39  ;;  %v8131_v47 = vadd.f32 %v731_v45, %v8119_v39 }
  0xfb   : > { %v8136_v49 = vmul.f32 100.0, %v8122_v42  ;;  %v8139_v50 = vmul.f32 100.0, %v8125_v43 }
  0xfc   : > { %13552 = vst [vmem:[#allocation11_spill] sm:$0xff] %v8128_v46  ;;  %13553 = vst [vmem:[#allocation12_spill] sm:$0xff] %v8131_v47  ;;  %v8142_v51 = vmul.f32 100.0, %v8128_v46  ;;  %v8145_v52 = vmul.f32 100.0, %v8131_v47  ;;  %v646_v53 = vpop.f32.mrb[2].mxu0  ;;  %v735_v54 = vpop.f32.mrb[2].mxu1 }
  0xfd   : > { %vm962_vm1 = vcmp.gt.f32.partialorder %v8136_v49, 20.0  ;;  %vm964_vm2 = vcmp.gt.f32.partialorder %v8139_v50, 20.0  ;;  %v8150_v55 = vadd.f32 %v646_v53, %v8133_v48  ;;  %v8153_v56 = vadd.f32 %v735_v54, %v8133_v48  ;;  %v648_v57 = vpop.f32.mrb[3].mxu0  ;;  %v737_v58 = vpop.f32.mrb[3].mxu1 }
  0xfe   : > { %13554 = vst [vmem:[#allocation13_spill] sm:$0xff] %v8142_v51  ;;  %13555 = vst [vmem:[#allocation14_spill] sm:$0xff] %v8145_v52  ;;  %v994_v59 = vsel %vm962_vm1, 0.0, %v8136_v49  ;;  %v996_v60 = vsel %vm964_vm2, 0.0, %v8139_v50  ;;  %vm963_vm3 = vcmp.gt.f32.partialorder %v8142_v51, 20.0  ;;  %vm13336_vm4 = vcmp.gt.f32.partialorder %v8145_v52, 20.0 }
  0xff   : > { %v1026_v61 = vmul.f32 1.442695, %v994_v59  ;;  %v1030_v62 = vmul.f32 1.442695, %v996_v60  ;;  %v995_v63 = vsel %vm963_vm3, 0.0, %v8142_v51  ;;  %v997_v3 = vsel %vm13336_vm4, 0.0, %v8145_v52 }
 0x100   : > { %v1028_v2 = vmul.f32 1.442695, %v995_v63  ;;  %v8172_v4 = vmul.f32 100.0, %v8150_v55  ;;  %v8175_v5 = vmul.f32 100.0, %v8153_v56  ;;  %v8178_v6 = vadd.f32 %v648_v57, %v8133_v48  ;;  %v652_v8 = vpop.f32.mrb[4].mxu0  ;;  %v741_v9 = vpop.f32.mrb[4].mxu1 }
 0x101   : > { %7042 = vpow2.f32 %v1026_v61  ;;  %v8181_v7 = vadd.f32 %v737_v58, %v8133_v48  ;;  %v8186_v10 = vadd.f32 %v652_v8, %v8166_v0  ;;  %v654_v11 = vpop.f32.mrb[5].mxu0  ;;  %v743_v12 = vpop.f32.mrb[5].mxu1  ;;  %v1032_v13 = vmul.f32 1.442695, %v997_v3 }
 0x102   : > { %13556 = vst [vmem:[#allocation15_spill] sm:$0xff] %v8178_v6  ;;  %7044 = vpow2.f32 %v1030_v62  ;;  %vm970_vm5 = vcmp.gt.f32.partialorder %v8172_v4, 20.0  ;;  %vm972_vm6 = vcmp.gt.f32.partialorder %v8175_v5, 20.0  ;;  %v8195_v16 = vmul.f32 100.0, %v8178_v6 }
 0x103   : > { %13557 = vst [vmem:[#allocation16_spill] sm:$0xff] %v8181_v7  ;;  %v1002_v14 = vsel %vm970_vm5, 0.0, %v8172_v4  ;;  %v1004_v15 = vsel %vm972_vm6, 0.0, %v8175_v5  ;;  %7046 = vpow2.f32 %v1028_v2  ;;  %v8198_v19 = vmul.f32 100.0, %v8181_v7 }
 0x104   : > { %13558 = vst [vmem:[#allocation17_spill] sm:$0xff] %v8195_v16  ;;  %v1042_v17 = vmul.f32 1.442695, %v1002_v14  ;;  %v1046_v18 = vmul.f32 1.442695, %v1004_v15  ;;  %v658_v20 = vpop.f32.mrb[6].mxu0  ;;  %v8205_v22 = vadd.f32 %v741_v9, %v8166_v0  ;;  %v8208_v23 = vadd.f32 %v654_v11, %v8166_v0 }
 0x105   : > { %13559 = vst [vmem:[#allocation18_spill] sm:$0xff] %v8198_v19  ;;  %vm971_vm7 = vcmp.gt.f32.partialorder %v8195_v16, 20.0  ;;  %v8202_v21 = vmul.f32 100.0, %v8186_v10  ;;  %v747_v24 = vpop.f32.mrb[6].mxu1  ;;  %v8210_v25 = vpop.f32.mrb[7].mxu0  ;;  %v8216_v27 = vadd.f32 %v743_v12, %v8166_v0  ;;  %vm13335_vm9 = vcmp.gt.f32.partialorder %v8198_v19, 20.0 }
 0x106   : > { %13560 = vst [vmem:[#allocation19_spill] sm:$0xff] %v8208_v23  ;;  %7048 = vpow2.f32 %v1042_v17  ;;  %v1003_v26 = vsel %vm971_vm7, 0.0, %v8195_v16  ;;  %v8218_v28 = vpop.f32.mrb[7].mxu1  ;;  %v8226_v31 = vmul.f32 100.0, %v8205_v22  ;;  %v8229_v32 = vmul.f32 100.0, %v8208_v23 }
 0x107   : > { %13561 = vst [vmem:[#allocation20_spill] sm:$0xff] %v8216_v27  ;;  %7050 = vpow2.f32 %v1046_v18  ;;  %v1044_v29 = vmul.f32 1.442695, %v1003_v26  ;;  %vm978_vm8 = vcmp.gt.f32.partialorder %v8202_v21, 20.0  ;;  %v8234_v35 = vmul.f32 100.0, %v8216_v27 }
 0x108   : > { %v1010_v30 = vsel %vm978_vm8, 0.0, %v8202_v21  ;;  %13562 = vst [vmem:[#allocation21_spill] sm:$0xff] %v8229_v32  ;;  %v8231_v33 = vpop.f32.mrb[8].mxu0  ;;  %7052 = vpow2.f32 %v1032_v13  ;;  %v8236_v36 = vpop.f32.mrb[8].mxu1  ;;  %vm980_vm10 = vcmp.gt.f32.partialorder %v8226_v31, 20.0  ;;  %vm13330_vm11 = vcmp.gt.f32.partialorder %v8229_v32, 20.0 }
 0x109   : > { %v1058_v34 = vmul.f32 1.442695, %v1010_v30  ;;  %13563 = vst [vmem:[#allocation22_spill] sm:$0xff] %v8234_v35  ;;  %v8238_v37 = vpop.f32.mrb[9].mxu0  ;;  %7054 = vpow2.f32 %v1044_v29  ;;  %v8244_v40 = vpop.f32.mrb[9].mxu1  ;;  %v1005_v44 = vsel %vm13335_vm9, 0.0, %v8198_v19  ;;  %v8253_v53 = vadd.f32 %v658_v20, %v8240_v38 }
 0x10a   : > { %v1012_v45 = vsel %vm980_vm10, 0.0, %v8226_v31  ;;  %v1011_v59 = vsel %vm13330_vm11, 0.0, %v8229_v32  ;;  %v8259_v60 = vadd.f32 %v747_v24, %v8240_v38  ;;  %vm13329_vm12 = vcmp.gt.f32.partialorder %v8234_v35, 20.0 }
 0x10b   : > { %v7043_v41 = vpop.eup %7042  ;;  %7056 = vpow2.f32 %v1058_v34  ;;  %v1062_v58 = vmul.f32 1.442695, %v1012_v45  ;;  %v1048_v8 = vmul.f32 1.442695, %v1005_v44  ;;  %v1060_v15 = vmul.f32 1.442695, %v1011_v59 }
 0x10c   : > { %v7045_v54 = vpop.eup %7044  ;;  %v1090_v57 = vadd.f32 1.0, %v7043_v41  ;;  %v1093_v61 = vmul.f32 -0.5, %v7043_v41  ;;  %v1096_v3 = vand.u32 2147483647, %v7043_v41  ;;  %v8264_v9 = vpop.f32.mrb[10].mxu0  ;;  %v1013_v17 = vsel %vm13329_vm12, 0.0, %v8234_v35 }
 0x10d   : > { %v1108_v62 = vadd.f32 1.0, %v7045_v54  ;;  %v1111_v63 = vmul.f32 -0.5, %v7045_v54  ;;  %v8262_v2 = vpop.eup %7046  ;;  %v8266_v11 = vpop.f32.mrb[10].mxu1  ;;  %v1114_v12 = vand.u32 2147483647, %v7045_v54  ;;  %v8274_v18 = vmul.f32 100.0, %v8253_v53 }
 0x10e   : > { %13564 = vst [vmem:[#allocation23_spill] sm:$0xff] %v8262_v2  ;;  %7058 = vlog2.f32 %v1090_v57  ;;  %v8268_v13 = vpop.f32.mrb[11].mxu0  ;;  %v8276_v20 = vpop.f32.mrb[11].mxu1  ;;  %v1094_v29 = vadd.f32 1.0, %v1093_v61  ;;  %v8283_v44 = vmul.f32 100.0, %v8259_v60 }
 0x10f   : > { %7060 = vlog2.f32 %v1108_v62  ;;  %v1112_v30 = vadd.f32 1.0, %v1111_v63  ;;  %vm8289_vm13 = vcmp.lt.f32.partialorder %v1096_v3, 0.0004427343  ;;  %vm8298_vm14 = vcmp.lt.f32.partialorder %v1114_v12, 0.0004427343 }
 0x110   : > { %v7049_v14 = vpop.eup %7048  ;;  %7062 = vpow2.f32 %v1062_v58  ;;  %v8278_v24 = vpop.f32.mrb[12].mxu0  ;;  %v8302_v27 = vmul.f32 1.442695, %v1013_v17  ;;  %vm986_vm15 = vcmp.gt.f32.partialorder %v8274_v18, 20.0  ;;  %v1095_v17 = vmul.f32 %v7043_v41, %v1094_v29 }
 0x111   : > { %v8280_v26 = vpop.eup %7050  ;;  %v1162_v34 = vadd.f32 1.0, %v7049_v14  ;;  %v8285_v45 = vpop.f32.mrb[12].mxu1  ;;  %v1165_v59 = vmul.f32 -0.5, %v7049_v14  ;;  %7064 = vpow2.f32 %v1048_v8  ;;  %v1168_v35 = vand.u32 2147483647, %v7049_v14 }
 0x112   : > { %v8287_v57 = vpop.f32.mrb[13].mxu0  ;;  %v1180_v62 = vadd.f32 1.0, %v8280_v26  ;;  %v8294_v1 = vpop.f32.mrb[13].mxu1  ;;  %v1183_v32 = vmul.f32 -0.5, %v8280_v26  ;;  %v1186_v8 = vand.u32 2147483647, %v8280_v26  ;;  %v1113_v7 = vmul.f32 %v7045_v54, %v1112_v30 }
 0x113   : > { %v8296_v61 = vpop.eup %7052  ;;  %7066 = vlog2.f32 %v1162_v34  ;;  %v1018_v12 = vsel %vm986_vm15, 0.0, %v8274_v18  ;;  %vm988_vm0 = vcmp.gt.f32.partialorder %v8283_v44, 20.0  ;;  %v1166_v16 = vadd.f32 1.0, %v1165_v59 }
 0x114   : > { %13567 = vst [vmem:[#allocation24_spill] sm:$0xff] %v8296_v61  ;;  %v8305_v3 = vpop.eup %7054  ;;  %7068 = vlog2.f32 %v1180_v62  ;;  %v8312_v23 = vpop.f32.mrb[14].mxu0  ;;  %v1074_v52 = vmul.f32 1.442695, %v1018_v12  ;;  %v1020_v46 = vsel %vm988_vm0, 0.0, %v8283_v44  ;;  %v8326_v41 = vadd.f32 %v8210_v25, %v8240_v38 }
 0x115   : > { %13570 = vst [vmem:[#allocation25_spill] sm:$0xff] %v8305_v3  ;;  %v8314_v19 = vpop.f32.mrb[14].mxu1  ;;  %v7057_v34 = vpop.eup %7056  ;;  %7070 = vpow2.f32 %v1060_v15  ;;  %v8330_v54 = vadd.f32 %v8218_v28, %v8240_v38  ;;  %vm8332_vm12 = vcmp.lt.f32.partialorder %v1168_v35, 0.0004427343  ;;  %v1184_v59 = vadd.f32 1.0, %v1183_v32 }
 0x116   : > { %v8317_v47 = vpop.f32.mrb[15].mxu0  ;;  %v8319_v62 = vpop.f32.mrb[15].mxu1  ;;  %v1234_v6 = vadd.f32 1.0, %v7057_v34  ;;  %v1237_v51 = vmul.f32 -0.5, %v7057_v34  ;;  %7072 = vpow2.f32 %v1074_v52  ;;  %13573 = vst [vmem:[#allocation28_spill] sm:$0xff] %v8326_v41  ;;  %v8341_v25 = vmul.f32 100.0, %v8326_v41 }
 0x117   : > { %13571 = vst [vmem:[#allocation26_spill] sm:$0xff] %v8317_v47  ;;  %13572 = vst [vmem:[#allocation27_spill] sm:$0xff] %v8319_v62  ;;  %v1078_v52 = vmul.f32 1.442695, %v1020_v46  ;;  %vm8336_vm11 = vcmp.lt.f32.partialorder %v1186_v8, 0.0004427343  ;;  %v1167_v62 = vmul.f32 %v7049_v14, %v1166_v16  ;;  %v1185_v58 = vmul.f32 %v8280_v26, %v1184_v59 }
 0x118   : > { %v7059_v29 = vpop.eup %7058  ;;  %7074 = vlog2.f32 %v1234_v6  ;;  %v8344_v28 = vmul.f32 100.0, %v8330_v54  ;;  %v1240_v2 = vand.u32 2147483647, %v7057_v34  ;;  %v1238_v6 = vadd.f32 1.0, %v1237_v51 }
 0x119   : > { %v7061_v15 = vpop.eup %7060  ;;  %v1092_v12 = vmul.f32 0.6931472, %v7059_v29  ;;  %7076 = vpow2.f32 %v1078_v52  ;;  %vm987_vm9 = vcmp.gt.f32.partialorder %v8341_v25, 20.0 }
 0x11a   : > { %v7063_v3 = vpop.eup %7062  ;;  %v1110_v35 = vmul.f32 0.6931472, %v7061_v15  ;;  %v8355_v15 = vadd.f32 %v8231_v33, %v8119_v39  ;;  %vm8359_vm4 = vcmp.lt.f32.partialorder %v1240_v2, 0.0004427343  ;;  %v8368_v33 = vadd.f32 %v8236_v36, %v8119_v39 }
 0x11b   : > { %v1098_v46 = vsel %vm8289_vm13, %v1095_v17, %v1092_v12  ;;  %v1252_v32 = vadd.f32 1.0, %v7063_v3  ;;  %v1255_v8 = vmul.f32 -0.5, %v7063_v3  ;;  %v8348_v29 = vpop.eup %7064  ;;  %vm13355_vm13 = vcmp.gt.f32.partialorder %v8344_v28, 20.0 }
 0x11c   : > { %v1378_v47 = vmul.f32 0.01, %v1098_v46  ;;  %v1116_v41 = vsel %vm8298_vm14, %v1113_v7, %v1110_v35  ;;  %v1019_v7 = vsel %vm987_vm9, 0.0, %v8341_v25  ;;  %v1258_v59 = vand.u32 2147483647, %v7063_v3 }
 0x11d   : > { %v7067_v16 = vpop.eup %7066  ;;  %v1380_v14 = vmul.f32 0.01, %v1116_v41  ;;  %7078 = vlog2.f32 %v1252_v32  ;;  %v1239_v41 = vmul.f32 %v7057_v34, %v1238_v6  ;;  %v1256_v26 = vadd.f32 1.0, %v1255_v8 }
 0x11e   : > { %v7069_v51 = vpop.eup %7068  ;;  %v1164_v17 = vmul.f32 0.6931472, %v7067_v16  ;;  %v8375_v2 = vsel %vm962_vm1, %v8122_v42, %v1378_v47  ;;  %v1021_v46 = vsel %vm13355_vm13, 0.0, %v8344_v28  ;;  %v8383_v36 = vmul.f32 100.0, %v8355_v15 }
 0x11f   : > { %v1182_v63 = vmul.f32 0.6931472, %v7069_v51  ;;  %v8370_v12 = vpop.eup %7070  ;;  %v8388_v6 = vsel %vm964_vm2, %v8125_v43, %v1380_v14  ;;  %v1076_v47 = vmul.f32 1.442695, %v1019_v7  ;;  %v8393_v8 = vmul.f32 100.0, %v8368_v33 }
 0x120   : > { %v1170_v35 = vsel %vm8332_vm12, %v1167_v62, %v1164_v17  ;;  %v7073_v34 = vpop.eup %7072  ;;  %v8397_v16 = vadd.f32 %v8238_v37, %v8119_v39  ;;  %vm966_vm1 = vcmp.gt.f32.partialorder %v8383_v36, 20.0  ;;  %v1257_v7 = vmul.f32 %v7063_v3, %v1256_v26 }
 0x121   : > { %v1386_v32 = vmul.f32 0.01, %v1170_v35  ;;  %v1188_v42 = vsel %vm8336_vm11, %v1185_v58, %v1182_v63  ;;  %v1306_v30 = vadd.f32 1.0, %v7073_v34  ;;  %v1309_v14 = vmul.f32 -0.5, %v7073_v34 }
 0x122   : > { %v7075_v49 = vpop.eup %7074  ;;  %v1388_v62 = vmul.f32 0.01, %v1188_v42  ;;  %13580 = vst [vmem:[#allocation29_spill] sm:$0xff] %v8397_v16  ;;  %v1312_v61 = vand.u32 2147483647, %v7073_v34  ;;  %v8426_v52 = vmul.f32 100.0, %v8397_v16 }
 0x123   : > { %v8402_v43 = vsel %vm970_vm5, %v8150_v55, %v1386_v32  ;;  %v1236_v50 = vmul.f32 0.6931472, %v7075_v49  ;;  %v7077_v58 = vpop.eup %7076  ;;  %7080 = vlog2.f32 %v1306_v30  ;;  %vm8417_vm2 = vcmp.lt.f32.partialorder %v1258_v59, 0.0004427343 }
 0x124   : > { %v8409_v17 = vsel %vm972_vm6, %v8153_v56, %v1388_v62  ;;  %7082 = vpow2.f32 %v8302_v27  ;;  %v1324_v37 = vadd.f32 1.0, %v7077_v58  ;;  %v1327_v5 = vmul.f32 -0.5, %v7077_v58  ;;  %13583 = vst [vmem:[#allocation30_spill] sm:$0xff] %v8426_v52 }
 0x125   : > { %v1242_v55 = vsel %vm8359_vm4, %v1239_v41, %v1236_v50  ;;  %v1080_v56 = vmul.f32 1.442695, %v1021_v46  ;;  %v998_v32 = vsel %vm966_vm1, 0.0, %v8383_v36  ;;  %vm968_vm5 = vcmp.gt.f32.partialorder %v8393_v8, 20.0 }
 0x126   : > { %7084 = vlog2.f32 %v1324_v37  ;;  %v1394_v27 = vmul.f32 0.01, %v1242_v55  ;;  %v1310_v41 = vadd.f32 1.0, %v1309_v14  ;;  %vm8428_vm4 = vcmp.lt.f32.partialorder %v1312_v61, 0.0004427343 }
 0x127   : > { %v7079_v35 = vpop.eup %7078  ;;  %7086 = vpow2.f32 %v1076_v47  ;;  %v1034_v26 = vmul.f32 1.442695, %v998_v32  ;;  %v1000_v59 = vsel %vm968_vm5, 0.0, %v8393_v8  ;;  %vm13354_vm6 = vcmp.gt.f32.partialorder %v8426_v52, 20.0 }
 0x128   : > { %v8438_v46 = vadd.f32 %v8244_v40, %v8119_v39  ;;  %v1254_v42 = vmul.f32 0.6931472, %v7079_v35  ;;  %v1330_v49 = vand.u32 2147483647, %v7077_v58  ;;  %7088 = vpow2.f32 %v1080_v56 }
 0x129   : > { %v1038_v62 = vmul.f32 1.442695, %v1000_v59  ;;  %v1328_v30 = vadd.f32 1.0, %v1327_v5  ;;  %7090 = vpow2.f32 %v1034_v26  ;;  %v999_v47 = vsel %vm13354_vm6, 0.0, %v8426_v52 }
 0x12a   : > { %13586 = vst [vmem:[#allocation31_spill] sm:$0xff] %v8438_v46  ;;  %v8444_v50 = vmul.f32 100.0, %v8438_v46  ;;  %v8448_v14 = vadd.f32 %v8264_v9, %v8133_v48  ;;  %v8452_v39 = vadd.f32 %v8266_v11, %v8133_v48  ;;  %v8456_v40 = vadd.f32 %v8268_v13, %v8133_v48 }
 0x12b   : > { %7092 = vpow2.f32 %v1038_v62  ;;  %v8461_v61 = vsel %vm978_vm8, %v8186_v10, %v1394_v27  ;;  %v1311_v55 = vmul.f32 %v7073_v34, %v1310_v41  ;;  %v8466_v9 = vadd.f32 %v8276_v20, %v8133_v48 }
 0x12c   : > { %13587 = vst [vmem:[#allocation32_spill] sm:$0xff] %v8444_v50  ;;  %13588 = vst [vmem:[#allocation33_spill] sm:$0xff] %v8456_v40  ;;  %vm13338_vm11 = vcmp.gt.f32.partialorder %v8444_v50, 20.0  ;;  %vm8468_vm12 = vcmp.lt.f32.partialorder %v1330_v49, 0.0004427343  ;;  %v8473_v13 = vmul.f32 100.0, %v8448_v14  ;;  %v1260_v48 = vsel %vm8417_vm2, %v1257_v7, %v1254_v42 }
 0x12d   : > { %13589 = vst [vmem:[#allocation34_spill] sm:$0xff] %v8466_v9  ;;  %v7081_v37 = vpop.eup %7080  ;;  %v8476_v5 = vmul.f32 100.0, %v8452_v39  ;;  %v8479_v10 = vmul.f32 100.0, %v8456_v40  ;;  %v1329_v34 = vmul.f32 %v7077_v58, %v1328_v30  ;;  %v1036_v56 = vmul.f32 1.442695, %v999_v47 }
 0x12e   : > { %v8481_v21 = vpop.eup %7082  ;;  %v1308_v20 = vmul.f32 0.6931472, %v7081_v37  ;;  %v1001_v35 = vsel %vm13338_vm11, 0.0, %v8444_v50  ;;  %vm974_vm8 = vcmp.gt.f32.partialorder %v8473_v13, 20.0  ;;  %v8491_v32 = vmul.f32 100.0, %v8466_v9  ;;  %v13603_v9 = vld [vmem:[#allocation23_spill] sm:$0xff] }
 0x12f   : > { %13592 = vst [vmem:[#allocation35_spill] sm:$0xff] %v8479_v10  ;;  %vm976_vm14 = vcmp.gt.f32.partialorder %v8476_v5, 20.0  ;;  %v1006_v58 = vsel %vm974_vm8, 0.0, %v8473_v13  ;;  %vm13350_vm2 = vcmp.gt.f32.partialorder %v8479_v10, 20.0  ;;  %v8506_v49 = vadd.f32 %v8278_v24, %v8166_v0 }
 0x130   : > { %13593 = vst [vmem:[#allocation36_spill] sm:$0xff] %v8491_v32  ;;  %v7085_v27 = vpop.eup %7084  ;;  %v1314_v41 = vsel %vm8428_vm4, %v1311_v55, %v1308_v20  ;;  %v1008_v7 = vsel %vm976_vm14, 0.0, %v8476_v5  ;;  %v1050_v42 = vmul.f32 1.442695, %v1006_v58  ;;  %v1396_v3 = vmul.f32 0.01, %v1260_v48 }
 0x131   : > { %v8502_v63 = vpop.eup %7086  ;;  %v1402_v26 = vmul.f32 0.01, %v1314_v41  ;;  %v1326_v59 = vmul.f32 0.6931472, %v7085_v27  ;;  %7094 = vpow2.f32 %v1036_v56  ;;  %v1040_v62 = vmul.f32 1.442695, %v1001_v35 }
 0x132   : > { %v1054_v30 = vmul.f32 1.442695, %v1008_v7  ;;  %v8508_v47 = vpop.eup %7088  ;;  %7096 = vpow2.f32 %v1050_v42  ;;  %v1007_v24 = vsel %vm13350_vm2, 0.0, %v8479_v10  ;;  %vm13337_vm4 = vcmp.gt.f32.partialorder %v8491_v32, 20.0 }
 0x133   : > { %v8513_v55 = vsel %vm986_vm15, %v8253_v53, %v1402_v26  ;;  %v1332_v37 = vsel %vm8468_vm12, %v1329_v34, %v1326_v59  ;;  %v7091_v20 = vpop.eup %7090  ;;  %v8524_v53 = vmul.f32 100.0, %v8506_v49  ;;  %v8528_v11 = vadd.f32 %v8285_v45, %v8166_v0 }
 0x134   : > { %v1404_v56 = vmul.f32 0.01, %v1332_v37  ;;  %7098 = vpow2.f32 %v1054_v30  ;;  %v1126_v18 = vadd.f32 1.0, %v7091_v20  ;;  %v8532_v34 = vadd.f32 %v8287_v57, %v8166_v0 }
 0x135   : > { %v7093_v35 = vpop.eup %7092  ;;  %v8537_v27 = vsel %vm980_vm10, %v8205_v22, %v1396_v3  ;;  %7100 = vpow2.f32 %v1040_v62  ;;  %v1052_v7 = vmul.f32 1.442695, %v1007_v24  ;;  %v1009_v57 = vsel %vm13337_vm4, 0.0, %v8491_v32 }
 0x136   : > { %13594 = vst [vmem:[#allocation37_spill] sm:$0xff] %v8532_v34  ;;  %v8542_v41 = vsel %vm988_vm0, %v8259_v60, %v1404_v56  ;;  %v1144_v58 = vadd.f32 1.0, %v7093_v35  ;;  %7102 = vlog2.f32 %v1126_v18  ;;  %v1129_v26 = vmul.f32 -0.5, %v7091_v20 }
 0x137   : > { %v1147_v22 = vmul.f32 -0.5, %v7093_v35  ;;  %vm982_vm10 = vcmp.gt.f32.partialorder %v8524_v53, 20.0  ;;  %v8551_v31 = vmul.f32 100.0, %v8528_v11  ;;  %v8554_v60 = vmul.f32 100.0, %v8532_v34 }
 0x138   : > { %7104 = vlog2.f32 %v1144_v58  ;;  %v1132_v44 = vand.u32 2147483647, %v7091_v20  ;;  %v1056_v59 = vmul.f32 1.442695, %v1009_v57  ;;  %v1014_v42 = vsel %vm982_vm10, 0.0, %v8524_v53 }
 0x139   : > { %13595 = vst [vmem:[#allocation38_spill] sm:$0xff] %v8554_v60  ;;  %v8561_v3 = vadd.f32 %v8294_v1, %v8166_v0  ;;  %7106 = vpow2.f32 %v1052_v7  ;;  %v1066_v62 = vmul.f32 1.442695, %v1014_v42  ;;  %vm984_vm0 = vcmp.gt.f32.partialorder %v8551_v31, 20.0 }
 0x13a   : > { %v8566_v30 = vadd.f32 %v8312_v23, %v8240_v38  ;;  %v1150_v24 = vand.u32 2147483647, %v7093_v35  ;;  %v1016_v56 = vsel %vm984_vm0, 0.0, %v8551_v31  ;;  %vm13341_vm15 = vcmp.gt.f32.partialorder %v8554_v60, 20.0 }
 0x13b   : > { %13596 = vst [vmem:[#allocation39_spill] sm:$0xff] %v8561_v3  ;;  %v8568_v37 = vpop.eup %7094  ;;  %v8575_v1 = vmul.f32 100.0, %v8561_v3  ;;  %v1130_v18 = vadd.f32 1.0, %v1129_v26  ;;  %v1148_v58 = vadd.f32 1.0, %v1147_v22  ;;  %7108 = vpow2.f32 %v1066_v62 }
 0x13c   : > { %v7097_v0 = vpop.eup %7096  ;;  %v1070_v7 = vmul.f32 1.442695, %v1016_v56  ;;  %7110 = vpow2.f32 %v1056_v59  ;;  %v8580_v42 = vmul.f32 100.0, %v8566_v30  ;;  %v1015_v48 = vsel %vm13341_vm15, 0.0, %v8554_v60 }
 0x13d   : > { %13597 = vst [vmem:[#allocation40_spill] sm:$0xff] %v8575_v1  ;;  %v1198_v23 = vadd.f32 1.0, %v7097_v0  ;;  %vm13347_vm12 = vcmp.gt.f32.partialorder %v8575_v1, 20.0  ;;  %vm8589_vm4 = vcmp.lt.f32.partialorder %v1132_v44, 0.0004427343  ;;  %v1201_v59 = vmul.f32 -0.5, %v7097_v0 }
 0x13e   : > { %v8577_v57 = vpop.eup %7098  ;;  %7112 = vpow2.f32 %v1070_v7  ;;  %v8595_v62 = vadd.f32 %v8314_v19, %v8240_v38  ;;  %v1131_v7 = vmul.f32 %v7091_v20, %v1130_v18  ;;  %v1149_v4 = vmul.f32 %v7093_v35, %v1148_v58 }
 0x13f   : > { %v1216_v45 = vadd.f32 1.0, %v8577_v57  ;;  %v8587_v26 = vpop.eup %7100  ;;  %7114 = vlog2.f32 %v1198_v23  ;;  %vm8597_vm11 = vcmp.lt.f32.partialorder %v1150_v24, 0.0004427343  ;;  %v1068_v44 = vmul.f32 1.442695, %v1015_v48 }
 0x140   : > { %v7103_v56 = vpop.eup %7102  ;;  %v1017_v23 = vsel %vm13347_vm12, 0.0, %v8575_v1  ;;  %vm990_vm15 = vcmp.gt.f32.partialorder %v8580_v42, 20.0  ;;  %v1204_v19 = vand.u32 2147483647, %v7097_v0  ;;  %v1219_v32 = vmul.f32 -0.5, %v8577_v57 }
 0x141   : > { %7116 = vlog2.f32 %v1216_v45  ;;  %v1128_v60 = vmul.f32 0.6931472, %v7103_v56  ;;  %v1022_v20 = vsel %vm990_vm15, 0.0, %v8580_v42  ;;  %v1202_v35 = vadd.f32 1.0, %v1201_v59  ;;  %v13602_v56 = vld [vmem:[#allocation26_spill] sm:$0xff] }
 0x142   : > { %v7105_v3 = vpop.eup %7104  ;;  %v1222_v45 = vand.u32 2147483647, %v8577_v57  ;;  %v1082_v24 = vmul.f32 1.442695, %v1022_v20  ;;  %v8611_v48 = vmul.f32 100.0, %v8595_v62  ;;  %v8619_v1 = vadd.f32 %v13602_v56, %v8240_v38  ;;  %v13604_v20 = vld [vmem:[#allocation27_spill] sm:$0xff] }
 0x143   : > { %v1146_v34 = vmul.f32 0.6931472, %v7105_v3  ;;  %v8613_v18 = vpop.eup %7106  ;;  %v1134_v58 = vsel %vm8589_vm4, %v1131_v7, %v1128_v60  ;;  %v1072_v3 = vmul.f32 1.442695, %v1017_v23  ;;  %v1099_v50 = vadd.f32 1.0, %v13603_v9 }
 0x144   : > { %7118 = vpow2.f32 %v1082_v24  ;;  %vm992_vm12 = vcmp.gt.f32.partialorder %v8611_v48, 20.0  ;;  %v8627_v46 = vadd.f32 %v13604_v20, %v8240_v38  ;;  %vm8629_vm2 = vcmp.lt.f32.partialorder %v1204_v19, 0.0004427343 }
 0x145   : > { %v1152_v59 = vsel %vm8597_vm11, %v1149_v4, %v1146_v34  ;;  %v7109_v10 = vpop.eup %7108  ;;  %v1220_v22 = vadd.f32 1.0, %v1219_v32  ;;  %v1024_v7 = vsel %vm992_vm12, 0.0, %v8611_v48  ;;  %7120 = vlog2.f32 %v1099_v50 }
 0x146   : > { %13605 = vst [vmem:[#allocation26_spill] sm:$0xff] %v8627_v46  ;;  %v8636_v51 = vpop.eup %7110  ;;  %v1382_v4 = vmul.f32 0.01, %v1134_v58  ;;  %v1203_v34 = vmul.f32 %v7097_v0, %v1202_v35  ;;  %v1270_v23 = vadd.f32 1.0, %v7109_v10  ;;  %7122 = vpow2.f32 %v1068_v44 }
 0x147   : > { %v1384_v38 = vmul.f32 0.01, %v1152_v59  ;;  %7124 = vpow2.f32 %v1072_v3  ;;  %v1086_v56 = vmul.f32 1.442695, %v1024_v7  ;;  %v8639_v19 = vmul.f32 100.0, %v8619_v1 }
 0x148   : > { %v7113_v24 = vpop.eup %7112  ;;  %7126 = vlog2.f32 %v1270_v23  ;;  %v1273_v32 = vmul.f32 -0.5, %v7109_v10  ;;  %v8642_v52 = vmul.f32 100.0, %v8627_v46  ;;  %v1276_v58 = vand.u32 2147483647, %v7109_v10 }
 0x149   : > { %13608 = vst [vmem:[#allocation23_spill] sm:$0xff] %v8639_v19  ;;  %v7115_v20 = vpop.eup %7114  ;;  %v1288_v40 = vadd.f32 1.0, %v7113_v24  ;;  %7128 = vpow2.f32 %v1086_v56  ;;  %v1102_v0 = vmul.f32 -0.5, %v13603_v9  ;;  %v1221_v35 = vmul.f32 %v8577_v57, %v1220_v22  ;;  %v13612_v22 = vld [vmem:[#allocation25_spill] sm:$0xff] }
 0x14a   : > { %13609 = vst [vmem:[#allocation27_spill] sm:$0xff] %v8642_v52  ;;  %v1200_v16 = vmul.f32 0.6931472, %v7115_v20  ;;  %vm1223_vm11 = vcmp.lt.f32.partialorder %v1222_v45, 0.0004427343  ;;  %v8649_v3 = vsel %vm966_vm1, %v8355_v15, %v1382_v4  ;;  %v8654_v59 = vsel %vm968_vm5, %v8368_v33, %v1384_v38 }
 0x14b   : > { %v7117_v50 = vpop.eup %7116  ;;  %7130 = vlog2.f32 %v1288_v40  ;;  %vm991_vm4 = vcmp.gt.f32.partialorder %v8639_v19, 20.0  ;;  %v1291_v57 = vmul.f32 -0.5, %v7113_v24  ;;  %vm993_vm6 = vcmp.gt.f32.partialorder %v8642_v52, 20.0 }
 0x14c   : > { %v1218_v44 = vmul.f32 0.6931472, %v7117_v50  ;;  %v1206_v7 = vsel %vm8629_vm2, %v1203_v34, %v1200_v16  ;;  %v1274_v45 = vadd.f32 1.0, %v1273_v32  ;;  %vm8660_vm13 = vcmp.lt.f32.partialorder %v1276_v58, 0.0004427343 }
 0x14d   : > { %v1390_v23 = vmul.f32 0.01, %v1206_v7  ;;  %v1103_v36 = vadd.f32 1.0, %v1102_v0  ;;  %v1023_v16 = vsel %vm991_vm4, 0.0, %v8639_v19  ;;  %v1105_v60 = vand.u32 2147483647, %v13603_v9 }
 0x14e   : > { %v1224_v56 = vsel %vm1223_vm11, %v1221_v35, %v1218_v44  ;;  %v7119_v8 = vpop.eup %7118  ;;  %v1171_v4 = vadd.f32 1.0, %v13612_v22  ;;  %v1294_v13 = vand.u32 2147483647, %v7113_v24  ;;  %v1292_v58 = vadd.f32 1.0, %v1291_v57 }
 0x14f   : > { %v1392_v40 = vmul.f32 0.01, %v1224_v56  ;;  %v8667_v33 = vsel %vm974_vm8, %v8448_v14, %v1390_v23  ;;  %v7121_v34 = vpop.eup %7120  ;;  %v1342_v14 = vadd.f32 1.0, %v7119_v8  ;;  %v1345_v0 = vmul.f32 -0.5, %v7119_v8 }
 0x150   : > { %v8681_v32 = vpop.eup %7122  ;;  %v1101_v44 = vmul.f32 0.6931472, %v7121_v34  ;;  %v1275_v7 = vmul.f32 %v7109_v10, %v1274_v45  ;;  %v1084_v23 = vmul.f32 1.442695, %v1023_v16  ;;  %v1104_v56 = vmul.f32 %v13603_v9, %v1103_v36 }
 0x151   : > { %v8679_v20 = vsel %vm976_vm14, %v8452_v39, %v1392_v40  ;;  %v8685_v35 = vpop.eup %7124  ;;  %7132 = vlog2.f32 %v1342_v14  ;;  %v1025_v39 = vsel %vm993_vm6, 0.0, %v8642_v52  ;;  %vm8691_vm1 = vcmp.lt.f32.partialorder %v1105_v60, 0.0004427343 }
 0x152   : > { %v7127_v5 = vpop.eup %7126  ;;  %7134 = vlog2.f32 %v1171_v4  ;;  %v1174_v57 = vmul.f32 -0.5, %v13612_v22  ;;  %vm8696_vm5 = vcmp.lt.f32.partialorder %v1294_v13, 0.0004427343  ;;  %v1348_v45 = vand.u32 2147483647, %v7119_v8 }
 0x153   : > { %v7129_v34 = vpop.eup %7128  ;;  %v1272_v50 = vmul.f32 0.6931472, %v7127_v5  ;;  %v1107_v9 = vsel %vm8691_vm1, %v1104_v56, %v1101_v44  ;;  %v1293_v16 = vmul.f32 %v7113_v24, %v1292_v58  ;;  %v1346_v14 = vadd.f32 1.0, %v1345_v0  ;;  %v13619_v58 = vld [vmem:[#allocation24_spill] sm:$0xff] }
 0x154   : > { %v1360_v60 = vadd.f32 1.0, %v7129_v34  ;;  %v1177_v38 = vand.u32 2147483647, %v13612_v22  ;;  %v1363_v4 = vmul.f32 -0.5, %v7129_v34  ;;  %7136 = vpow2.f32 %v1084_v23 }
 0x155   : > { %v7131_v36 = vpop.eup %7130  ;;  %v8703_v46 = vmul.f32 1.442695, %v1025_v39  ;;  %v1278_v13 = vsel %vm8660_vm13, %v1275_v7, %v1272_v50  ;;  %v1175_v5 = vadd.f32 1.0, %v1174_v57  ;;  %v1379_v19 = vmul.f32 0.01, %v1107_v9  ;;  %v13622_v9 = vld [vmem:[#allocation11_spill] sm:$0xff] }
 0x156   : > { %v1290_v52 = vmul.f32 0.6931472, %v7131_v36  ;;  %7138 = vlog2.f32 %v1360_v60  ;;  %vm8707_vm8 = vcmp.lt.f32.partialorder %v1348_v45, 0.0004427343  ;;  %v1366_v24 = vand.u32 2147483647, %v7129_v34 }
 0x157   : > { %v1117_v0 = vadd.f32 1.0, %v13619_v58  ;;  %v1120_v44 = vmul.f32 -0.5, %v13619_v58  ;;  %v1347_v56 = vmul.f32 %v7119_v8, %v1346_v14  ;;  %vm8715_vm14 = vcmp.lt.f32.partialorder %v1177_v38, 0.0004427343 }
 0x158   : > { %v1296_v23 = vsel %vm8696_vm5, %v1293_v16, %v1290_v52  ;;  %v1189_v15 = vadd.f32 1.0, %v8348_v29  ;;  %v1398_v50 = vmul.f32 0.01, %v1278_v13  ;;  %v1364_v7 = vadd.f32 1.0, %v1363_v4 }
 0x159   : > { %7140 = vlog2.f32 %v1117_v0  ;;  %v1123_v57 = vand.u32 2147483647, %v13619_v58  ;;  %v1176_v45 = vmul.f32 %v13612_v22, %v1175_v5  ;;  %v1411_v60 = vsel %vm963_vm3, %v13622_v9, %v1379_v19 }
 0x15a   : > { %7142 = vlog2.f32 %v1189_v15  ;;  %v1243_v52 = vadd.f32 1.0, %v8370_v12  ;;  %v1400_v38 = vmul.f32 0.01, %v1296_v23  ;;  %vm8726_vm13 = vcmp.lt.f32.partialorder %v1366_v24, 0.0004427343 }
 0x15b   : > { %v7133_v8 = vpop.eup %7132  ;;  %v1121_v16 = vadd.f32 1.0, %v1120_v44  ;;  %v1192_v14 = vmul.f32 -0.5, %v8348_v29  ;;  %v1195_v22 = vand.u32 2147483647, %v8348_v29  ;;  %v1315_v5 = vadd.f32 1.0, %v8502_v63 }
 0x15c   : > { %v7135_v4 = vpop.eup %7134  ;;  %v1344_v13 = vmul.f32 0.6931472, %v7133_v8  ;;  %7144 = vlog2.f32 %v1243_v52  ;;  %v8736_v19 = vsel %vm982_vm10, %v8506_v49, %v1398_v50  ;;  %v1365_v0 = vmul.f32 %v7129_v34, %v1364_v7  ;;  %v13630_v8 = vld [vmem:[#allocation15_spill] sm:$0xff]  ;;  %v13637_v52 = vld [vmem:[#allocation12_spill] sm:$0xff] }
 0x15d   : > { %v1173_v24 = vmul.f32 0.6931472, %v7135_v4  ;;  %vm8738_vm3 = vcmp.lt.f32.partialorder %v1123_v57, 0.0004427343  ;;  %v1246_v15 = vmul.f32 -0.5, %v8370_v12  ;;  %7146 = vlog2.f32 %v1315_v5 }
 0x15e   : > { %v1350_v44 = vsel %vm8707_vm8, %v1347_v56, %v1344_v13  ;;  %v1249_v9 = vand.u32 2147483647, %v8370_v12  ;;  %v8746_v36 = vpop.eup %7136  ;;  %v8751_v49 = vsel %vm984_vm0, %v8528_v11, %v1400_v38  ;;  %v1261_v50 = vadd.f32 1.0, %v8481_v21 }
 0x15f   : > { %v1406_v53 = vmul.f32 0.01, %v1350_v44  ;;  %v1179_v34 = vsel %vm8715_vm14, %v1176_v45, %v1173_v24  ;;  %v1122_v7 = vmul.f32 %v13619_v58, %v1121_v16  ;;  %v1193_v57 = vadd.f32 1.0, %v1192_v14 }
 0x160   : > { %v7139_v40 = vpop.eup %7138  ;;  %v1387_v56 = vmul.f32 0.01, %v1179_v34  ;;  %vm8757_vm2 = vcmp.lt.f32.partialorder %v1195_v22, 0.0004427343  ;;  %v1318_v39 = vmul.f32 -0.5, %v8502_v63  ;;  %7148 = vlog2.f32 %v1261_v50 }
 0x161   : > { %v8764_v11 = vsel %vm990_vm15, %v8566_v30, %v1406_v53  ;;  %v1362_v31 = vmul.f32 0.6931472, %v7139_v40  ;;  %v1247_v16 = vadd.f32 1.0, %v1246_v15  ;;  %vm8772_vm10 = vcmp.lt.f32.partialorder %v1249_v9, 0.0004427343 }
 0x162   : > { %v6812_v45 = vpack.c.bf16 %v8764_v11, %v8736_v19  ;;  %v1419_v58 = vsel %vm971_vm7, %v13630_v8, %v1387_v56  ;;  %v1321_v13 = vand.u32 2147483647, %v8502_v63  ;;  %v1333_v22 = vadd.f32 1.0, %v8508_v47  ;;  %v9001_v19 = vpop.permute.xlu0 %1452 }
 0x163   : > { %v7141_v4 = vpop.eup %7140  ;;  %v1368_v30 = vsel %vm8726_vm13, %v1365_v0, %v1362_v31  ;;  %v6790_v42 = vpack.c.bf16 %v1419_v58, %v1411_v60  ;;  %v1194_v53 = vmul.f32 %v8348_v29, %v1193_v57  ;;  %v1264_v15 = vmul.f32 -0.5, %v8481_v21  ;;  %v13638_v58 = vld [vmem:[#allocation14_spill] sm:$0xff] }
 0x164   : > { %v7143_v5 = vpop.eup %7142  ;;  %v1408_v24 = vmul.f32 0.01, %v1368_v30  ;;  %v1119_v44 = vmul.f32 0.6931472, %v7141_v4  ;;  %v1319_v34 = vadd.f32 1.0, %v1318_v39  ;;  %7150 = vlog2.f32 %v1333_v22  ;;  %v13640_v4 = vld [vmem:[#allocation16_spill] sm:$0xff] }
 0x165   : > { %6791 = vmatprep.subr.bf16.mxu0 %v6790_v42  ;;  %v1191_v9 = vmul.f32 0.6931472, %v7143_v5  ;;  %v1135_v50 = vadd.f32 1.0, %v8568_v37  ;;  %v13634_v29 = vpack.c.bf16 %v8402_v43, %v8375_v2  ;;  %v1248_v40 = vmul.f32 %v8370_v12, %v1247_v16  ;;  %v13641_v30 = vld [vmem:[#allocation18_spill] sm:$0xff] }
 0x166   : > { %v7145_v10 = vpop.eup %7144  ;;  %v8786_v60 = vsel %vm992_vm12, %v8595_v62, %v1408_v24  ;;  %v1125_v0 = vsel %vm8738_vm3, %v1122_v7, %v1119_v44  ;;  %v1336_v56 = vmul.f32 -0.5, %v8508_v47  ;;  %vm8799_vm7 = vcmp.lt.f32.partialorder %v1321_v13, 0.0004427343 }
 0x167   : > { %6793 = vmatpush1.bf16.msra.mxu0 %v13634_v29  ;;  %v6820_v57 = vpack.c.bf16 %v8786_v60, %v8751_v49  ;;  %v1197_v31 = vsel %vm8757_vm2, %v1194_v53, %v1191_v9  ;;  %v1381_v48 = vmul.f32 0.01, %v1125_v0  ;;  %v1245_v62 = vmul.f32 0.6931472, %v7145_v10  ;;  %v7147_v39 = vpop.eup %7146  ;;  %v13646_v29 = vld [vmem:[#allocation19_spill] sm:$0xff] }
 0x168   : > { %v1389_v8 = vmul.f32 0.01, %v1197_v31  ;;  %v1265_v2 = vadd.f32 1.0, %v1264_v15  ;;  %7152 = vlog2.f32 %v1135_v50  ;;  %v1317_v43 = vmul.f32 0.6931472, %v7147_v39 }
 0x169   : > { %v1251_v12 = vsel %vm8772_vm10, %v1248_v40, %v1245_v62  ;;  %v1320_v7 = vmul.f32 %v8502_v63, %v1319_v34  ;;  %v1267_v38 = vand.u32 2147483647, %v8481_v21  ;;  %vm13639_vm0 = vcmp.gt.f32.partialorder %v13638_v58, 20.0 }
 0x16a   : > { %v1413_v16 = vsel %vm13639_vm0, %v13637_v52, %v1381_v48  ;;  %vm13642_vm15 = vcmp.gt.f32.partialorder %v13641_v30, 20.0  ;;  %v1395_v13 = vmul.f32 0.01, %v1251_v12  ;;  %v1207_v22 = vadd.f32 1.0, %v8613_v18  ;;  %v7149_v5 = vpop.eup %7148 }
 0x16b   : > { %v1421_v42 = vsel %vm13642_vm15, %v13640_v4, %v1389_v8  ;;  %v1323_v14 = vsel %vm8799_vm7, %v1320_v7, %v1317_v43  ;;  %v1337_v44 = vadd.f32 1.0, %v1336_v56  ;;  %v1138_v63 = vmul.f32 -0.5, %v8568_v37  ;;  %v13649_v56 = vld [vmem:[#allocation28_spill] sm:$0xff] }
 0x16c   : > { %v6798_v24 = vpack.c.bf16 %v1421_v42, %v1413_v16  ;;  %7154 = vpow2.f32 %v8703_v46  ;;  %v1403_v53 = vmul.f32 0.01, %v1323_v14  ;;  %v1263_v15 = vmul.f32 0.6931472, %v7149_v5  ;;  %v13647_v46 = vld [vmem:[#allocation21_spill] sm:$0xff]  ;;  %v13653_v42 = vld [vmem:[#allocation20_spill] sm:$0xff] }
 0x16d   : > { %v1266_v9 = vmul.f32 %v8481_v21, %v1265_v2  ;;  %vm8819_vm12 = vcmp.lt.f32.partialorder %v1267_v38, 0.0004427343  ;;  %v1339_v50 = vand.u32 2147483647, %v8508_v47  ;;  %7156 = vlog2.f32 %v1207_v22 }
 0x16e   : > { %6799 = vmatprep.subr.bf16.mxu1 %v6798_v24  ;;  %v1153_v10 = vadd.f32 1.0, %v8587_v26  ;;  %v13645_v0 = vpack.c.bf16 %v8409_v17, %v8388_v6  ;;  %vm13648_vm11 = vcmp.gt.f32.partialorder %v13647_v46, 20.0  ;;  %v1435_v21 = vsel %vm987_vm9, %v13649_v56, %v1403_v53  ;;  %v7151_v48 = vpop.eup %7150  ;;  %v8872_v53 = vld [vmem:[%s13295_s3 + $0x8] sm:$0xff] }
 0x16f   : > { %v1427_v40 = vsel %vm13648_vm11, %v13646_v29, %v1395_v13  ;;  %v1269_v31 = vsel %vm8819_vm12, %v1266_v9, %v1263_v15  ;;  %v1338_v39 = vmul.f32 %v8508_v47, %v1337_v44  ;;  %v1139_v8 = vadd.f32 1.0, %v1138_v63  ;;  %v8846_v47 = vld [vmem:[%s13295_s3] sm:$0xff]  ;;  %v13654_v13 = vld [vmem:[#allocation22_spill] sm:$0xff] }
 0x170   : > { %6801 = vmatpush1.bf16.msra.mxu1 %v13645_v0  ;;  %v6794_v62 = vpack.c.bf16 %v1435_v21, %v1427_v40  ;;  %v1335_v23 = vmul.f32 0.6931472, %v7151_v48  ;;  %v1141_v6 = vand.u32 2147483647, %v8568_v37  ;;  %v1210_v17 = vmul.f32 -0.5, %v8613_v18 }
 0x171   : > { %7158 = vlog2.f32 %v1153_v10  ;;  %vm1340_vm1 = vcmp.lt.f32.partialorder %v1339_v50, 0.0004427343  ;;  %v1397_v2 = vmul.f32 0.01, %v1269_v31  ;;  %v1225_v25 = vadd.f32 1.0, %v8636_v51 }
 0x172   : > { %6795 = vmatprep.subr.bf16.mxu0 %v6794_v62  ;;  %v7153_v12 = vpop.eup %7152  ;;  %v1341_v43 = vsel %vm1340_vm1, %v1338_v39, %v1335_v23  ;;  %v13650_v7 = vpack.c.bf16 %v8513_v55, %v8461_v61  ;;  %vm13359_vm9 = vcmask 261120   ;;  %v1156_v38 = vmul.f32 -0.5, %v8587_v26 }
 0x173   : > { %v1279_v52 = vadd.f32 1.0, %v8681_v32  ;;  %v1405_v58 = vmul.f32 0.01, %v1341_v43  ;;  %v1137_v16 = vmul.f32 0.6931472, %v7153_v12  ;;  %v1140_v4 = vmul.f32 %v8568_v37, %v1139_v8  ;;  %v13662_v12 = vld [vmem:[#allocation30_spill] sm:$0xff] }
 0x174   : > { %6797 = vmatpush1.bf16.msra.mxu0 %v13650_v7  ;;  %7160 = vlog2.f32 %v1225_v25  ;;  %vm8851_vm5 = vcmp.lt.f32.partialorder %v1141_v6, 0.0004427343  ;;  %v1211_v61 = vadd.f32 1.0, %v1210_v17  ;;  %v1228_v55 = vmul.f32 -0.5, %v8636_v51  ;;  %v13661_v25 = vld [vmem:[#allocation29_spill] sm:$0xff] }
 0x175   : > { %7162 = vlog2.f32 %v1279_v52  ;;  %vm13655_vm8 = vcmp.gt.f32.partialorder %v13654_v13, 20.0  ;;  %vm13656_vm14 = vcmp.gt.f32.partialorder %v8344_v28, 20.0  ;;  %v1213_v37 = vand.u32 2147483647, %v8613_v18  ;;  %v13664_v7 = vld [vmem:[#allocation33_spill] sm:$0xff] }
 0x176   : > { %v1429_v22 = vsel %vm13655_vm8, %v13653_v42, %v1397_v2  ;;  %v1437_v5 = vsel %vm13656_vm14, %v8330_v54, %v1405_v58  ;;  %v1351_v24 = vadd.f32 1.0, %v8746_v36  ;;  %v8866_v14 = vpop.eup %7154  ;;  %v13657_v63 = vmov 0.0  }
 0x177   : > { %6688 = vmatmul.mubr.msk.f32.vlgmr.msra.gmra.mrb[16].mxu0 %vm13359_vm9, %v8846_v47  ;;  %v6802_v44 = vpack.c.bf16 %v1437_v5, %v1429_v22  ;;  %v1143_v54 = vsel %vm8851_vm5, %v1140_v4, %v1137_v16  ;;  %v1157_v28 = vadd.f32 1.0, %v1156_v38  ;;  %v7157_v15 = vpop.eup %7156  ;;  %v1282_v9 = vmul.f32 -0.5, %v8681_v32  ;;  %v13665_v38 = vld [vmem:[#allocation35_spill] sm:$0xff] }
 0x178   : > { %1553 = vmatprep.mubr.f32.mxu0 %v13657_v63  ;;  %7164 = vlog2.f32 %v1351_v24  ;;  %v1297_v34 = vadd.f32 1.0, %v8685_v35  ;;  %v1209_v50 = vmul.f32 0.6931472, %v7157_v15  ;;  %v1212_v10 = vmul.f32 %v8613_v18, %v1211_v61  ;;  %v8920_v61 = vld [vmem:[%s13295_s3 + $0x18] sm:$0xff] }
 0x179   : > { %6803 = vmatprep.subr.bf16.mxu1 %v6802_v44  ;;  %v1159_v0 = vand.u32 2147483647, %v8587_v26  ;;  %v1229_v29 = vadd.f32 1.0, %v1228_v55  ;;  %v13658_v46 = vpack.c.bf16 %v8542_v41, %v8537_v27  ;;  %vm1214_vm13 = vcmp.lt.f32.partialorder %v1213_v37, 0.0004427343  ;;  %v8892_v27 = vld [vmem:[%s13295_s3 + $0x10] sm:$0xff] }
 0x17a   : > { %v1383_v40 = vmul.f32 0.01, %v1143_v54  ;;  %7166 = vlog2.f32 %v1297_v34  ;;  %v1369_v56 = vadd.f32 1.0, %v8866_v14  ;;  %v1215_v31 = vsel %vm1214_vm13, %v1212_v10, %v1209_v50 }
 0x17b   : > { %6805 = vmatpush1.bf16.msra.mxu1 %v13658_v46  ;;  %6689 = vmatmul.mubr.msk.f32.gmra.mrb[18].mxu0 %vm13359_vm9, %v8872_v53  ;;  %v7159_v21 = vpop.eup %7158  ;;  %v1158_v48 = vmul.f32 %v8587_v26, %v1157_v28  ;;  %v1231_v18 = vand.u32 2147483647, %v8636_v51  ;;  %v1354_v41 = vmul.f32 -0.5, %v8746_v36  ;;  %v1391_v62 = vmul.f32 0.01, %v1215_v31  ;;  %v13671_v46 = vld [vmem:[#allocation32_spill] sm:$0xff] }
 0x17c   : > { %1559 = vmatprep.mubr.f32.mxu0 %v13657_v63  ;;  %v1155_v39 = vmul.f32 0.6931472, %v7159_v21  ;;  %v1283_v8 = vadd.f32 1.0, %v1282_v9  ;;  %7168 = vlog2.f32 %v1369_v56  ;;  %vm8897_vm3 = vcmp.lt.f32.partialorder %v1159_v0, 0.0004427343 }
 0x17d   : > { %v1230_v23 = vmul.f32 %v8636_v51, %v1229_v29  ;;  %v1285_v6 = vand.u32 2147483647, %v8681_v32  ;;  %v1300_v17 = vmul.f32 -0.5, %v8685_v35  ;;  %vm13663_vm2 = vcmp.gt.f32.partialorder %v13662_v12, 20.0  ;;  %v13670_v29 = vld [vmem:[#allocation31_spill] sm:$0xff] }
 0x17e   : > { %6692 = vmatmul.mubr.msk.f32.vlgmr.msra.gmra.mrb[16].mxu1 %vm13359_vm9, %v8846_v47  ;;  %v7161_v2 = vpop.eup %7160  ;;  %v1415_v43 = vsel %vm13663_vm2, %v13661_v25, %v1383_v40  ;;  %vm13666_vm10 = vcmp.gt.f32.partialorder %v13665_v38, 20.0  ;;  %v1161_v58 = vsel %vm8897_vm3, %v1158_v48, %v1155_v39  ;;  %v1357_v51 = vand.u32 2147483647, %v8746_v36  ;;  %v13674_v40 = vld [vmem:[#allocation36_spill] sm:$0xff] }
 0x17f   : > { %1642 = vmatprep.mubr.f32.mxu1 %v13657_v63  ;;  %v1423_v52 = vsel %vm13666_vm10, %v13664_v7, %v1391_v62  ;;  %6690 = vmatmul.mubr.msk.f32.gmra.mrb[20].mxu0 %vm13359_vm9, %v8892_v27  ;;  %v7163_v16 = vpop.eup %7162  ;;  %v1227_v30 = vmul.f32 0.6931472, %v7161_v2  ;;  %v1355_v55 = vadd.f32 1.0, %v1354_v41  ;;  %v1372_v42 = vmul.f32 -0.5, %v8866_v14  ;;  %v13678_v2 = vld [vmem:[#allocation38_spill] sm:$0xff] }
 0x180   : > { %v6806_v4 = vpack.c.bf16 %v1423_v52, %v1415_v43  ;;  %1565 = vmatprep.mubr.f32.mxu0 %v13657_v63  ;;  %vm1232_vm7 = vcmp.lt.f32.partialorder %v1231_v18, 0.0004427343  ;;  %v1385_v13 = vmul.f32 0.01, %v1161_v58  ;;  %v1281_v22 = vmul.f32 0.6931472, %v7163_v16 }
 0x181   : > { %v1284_v5 = vmul.f32 %v8681_v32, %v1283_v8  ;;  %v1233_v37 = vsel %vm1232_vm7, %v1230_v23, %v1227_v30  ;;  %vm8926_vm0 = vcmp.lt.f32.partialorder %v1285_v6, 0.0004427343  ;;  %v1301_v44 = vadd.f32 1.0, %v1300_v17  ;;  %v13677_v17 = vld [vmem:[#allocation37_spill] sm:$0xff]  ;;  %v13684_v58 = vld [vmem:[#allocation26_spill] sm:$0xff] }
 0x182   : > { %6693 = vmatmul.mubr.msk.f32.gmra.mrb[18].mxu1 %vm13359_vm9, %v8872_v53  ;;  %6807 = vmatprep.subr.bf16.mxu0 %v6806_v4  ;;  %v7165_v54 = vpop.eup %7164  ;;  %v1393_v28 = vmul.f32 0.01, %v1233_v37  ;;  %v13669_v15 = vpack.c.bf16 %v8667_v33, %v8649_v3  ;;  %v1303_v9 = vand.u32 2147483647, %v8685_v35  ;;  %v1356_v50 = vmul.f32 %v8746_v36, %v1355_v55  ;;  %v13673_v33 = vld [vmem:[#allocation34_spill] sm:$0xff]  ;;  %v9024_v55 = vpop.permute.xlu0 %1462 }
 0x183   : > { %1648 = vmatprep.mubr.f32.mxu1 %v13657_v63  ;;  %v1287_v32 = vsel %vm8926_vm0, %v1284_v5, %v1281_v22  ;;  %6691 = vmatmul.mubr.msk.f32.gmra.mrb[22].mxu0 %vm13359_vm9, %v8920_v61  ;;  %v1353_v34 = vmul.f32 0.6931472, %v7165_v54  ;;  %vm1358_vm15 = vcmp.lt.f32.partialorder %v1357_v51, 0.0004427343  ;;  %v1373_v10 = vadd.f32 1.0, %v1372_v42 }
 0x184   : > { %6809 = vmatpush1.bf16.msra.mxu0 %v13669_v15  ;;  %v7167_v0 = vpop.eup %7166  ;;  %vm13672_vm12 = vcmp.gt.f32.partialorder %v13671_v46, 20.0  ;;  %vm13675_vm11 = vcmp.gt.f32.partialorder %v13674_v40, 20.0  ;;  %v1399_v21 = vmul.f32 0.01, %v1287_v32  ;;  %v1375_v31 = vand.u32 2147483647, %v8866_v14  ;;  %1725 = vmatprep.mubr.f32.mxu0 %v13657_v63 }
 0x185   : > { %v1417_v3 = vsel %vm13672_vm12, %v13670_v29, %v1385_v13  ;;  %v1425_v56 = vsel %vm13675_vm11, %v13673_v33, %v1393_v28  ;;  %v1359_v36 = vsel %vm1358_vm15, %v1356_v50, %v1353_v34  ;;  %v1299_v18 = vmul.f32 0.6931472, %v7167_v0 }
 0x186   : > { %v6814_v48 = vpack.c.bf16 %v1425_v56, %v1417_v3  ;;  %6694 = vmatmul.mubr.msk.f32.gmra.mrb[20].mxu1 %vm13359_vm9, %v8892_v27  ;;  %v1302_v41 = vmul.f32 %v8685_v35, %v1301_v44  ;;  %v7169_v62 = vpop.eup %7168  ;;  %v1407_v39 = vmul.f32 0.01, %v1359_v36  ;;  %vm1304_vm1 = vcmp.lt.f32.partialorder %v1303_v9, 0.0004427343 }
 0x187   : > { %1654 = vmatprep.mubr.f32.mxu1 %v13657_v63  ;;  %v1371_v26 = vmul.f32 0.6931472, %v7169_v62  ;;  %v1374_v23 = vmul.f32 %v8866_v14, %v1373_v10  ;;  %v13676_v6 = vpack.c.bf16 %v8679_v20, %v8654_v59  ;;  %vm13679_vm5 = vcmp.gt.f32.partialorder %v13678_v2, 20.0  ;;  %v13681_v59 = vld [vmem:[#allocation39_spill] sm:$0xff]  ;;  %v13682_v20 = vld [vmem:[#allocation40_spill] sm:$0xff] }
 0x188   : > { %6815 = vmatprep.subr.bf16.mxu1 %v6814_v48  ;;  %v1305_v8 = vsel %vm1304_vm1, %v1302_v41, %v1299_v18  ;;  %v1431_v25 = vsel %vm13679_vm5, %v13677_v17, %v1399_v21  ;;  %v1439_v12 = vsel %vm991_vm4, %v8619_v1, %v1407_v39  ;;  %vm1376_vm8 = vcmp.lt.f32.partialorder %v1375_v31, 0.0004427343 }
 0x189   : > { %6817 = vmatpush1.bf16.msra.mxu1 %v13676_v6  ;;  %v1401_v43 = vmul.f32 0.01, %v1305_v8  ;;  %v6810_v7 = vpack.c.bf16 %v1439_v12, %v1431_v25  ;;  %v1377_v38 = vsel %vm1376_vm8, %v1374_v23, %v1371_v26  ;;  %vm13683_vm14 = vcmp.gt.f32.partialorder %v13682_v20, 20.0 }
 0x18a   : > { %6695 = vmatmul.mubr.msk.f32.gmra.mrb[22].mxu1 %vm13359_vm9, %v8920_v61  ;;  %v1409_v14 = vmul.f32 0.01, %v1377_v38 }
 0x18b   : > { %1814 = vmatprep.mubr.f32.mxu1 %v13657_v63  ;;  %6811 = vmatprep.subr.bf16.mxu0 %v6810_v7  ;;  %v1433_v52 = vsel %vm13683_vm14, %v13681_v59, %v1401_v43 }
 0x18c   : > { %v1441_v16 = vsel %vm993_vm6, %v13684_v58, %v1409_v14  ;;  %6813 = vmatpush1.bf16.msra.mxu0 %v6812_v45 }
 0x18d   : > { %v6818_v1 = vpack.c.bf16 %v1441_v16, %v1433_v52 }
 0x18f   : > { %6819 = vmatprep.subr.bf16.mxu1 %v6818_v1  ;;  %6696 = vmatmul.mubr.msk.f32.vlgmr.msra.gmra.mrb[24].mxu0 %vm13359_vm9, %v8846_v47 }
 0x190   : > { %6821 = vmatpush1.bf16.msra.mxu1 %v6820_v57  ;;  %1731 = vmatprep.mubr.f32.mxu0 %v13657_v63 }
 0x193   : > { %6700 = vmatmul.mubr.msk.f32.vlgmr.msra.gmra.mrb[24].mxu1 %vm13359_vm9, %v8846_v47  ;;  %6697 = vmatmul.mubr.msk.f32.gmra.mrb[26].mxu0 %vm13359_vm9, %v8872_v53  ;;  %v9012_v47 = vpop.permute.xlu1 %1457 }
 0x194   : > { %1820 = vmatprep.mubr.f32.mxu1 %v13657_v63  ;;  %1737 = vmatprep.mubr.f32.mxu0 %v13657_v63 }
 0x197   : > { %6701 = vmatmul.mubr.msk.f32.gmra.mrb[26].mxu1 %vm13359_vm9, %v8872_v53  ;;  %6698 = vmatmul.mubr.msk.f32.gmra.mrb[28].mxu0 %vm13359_vm9, %v8892_v27  ;;  %v9118_v16 = vpop.permute.xlu1 %1467 }
 0x198   : > { %1826 = vmatprep.mubr.f32.mxu1 %v13657_v63  ;;  %1743 = vmatprep.mubr.f32.mxu0 %v13657_v63 }
 0x19b   : > { %6702 = vmatmul.mubr.msk.f32.gmra.mrb[28].mxu1 %vm13359_vm9, %v8892_v27  ;;  %6699 = vmatmul.mubr.msk.f32.gmra.mrb[30].mxu0 %vm13359_vm9, %v8920_v61 }
 0x19c   : > { %1832 = vmatprep.mubr.f32.mxu1 %v13657_v63  ;;  %2455 = vmatprep.mubr.f32.mxu0 %v13657_v63 }
 0x19f   : > { %6703 = vmatmul.mubr.msk.f32.gmra.mrb[30].mxu1 %vm13359_vm9, %v8920_v61 }
 0x1a0   : > { %2544 = vmatprep.mubr.f32.mxu1 %v13657_v63 }
 0x24a   : > { %v1549_v49 = vpop.f32.mrb[16].mxu0 }
 0x24b   : > { %v9004_v11 = vadd.f32 %v1549_v49, %v9001_v19  ;;  %v1551_v45 = vpop.f32.mrb[17].mxu0 }
 0x24c   : > { %v9010_v57 = vadd.f32 %v1551_v45, %v9001_v19 }
 0x24d   : > { %v9007_v60 = vmul.f32 100.0, %v9004_v11 }
 0x24e   : > { %13686 = vst [vmem:[#allocation25_spill] sm:$0xff] %v9010_v57  ;;  %v1555_v53 = vpop.f32.mrb[18].mxu0  ;;  %v9027_v22 = vmul.f32 100.0, %v9010_v57 }
 0x24f   : > { %vm1871_vm6 = vcmp.gt.f32.partialorder %v9007_v60, 20.0  ;;  %v9016_v27 = vadd.f32 %v1555_v53, %v9012_v47  ;;  %v1557_v4 = vpop.f32.mrb[19].mxu0 }
 0x250   : > { %v1903_v30 = vsel %vm1871_vm6, 0.0, %v9007_v60  ;;  %v9022_v61 = vadd.f32 %v1557_v4, %v9012_v47  ;;  %13688 = vst [vmem:[#allocation11_spill] sm:$0xff] %v9027_v22  ;;  %vm1872_vm13 = vcmp.gt.f32.partialorder %v9027_v22, 20.0 }
 0x251   : > { %v1935_v42 = vmul.f32 1.442695, %v1903_v30  ;;  %v1638_v13 = vpop.f32.mrb[16].mxu1  ;;  %v9030_v5 = vmul.f32 100.0, %v9016_v27  ;;  %v1904_v48 = vsel %vm1872_vm13, 0.0, %v9027_v22 }
 0x252   : > { %13687 = vst [vmem:[#allocation24_spill] sm:$0xff] %v9022_v61  ;;  %v9033_v37 = vadd.f32 %v1638_v13, %v9001_v19  ;;  %v1640_v24 = vpop.f32.mrb[17].mxu1  ;;  %v9036_v44 = vmul.f32 100.0, %v9022_v61  ;;  %v1561_v54 = vpop.f32.mrb[20].mxu0  ;;  %v1937_v17 = vmul.f32 1.442695, %v1904_v48 }
 0x253   : > { %7170 = vpow2.f32 %v1935_v42  ;;  %v9039_v28 = vadd.f32 %v1640_v24, %v9001_v19  ;;  %vm1879_vm4 = vcmp.gt.f32.partialorder %v9030_v5, 20.0  ;;  %v9043_v15 = vadd.f32 %v1561_v54, %v9024_v55  ;;  %v1563_v32 = vpop.f32.mrb[21].mxu0 }
 0x254   : > { %13689 = vst [vmem:[#allocation13_spill] sm:$0xff] %v9036_v44  ;;  %v9046_v9 = vmul.f32 100.0, %v9033_v37  ;;  %v1911_v34 = vsel %vm1879_vm4, 0.0, %v9030_v5  ;;  %vm1880_vm2 = vcmp.gt.f32.partialorder %v9036_v44, 20.0  ;;  %v9064_v33 = vadd.f32 %v1563_v32, %v9024_v55 }
 0x255   : > { %13690 = vst [vmem:[#allocation15_spill] sm:$0xff] %v9039_v28  ;;  %v9053_v50 = vmul.f32 100.0, %v9039_v28  ;;  %v1951_v10 = vmul.f32 1.442695, %v1911_v34  ;;  %v1644_v0 = vpop.f32.mrb[18].mxu1  ;;  %v9056_v29 = vmul.f32 100.0, %v9043_v15 }
 0x256   : > { %vm1873_vm3 = vcmp.gt.f32.partialorder %v9046_v9, 20.0  ;;  %v9060_v46 = vadd.f32 %v1644_v0, %v9012_v47  ;;  %v1646_v3 = vpop.f32.mrb[19].mxu1  ;;  %13692 = vst [vmem:[#allocation12_spill] sm:$0xff] %v9064_v33  ;;  %v1567_v21 = vpop.f32.mrb[22].mxu0  ;;  %v1912_v41 = vsel %vm1880_vm2, 0.0, %v9036_v44  ;;  %v9089_v8 = vmul.f32 100.0, %v9064_v33 }
 0x257   : > { %13691 = vst [vmem:[#allocation17_spill] sm:$0xff] %v9053_v50  ;;  %v1905_v40 = vsel %vm1873_vm3, 0.0, %v9046_v9  ;;  %7172 = vpow2.f32 %v1951_v10  ;;  %v9070_v56 = vadd.f32 %v1646_v3, %v9012_v47  ;;  %vm1874_vm10 = vcmp.gt.f32.partialorder %v9053_v50, 20.0  ;;  %v9079_v18 = vpop.f32.mrb[23].mxu0 }
 0x258   : > { %v1939_v31 = vmul.f32 1.442695, %v1905_v40  ;;  %v9077_v36 = vmul.f32 100.0, %v9060_v46  ;;  %vm1887_vm7 = vcmp.gt.f32.partialorder %v9056_v29, 20.0  ;;  %13695 = vst [vmem:[#allocation18_spill] sm:$0xff] %v9089_v8  ;;  %v1906_v2 = vsel %vm1874_vm10, 0.0, %v9053_v50 }
 0x259   : > { %13693 = vst [vmem:[#allocation14_spill] sm:$0xff] %v9070_v56  ;;  %v9085_v62 = vmul.f32 100.0, %v9070_v56  ;;  %v1650_v39 = vpop.f32.mrb[20].mxu1  ;;  %v1919_v26 = vsel %vm1887_vm7, 0.0, %v9056_v29  ;;  %v1953_v38 = vmul.f32 1.442695, %v1912_v41  ;;  %v9132_v42 = vadd.f32 %v1567_v21, %v9118_v16 }
 0x25a   : > { %7174 = vpow2.f32 %v1939_v31  ;;  %vm1881_vm0 = vcmp.gt.f32.partialorder %v9077_v36, 20.0  ;;  %v9096_v23 = vadd.f32 %v1650_v39, %v9024_v55  ;;  %v1652_v6 = vpop.f32.mrb[21].mxu1  ;;  %v1967_v35 = vmul.f32 1.442695, %v1919_v26 }
 0x25b   : > { %13694 = vst [vmem:[#allocation16_spill] sm:$0xff] %v9085_v62  ;;  %v1913_v25 = vsel %vm1881_vm0, 0.0, %v9077_v36  ;;  %vm13374_vm15 = vcmp.gt.f32.partialorder %v9085_v62, 20.0  ;;  %v9109_v14 = vadd.f32 %v1652_v6, %v9024_v55  ;;  %v1941_v52 = vmul.f32 1.442695, %v1906_v2 }
 0x25c   : > { %v1955_v12 = vmul.f32 1.442695, %v1913_v25  ;;  %v9106_v43 = vmul.f32 100.0, %v9096_v23  ;;  %7176 = vpow2.f32 %v1967_v35  ;;  %vm13372_vm12 = vcmp.gt.f32.partialorder %v9089_v8, 20.0 }
 0x25d   : > { %v7171_v7 = vpop.eup %7170  ;;  %13696 = vst [vmem:[#allocation19_spill] sm:$0xff] %v9109_v14  ;;  %v1656_v59 = vpop.f32.mrb[22].mxu1  ;;  %v1914_v51 = vsel %vm13374_vm15, 0.0, %v9085_v62  ;;  %v9124_v45 = vmul.f32 100.0, %v9109_v14  ;;  %v1920_v30 = vsel %vm13372_vm12, 0.0, %v9089_v8  ;;  %v9136_v32 = vmul.f32 100.0, %v9132_v42 }
 0x25e   : > { %v1999_v20 = vadd.f32 1.0, %v7171_v7  ;;  %7178 = vpow2.f32 %v1955_v12  ;;  %v9112_v58 = vpop.f32.mrb[23].mxu1  ;;  %vm1889_vm11 = vcmp.gt.f32.partialorder %v9106_v43, 20.0  ;;  %v2002_v1 = vmul.f32 -0.5, %v7171_v7 }
 0x25f   : > { %7180 = vpow2.f32 %v1937_v17  ;;  %v1921_v49 = vsel %vm1889_vm11, 0.0, %v9106_v43  ;;  %13697 = vst [vmem:[#allocation21_spill] sm:$0xff] %v9124_v45  ;;  %v1957_v24 = vmul.f32 1.442695, %v1914_v51  ;;  %v2005_v54 = vand.u32 2147483647, %v7171_v7 }
 0x260   : > { %7182 = vlog2.f32 %v1999_v20  ;;  %v1971_v4 = vmul.f32 1.442695, %v1921_v49  ;;  %v9139_v34 = vadd.f32 %v1656_v59, %v9118_v16  ;;  %v2003_v3 = vadd.f32 1.0, %v2002_v1 }
 0x261   : > { %v9126_v53 = vpop.eup %7172  ;;  %7184 = vpow2.f32 %v1953_v38  ;;  %v1969_v40 = vmul.f32 1.442695, %v1920_v30  ;;  %vm13370_vm1 = vcmp.gt.f32.partialorder %v9124_v45, 20.0  ;;  %vm1895_vm5 = vcmp.gt.f32.partialorder %v9136_v32, 20.0 }
 0x262   : > { %7186 = vpow2.f32 %v1941_v52  ;;  %v2071_v13 = vadd.f32 1.0, %v9126_v53  ;;  %v1727_v10 = vpop.f32.mrb[24].mxu0  ;;  %v2074_v48 = vmul.f32 -0.5, %v9126_v53  ;;  %v2077_v41 = vand.u32 2147483647, %v9126_v53 }
 0x263   : > { %7188 = vpow2.f32 %v1971_v4  ;;  %v9144_v21 = vpop.f32.mrb[25].mxu0  ;;  %v1927_v39 = vsel %vm1895_vm5, 0.0, %v9136_v32  ;;  %v9154_v26 = vmul.f32 100.0, %v9139_v34  ;;  %vm9158_vm8 = vcmp.lt.f32.partialorder %v2005_v54, 0.0004427343 }
 0x264   : > { %v9141_v0 = vpop.eup %7174  ;;  %7190 = vlog2.f32 %v2071_v13  ;;  %v1922_v25 = vsel %vm13370_vm1, 0.0, %v9124_v45  ;;  %v1983_v59 = vmul.f32 1.442695, %v1927_v39  ;;  %v2004_v51 = vmul.f32 %v7171_v7, %v2003_v3 }
 0x265   : > { %v2017_v31 = vadd.f32 1.0, %v9141_v0  ;;  %7192 = vpow2.f32 %v1957_v24  ;;  %v2020_v2 = vmul.f32 -0.5, %v9141_v0  ;;  %vm1897_vm14 = vcmp.gt.f32.partialorder %v9154_v26, 20.0 }
 0x266   : > { %v9156_v6 = vpop.eup %7176  ;;  %v9166_v35 = vpop.f32.mrb[24].mxu1  ;;  %v2075_v1 = vadd.f32 1.0, %v2074_v48  ;;  %vm9176_vm9 = vcmp.lt.f32.partialorder %v2077_v41, 0.0004427343  ;;  %v2023_v24 = vand.u32 2147483647, %v9141_v0  ;;  %v9201_v45 = vadd.f32 %v9079_v18, %v9118_v16 }
 0x267   : > { %7194 = vlog2.f32 %v2017_v31  ;;  %v2143_v38 = vadd.f32 1.0, %v9156_v6  ;;  %v9172_v20 = vpop.f32.mrb[25].mxu1  ;;  %v9181_v30 = vpop.f32.mrb[26].mxu0  ;;  %v9184_v54 = vmul.f32 1.442695, %v1922_v25  ;;  %v2021_v48 = vadd.f32 1.0, %v2020_v2 }
 0x268   : > { %v9168_v12 = vpop.eup %7178  ;;  %7196 = vpow2.f32 %v1969_v40  ;;  %v1929_v40 = vsel %vm1897_vm14, 0.0, %v9154_v26  ;;  %v9189_v7 = vpop.f32.mrb[27].mxu0  ;;  %13702 = vst [vmem:[#allocation28_spill] sm:$0xff] %v9201_v45  ;;  %v9214_v33 = vadd.f32 %v9112_v58, %v9118_v16  ;;  %v2076_v56 = vmul.f32 %v9126_v53, %v2075_v1 }
 0x269   : > { %v9174_v52 = vpop.eup %7180  ;;  %v2089_v4 = vadd.f32 1.0, %v9168_v12  ;;  %7198 = vlog2.f32 %v2143_v38  ;;  %v2092_v41 = vmul.f32 -0.5, %v9168_v12  ;;  %v2095_v25 = vand.u32 2147483647, %v9168_v12 }
 0x26a   : > { %v7183_v13 = vpop.eup %7182  ;;  %v9194_v39 = vpop.f32.mrb[26].mxu1  ;;  %v1987_v38 = vmul.f32 1.442695, %v1929_v40  ;;  %13703 = vst [vmem:[#allocation20_spill] sm:$0xff] %v9214_v33  ;;  %v2146_v50 = vmul.f32 -0.5, %v9156_v6  ;;  %v9225_v28 = vmul.f32 100.0, %v9201_v45 }
 0x26b   : > { %v9191_v3 = vpop.eup %7184  ;;  %v2001_v31 = vmul.f32 0.6931472, %v7183_v13  ;;  %7200 = vlog2.f32 %v2089_v4  ;;  %v9203_v14 = vpop.f32.mrb[27].mxu1  ;;  %v2149_v13 = vand.u32 2147483647, %v9156_v6 }
 0x26c   : > { %v9196_v63 = vpop.eup %7186  ;;  %7202 = vpow2.f32 %v1983_v59  ;;  %v9205_v8 = vpop.f32.mrb[28].mxu0  ;;  %v9217_v59 = vadd.f32 %v1727_v10, %v9001_v19  ;;  %13704 = vst [vmem:[#allocation22_spill] sm:$0xff] %v9225_v28  ;;  %vm9238_vm1 = vcmp.lt.f32.partialorder %v2095_v25, 0.0004427343  ;;  %vm1896_vm15 = vcmp.gt.f32.partialorder %v9225_v28, 20.0 }
 0x26d   : > { %v9207_v2 = vpop.eup %7188  ;;  %v2007_v4 = vsel %vm9158_vm8, %v2004_v51, %v2001_v31  ;;  %v9219_v18 = vpop.f32.mrb[29].mxu0  ;;  %v2093_v31 = vadd.f32 1.0, %v2092_v41  ;;  %7204 = vpow2.f32 %v1987_v38  ;;  %vm9234_vm8 = vcmp.lt.f32.partialorder %v2023_v24, 0.0004427343 }
 0x26e   : > { %v7191_v40 = vpop.eup %7190  ;;  %v2287_v62 = vmul.f32 0.01, %v2007_v4  ;;  %v2161_v17 = vadd.f32 1.0, %v9207_v2  ;;  %v9227_v58 = vpop.f32.mrb[28].mxu1  ;;  %v2022_v4 = vmul.f32 %v9141_v0, %v2021_v48  ;;  %vm9248_vm12 = vcmp.lt.f32.partialorder %v2149_v13, 0.0004427343 }
 0x26f   : > { %v2073_v51 = vmul.f32 0.6931472, %v7191_v40  ;;  %v9229_v10 = vpop.f32.mrb[30].mxu0  ;;  %v9231_v44 = vpop.eup %7192  ;;  %v9254_v0 = vmul.f32 100.0, %v9214_v33  ;;  %v9257_v24 = vmul.f32 100.0, %v9217_v59  ;;  %v2147_v22 = vadd.f32 1.0, %v2146_v50 }
 0x270   : > { %7206 = vlog2.f32 %v2161_v17  ;;  %v9242_v41 = vpop.f32.mrb[29].mxu1  ;;  %v9244_v38 = vpop.f32.mrb[31].mxu0  ;;  %v2164_v49 = vmul.f32 -0.5, %v9207_v2  ;;  %v2094_v13 = vmul.f32 %v9168_v12, %v2093_v31 }
 0x271   : > { %v7195_v40 = vpop.eup %7194  ;;  %v2079_v45 = vsel %vm9176_vm9, %v2076_v56, %v2073_v51  ;;  %v9265_v56 = vsel %vm1871_vm6, %v9004_v11, %v2287_v62  ;;  %vm1875_vm9 = vcmp.gt.f32.partialorder %v9257_v24, 20.0  ;;  %v9271_v51 = vadd.f32 %v9166_v35, %v9001_v19 }
 0x272   : > { %v9259_v48 = vpop.eup %7196  ;;  %v2019_v25 = vmul.f32 0.6931472, %v7195_v40  ;;  %v2295_v17 = vmul.f32 0.01, %v2079_v45  ;;  %13712 = vst [vmem:[#allocation30_spill] sm:$0xff] %v9265_v56  ;;  %v9273_v33 = vpop.f32.mrb[30].mxu1  ;;  %7208 = vpow2.f32 %v9184_v54 }
 0x273   : > { %13711 = vst [vmem:[#allocation29_spill] sm:$0xff] %v9259_v48  ;;  %v7199_v40 = vpop.eup %7198  ;;  %v1928_v11 = vsel %vm1896_vm15, 0.0, %v9225_v28  ;;  %v1907_v62 = vsel %vm1875_vm9, 0.0, %v9257_v24  ;;  %v9288_v45 = vpop.f32.mrb[31].mxu1  ;;  %vm1898_vm6 = vcmp.gt.f32.partialorder %v9254_v0, 20.0  ;;  %v2165_v53 = vadd.f32 1.0, %v2164_v49 }
 0x274   : > { %v2025_v50 = vsel %vm9234_vm8, %v2022_v4, %v2019_v25  ;;  %v9280_v60 = vsel %vm1879_vm4, %v9016_v27, %v2295_v17  ;;  %v2145_v31 = vmul.f32 0.6931472, %v7199_v40  ;;  %v2167_v4 = vand.u32 2147483647, %v9207_v2 }
 0x275   : > { %v7201_v35 = vpop.eup %7200  ;;  %v1943_v25 = vmul.f32 1.442695, %v1907_v62  ;;  %v9295_v17 = vmul.f32 100.0, %v9271_v51  ;;  %v2289_v28 = vmul.f32 0.01, %v2025_v50  ;;  %v2148_v40 = vmul.f32 %v9156_v6, %v2147_v22 }
 0x276   : > { %v7203_v27 = vpop.eup %7202  ;;  %v2091_v5 = vmul.f32 0.6931472, %v7201_v35  ;;  %v1985_v48 = vmul.f32 1.442695, %v1928_v11  ;;  %v1930_v56 = vsel %vm1898_vm6, 0.0, %v9254_v0  ;;  %v2166_v22 = vmul.f32 %v9207_v2, %v2165_v53 }
 0x277   : > { %v2215_v57 = vadd.f32 1.0, %v7203_v27  ;;  %7210 = vpow2.f32 %v1943_v25  ;;  %v9304_v49 = vpop.eup %7204  ;;  %vm9306_vm4 = vcmp.lt.f32.partialorder %v2167_v4, 0.0004427343  ;;  %vm1877_vm8 = vcmp.gt.f32.partialorder %v9295_v17, 20.0 }
 0x278   : > { %v2097_v12 = vsel %vm9238_vm1, %v2094_v13, %v2091_v5  ;;  %v2151_v1 = vsel %vm9248_vm12, %v2148_v40, %v2145_v31  ;;  %v2218_v6 = vmul.f32 -0.5, %v7203_v27  ;;  %v2233_v13 = vadd.f32 1.0, %v9304_v49 }
 0x279   : > { %v2297_v62 = vmul.f32 0.01, %v2097_v12  ;;  %7212 = vlog2.f32 %v2215_v57  ;;  %v9318_v50 = vsel %vm1873_vm3, %v9033_v37, %v2289_v28  ;;  %v1989_v11 = vmul.f32 1.442695, %v1930_v56 }
 0x27a   : > { %v7207_v54 = vpop.eup %7206  ;;  %7214 = vpow2.f32 %v1985_v48  ;;  %v1909_v2 = vsel %vm1877_vm8, 0.0, %v9295_v17  ;;  %v2303_v31 = vmul.f32 0.01, %v2151_v1  ;;  %v2221_v9 = vand.u32 2147483647, %v7203_v27 }
 0x27b   : > { %v9323_v57 = vsel %vm1881_vm0, %v9060_v46, %v2297_v62  ;;  %v2163_v12 = vmul.f32 0.6931472, %v7207_v54  ;;  %7216 = vlog2.f32 %v2233_v13  ;;  %v1947_v37 = vmul.f32 1.442695, %v1909_v2 }
 0x27c   : > { %v9332_v28 = vadd.f32 %v9144_v21, %v9001_v19  ;;  %v2219_v46 = vadd.f32 1.0, %v2218_v6  ;;  %v2236_v36 = vmul.f32 -0.5, %v9304_v49  ;;  %v9337_v48 = vadd.f32 %v9172_v20, %v9001_v19 }
 0x27d   : > { %v9341_v56 = vadd.f32 %v9181_v30, %v9012_v47  ;;  %v2239_v4 = vand.u32 2147483647, %v9304_v49  ;;  %7218 = vpow2.f32 %v1947_v37  ;;  %v9349_v21 = vadd.f32 %v9194_v39, %v9012_v47  ;;  %v9360_v30 = vpop.eup %7208 }
 0x27e   : > { %v9345_v5 = vmul.f32 100.0, %v9332_v28  ;;  %v2169_v53 = vsel %vm9306_vm4, %v2166_v22, %v2163_v12  ;;  %7220 = vpow2.f32 %v1989_v11  ;;  %v9358_v20 = vadd.f32 %v9189_v7, %v9012_v47 }
 0x27f   : > { %v9354_v19 = vmul.f32 100.0, %v9341_v56  ;;  %v9365_v25 = vsel %vm1887_vm7, %v9043_v15, %v2303_v31  ;;  %vm9367_vm3 = vcmp.lt.f32.partialorder %v2221_v9, 0.0004427343  ;;  %v9372_v40 = vmul.f32 100.0, %v9337_v48 }
 0x280   : > { %v9375_v62 = vmul.f32 100.0, %v9349_v21  ;;  %v2220_v7 = vmul.f32 %v7203_v27, %v2219_v46  ;;  %vm1876_vm0 = vcmp.gt.f32.partialorder %v9345_v5, 20.0  ;;  %v9381_v15 = vadd.f32 %v9203_v14, %v9012_v47 }
 0x281   : > { %13717 = vst [vmem:[#allocation33_spill] sm:$0xff] %v9372_v40  ;;  %v7211_v35 = vpop.eup %7210  ;;  %vm1883_vm12 = vcmp.gt.f32.partialorder %v9354_v19, 20.0  ;;  %v2305_v54 = vmul.f32 0.01, %v2169_v53  ;;  %v2237_v1 = vadd.f32 1.0, %v2236_v36  ;;  %v9392_v11 = vmul.f32 100.0, %v9358_v20 }
 0x282   : > { %13718 = vst [vmem:[#allocation35_spill] sm:$0xff] %v9381_v15  ;;  %vm9383_vm7 = vcmp.lt.f32.partialorder %v2239_v4, 0.0004427343  ;;  %v2035_v6 = vadd.f32 1.0, %v7211_v35  ;;  %v1915_v27 = vsel %vm1883_vm12, 0.0, %v9354_v19  ;;  %vm1885_vm1 = vcmp.gt.f32.partialorder %v9375_v62, 20.0 }
 0x283   : > { %v7213_v29 = vpop.eup %7212  ;;  %v2038_v14 = vmul.f32 -0.5, %v7211_v35  ;;  %v1908_v12 = vsel %vm1876_vm0, 0.0, %v9345_v5  ;;  %vm13382_vm4 = vcmp.gt.f32.partialorder %v9372_v40, 20.0  ;;  %v1959_v9 = vmul.f32 1.442695, %v1915_v27  ;;  %v9854_v5 = vld [vmem:[%s13297_s5 + $0x10] sm:$0xff] }
 0x284   : > { %v2217_v13 = vmul.f32 0.6931472, %v7213_v29  ;;  %v9394_v47 = vpop.eup %7214  ;;  %7222 = vlog2.f32 %v2035_v6  ;;  %v1917_v37 = vsel %vm1885_vm1, 0.0, %v9375_v62  ;;  %v9406_v46 = vmul.f32 100.0, %v9381_v15 }
 0x285   : > { %v7217_v2 = vpop.eup %7216  ;;  %v2238_v53 = vmul.f32 %v9304_v49, %v2237_v1  ;;  %v2041_v29 = vand.u32 2147483647, %v7211_v35  ;;  %v1945_v6 = vmul.f32 1.442695, %v1908_v12  ;;  %7224 = vpow2.f32 %v1959_v9 }
 0x286   : > { %v2223_v31 = vsel %vm9367_vm3, %v2220_v7, %v2217_v13  ;;  %13721 = vst [vmem:[#allocation31_spill] sm:$0xff] %v9406_v46  ;;  %v2235_v4 = vmul.f32 0.6931472, %v7217_v2  ;;  %v1963_v61 = vmul.f32 1.442695, %v1917_v37  ;;  %v9411_v39 = vadd.f32 %v9205_v8, %v9024_v55 }
 0x287   : > { %v2311_v36 = vmul.f32 0.01, %v2223_v31  ;;  %v9413_v7 = vpop.eup %7218  ;;  %v2039_v2 = vadd.f32 1.0, %v2038_v14  ;;  %v1910_v49 = vsel %vm13382_vm4, 0.0, %v9372_v40  ;;  %vm13383_vm3 = vcmp.gt.f32.partialorder %v9392_v11, 20.0 }
 0x288   : > { %v2241_v27 = vsel %vm9383_vm7, %v2238_v53, %v2235_v4  ;;  %v9425_v1 = vpop.eup %7220  ;;  %v2053_v31 = vadd.f32 1.0, %v9413_v7  ;;  %7226 = vpow2.f32 %v1963_v61  ;;  %vm13381_vm7 = vcmp.gt.f32.partialorder %v9406_v46, 20.0 }
 0x289   : > { %v9418_v13 = vsel %vm1895_vm5, %v9132_v42, %v2311_v36  ;;  %v2313_v12 = vmul.f32 0.01, %v2241_v27  ;;  %v9434_v42 = vsel %vm1889_vm11, %v9096_v23, %v2305_v54  ;;  %vm9436_vm5 = vcmp.lt.f32.partialorder %v2041_v29, 0.0004427343 }
 0x28a   : > { %7228 = vlog2.f32 %v2053_v31  ;;  %v1949_v14 = vmul.f32 1.442695, %v1910_v49  ;;  %v9447_v9 = vmul.f32 100.0, %v9411_v39  ;;  %v1916_v43 = vsel %vm13383_vm3, 0.0, %v9392_v11 }
 0x28b   : > { %v9444_v22 = vsel %vm1897_vm14, %v9139_v34, %v2313_v12  ;;  %7230 = vpow2.f32 %v1945_v6  ;;  %v9456_v61 = vadd.f32 %v9227_v58, %v9024_v55  ;;  %v2040_v26 = vmul.f32 %v7211_v35, %v2039_v2 }
 0x28c   : > { %v1918_v34 = vsel %vm13381_vm7, 0.0, %v9406_v46  ;;  %vm1891_vm11 = vcmp.gt.f32.partialorder %v9447_v9, 20.0  ;;  %v9464_v54 = vadd.f32 %v9219_v18, %v9024_v55  ;;  %v2056_v36 = vmul.f32 -0.5, %v9413_v7 }
 0x28d   : > { %v1923_v4 = vsel %vm1891_vm11, 0.0, %v9447_v9  ;;  %v9471_v58 = vmul.f32 100.0, %v9456_v61  ;;  %v9475_v35 = vadd.f32 %v9229_v10, %v9118_v16  ;;  %v1961_v29 = vmul.f32 1.442695, %v1916_v43 }
 0x28e   : > { %13724 = vst [vmem:[#allocation32_spill] sm:$0xff] %v9464_v54  ;;  %v7223_v37 = vpop.eup %7222  ;;  %v1975_v6 = vmul.f32 1.442695, %v1923_v4  ;;  %v9479_v18 = vadd.f32 %v9242_v41, %v9024_v55  ;;  %v2059_v27 = vand.u32 2147483647, %v9413_v7  ;;  %7232 = vpow2.f32 %v1949_v14 }
 0x28f   : > { %v2037_v53 = vmul.f32 0.6931472, %v7223_v37  ;;  %vm1893_vm14 = vcmp.gt.f32.partialorder %v9471_v58, 20.0  ;;  %v9484_v2 = vmul.f32 100.0, %v9464_v54  ;;  %v9486_v49 = vpop.eup %7224  ;;  %v9494_v55 = vmul.f32 100.0, %v9475_v35 }
 0x290   : > { %13725 = vst [vmem:[#allocation34_spill] sm:$0xff] %v9479_v18  ;;  %7234 = vpow2.f32 %v1975_v6  ;;  %v1925_v12 = vsel %vm1893_vm14, 0.0, %v9471_v58  ;;  %v2057_v41 = vadd.f32 1.0, %v2056_v36  ;;  %v2107_v31 = vadd.f32 1.0, %v9486_v49 }
 0x291   : > { %13726 = vst [vmem:[#allocation36_spill] sm:$0xff] %v9484_v2  ;;  %v2043_v10 = vsel %vm9436_vm5, %v2040_v26, %v2037_v53  ;;  %v2110_v14 = vmul.f32 -0.5, %v9486_v49  ;;  %v1965_v43 = vmul.f32 1.442695, %v1918_v34  ;;  %7236 = vpow2.f32 %v1961_v29 }
 0x292   : > { %v1979_v37 = vmul.f32 1.442695, %v1925_v12  ;;  %v9499_v4 = vmul.f32 100.0, %v9479_v18  ;;  %v9501_v32 = vpop.eup %7226  ;;  %v2291_v26 = vmul.f32 0.01, %v2043_v10  ;;  %7238 = vlog2.f32 %v2107_v31 }
 0x293   : > { %vm13396_vm5 = vcmp.gt.f32.partialorder %v9484_v2, 20.0  ;;  %v9506_v53 = vadd.f32 %v9273_v33, %v9118_v16  ;;  %v2111_v6 = vadd.f32 1.0, %v2110_v14  ;;  %v2125_v23 = vadd.f32 1.0, %v9501_v32 }
 0x294   : > { %13727 = vst [vmem:[#allocation37_spill] sm:$0xff] %v9499_v4  ;;  %v7229_v36 = vpop.eup %7228  ;;  %7240 = vpow2.f32 %v1979_v37  ;;  %vm1899_vm7 = vcmp.gt.f32.partialorder %v9494_v55, 20.0  ;;  %v2058_v29 = vmul.f32 %v9413_v7, %v2057_v41  ;;  %vm9513_vm4 = vcmp.lt.f32.partialorder %v2059_v27, 0.0004427343 }
 0x295   : > { %v9510_v34 = vpop.eup %7230  ;;  %7242 = vpow2.f32 %v1965_v43  ;;  %v9519_v33 = vadd.f32 %v9244_v38, %v9118_v16  ;;  %v2055_v12 = vmul.f32 0.6931472, %v7229_v36  ;;  %v2113_v31 = vand.u32 2147483647, %v9486_v49  ;;  %v13814_v0 = vld [vmem:[#allocation32_spill] sm:$0xff] }
 0x296   : > { %7244 = vlog2.f32 %v2125_v23  ;;  %vm13391_vm3 = vcmp.gt.f32.partialorder %v9499_v4, 20.0  ;;  %v9526_v14 = vsel %vm1875_vm9, %v9217_v59, %v2291_v26  ;;  %v1924_v7 = vsel %vm13396_vm5, 0.0, %v9484_v2 }
 0x297   : > { %13730 = vst [vmem:[#allocation38_spill] sm:$0xff] %v9519_v33  ;;  %v1931_v38 = vsel %vm1899_vm7, 0.0, %v9494_v55  ;;  %v9535_v27 = vmul.f32 100.0, %v9506_v53  ;;  %v2112_v23 = vmul.f32 %v9486_v49, %v2111_v6  ;;  %v2128_v41 = vmul.f32 -0.5, %v9501_v32 }
 0x298   : > { %v2131_v43 = vand.u32 2147483647, %v9501_v32  ;;  %v1991_v24 = vmul.f32 1.442695, %v1931_v38  ;;  %v9540_v59 = vpop.eup %7232  ;;  %v1926_v37 = vsel %vm13391_vm3, 0.0, %v9499_v4  ;;  %v9547_v26 = vmul.f32 100.0, %v9519_v33 }
 0x299   : > { %vm1901_vm9 = vcmp.gt.f32.partialorder %v9535_v27, 20.0  ;;  %v2008_v36 = vadd.f32 1.0, %v9174_v52  ;;  %v2061_v49 = vsel %vm9513_vm4, %v2058_v29, %v2055_v12  ;;  %v9557_v38 = vadd.f32 %v9288_v45, %v9118_v16 }
 0x29a   : > { %13731 = vst [vmem:[#allocation23_spill] sm:$0xff] %v9547_v26  ;;  %v7235_v8 = vpop.eup %7234  ;;  %7246 = vpow2.f32 %v1991_v24  ;;  %v1933_v6 = vsel %vm1901_vm9, 0.0, %v9535_v27  ;;  %v1977_v2 = vmul.f32 1.442695, %v1924_v7  ;;  %v2129_v46 = vadd.f32 1.0, %v2128_v41 }
 0x29b   : > { %13732 = vst [vmem:[#allocation39_spill] sm:$0xff] %v9557_v38  ;;  %v2179_v4 = vadd.f32 1.0, %v7235_v8  ;;  %v2182_v18 = vmul.f32 -0.5, %v7235_v8  ;;  %v1995_v33 = vmul.f32 1.442695, %v1933_v6  ;;  %v9559_v54 = vpop.eup %7236  ;;  %vm13392_vm3 = vcmp.gt.f32.partialorder %v9547_v26, 20.0 }
 0x29c   : > { %v1981_v15 = vmul.f32 1.442695, %v1926_v37  ;;  %7248 = vlog2.f32 %v2008_v36  ;;  %v7239_v29 = vpop.eup %7238  ;;  %v2293_v10 = vmul.f32 0.01, %v2061_v49  ;;  %v1932_v12 = vsel %vm13392_vm3, 0.0, %v9547_v26 }
 0x29d   : > { %7250 = vlog2.f32 %v2179_v4  ;;  %v2011_v16 = vmul.f32 -0.5, %v9174_v52  ;;  %v2109_v7 = vmul.f32 0.6931472, %v7239_v29  ;;  %v2185_v24 = vand.u32 2147483647, %v7235_v8 }
 0x29e   : > { %v9566_v45 = vpop.eup %7240  ;;  %7252 = vpow2.f32 %v1995_v33  ;;  %v9569_v41 = vmul.f32 100.0, %v9557_v38  ;;  %vm2114_vm4 = vcmp.lt.f32.partialorder %v2113_v31, 0.0004427343  ;;  %v2183_v36 = vadd.f32 1.0, %v2182_v18 }
 0x29f   : > { %v9571_v37 = vpop.eup %7242  ;;  %v2197_v4 = vadd.f32 1.0, %v9566_v45  ;;  %7254 = vpow2.f32 %v1977_v2  ;;  %v2115_v6 = vsel %vm2114_vm4, %v2112_v23, %v2109_v7  ;;  %vm9574_vm3 = vcmp.lt.f32.partialorder %v2131_v43, 0.0004427343 }
 0x2a0   : > { %13733 = vst [vmem:[#allocation40_spill] sm:$0xff] %v9569_v41  ;;  %v7245_v49 = vpop.eup %7244  ;;  %7256 = vpow2.f32 %v1981_v15  ;;  %v1993_v29 = vmul.f32 1.442695, %v1932_v12  ;;  %v2299_v40 = vmul.f32 0.01, %v2115_v6  ;;  %v2130_v38 = vmul.f32 %v9501_v32, %v2129_v46 }
 0x2a1   : > { %v2127_v33 = vmul.f32 0.6931472, %v7245_v49  ;;  %7258 = vlog2.f32 %v2197_v4  ;;  %v9582_v18 = vsel %vm1877_vm8, %v9271_v51, %v2293_v10  ;;  %vm9584_vm5 = vcmp.lt.f32.partialorder %v2185_v24, 0.0004427343 }
 0x2a2   : > { %13736 = vst [vmem:[#allocation26_spill] sm:$0xff] %v9582_v18  ;;  %vm1902_vm4 = vcmp.gt.f32.partialorder %v9569_v41, 20.0  ;;  %v2012_v31 = vadd.f32 1.0, %v2011_v16  ;;  %v9592_v15 = vsel %vm1883_vm12, %v9341_v56, %v2299_v40  ;;  %v2184_v32 = vmul.f32 %v7235_v8, %v2183_v36 }
 0x2a3   : > { %v2133_v46 = vsel %vm9574_vm3, %v2130_v38, %v2127_v33  ;;  %v2080_v17 = vadd.f32 1.0, %v9191_v3  ;;  %v2200_v10 = vmul.f32 -0.5, %v9566_v45  ;;  %7260 = vpow2.f32 %v1993_v29 }
 0x2a4   : > { %v7247_v51 = vpop.eup %7246  ;;  %v2301_v43 = vmul.f32 0.01, %v2133_v46  ;;  %v2203_v12 = vand.u32 2147483647, %v9566_v45  ;;  %v1934_v56 = vsel %vm1902_vm4, 0.0, %v9569_v41  ;;  %v2013_v26 = vmul.f32 %v9174_v52, %v2012_v31 }
 0x2a5   : > { %v2251_v16 = vadd.f32 1.0, %v7247_v51  ;;  %7262 = vlog2.f32 %v2080_v17  ;;  %v2254_v8 = vmul.f32 -0.5, %v7247_v51  ;;  %v2026_v38 = vadd.f32 1.0, %v9196_v63 }
 0x2a6   : > { %v7249_v19 = vpop.eup %7248  ;;  %v9607_v40 = vsel %vm1885_vm1, %v9349_v21, %v2301_v43  ;;  %v2014_v36 = vand.u32 2147483647, %v9174_v52  ;;  %v2083_v4 = vmul.f32 -0.5, %v9191_v3  ;;  %v2201_v29 = vadd.f32 1.0, %v2200_v10 }
 0x2a7   : > { %13739 = vst [vmem:[#allocation27_spill] sm:$0xff] %v9607_v40  ;;  %v7251_v7 = vpop.eup %7250  ;;  %7264 = vlog2.f32 %v2251_v16  ;;  %v2010_v62 = vmul.f32 0.6931472, %v7249_v19  ;;  %vm9617_vm8 = vcmp.lt.f32.partialorder %v2203_v12, 0.0004427343  ;;  %v2255_v16 = vadd.f32 1.0, %v2254_v8 }
 0x2a8   : > { %v7253_v49 = vpop.eup %7252  ;;  %v2181_v6 = vmul.f32 0.6931472, %v7251_v7  ;;  %7266 = vlog2.f32 %v2026_v38  ;;  %v2257_v31 = vand.u32 2147483647, %v7247_v51  ;;  %v9625_v24 = vmul.f32 1.442695, %v1934_v56 }
 0x2a9   : > { %v9615_v21 = vpop.eup %7254  ;;  %v2269_v46 = vadd.f32 1.0, %v7253_v49  ;;  %v2272_v17 = vmul.f32 -0.5, %v7253_v49  ;;  %v2086_v10 = vand.u32 2147483647, %v9191_v3  ;;  %v2275_v38 = vand.u32 2147483647, %v7253_v49 }
 0x2aa   : > { %v9621_v43 = vpop.eup %7256  ;;  %v2187_v52 = vsel %vm9584_vm5, %v2184_v32, %v2181_v6  ;;  %vm9628_vm12 = vcmp.lt.f32.partialorder %v2014_v36, 0.0004427343  ;;  %v2084_v7 = vadd.f32 1.0, %v2083_v4  ;;  %v2029_v2 = vmul.f32 -0.5, %v9196_v63 }
 0x2ab   : > { %v7259_v19 = vpop.eup %7258  ;;  %7268 = vlog2.f32 %v2269_v46  ;;  %v2016_v41 = vsel %vm9628_vm12, %v2013_v26, %v2010_v62  ;;  %v2098_v32 = vadd.f32 1.0, %v9231_v44  ;;  %v2307_v56 = vmul.f32 0.01, %v2187_v52 }
 0x2ac   : > { %v2199_v23 = vmul.f32 0.6931472, %v7259_v19  ;;  %v2202_v8 = vmul.f32 %v9566_v45, %v2201_v29  ;;  %vm9637_vm1 = vcmp.lt.f32.partialorder %v2257_v31, 0.0004427343  ;;  %v2273_v36 = vadd.f32 1.0, %v2272_v17  ;;  %v13748_v31 = vld [vmem:[#allocation29_spill] sm:$0xff] }
 0x2ad   : > { %v9641_v46 = vpop.eup %7260  ;;  %v2256_v18 = vmul.f32 %v7247_v51, %v2255_v16  ;;  %vm9643_vm3 = vcmp.lt.f32.partialorder %v2086_v10, 0.0004427343  ;;  %v2032_v26 = vand.u32 2147483647, %v9196_v63  ;;  %7270 = vlog2.f32 %v2098_v32 }
 0x2ae   : > { %v2205_v52 = vsel %vm9617_vm8, %v2202_v8, %v2199_v23  ;;  %v2288_v45 = vmul.f32 0.01, %v2016_v41  ;;  %v2101_v29 = vmul.f32 -0.5, %v9231_v44  ;;  %v2152_v19 = vadd.f32 1.0, %v13748_v31 }
 0x2af   : > { %v7263_v62 = vpop.eup %7262  ;;  %vm9652_vm5 = vcmp.lt.f32.partialorder %v2275_v38, 0.0004427343  ;;  %v2085_v16 = vmul.f32 %v9191_v3, %v2084_v7  ;;  %v2030_v10 = vadd.f32 1.0, %v2029_v2  ;;  %v9660_v32 = vsel %vm1891_vm11, %v9411_v39, %v2307_v56  ;;  %v13753_v7 = vld [vmem:[#allocation25_spill] sm:$0xff] }
 0x2b0   : > { %v2082_v51 = vmul.f32 0.6931472, %v7263_v62  ;;  %v2274_v23 = vmul.f32 %v7253_v49, %v2273_v36  ;;  %7272 = vlog2.f32 %v2152_v19  ;;  %v2155_v41 = vmul.f32 -0.5, %v13748_v31 }
 0x2b1   : > { %v7265_v12 = vpop.eup %7264  ;;  %v2309_v8 = vmul.f32 0.01, %v2205_v52  ;;  %vm9665_vm8 = vcmp.lt.f32.partialorder %v2032_v26, 0.0004427343  ;;  %v2320_v39 = vsel %vm1872_vm13, %v13753_v7, %v2288_v45  ;;  %v2102_v49 = vadd.f32 1.0, %v2101_v29  ;;  %v13759_v7 = vld [vmem:[#allocation30_spill] sm:$0xff] }
 0x2b2   : > { %v7267_v33 = vpop.eup %7266  ;;  %v2253_v38 = vmul.f32 0.6931472, %v7265_v12  ;;  %v2088_v40 = vsel %vm9643_vm3, %v2085_v16, %v2082_v51  ;;  %v2031_v36 = vmul.f32 %v9196_v63, %v2030_v10  ;;  %v2104_v52 = vand.u32 2147483647, %v9231_v44  ;;  %v13755_v51 = vld [vmem:[#allocation24_spill] sm:$0xff] }
 0x2b3   : > { %v2296_v3 = vmul.f32 0.01, %v2088_v40  ;;  %v2028_v9 = vmul.f32 0.6931472, %v7267_v33  ;;  %v2224_v4 = vadd.f32 1.0, %v9394_v47  ;;  %v2156_v12 = vadd.f32 1.0, %v2155_v41 }
 0x2b4   : > { %v2259_v56 = vsel %vm9637_vm1, %v2256_v18, %v2253_v38  ;;  %v2158_v45 = vand.u32 2147483647, %v13748_v31  ;;  %v9686_v63 = vsel %vm1893_vm14, %v9456_v61, %v2309_v8  ;;  %v2227_v10 = vmul.f32 -0.5, %v9394_v47 }
 0x2b5   : > { %v7269_v26 = vpop.eup %7268  ;;  %v2315_v19 = vmul.f32 0.01, %v2259_v56  ;;  %v2328_v40 = vsel %vm1880_vm2, %v13755_v51, %v2296_v3  ;;  %v2034_v18 = vsel %vm9665_vm8, %v2031_v36, %v2028_v9  ;;  %7274 = vlog2.f32 %v2224_v4  ;;  %v13778_v51 = vld [vmem:[#allocation28_spill] sm:$0xff] }
 0x2b6   : > { %v2271_v33 = vmul.f32 0.6931472, %v7269_v26  ;;  %v6822_v29 = vpack.c.bf16 %v2328_v40, %v2320_v39  ;;  %v2170_v41 = vadd.f32 1.0, %v9360_v30  ;;  %v2103_v61 = vmul.f32 %v9231_v44, %v2102_v49  ;;  %v13765_v40 = vld [vmem:[#allocation14_spill] sm:$0xff] }
 0x2b7   : > { %v9691_v6 = vsel %vm1899_vm7, %v9475_v35, %v2315_v19  ;;  %v7271_v38 = vpop.eup %7270  ;;  %vm9700_vm13 = vcmp.lt.f32.partialorder %v2104_v52, 0.0004427343  ;;  %v2290_v8 = vmul.f32 0.01, %v2034_v18  ;;  %v13760_v2 = vpack.c.bf16 %v9280_v60, %v13759_v7  ;;  %v13763_v19 = vld [vmem:[#allocation15_spill] sm:$0xff] }
 0x2b8   : > { %v6844_v62 = vpack.c.bf16 %v9691_v6, %v9660_v32  ;;  %v2277_v3 = vsel %vm9652_vm5, %v2274_v23, %v2271_v33  ;;  %6823 = vmatprep.subr.bf16.mxu0 %v6822_v29  ;;  %v2100_v55 = vmul.f32 0.6931472, %v7271_v38  ;;  %7276 = vlog2.f32 %v2170_v41  ;;  %v9940_v32 = vpop.permute.xlu0 %2361 }
 0x2b9   : > { %v2317_v35 = vmul.f32 0.01, %v2277_v3  ;;  %6825 = vmatpush1.bf16.msra.mxu0 %v13760_v2  ;;  %v2157_v39 = vmul.f32 %v13748_v31, %v2156_v12  ;;  %vm9708_vm2 = vcmp.lt.f32.partialorder %v2158_v45, 0.0004427343  ;;  %v2230_v44 = vand.u32 2147483647, %v9394_v47 }
 0x2ba   : > { %v2242_v23 = vadd.f32 1.0, %v9425_v1  ;;  %v7273_v9 = vpop.eup %7272  ;;  %v2106_v60 = vsel %vm9700_vm13, %v2103_v61, %v2100_v55  ;;  %v2228_v56 = vadd.f32 1.0, %v2227_v10  ;;  %v2044_v31 = vadd.f32 1.0, %v9510_v34  ;;  %v13766_v12 = vld [vmem:[#allocation16_spill] sm:$0xff] }
 0x2bb   : > { %v9717_v49 = vsel %vm1901_vm9, %v9506_v53, %v2317_v35  ;;  %v2298_v52 = vmul.f32 0.01, %v2106_v60  ;;  %v2154_v4 = vmul.f32 0.6931472, %v7273_v9  ;;  %v2173_v26 = vmul.f32 -0.5, %v9360_v30 }
 0x2bc   : > { %v6852_v36 = vpack.c.bf16 %v9717_v49, %v9686_v63  ;;  %v2322_v16 = vsel %vm1874_vm10, %v13763_v19, %v2290_v8  ;;  %v2176_v53 = vand.u32 2147483647, %v9360_v30  ;;  %7278 = vlog2.f32 %v2242_v23 }
 0x2bd   : > { %v2245_v27 = vmul.f32 -0.5, %v9425_v1  ;;  %vm13767_vm7 = vcmp.gt.f32.partialorder %v13766_v12, 20.0  ;;  %v2160_v33 = vsel %vm9708_vm2, %v2157_v39, %v2154_v4  ;;  %v2248_v29 = vand.u32 2147483647, %v9425_v1 }
 0x2be   : > { %v2330_v45 = vsel %vm13767_vm7, %v13765_v40, %v2298_v52  ;;  %7280 = vlog2.f32 %v2044_v31  ;;  %v2229_v41 = vmul.f32 %v9394_v47, %v2228_v56  ;;  %vm9738_vm10 = vcmp.lt.f32.partialorder %v2230_v44, 0.0004427343  ;;  %v13775_v56 = vld [vmem:[#allocation12_spill] sm:$0xff]  ;;  %v13776_v31 = vld [vmem:[#allocation18_spill] sm:$0xff] }
 0x2bf   : > { %7282 = vpow2.f32 %v9625_v24  ;;  %v6830_v18 = vpack.c.bf16 %v2330_v45, %v2322_v16  ;;  %v7275_v10 = vpop.eup %7274  ;;  %v2174_v3 = vadd.f32 1.0, %v2173_v26  ;;  %v2116_v61 = vadd.f32 1.0, %v9559_v54 }
 0x2c0   : > { %v2226_v58 = vmul.f32 0.6931472, %v7275_v10  ;;  %v2304_v35 = vmul.f32 0.01, %v2160_v33  ;;  %v2047_v55 = vmul.f32 -0.5, %v9510_v34  ;;  %v2062_v8 = vadd.f32 1.0, %v9540_v59 }
 0x2c1   : > { %6831 = vmatprep.subr.bf16.mxu1 %v6830_v18  ;;  %v13770_v24 = vpack.c.bf16 %v9323_v57, %v9318_v50  ;;  %vm9748_vm11 = vcmp.lt.f32.partialorder %v2176_v53, 0.0004427343  ;;  %v2246_v7 = vadd.f32 1.0, %v2245_v27  ;;  %vm9752_vm14 = vcmp.lt.f32.partialorder %v2248_v29, 0.0004427343 }
 0x2c2   : > { %7284 = vlog2.f32 %v2116_v61  ;;  %v7277_v39 = vpop.eup %7276  ;;  %v2232_v17 = vsel %vm9738_vm10, %v2229_v41, %v2226_v58  ;;  %v2050_v44 = vand.u32 2147483647, %v9510_v34  ;;  %v2119_v23 = vmul.f32 -0.5, %v9559_v54 }
 0x2c3   : > { %6833 = vmatpush1.bf16.msra.mxu1 %v13770_v24  ;;  %7286 = vlog2.f32 %v2062_v8  ;;  %v2312_v50 = vmul.f32 0.01, %v2232_v17  ;;  %v2172_v57 = vmul.f32 0.6931472, %v7277_v39  ;;  %v2175_v9 = vmul.f32 %v9360_v30, %v2174_v3  ;;  %v9795_v24 = vld [vmem:[%s13297_s5] sm:$0xff] }
 0x2c4   : > { %v2134_v60 = vadd.f32 1.0, %v9571_v37  ;;  %vm13777_vm9 = vcmp.gt.f32.partialorder %v13776_v31, 20.0  ;;  %v2048_v4 = vadd.f32 1.0, %v2047_v55  ;;  %v2122_v26 = vand.u32 2147483647, %v9559_v54 }
 0x2c5   : > { %v2336_v52 = vsel %vm13777_vm9, %v13775_v56, %v2304_v35  ;;  %v2065_v19 = vmul.f32 -0.5, %v9540_v59  ;;  %v2344_v53 = vsel %vm1896_vm15, %v13778_v51, %v2312_v50  ;;  %v2178_v27 = vsel %vm9748_vm11, %v2175_v9, %v2172_v57  ;;  %v13788_v56 = vld [vmem:[#allocation20_spill] sm:$0xff]  ;;  %v9816_v51 = vld [vmem:[%s13297_s5 + $0x8] sm:$0xff] }
 0x2c6   : > { %7288 = vlog2.f32 %v2134_v60  ;;  %v2188_v30 = vadd.f32 1.0, %v9615_v21  ;;  %v7279_v40 = vpop.eup %7278  ;;  %v6826_v12 = vpack.c.bf16 %v2344_v53, %v2336_v52  ;;  %v2247_v45 = vmul.f32 %v9425_v1, %v2246_v7 }
 0x2c7   : > { %v2120_v33 = vadd.f32 1.0, %v2119_v23  ;;  %v2137_v29 = vmul.f32 -0.5, %v9571_v37  ;;  %v2244_v10 = vmul.f32 0.6931472, %v7279_v40  ;;  %v2306_v41 = vmul.f32 0.01, %v2178_v27 }
 0x2c8   : > { %v7281_v18 = vpop.eup %7280  ;;  %7290 = vlog2.f32 %v2188_v30  ;;  %v2191_v38 = vmul.f32 -0.5, %v9615_v21  ;;  %6827 = vmatprep.subr.bf16.mxu0 %v6826_v12  ;;  %v2049_v58 = vmul.f32 %v9510_v34, %v2048_v4  ;;  %vm9779_vm15 = vcmp.lt.f32.partialorder %v2050_v44, 0.0004427343  ;;  %v13786_v23 = vld [vmem:[#allocation21_spill] sm:$0xff] }
 0x2c9   : > { %v9776_v3 = vpop.eup %7282  ;;  %v2046_v61 = vmul.f32 0.6931472, %v7281_v18  ;;  %vm9783_vm12 = vcmp.lt.f32.partialorder %v2122_v26, 0.0004427343  ;;  %v2250_v55 = vsel %vm9752_vm14, %v2247_v45, %v2244_v10  ;;  %v13784_v8 = vpack.c.bf16 %v9418_v13, %v9365_v25  ;;  %v13785_v13 = vld [vmem:[#allocation19_spill] sm:$0xff] }
 0x2ca   : > { %v2066_v34 = vadd.f32 1.0, %v2065_v19  ;;  %v2068_v47 = vand.u32 2147483647, %v9540_v59  ;;  %v2260_v7 = vadd.f32 1.0, %v9641_v46  ;;  %v2314_v39 = vmul.f32 0.01, %v2250_v55 }
 0x2cb   : > { %6829 = vmatpush1.bf16.msra.mxu0 %v13784_v8  ;;  %v2052_v17 = vsel %vm9779_vm15, %v2049_v58, %v2046_v61  ;;  %v2121_v2 = vmul.f32 %v9559_v54, %v2120_v33  ;;  %v2140_v44 = vand.u32 2147483647, %v9571_v37  ;;  %vm13787_vm1 = vcmp.gt.f32.partialorder %v13786_v23, 20.0 }
 0x2cc   : > { %v7285_v25 = vpop.eup %7284  ;;  %v2338_v50 = vsel %vm13787_vm1, %v13785_v13, %v2306_v41  ;;  %v2138_v57 = vadd.f32 1.0, %v2137_v29  ;;  %v2192_v9 = vadd.f32 1.0, %v2191_v38  ;;  %7292 = vlog2.f32 %v2260_v7  ;;  %v13801_v7 = vld [vmem:[#allocation33_spill] sm:$0xff] }
 0x2cd   : > { %v7287_v60 = vpop.eup %7286  ;;  %v2346_v31 = vsel %vm1898_vm6, %v13788_v56, %v2314_v39  ;;  %vm13789_vm3 = vcmask 261120   ;;  %v2118_v52 = vmul.f32 0.6931472, %v7285_v25  ;;  %v2292_v54 = vmul.f32 0.01, %v2052_v17  ;;  %v13803_v17 = vld [vmem:[#allocation35_spill] sm:$0xff] }
 0x2ce   : > { %6704 = vmatmul.mubr.msk.f32.vlgmr.msra.gmra.mrb[32].mxu0 %vm13789_vm3, %v9795_v24  ;;  %v2206_v4 = vadd.f32 1.0, %v9621_v43  ;;  %v6834_v26 = vpack.c.bf16 %v2346_v31, %v2338_v50  ;;  %v13790_v19 = vmov 0.0   ;;  %v2064_v16 = vmul.f32 0.6931472, %v7287_v60  ;;  %vm13796_vm8 = vmmov %vm13789_vm3  ;;  %v13810_v31 = vld [vmem:[#allocation26_spill] sm:$0xff] }
 0x2cf   : > { %2461 = vmatprep.mubr.f32.mxu0 %v13790_v19  ;;  %v2067_v53 = vmul.f32 %v9540_v59, %v2066_v34  ;;  %vm9819_vm5 = vcmp.lt.f32.partialorder %v2068_v47, 0.0004427343  ;;  %v2124_v27 = vsel %vm9783_vm12, %v2121_v2, %v2118_v52  ;;  %vm9825_vm6 = vcmp.lt.f32.partialorder %v2140_v44, 0.0004427343  ;;  %v13804_v2 = vld [vmem:[#allocation31_spill] sm:$0xff] }
 0x2d0   : > { %v2263_v40 = vmul.f32 -0.5, %v9641_v46  ;;  %7294 = vlog2.f32 %v2206_v4  ;;  %v7289_v12 = vpop.eup %7288  ;;  %6835 = vmatprep.subr.bf16.mxu1 %v6834_v26  ;;  %v2300_v45 = vmul.f32 0.01, %v2124_v27  ;;  %v2194_v33 = vand.u32 2147483647, %v9615_v21  ;;  %v13815_v27 = vld [vmem:[#allocation36_spill] sm:$0xff] }
 0x2d1   : > { %v2070_v59 = vsel %vm9819_vm5, %v2067_v53, %v2064_v16  ;;  %v2278_v29 = vadd.f32 1.0, %v9776_v3  ;;  %v13795_v18 = vpack.c.bf16 %v9444_v22, %v9434_v42  ;;  %v2324_v10 = vsel %vm1876_vm0, %v9332_v28, %v2292_v54  ;;  %vm13798_vm0 = vmmov %vm13789_vm3 }
 0x2d2   : > { %6705 = vmatmul.mubr.msk.f32.gmra.mrb[34].mxu0 %vm13796_vm8, %v9816_v51  ;;  %v2136_v41 = vmul.f32 0.6931472, %v7289_v12  ;;  %v2139_v38 = vmul.f32 %v9571_v37, %v2138_v57  ;;  %v2193_v61 = vmul.f32 %v9615_v21, %v2192_v9  ;;  %v7291_v58 = vpop.eup %7290  ;;  %vm13797_vm13 = vcmp.gt.f32.partialorder %v9392_v11, 20.0  ;;  %vm13807_vm11 = vmmov %vm13798_vm0  ;;  %v13818_v12 = vld [vmem:[#allocation23_spill] sm:$0xff] }
 0x2d3   : > { %6837 = vmatpush1.bf16.msra.mxu1 %v13795_v18  ;;  %v2332_v35 = vsel %vm13797_vm13, %v9358_v20, %v2300_v45  ;;  %v2294_v1 = vmul.f32 0.01, %v2070_v59  ;;  %2467 = vmatprep.mubr.f32.mxu0 %v13790_v19  ;;  %v2209_v42 = vmul.f32 -0.5, %v9621_v43  ;;  %7296 = vlog2.f32 %v2278_v29  ;;  %vm13808_vm14 = vmmov %vm13798_vm0 }
 0x2d4   : > { %v6838_v22 = vpack.c.bf16 %v2332_v35, %v2324_v10  ;;  %v2142_v28 = vsel %vm9825_vm6, %v2139_v38, %v2136_v41  ;;  %v2190_v37 = vmul.f32 0.6931472, %v7291_v58  ;;  %v2264_v21 = vadd.f32 1.0, %v2263_v40  ;;  %vm13812_vm15 = vmmov %vm13798_vm0  ;;  %v13817_v40 = vld [vmem:[#allocation38_spill] sm:$0xff]  ;;  %v13824_v35 = vld [vmem:[#allocation39_spill] sm:$0xff] }
 0x2d5   : > { %v2302_v20 = vmul.f32 0.01, %v2142_v28  ;;  %vm9858_vm2 = vcmp.lt.f32.partialorder %v2194_v33, 0.0004427343  ;;  %v2266_v55 = vand.u32 2147483647, %v9641_v46  ;;  %v13806_v25 = vpack.c.bf16 %v9592_v15, %v9526_v14  ;;  %vm13813_vm1 = vmmov %vm13798_vm0 }
 0x2d6   : > { %6708 = vmatmul.mubr.msk.f32.vlgmr.msra.gmra.mrb[32].mxu1 %vm13798_vm0, %v9795_v24  ;;  %6839 = vmatprep.subr.bf16.mxu0 %v6838_v22  ;;  %v2196_v8 = vsel %vm9858_vm2, %v2193_v61, %v2190_v37  ;;  %v2281_v34 = vmul.f32 -0.5, %v9776_v3  ;;  %v7293_v47 = vpop.eup %7292  ;;  %vm13802_vm7 = vcmp.gt.f32.partialorder %v13801_v7, 20.0  ;;  %vm13805_vm10 = vcmp.gt.f32.partialorder %v13804_v2, 20.0  ;;  %vm13820_vm8 = vmmov %vm13798_vm0  ;;  %v13821_v38 = vld [vmem:[#allocation34_spill] sm:$0xff]  ;;  %v13822_v61 = vld [vmem:[#allocation37_spill] sm:$0xff] }
 0x2d7   : > { %2550 = vmatprep.mubr.f32.mxu1 %v13790_v19  ;;  %v2326_v39 = vsel %vm13802_vm7, %v9337_v48, %v2294_v1  ;;  %v2334_v44 = vsel %vm13805_vm10, %v13803_v17, %v2302_v20  ;;  %6841 = vmatpush1.bf16.msra.mxu0 %v13806_v25  ;;  %v2210_v13 = vadd.f32 1.0, %v2209_v42  ;;  %v2262_v50 = vmul.f32 0.6931472, %v7293_v47  ;;  %v2354_v48 = vld [vmem:[%s13297_s5 + $0x18] sm:$0xff]  ;;  %vm13826_vm2 = vmmov %vm13798_vm0  ;;  %v9983_v17 = vpop.permute.xlu0 %2371 }
 0x2d8   : > { %v6846_v23 = vpack.c.bf16 %v2334_v44, %v2326_v39  ;;  %6706 = vmatmul.mubr.msk.f32.gmra.mrb[36].mxu0 %vm13807_vm11, %v9854_v5  ;;  %v2265_v57 = vmul.f32 %v9641_v46, %v2264_v21  ;;  %v2212_v9 = vand.u32 2147483647, %v9621_v43  ;;  %vm2267_vm9 = vcmp.lt.f32.partialorder %v2266_v55, 0.0004427343  ;;  %v13809_v46 = vld [vmem:[#allocation27_spill] sm:$0xff]  ;;  %vm13827_vm7 = vmmov %vm13798_vm0 }
 0x2d9   : > { %2473 = vmatprep.mubr.f32.mxu0 %v13790_v19  ;;  %v2308_v14 = vmul.f32 0.01, %v2196_v8  ;;  %v2282_v56 = vadd.f32 1.0, %v2281_v34  ;;  %v13811_v52 = vpack.c.bf16 %v13809_v46, %v13810_v31  ;;  %v2211_v26 = vmul.f32 %v9621_v43, %v2210_v13  ;;  %vm13829_vm10 = vmmov %vm13798_vm0 }
 0x2da   : > { %6709 = vmatmul.mubr.msk.f32.gmra.mrb[34].mxu1 %vm13808_vm14, %v9816_v51  ;;  %v7295_v15 = vpop.eup %7294  ;;  %6847 = vmatprep.subr.bf16.mxu1 %v6846_v23  ;;  %v2268_v60 = vsel %vm2267_vm9, %v2265_v57, %v2262_v50  ;;  %v2284_v16 = vand.u32 2147483647, %v9776_v3  ;;  %vm2213_vm12 = vcmp.lt.f32.partialorder %v2212_v9, 0.0004427343  ;;  %vm13816_vm3 = vcmp.gt.f32.partialorder %v13815_v27, 20.0  ;;  %vm13830_vm11 = vmmov %vm13798_vm0 }
 0x2db   : > { %2556 = vmatprep.mubr.f32.mxu1 %v13790_v19  ;;  %6849 = vmatpush1.bf16.msra.mxu1 %v13811_v52  ;;  %v2316_v54 = vmul.f32 0.01, %v2268_v60  ;;  %v2208_v4 = vmul.f32 0.6931472, %v7295_v15  ;;  %v2340_v30 = vsel %vm13816_vm3, %v13814_v0, %v2308_v14  ;;  %vm13819_vm5 = vcmp.gt.f32.partialorder %v13818_v12, 20.0  ;;  %vm13831_vm14 = vmmov %vm13798_vm0 }
 0x2dc   : > { %6707 = vmatmul.mubr.msk.f32.gmra.mrb[38].mxu0 %vm13812_vm15, %v2354_v48  ;;  %v2283_v29 = vmul.f32 %v9776_v3, %v2282_v56  ;;  %vm2285_vm6 = vcmp.lt.f32.partialorder %v2284_v16, 0.0004427343  ;;  %vm13823_vm13 = vcmp.gt.f32.partialorder %v13822_v61, 20.0  ;;  %vm13832_vm9 = vmmov %vm13798_vm0 }
 0x2dd   : > { %v7297_v53 = vpop.eup %7296  ;;  %v2348_v45 = vsel %vm13819_vm5, %v13817_v40, %v2316_v54  ;;  %v2214_v59 = vsel %vm2213_vm12, %v2211_v26, %v2208_v4  ;;  %2633 = vmatprep.mubr.f32.mxu0 %v13790_v19 }
 0x2de   : > { %6710 = vmatmul.mubr.msk.f32.gmra.mrb[36].mxu1 %vm13813_vm1, %v9854_v5  ;;  %v6842_v43 = vpack.c.bf16 %v2348_v45, %v2340_v30  ;;  %v2280_v33 = vmul.f32 0.6931472, %v7297_v53  ;;  %v2310_v18 = vmul.f32 0.01, %v2214_v59 }
 0x2df   : > { %2562 = vmatprep.mubr.f32.mxu1 %v13790_v19 }
 0x2e0   : > { %6843 = vmatprep.subr.bf16.mxu0 %v6842_v43  ;;  %v2286_v10 = vsel %vm2285_vm6, %v2283_v29, %v2280_v33  ;;  %v2342_v58 = vsel %vm13823_vm13, %v13821_v38, %v2310_v18 }
 0x2e1   : > { %v2318_v41 = vmul.f32 0.01, %v2286_v10  ;;  %6845 = vmatpush1.bf16.msra.mxu0 %v6844_v62 }
 0x2e2   : > { %6711 = vmatmul.mubr.msk.f32.gmra.mrb[38].mxu1 %vm13820_vm8, %v2354_v48 }
 0x2e3   : > { %2722 = vmatprep.mubr.f32.mxu1 %v13790_v19  ;;  %v2350_v3 = vsel %vm1902_vm4, %v13824_v35, %v2318_v41  ;;  %vm13828_vm4 = vmmov %vm13798_vm0 }
 0x2e4   : > { %v6850_v42 = vpack.c.bf16 %v2350_v3, %v2342_v58  ;;  %6712 = vmatmul.mubr.msk.f32.vlgmr.msra.gmra.mrb[40].mxu0 %vm13798_vm0, %v9795_v24 }
 0x2e5   : > { %2639 = vmatprep.mubr.f32.mxu0 %v13790_v19 }
 0x2e6   : > { %6851 = vmatprep.subr.bf16.mxu1 %v6850_v42 }
 0x2e7   : > { %6853 = vmatpush1.bf16.msra.mxu1 %v6852_v36 }
 0x2e8   : > { %6713 = vmatmul.mubr.msk.f32.gmra.mrb[42].mxu0 %vm13826_vm2, %v9816_v51 }
 0x2e9   : > { %2645 = vmatprep.mubr.f32.mxu0 %v13790_v19 }
 0x2ea   : > { %6716 = vmatmul.mubr.msk.f32.vlgmr.msra.gmra.mrb[40].mxu1 %vm13827_vm7, %v9795_v24  ;;  %v9951_v24 = vpop.permute.xlu1 %2366 }
 0x2eb   : > { %2728 = vmatprep.mubr.f32.mxu1 %v13790_v19 }
 0x2ec   : > { %6714 = vmatmul.mubr.msk.f32.gmra.mrb[44].mxu0 %vm13828_vm4, %v9854_v5 }
 0x2ed   : > { %2651 = vmatprep.mubr.f32.mxu0 %v13790_v19 }
 0x2ee   : > { %6717 = vmatmul.mubr.msk.f32.gmra.mrb[42].mxu1 %vm13829_vm10, %v9816_v51  ;;  %v10044_v18 = vpop.permute.xlu1 %2376 }
 0x2ef   : > { %2734 = vmatprep.mubr.f32.mxu1 %v13790_v19 }
 0x2f0   : > { %6715 = vmatmul.mubr.msk.f32.gmra.mrb[46].mxu0 %vm13830_vm11, %v2354_v48 }
 0x2f1   : > { %3353 = vmatprep.mubr.f32.mxu0 %v13790_v19 }
 0x2f2   : > { %6718 = vmatmul.mubr.msk.f32.gmra.mrb[44].mxu1 %vm13831_vm14, %v9854_v5 }
 0x2f3   : > { %2740 = vmatprep.mubr.f32.mxu1 %v13790_v19 }
 0x2f6   : > { %6719 = vmatmul.mubr.msk.f32.gmra.mrb[46].mxu1 %vm13832_vm9, %v2354_v48 }
 0x2f7   : > { %3436 = vmatprep.mubr.f32.mxu1 %v13790_v19 }
 0x3a1   : > { %v2457_v63 = vpop.f32.mrb[32].mxu0 }
 0x3a2   : > { %v9943_v6 = vadd.f32 %v2457_v63, %v9940_v32  ;;  %v2459_v62 = vpop.f32.mrb[33].mxu0 }
 0x3a3   : > { %v9946_v49 = vadd.f32 %v2459_v62, %v9940_v32 }
 0x3a4   : > { %v9949_v36 = vmul.f32 100.0, %v9943_v6 }
 0x3a5   : > { %v9954_v51 = vmul.f32 100.0, %v9946_v49  ;;  %v2463_v22 = vpop.f32.mrb[34].mxu0 }
 0x3a6   : > { %vm2779_vm15 = vcmp.gt.f32.partialorder %v9949_v36, 20.0  ;;  %v9958_v28 = vadd.f32 %v2463_v22, %v9951_v24  ;;  %v2465_v5 = vpop.f32.mrb[35].mxu0 }
 0x3a7   : > { %13833 = vst [vmem:[#allocation29_spill] sm:$0xff] %v9954_v51  ;;  %v2811_v37 = vsel %vm2779_vm15, 0.0, %v9949_v36  ;;  %vm2780_vm12 = vcmp.gt.f32.partialorder %v9954_v51, 20.0  ;;  %v9965_v21 = vadd.f32 %v2465_v5, %v9951_v24 }
 0x3a8   : > { %v2843_v20 = vmul.f32 1.442695, %v2811_v37  ;;  %v9968_v55 = vmul.f32 100.0, %v9958_v28  ;;  %v2812_v34 = vsel %vm2780_vm12, 0.0, %v9954_v51 }
 0x3a9   : > { %13834 = vst [vmem:[#allocation25_spill] sm:$0xff] %v9965_v21  ;;  %v2546_v11 = vpop.f32.mrb[32].mxu1  ;;  %v9977_v7 = vmul.f32 100.0, %v9965_v21  ;;  %v2845_v13 = vmul.f32 1.442695, %v2812_v34 }
 0x3aa   : > { %v9971_v8 = vadd.f32 %v2546_v11, %v9940_v32  ;;  %v2548_v47 = vpop.f32.mrb[33].mxu1  ;;  %7298 = vpow2.f32 %v2843_v20  ;;  %vm2787_vm1 = vcmp.gt.f32.partialorder %v9968_v55, 20.0 }
 0x3ab   : > { %13835 = vst [vmem:[#allocation11_spill] sm:$0xff] %v9977_v7  ;;  %v9980_v39 = vadd.f32 %v2548_v47, %v9940_v32  ;;  %v2819_v44 = vsel %vm2787_vm1, 0.0, %v9968_v55  ;;  %vm2788_vm3 = vcmp.gt.f32.partialorder %v9977_v7, 20.0  ;;  %v2469_v25 = vpop.f32.mrb[36].mxu0 }
 0x3ac   : > { %v9986_v2 = vmul.f32 100.0, %v9971_v8  ;;  %v2859_v23 = vmul.f32 1.442695, %v2819_v44  ;;  %v9993_v57 = vadd.f32 %v2469_v25, %v9983_v17  ;;  %v2471_v9 = vpop.f32.mrb[37].mxu0  ;;  %v2820_v15 = vsel %vm2788_vm3, 0.0, %v9977_v7 }
 0x3ad   : > { %13836 = vst [vmem:[#allocation24_spill] sm:$0xff] %v9980_v39  ;;  %v2552_v50 = vpop.f32.mrb[34].mxu1  ;;  %v9997_v48 = vmul.f32 100.0, %v9980_v39  ;;  %v10012_v31 = vadd.f32 %v2471_v9, %v9983_v17  ;;  %v2861_v26 = vmul.f32 1.442695, %v2820_v15 }
 0x3ae   : > { %vm2781_vm5 = vcmp.gt.f32.partialorder %v9986_v2, 20.0  ;;  %v10000_v14 = vadd.f32 %v2552_v50, %v9951_v24  ;;  %v2554_v60 = vpop.f32.mrb[35].mxu1  ;;  %7300 = vpow2.f32 %v2859_v23  ;;  %v10021_v53 = vmul.f32 100.0, %v9993_v57 }
 0x3af   : > { %13837 = vst [vmem:[#allocation13_spill] sm:$0xff] %v9997_v48  ;;  %v2813_v56 = vsel %vm2781_vm5, 0.0, %v9986_v2  ;;  %v10009_v46 = vadd.f32 %v2554_v60, %v9951_v24  ;;  %13839 = vst [vmem:[#allocation15_spill] sm:$0xff] %v10012_v31  ;;  %v2475_v4 = vpop.f32.mrb[38].mxu0  ;;  %7302 = vpow2.f32 %v2845_v13  ;;  %vm13416_vm8 = vcmp.gt.f32.partialorder %v9997_v48, 20.0 }
 0x3b0   : > { %v2847_v52 = vmul.f32 1.442695, %v2813_v56  ;;  %v10015_v54 = vmul.f32 100.0, %v10000_v14  ;;  %v10027_v40 = vpop.f32.mrb[39].mxu0  ;;  %vm2795_vm13 = vcmp.gt.f32.partialorder %v10021_v53, 20.0  ;;  %v10035_v45 = vmul.f32 100.0, %v10012_v31 }
 0x3b1   : > { %13838 = vst [vmem:[#allocation30_spill] sm:$0xff] %v10009_v46  ;;  %v10018_v16 = vmul.f32 100.0, %v10009_v46  ;;  %v2558_v0 = vpop.f32.mrb[36].mxu1  ;;  %v2827_v43 = vsel %vm2795_vm13, 0.0, %v10021_v53  ;;  %v2814_v58 = vsel %vm13416_vm8, 0.0, %v9997_v48  ;;  %v10053_v35 = vadd.f32 %v2475_v4, %v10044_v18 }
 0x3b2   : > { %7304 = vpow2.f32 %v2847_v52  ;;  %vm2789_vm6 = vcmp.gt.f32.partialorder %v10015_v54, 20.0  ;;  %v10025_v27 = vadd.f32 %v2558_v0, %v9983_v17  ;;  %v2560_v30 = vpop.f32.mrb[37].mxu1  ;;  %13841 = vst [vmem:[#allocation14_spill] sm:$0xff] %v10035_v45  ;;  %v2875_v10 = vmul.f32 1.442695, %v2827_v43 }
 0x3b3   : > { %13840 = vst [vmem:[#allocation17_spill] sm:$0xff] %v10018_v16  ;;  %v2821_v12 = vsel %vm2789_vm6, 0.0, %v10015_v54  ;;  %vm13415_vm0 = vcmp.gt.f32.partialorder %v10018_v16, 20.0  ;;  %7306 = vpow2.f32 %v2861_v26  ;;  %v10047_v41 = vadd.f32 %v2560_v30, %v9983_v17 }
 0x3b4   : > { %v2863_v59 = vmul.f32 1.442695, %v2821_v12  ;;  %v10042_v33 = vmul.f32 100.0, %v10025_v27  ;;  %v7299_v29 = vpop.eup %7298  ;;  %v2822_v3 = vsel %vm13415_vm0, 0.0, %v10018_v16  ;;  %vm13414_vm7 = vcmp.gt.f32.partialorder %v10035_v45, 20.0 }
 0x3b5   : > { %13842 = vst [vmem:[#allocation16_spill] sm:$0xff] %v10047_v41  ;;  %v2564_v38 = vpop.f32.mrb[38].mxu1  ;;  %v2907_v61 = vadd.f32 1.0, %v7299_v29  ;;  %v10061_v42 = vmul.f32 100.0, %v10047_v41  ;;  %v2910_v63 = vmul.f32 -0.5, %v7299_v29  ;;  %v2828_v25 = vsel %vm13414_vm7, 0.0, %v10035_v45 }
 0x3b6   : > { %7308 = vpow2.f32 %v2863_v59  ;;  %v2566_v1 = vpop.f32.mrb[39].mxu1  ;;  %vm2797_vm2 = vcmp.gt.f32.partialorder %v10042_v33, 20.0  ;;  %v2913_v62 = vand.u32 2147483647, %v7299_v29  ;;  %v2849_v20 = vmul.f32 1.442695, %v2814_v58 }
 0x3b7   : > { %13843 = vst [vmem:[#allocation12_spill] sm:$0xff] %v10061_v42  ;;  %7310 = vlog2.f32 %v2907_v61  ;;  %v2829_v22 = vsel %vm2797_vm2, 0.0, %v10042_v33  ;;  %v10066_v5 = vpop.f32.mrb[40].mxu0  ;;  %v2865_v44 = vmul.f32 1.442695, %v2822_v3  ;;  %vm13408_vm4 = vcmp.gt.f32.partialorder %v10061_v42, 20.0 }
 0x3b8   : > { %v10068_v37 = vpop.eup %7300  ;;  %7312 = vpow2.f32 %v2875_v10  ;;  %v2879_v11 = vmul.f32 1.442695, %v2829_v22  ;;  %v10070_v34 = vpop.f32.mrb[41].mxu0  ;;  %v10081_v50 = vmul.f32 100.0, %v10053_v35  ;;  %v10084_v9 = vadd.f32 %v2564_v38, %v10044_v18 }
 0x3b9   : > { %v2979_v47 = vadd.f32 1.0, %v10068_v37  ;;  %v10077_v13 = vpop.eup %7302  ;;  %v2982_v23 = vmul.f32 -0.5, %v10068_v37  ;;  %v2911_v60 = vadd.f32 1.0, %v2910_v63  ;;  %vm10086_vm10 = vcmp.lt.f32.partialorder %v2913_v62, 0.0004427343 }
 0x3ba   : > { %7314 = vpow2.f32 %v2879_v11  ;;  %v2877_v26 = vmul.f32 1.442695, %v2828_v25  ;;  %v2830_v0 = vsel %vm13408_vm4, 0.0, %v10061_v42  ;;  %v2985_v12 = vand.u32 2147483647, %v10068_v37 }
 0x3bb   : > { %7316 = vlog2.f32 %v2979_v47  ;;  %v10090_v52 = vpop.f32.mrb[42].mxu0  ;;  %vm2803_vm11 = vcmp.gt.f32.partialorder %v10081_v50, 20.0  ;;  %v10100_v59 = vmul.f32 100.0, %v10084_v9  ;;  %v2983_v61 = vadd.f32 1.0, %v2982_v23 }
 0x3bc   : > { %v7305_v15 = vpop.eup %7304  ;;  %7318 = vpow2.f32 %v2849_v20  ;;  %v10095_v30 = vpop.f32.mrb[43].mxu0  ;;  %v2835_v58 = vsel %vm2803_vm11, 0.0, %v10081_v50  ;;  %v2912_v62 = vmul.f32 %v7299_v29, %v2911_v60  ;;  %v2881_v22 = vmul.f32 1.442695, %v2830_v0 }
 0x3bd   : > { %v2925_v4 = vadd.f32 1.0, %v7305_v15  ;;  %7320 = vpow2.f32 %v2865_v44  ;;  %v10102_v43 = vpop.f32.mrb[40].mxu1  ;;  %v10104_v10 = vpop.eup %7306  ;;  %v2928_v38 = vmul.f32 -0.5, %v7305_v15  ;;  %v2891_v20 = vmul.f32 1.442695, %v2835_v58 }
 0x3be   : > { %v10109_v3 = vpop.f32.mrb[41].mxu1  ;;  %vm2805_vm14 = vcmp.gt.f32.partialorder %v10100_v59, 20.0  ;;  %v10116_v25 = vadd.f32 %v10027_v40, %v10044_v18  ;;  %v2931_v19 = vand.u32 2147483647, %v7305_v15  ;;  %v10124_v60 = vadd.f32 %v2566_v1, %v10044_v18 }
 0x3bf   : > { %7322 = vlog2.f32 %v2925_v4  ;;  %v10112_v11 = vpop.f32.mrb[44].mxu0  ;;  %v2837_v29 = vsel %vm2805_vm14, 0.0, %v10100_v59  ;;  %v2929_v42 = vadd.f32 1.0, %v2928_v38  ;;  %vm10128_vm9 = vcmp.lt.f32.partialorder %v2985_v12, 0.0004427343 }
 0x3c0   : > { %v7309_v63 = vpop.eup %7308  ;;  %7324 = vpow2.f32 %v2877_v26  ;;  %13846 = vst [vmem:[#allocation18_spill] sm:$0xff] %v10116_v25  ;;  %v10118_v23 = vpop.f32.mrb[45].mxu0  ;;  %13847 = vst [vmem:[#allocation28_spill] sm:$0xff] %v10124_v60  ;;  %v2895_v16 = vmul.f32 1.442695, %v2837_v29  ;;  %v10139_v38 = vmul.f32 100.0, %v10116_v25 }
 0x3c1   : > { %v2997_v47 = vadd.f32 1.0, %v7309_v63  ;;  %v3000_v44 = vmul.f32 -0.5, %v7309_v63  ;;  %v7311_v4 = vpop.eup %7310  ;;  %7326 = vpow2.f32 %v2891_v20  ;;  %v10126_v0 = vpop.f32.mrb[42].mxu1  ;;  %v3003_v45 = vand.u32 2147483647, %v7309_v63 }
 0x3c2   : > { %v7313_v58 = vpop.eup %7312  ;;  %v2909_v26 = vmul.f32 0.6931472, %v7311_v4  ;;  %v10132_v41 = vpop.f32.mrb[43].mxu1  ;;  %13850 = vst [vmem:[#allocation22_spill] sm:$0xff] %v10139_v38  ;;  %vm10143_vm4 = vcmp.lt.f32.partialorder %v2931_v19, 0.0004427343  ;;  %v10373_v59 = vadd.f32 %v10118_v23, %v9983_v17 }
 0x3c3   : > { %7328 = vlog2.f32 %v2997_v47  ;;  %v3001_v20 = vadd.f32 1.0, %v3000_v44  ;;  %v3051_v31 = vadd.f32 1.0, %v7313_v58  ;;  %v3054_v48 = vmul.f32 -0.5, %v7313_v58  ;;  %v10141_v12 = vpop.f32.mrb[46].mxu0 }
 0x3c4   : > { %v10134_v46 = vpop.eup %7314  ;;  %v2915_v1 = vsel %vm10086_vm10, %v2912_v62, %v2909_v26  ;;  %7330 = vpow2.f32 %v2881_v22  ;;  %v2984_v44 = vmul.f32 %v10068_v37, %v2983_v61  ;;  %v10149_v29 = vmul.f32 100.0, %v10124_v60  ;;  %v10164_v37 = vpop.f32.mrb[47].mxu0  ;;  %13871 = vst [vmem:[#allocation32_spill] sm:$0xff] %v10373_v59 }
 0x3c5   : > { %v7317_v4 = vpop.eup %7316  ;;  %7332 = vlog2.f32 %v3051_v31  ;;  %v10151_v56 = vpop.f32.mrb[44].mxu1  ;;  %v2930_v22 = vmul.f32 %v7305_v15, %v2929_v42  ;;  %v3057_v25 = vand.u32 2147483647, %v7313_v58  ;;  %v3069_v39 = vadd.f32 1.0, %v10134_v46 }
 0x3c6   : > { %13853 = vst [vmem:[#allocation19_spill] sm:$0xff] %v10149_v29  ;;  %v10153_v62 = vpop.eup %7318  ;;  %v2981_v26 = vmul.f32 0.6931472, %v7317_v4  ;;  %v3195_v19 = vmul.f32 0.01, %v2915_v1  ;;  %v3002_v21 = vmul.f32 %v7309_v63, %v3001_v20  ;;  %7334 = vpow2.f32 %v2895_v16  ;;  %v10162_v31 = vpop.f32.mrb[45].mxu1 }
 0x3c7   : > { %v10156_v7 = vpop.eup %7320  ;;  %vm10158_vm10 = vcmp.lt.f32.partialorder %v3003_v45, 0.0004427343  ;;  %v3055_v15 = vadd.f32 1.0, %v3054_v48  ;;  %7336 = vlog2.f32 %v3069_v39  ;;  %vm2804_vm7 = vcmp.gt.f32.partialorder %v10139_v38, 20.0 }
 0x3c8   : > { %v2987_v42 = vsel %vm10128_vm9, %v2984_v44, %v2981_v26  ;;  %vm13436_vm0 = vcmp.gt.f32.partialorder %v10149_v29, 20.0  ;;  %v10172_v45 = vadd.f32 %v10066_v5, %v9940_v32  ;;  %vm10176_vm8 = vcmp.lt.f32.partialorder %v3057_v25, 0.0004427343 }
 0x3c9   : > { %v7323_v61 = vpop.eup %7322  ;;  %v3203_v1 = vmul.f32 0.01, %v2987_v42  ;;  %v3072_v40 = vmul.f32 -0.5, %v10134_v46  ;;  %v3075_v39 = vand.u32 2147483647, %v10134_v46  ;;  %v10184_v48 = vadd.f32 %v10102_v43, %v9940_v32  ;;  %v10186_v20 = vpop.f32.mrb[46].mxu1 }
 0x3ca   : > { %v2927_v4 = vmul.f32 0.6931472, %v7323_v61  ;;  %v10174_v16 = vpop.eup %7324  ;;  %v10191_v5 = vsel %vm2779_vm15, %v9943_v6, %v3195_v19  ;;  %v2836_v43 = vsel %vm2804_vm7, 0.0, %v10139_v38  ;;  %v10203_v61 = vpop.f32.mrb[47].mxu1  ;;  %v3056_v36 = vmul.f32 %v7313_v58, %v3055_v15 }
 0x3cb   : > { %v7327_v44 = vpop.eup %7326  ;;  %13858 = vst [vmem:[#allocation21_spill] sm:$0xff] %v10191_v5  ;;  %v10198_v26 = vsel %vm2787_vm1, %v9958_v28, %v3203_v1  ;;  %v10212_v28 = vadd.f32 %v10070_v34, %v9940_v32  ;;  %v3073_v1 = vadd.f32 1.0, %v3072_v40  ;;  %v2893_v38 = vmul.f32 1.442695, %v2836_v43 }
 0x3cc   : > { %v2933_v25 = vsel %vm10143_vm4, %v2930_v22, %v2927_v4  ;;  %v3123_v19 = vadd.f32 1.0, %v7327_v44  ;;  %v3126_v22 = vmul.f32 -0.5, %v7327_v44  ;;  %v10208_v4 = vmul.f32 100.0, %v10172_v45 }
 0x3cd   : > { %v7329_v42 = vpop.eup %7328  ;;  %v3197_v60 = vmul.f32 0.01, %v2933_v25  ;;  %13859 = vst [vmem:[#allocation20_spill] sm:$0xff] %v10212_v28  ;;  %v10217_v25 = vmul.f32 100.0, %v10184_v48  ;;  %vm10221_vm15 = vcmp.lt.f32.partialorder %v3075_v39, 0.0004427343  ;;  %v10364_v33 = vadd.f32 %v10151_v56, %v9983_v17 }
 0x3ce   : > { %v2999_v47 = vmul.f32 0.6931472, %v7329_v42  ;;  %v10214_v55 = vpop.eup %7330  ;;  %7338 = vlog2.f32 %v3123_v19  ;;  %v3129_v42 = vand.u32 2147483647, %v7327_v44  ;;  %v2838_v34 = vsel %vm13436_vm0, 0.0, %v10149_v29 }
 0x3cf   : > { %v7333_v6 = vpop.eup %7332  ;;  %vm2783_vm1 = vcmp.gt.f32.partialorder %v10208_v4, 20.0  ;;  %v10232_v40 = vsel %vm2781_vm5, %v9971_v8, %v3197_v60  ;;  %v3127_v39 = vadd.f32 1.0, %v3126_v22  ;;  %vm2785_vm4 = vcmp.gt.f32.partialorder %v10217_v25, 20.0 }
 0x3d0   : > { %v3005_v58 = vsel %vm10158_vm10, %v3002_v21, %v2999_v47  ;;  %v3053_v19 = vmul.f32 0.6931472, %v7333_v6  ;;  %v2815_v51 = vsel %vm2783_vm1, 0.0, %v10208_v4  ;;  %v7335_v21 = vpop.eup %7334  ;;  %v10239_v29 = vmul.f32 100.0, %v10212_v28 }
 0x3d1   : > { %v3205_v43 = vmul.f32 0.01, %v3005_v58  ;;  %v2851_v47 = vmul.f32 1.442695, %v2815_v51  ;;  %v7337_v5 = vpop.eup %7336  ;;  %v3141_v60 = vadd.f32 1.0, %v7335_v21  ;;  %v3144_v6 = vmul.f32 -0.5, %v7335_v21 }
 0x3d2   : > { %v3059_v2 = vsel %vm10176_vm8, %v3056_v36, %v3053_v19  ;;  %v3074_v58 = vmul.f32 %v10134_v46, %v3073_v1  ;;  %7340 = vpow2.f32 %v2893_v38  ;;  %v10253_v51 = vadd.f32 %v10109_v3, %v9940_v32 }
 0x3d3   : > { %v10244_v8 = vsel %vm2789_vm6, %v10000_v14, %v3205_v43  ;;  %v3071_v28 = vmul.f32 0.6931472, %v7337_v5  ;;  %7342 = vlog2.f32 %v3141_v60  ;;  %v2897_v54 = vmul.f32 1.442695, %v2838_v34 }
 0x3d4   : > { %13862 = vst [vmem:[#allocation33_spill] sm:$0xff] %v10253_v51  ;;  %v2817_v14 = vsel %vm2785_vm4, 0.0, %v10217_v25  ;;  %v3211_v63 = vmul.f32 0.01, %v3059_v2  ;;  %vm10258_vm5 = vcmp.lt.f32.partialorder %v3129_v42, 0.0004427343  ;;  %7344 = vpow2.f32 %v2851_v47 }
 0x3d5   : > { %vm13429_vm6 = vcmp.gt.f32.partialorder %v10239_v29, 20.0  ;;  %v3128_v46 = vmul.f32 %v7327_v44, %v3127_v39  ;;  %v3145_v38 = vadd.f32 1.0, %v3144_v6  ;;  %v3147_v1 = vand.u32 2147483647, %v7335_v21 }
 0x3d6   : > { %v2855_v32 = vmul.f32 1.442695, %v2817_v14  ;;  %v10264_v3 = vmul.f32 100.0, %v10253_v51  ;;  %v10268_v5 = vadd.f32 %v10090_v52, %v9951_v24  ;;  %v10272_v42 = vadd.f32 %v10126_v0, %v9951_v24 }
 0x3d7   : > { %v10276_v34 = vadd.f32 %v10095_v30, %v9951_v24  ;;  %v3077_v44 = vsel %vm10221_vm15, %v3074_v58, %v3071_v28  ;;  %v2816_v19 = vsel %vm13429_vm6, 0.0, %v10239_v29  ;;  %v10285_v52 = vadd.f32 %v10132_v41, %v9951_v24 }
 0x3d8   : > { %13865 = vst [vmem:[#allocation35_spill] sm:$0xff] %v10264_v3  ;;  %v7339_v43 = vpop.eup %7338  ;;  %7346 = vpow2.f32 %v2855_v32  ;;  %vm13426_vm8 = vcmp.gt.f32.partialorder %v10264_v3, 20.0  ;;  %v10289_v0 = vmul.f32 100.0, %v10268_v5  ;;  %v10293_v30 = vadd.f32 %v10112_v11, %v9983_v17 }
 0x3d9   : > { %13866 = vst [vmem:[#allocation31_spill] sm:$0xff] %v10285_v52  ;;  %v3125_v39 = vmul.f32 0.6931472, %v7339_v43  ;;  %v10298_v28 = vsel %vm2795_vm13, %v9993_v57, %v3211_v63  ;;  %vm10300_vm9 = vcmp.lt.f32.partialorder %v3147_v1, 0.0004427343  ;;  %v10305_v24 = vmul.f32 100.0, %v10272_v42 }
 0x3da   : > { %v10308_v41 = vmul.f32 100.0, %v10276_v34  ;;  %v3213_v47 = vmul.f32 0.01, %v3077_v44  ;;  %vm2791_vm10 = vcmp.gt.f32.partialorder %v10289_v0, 20.0  ;;  %v10314_v53 = vmul.f32 100.0, %v10285_v52 }
 0x3db   : > { %v3131_v11 = vsel %vm10258_vm5, %v3128_v46, %v3125_v39  ;;  %v2818_v2 = vsel %vm13426_vm8, 0.0, %v10264_v3  ;;  %v2823_v60 = vsel %vm2791_vm10, 0.0, %v10289_v0  ;;  %vm2793_vm13 = vcmp.gt.f32.partialorder %v10305_v24, 20.0 }
 0x3dc   : > { %13869 = vst [vmem:[#allocation27_spill] sm:$0xff] %v10308_v41  ;;  %13870 = vst [vmem:[#allocation26_spill] sm:$0xff] %v10314_v53  ;;  %v3219_v57 = vmul.f32 0.01, %v3131_v11  ;;  %v10323_v6 = vpop.eup %7340  ;;  %v2867_v58 = vmul.f32 1.442695, %v2823_v60  ;;  %v3146_v1 = vmul.f32 %v7335_v21, %v3145_v38  ;;  %v10381_v56 = vadd.f32 %v10141_v12, %v10044_v18 }
 0x3dd   : > { %v2825_v14 = vsel %vm2793_vm13, 0.0, %v10305_v24  ;;  %vm13427_vm15 = vcmp.gt.f32.partialorder %v10308_v41, 20.0  ;;  %v10330_v63 = vmul.f32 100.0, %v10293_v30  ;;  %v7343_v36 = vpop.eup %7342  ;;  %v2853_v32 = vmul.f32 1.442695, %v2816_v19 }
 0x3de   : > { %v10335_v46 = vsel %vm2803_vm11, %v10053_v35, %v3219_v57  ;;  %v2871_v43 = vmul.f32 1.442695, %v2825_v14  ;;  %v7345_v44 = vpop.eup %7344  ;;  %v3143_v11 = vmul.f32 0.6931472, %v7343_v36  ;;  %7348 = vpow2.f32 %v2867_v58 }
 0x3df   : > { %vm13422_vm5 = vcmp.gt.f32.partialorder %v10314_v53, 20.0  ;;  %v2943_v60 = vadd.f32 1.0, %v7345_v44  ;;  %v2857_v22 = vmul.f32 1.442695, %v2818_v2  ;;  %v2824_v50 = vsel %vm13427_vm15, 0.0, %v10308_v41 }
 0x3e0   : > { %7350 = vpow2.f32 %v2871_v43  ;;  %v3149_v35 = vsel %vm10300_vm9, %v3146_v1, %v3143_v11  ;;  %v2946_v21 = vmul.f32 -0.5, %v7345_v44  ;;  %vm2799_vm11 = vcmp.gt.f32.partialorder %v10330_v63, 20.0 }
 0x3e1   : > { %7352 = vpow2.f32 %v2897_v54  ;;  %v10349_v19 = vsel %vm2797_vm2, %v10025_v27, %v3213_v47  ;;  %v3221_v57 = vmul.f32 0.01, %v3149_v35  ;;  %v2826_v2 = vsel %vm13422_vm5, 0.0, %v10314_v53 }
 0x3e2   : > { %v7347_v38 = vpop.eup %7346  ;;  %7354 = vlog2.f32 %v2943_v60  ;;  %v2949_v58 = vand.u32 2147483647, %v7345_v44  ;;  %v2869_v15 = vmul.f32 1.442695, %v2824_v50  ;;  %v2831_v27 = vsel %vm2799_vm11, 0.0, %v10330_v63 }
 0x3e3   : > { %v2961_v14 = vadd.f32 1.0, %v7347_v38  ;;  %7356 = vpow2.f32 %v2853_v32  ;;  %v10357_v54 = vsel %vm2805_vm14, %v10084_v9, %v3221_v57  ;;  %v2947_v36 = vadd.f32 1.0, %v2946_v21 }
 0x3e4   : > { %7358 = vpow2.f32 %v2857_v22  ;;  %v2873_v1 = vmul.f32 1.442695, %v2826_v2  ;;  %v2964_v32 = vmul.f32 -0.5, %v7347_v38  ;;  %v2883_v43 = vmul.f32 1.442695, %v2831_v27 }
 0x3e5   : > { %7360 = vlog2.f32 %v2961_v14  ;;  %v10369_v9 = vmul.f32 100.0, %v10364_v33  ;;  %vm10375_vm2 = vcmp.lt.f32.partialorder %v2949_v58, 0.0004427343  ;;  %v2967_v11 = vand.u32 2147483647, %v7347_v38 }
 0x3e6   : > { %7362 = vpow2.f32 %v2869_v15  ;;  %v10385_v60 = vmul.f32 100.0, %v10373_v59  ;;  %v10392_v35 = vadd.f32 %v10162_v31, %v9983_v17  ;;  %v10396_v12 = vadd.f32 %v10186_v20, %v10044_v18 }
 0x3e7   : > { %7364 = vpow2.f32 %v2883_v43  ;;  %vm2801_vm14 = vcmp.gt.f32.partialorder %v10369_v9, 20.0  ;;  %v2948_v57 = vmul.f32 %v7345_v44, %v2947_v36  ;;  %v2965_v2 = vadd.f32 1.0, %v2964_v32 }
 0x3e8   : > { %13874 = vst [vmem:[#allocation36_spill] sm:$0xff] %v10385_v60  ;;  %v7349_v50 = vpop.eup %7348  ;;  %7366 = vpow2.f32 %v2873_v1  ;;  %v2833_v23 = vsel %vm2801_vm14, 0.0, %v10369_v9  ;;  %13875 = vst [vmem:[#allocation38_spill] sm:$0xff] %v10392_v35  ;;  %v10401_v43 = vmul.f32 100.0, %v10381_v56  ;;  %v10405_v17 = vadd.f32 %v10164_v37, %v10044_v18 }
 0x3e9   : > { %v3015_v58 = vadd.f32 1.0, %v7349_v50  ;;  %v2887_v14 = vmul.f32 1.442695, %v2833_v23  ;;  %v3018_v27 = vmul.f32 -0.5, %v7349_v50  ;;  %v3021_v20 = vand.u32 2147483647, %v7349_v50 }
 0x3ea   : > { %v7351_v21 = vpop.eup %7350  ;;  %13876 = vst [vmem:[#allocation23_spill] sm:$0xff] %v10405_v17  ;;  %vm13430_vm9 = vcmp.gt.f32.partialorder %v10385_v60, 20.0  ;;  %v10411_v32 = vmul.f32 100.0, %v10392_v35  ;;  %v10414_v23 = vmul.f32 100.0, %v10396_v12  ;;  %v2966_v37 = vmul.f32 %v7347_v38, %v2965_v2 }
 0x3eb   : > { %v10398_v15 = vpop.eup %7352  ;;  %v3033_v1 = vadd.f32 1.0, %v7351_v21  ;;  %7368 = vlog2.f32 %v3015_v58  ;;  %v3036_v47 = vmul.f32 -0.5, %v7351_v21  ;;  %vm10418_vm5 = vcmp.lt.f32.partialorder %v2967_v11, 0.0004427343 }
 0x3ec   : > { %v7355_v31 = vpop.eup %7354  ;;  %13877 = vst [vmem:[#allocation34_spill] sm:$0xff] %v10411_v32  ;;  %v3039_v58 = vand.u32 2147483647, %v7351_v21  ;;  %v3019_v52 = vadd.f32 1.0, %v3018_v27  ;;  %vm2807_vm8 = vcmp.gt.f32.partialorder %v10401_v43, 20.0  ;;  %vm2802_vm6 = vcmp.gt.f32.partialorder %v10411_v32, 20.0 }
 0x3ed   : > { %v10408_v44 = vpop.eup %7356  ;;  %v2945_v36 = vmul.f32 0.6931472, %v7355_v31  ;;  %7370 = vlog2.f32 %v3033_v1  ;;  %v2832_v1 = vsel %vm13430_vm9, 0.0, %v10385_v60  ;;  %v10427_v31 = vmul.f32 100.0, %v10405_v17 }
 0x3ee   : > { %v10416_v39 = vpop.eup %7358  ;;  %7372 = vpow2.f32 %v2887_v14  ;;  %vm10431_vm15 = vcmp.lt.f32.partialorder %v3021_v20, 0.0004427343  ;;  %v3037_v14 = vadd.f32 1.0, %v3036_v47  ;;  %v2839_v27 = vsel %vm2807_vm8, 0.0, %v10401_v43 }
 0x3ef   : > { %v7361_v53 = vpop.eup %7360  ;;  %v2951_v38 = vsel %vm10375_vm2, %v2948_v57, %v2945_v36  ;;  %vm2809_vm9 = vcmp.gt.f32.partialorder %v10414_v23, 20.0  ;;  %v10444_v22 = vadd.f32 %v10203_v61, %v10044_v18  ;;  %vm10448_vm2 = vcmp.lt.f32.partialorder %v3039_v58, 0.0004427343 }
 0x3f0   : > { %v2963_v11 = vmul.f32 0.6931472, %v7361_v53  ;;  %v10435_v35 = vpop.eup %7362  ;;  %v2885_v20 = vmul.f32 1.442695, %v2832_v1  ;;  %v2899_v36 = vmul.f32 1.442695, %v2839_v27  ;;  %v3020_v3 = vmul.f32 %v7349_v50, %v3019_v52 }
 0x3f1   : > { %13882 = vst [vmem:[#allocation37_spill] sm:$0xff] %v10444_v22  ;;  %v7365_v53 = vpop.eup %7364  ;;  %v3199_v60 = vmul.f32 0.01, %v2951_v38  ;;  %v2834_v18 = vsel %vm2802_vm6, 0.0, %v10411_v32  ;;  %v2841_v61 = vsel %vm2809_vm9, 0.0, %v10414_v23  ;;  %v10461_v59 = vmul.f32 100.0, %v10444_v22 }
 0x3f2   : > { %v2969_v57 = vsel %vm10418_vm5, %v2966_v37, %v2963_v11  ;;  %v10452_v17 = vpop.eup %7366  ;;  %v3087_v51 = vadd.f32 1.0, %v7365_v53  ;;  %v3090_v41 = vmul.f32 -0.5, %v7365_v53  ;;  %7374 = vpow2.f32 %v2899_v36 }
 0x3f3   : > { %13885 = vst [vmem:[#allocation39_spill] sm:$0xff] %v10461_v59  ;;  %v3201_v37 = vmul.f32 0.01, %v2969_v57  ;;  %v3038_v58 = vmul.f32 %v7351_v21, %v3037_v14  ;;  %vm2808_vm5 = vcmp.gt.f32.partialorder %v10427_v31, 20.0  ;;  %v3093_v50 = vand.u32 2147483647, %v7365_v53 }
 0x3f4   : > { %7376 = vlog2.f32 %v3087_v51  ;;  %v2903_v1 = vmul.f32 1.442695, %v2841_v61  ;;  %vm2810_vm0 = vcmp.gt.f32.partialorder %v10461_v59, 20.0  ;;  %v10468_v11 = vsel %vm2783_vm1, %v10172_v45, %v3199_v60 }
 0x3f5   : > { %v7369_v52 = vpop.eup %7368  ;;  %7378 = vpow2.f32 %v2885_v20  ;;  %v3091_v36 = vadd.f32 1.0, %v3090_v41  ;;  %v10470_v22 = vmul.f32 1.442695, %v2834_v18  ;;  %v2840_v14 = vsel %vm2808_vm5, 0.0, %v10427_v31 }
 0x3f6   : > { %v3017_v27 = vmul.f32 0.6931472, %v7369_v52  ;;  %7380 = vpow2.f32 %v2903_v1  ;;  %v2916_v57 = vadd.f32 1.0, %v10077_v13  ;;  %v2842_v45 = vsel %vm2810_vm0, 0.0, %v10461_v59 }
 0x3f7   : > { %v7371_v38 = vpop.eup %7370  ;;  %v2919_v4 = vmul.f32 -0.5, %v10077_v13  ;;  %v10485_v41 = vsel %vm2785_vm4, %v10184_v48, %v3201_v37  ;;  %vm10489_vm1 = vcmp.lt.f32.partialorder %v3093_v50, 0.0004427343  ;;  %v3092_v2 = vmul.f32 %v7365_v53, %v3091_v36 }
 0x3f8   : > { %v7373_v21 = vpop.eup %7372  ;;  %v3035_v51 = vmul.f32 0.6931472, %v7371_v38  ;;  %v3023_v20 = vsel %vm10431_vm15, %v3020_v3, %v3017_v27  ;;  %13886 = vst [vmem:[#allocation40_spill] sm:$0xff] %v10485_v41  ;;  %v2901_v1 = vmul.f32 1.442695, %v2840_v14  ;;  %v2988_v27 = vadd.f32 1.0, %v10104_v10 }
 0x3f9   : > { %v3105_v61 = vadd.f32 1.0, %v7373_v21  ;;  %v3207_v60 = vmul.f32 0.01, %v3023_v20  ;;  %v3108_v25 = vmul.f32 -0.5, %v7373_v21  ;;  %v3111_v48 = vand.u32 2147483647, %v7373_v21 }
 0x3fa   : > { %v3041_v18 = vsel %vm10448_vm2, %v3038_v58, %v3035_v51  ;;  %v10498_v37 = vmul.f32 1.442695, %v2842_v45  ;;  %v2920_v53 = vadd.f32 1.0, %v2919_v4  ;;  %v2991_v36 = vmul.f32 -0.5, %v10104_v10 }
 0x3fb   : > { %v3209_v3 = vmul.f32 0.01, %v3041_v18  ;;  %7382 = vlog2.f32 %v3105_v61  ;;  %v10496_v38 = vsel %vm2791_vm10, %v10268_v5, %v3207_v60  ;;  %v2922_v5 = vand.u32 2147483647, %v10077_v13 }
 0x3fc   : > { %7384 = vlog2.f32 %v2916_v57  ;;  %v7375_v50 = vpop.eup %7374  ;;  %v2934_v24 = vadd.f32 1.0, %v10153_v62  ;;  %v3109_v61 = vadd.f32 1.0, %v3108_v25  ;;  %vm10515_vm4 = vcmp.lt.f32.partialorder %v3111_v48, 0.0004427343 }
 0x3fd   : > { %v10505_v58 = vsel %vm2793_vm13, %v10272_v42, %v3209_v3  ;;  %v3159_v14 = vadd.f32 1.0, %v7375_v50  ;;  %v3162_v20 = vmul.f32 -0.5, %v7375_v50  ;;  %7386 = vpow2.f32 %v2901_v1 }
 0x3fe   : > { %13889 = vst [vmem:[#allocation41_spill] sm:$0xff] %v10505_v58  ;;  %v7377_v51 = vpop.eup %7376  ;;  %7388 = vlog2.f32 %v2988_v27  ;;  %v3165_v4 = vand.u32 2147483647, %v7375_v50  ;;  %v2921_v60 = vmul.f32 %v10077_v13, %v2920_v53  ;;  %v2994_v18 = vand.u32 2147483647, %v10104_v10 }
 0x3ff   : > { %v10513_v42 = vpop.eup %7378  ;;  %v3089_v57 = vmul.f32 0.6931472, %v7377_v51  ;;  %7390 = vlog2.f32 %v3159_v14  ;;  %vm10523_vm10 = vcmp.lt.f32.partialorder %v2922_v5, 0.0004427343  ;;  %v2992_v25 = vadd.f32 1.0, %v2991_v36 }
 0x400   : > { %v7381_v3 = vpop.eup %7380  ;;  %7392 = vlog2.f32 %v2934_v24  ;;  %v3163_v48 = vadd.f32 1.0, %v3162_v20  ;;  %v2937_v27 = vmul.f32 -0.5, %v10153_v62  ;;  %v3110_v59 = vmul.f32 %v7373_v21, %v3109_v61 }
 0x401   : > { %v3095_v1 = vsel %vm10489_vm1, %v3092_v2, %v3089_v57  ;;  %v3177_v51 = vadd.f32 1.0, %v7381_v3  ;;  %v3180_v47 = vmul.f32 -0.5, %v7381_v3  ;;  %v2940_v13 = vand.u32 2147483647, %v10153_v62  ;;  %v13914_v2 = vld [vmem:[#allocation30_spill] sm:$0xff] }
 0x402   : > { %v3215_v14 = vmul.f32 0.01, %v3095_v1  ;;  %v3006_v53 = vadd.f32 1.0, %v10156_v7  ;;  %vm10530_vm13 = vcmp.lt.f32.partialorder %v3165_v4, 0.0004427343  ;;  %v3009_v5 = vmul.f32 -0.5, %v10156_v7 }
 0x403   : > { %7394 = vlog2.f32 %v3177_v51  ;;  %vm10534_vm15 = vcmp.lt.f32.partialorder %v2994_v18, 0.0004427343  ;;  %v3183_v20 = vand.u32 2147483647, %v7381_v3  ;;  %v2993_v21 = vmul.f32 %v10104_v10, %v2992_v25 }
 0x404   : > { %7396 = vlog2.f32 %v3006_v53  ;;  %v3164_v57 = vmul.f32 %v7375_v50, %v3163_v48  ;;  %v3181_v61 = vadd.f32 1.0, %v3180_v47  ;;  %v2938_v1 = vadd.f32 1.0, %v2937_v27 }
 0x405   : > { %v7383_v32 = vpop.eup %7382  ;;  %v3060_v4 = vadd.f32 1.0, %v10174_v16  ;;  %v10544_v18 = vsel %vm2799_vm11, %v10293_v30, %v3215_v14  ;;  %vm10546_vm2 = vcmp.lt.f32.partialorder %v2940_v13, 0.0004427343  ;;  %v3012_v47 = vand.u32 2147483647, %v10156_v7 }
 0x406   : > { %v3107_v36 = vmul.f32 0.6931472, %v7383_v32  ;;  %v7385_v24 = vpop.eup %7384  ;;  %v3010_v32 = vadd.f32 1.0, %v3009_v5  ;;  %v3063_v50 = vmul.f32 -0.5, %v10174_v16  ;;  %vm10556_vm1 = vcmp.lt.f32.partialorder %v3183_v20, 0.0004427343 }
 0x407   : > { %v2918_v51 = vmul.f32 0.6931472, %v7385_v24  ;;  %v10550_v58 = vpop.eup %7386  ;;  %7398 = vlog2.f32 %v3060_v4  ;;  %v3066_v48 = vand.u32 2147483647, %v10174_v16  ;;  %v3132_v27 = vadd.f32 1.0, %v10323_v6  ;;  %v13912_v4 = vld [vmem:[#allocation13_spill] sm:$0xff] }
 0x408   : > { %v3113_v10 = vsel %vm10515_vm4, %v3110_v59, %v3107_v36  ;;  %v7389_v25 = vpop.eup %7388  ;;  %v3182_v45 = vmul.f32 %v7381_v3, %v3181_v61  ;;  %v2939_v53 = vmul.f32 %v10153_v62, %v2938_v1  ;;  %v3011_v20 = vmul.f32 %v10156_v7, %v3010_v32 }
 0x409   : > { %v2924_v63 = vsel %vm10523_vm10, %v2921_v60, %v2918_v51  ;;  %v7391_v14 = vpop.eup %7390  ;;  %v2990_v59 = vmul.f32 0.6931472, %v7389_v25  ;;  %v3217_v36 = vmul.f32 0.01, %v3113_v10  ;;  %7400 = vlog2.f32 %v3132_v27 }
 0x40a   : > { %v3196_v13 = vmul.f32 0.01, %v2924_v63  ;;  %v7393_v5 = vpop.eup %7392  ;;  %v3161_v24 = vmul.f32 0.6931472, %v7391_v14  ;;  %vm10568_vm11 = vcmp.lt.f32.partialorder %v3012_v47, 0.0004427343 }
 0x40b   : > { %v2996_v0 = vsel %vm10534_vm15, %v2993_v21, %v2990_v59  ;;  %v2936_v60 = vmul.f32 0.6931472, %v7393_v5  ;;  %v3064_v51 = vadd.f32 1.0, %v3063_v50  ;;  %vm10574_vm4 = vcmp.lt.f32.partialorder %v3066_v48, 0.0004427343  ;;  %v13907_v50 = vld [vmem:[#allocation25_spill] sm:$0xff] }
 0x40c   : > { %v3167_v3 = vsel %vm10530_vm13, %v3164_v57, %v3161_v24  ;;  %v3204_v61 = vmul.f32 0.01, %v2996_v0  ;;  %v3078_v7 = vadd.f32 1.0, %v10214_v55  ;;  %v3228_v21 = vsel %vm2780_vm12, %v9946_v49, %v3196_v13 }
 0x40d   : > { %v7395_v1 = vpop.eup %7394  ;;  %v3223_v32 = vmul.f32 0.01, %v3167_v3  ;;  %v2942_v10 = vsel %vm10546_vm2, %v2939_v53, %v2936_v60  ;;  %v3135_v47 = vmul.f32 -0.5, %v10323_v6  ;;  %v3081_v48 = vmul.f32 -0.5, %v10214_v55 }
 0x40e   : > { %v7397_v52 = vpop.eup %7396  ;;  %v3179_v57 = vmul.f32 0.6931472, %v7395_v1  ;;  %v3236_v63 = vsel %vm2788_vm3, %v13907_v50, %v3204_v61  ;;  %7402 = vlog2.f32 %v3078_v7  ;;  %v3198_v41 = vmul.f32 0.01, %v2942_v10  ;;  %v13911_v7 = vld [vmem:[#allocation24_spill] sm:$0xff] }
 0x40f   : > { %v10592_v27 = vsel %vm2807_vm8, %v10381_v56, %v3223_v32  ;;  %v6854_v49 = vpack.c.bf16 %v3236_v63, %v3228_v21  ;;  %v3008_v14 = vmul.f32 0.6931472, %v7397_v52  ;;  %v10597_v59 = vsel %vm2801_vm14, %v10364_v33, %v3217_v36  ;;  %v13909_v33 = vld [vmem:[#allocation21_spill] sm:$0xff] }
 0x410   : > { %v6876_v13 = vpack.c.bf16 %v10592_v27, %v10544_v18  ;;  %v3185_v53 = vsel %vm10556_vm1, %v3182_v45, %v3179_v57  ;;  %v3138_v5 = vand.u32 2147483647, %v10323_v6  ;;  %v3136_v0 = vadd.f32 1.0, %v3135_v47  ;;  %v13915_v21 = vld [vmem:[#allocation17_spill] sm:$0xff] }
 0x411   : > { %v7399_v24 = vpop.eup %7398  ;;  %v3225_v43 = vmul.f32 0.01, %v3185_v53  ;;  %6855 = vmatprep.subr.bf16.mxu0 %v6854_v49  ;;  %v3014_v56 = vsel %vm10568_vm11, %v3011_v20, %v3008_v14  ;;  %v3150_v60 = vadd.f32 1.0, %v10398_v15  ;;  %v13910_v36 = vpack.c.bf16 %v10198_v26, %v13909_v33  ;;  %v13920_v53 = vld [vmem:[#allocation15_spill] sm:$0xff]  ;;  %v7779_v18 = vld [vmem:[%s8008_s22] sm:$0xff]  ;;  %v7780_v27 = vld [vmem:[%s8008_s22 + $0x28] sm:$0xff] }
 0x412   : > { %v3206_v9 = vmul.f32 0.01, %v3014_v56  ;;  %v3062_v3 = vmul.f32 0.6931472, %v7399_v24  ;;  %v3065_v30 = vmul.f32 %v10174_v16, %v3064_v51  ;;  %v3082_v45 = vadd.f32 1.0, %v3081_v48 }
 0x413   : > { %6857 = vmatpush1.bf16.msra.mxu0 %v13910_v36  ;;  %v10614_v61 = vsel %vm2809_vm9, %v10396_v12, %v3225_v43  ;;  %vm13913_vm12 = vcmp.gt.f32.partialorder %v13912_v4, 20.0  ;;  %v3084_v1 = vand.u32 2147483647, %v10214_v55  ;;  %7404 = vlog2.f32 %v3150_v60  ;;  %v7401_v32 = vpop.eup %7400 }
 0x414   : > { %v3230_v20 = vsel %vm13913_vm12, %v13911_v7, %v3198_v41  ;;  %v6884_v26 = vpack.c.bf16 %v10614_v61, %v10597_v59  ;;  %vm13916_vm3 = vcmp.gt.f32.partialorder %v13915_v21, 20.0  ;;  %v3068_v23 = vsel %vm10574_vm4, %v3065_v30, %v3062_v3  ;;  %v7782_v59 = vld [vmem:[%s8008_s22 + $0x10] sm:$0xff]  ;;  %v7783_v61 = vld [vmem:[%s8008_s22 + $0x38] sm:$0xff] }
 0x415   : > { %v3238_v16 = vsel %vm13916_vm3, %v13914_v2, %v3206_v9  ;;  %v2952_v12 = vadd.f32 1.0, %v10408_v44  ;;  %7406 = vpow2.f32 %v10470_v22  ;;  %v3134_v10 = vmul.f32 0.6931472, %v7401_v32  ;;  %v10665_v2 = vld [vmem:[%s13299_s7] sm:$0xff] }
 0x416   : > { %v6862_v51 = vpack.c.bf16 %v3238_v16, %v3230_v20  ;;  %v3137_v47 = vmul.f32 %v10323_v6, %v3136_v0  ;;  %vm3139_vm8 = vcmp.lt.f32.partialorder %v3138_v5, 0.0004427343  ;;  %v3212_v52 = vmul.f32 0.01, %v3068_v23  ;;  %v13921_v5 = vld [vmem:[#allocation14_spill] sm:$0xff] }
 0x417   : > { %v3153_v57 = vmul.f32 -0.5, %v10398_v15  ;;  %7408 = vlog2.f32 %v2952_v12  ;;  %v3024_v62 = vadd.f32 1.0, %v10435_v35  ;;  %v13917_v63 = vpack.c.bf16 %v10244_v8, %v10232_v40  ;;  %v13923_v8 = vld [vmem:[#allocation18_spill] sm:$0xff] }
 0x418   : > { %7410 = vpow2.f32 %v10498_v37  ;;  %6863 = vmatprep.subr.bf16.mxu1 %v6862_v51  ;;  %v3140_v50 = vsel %vm3139_vm8, %v3137_v47, %v3134_v10  ;;  %v7403_v25 = vpop.eup %7402  ;;  %v3083_v48 = vmul.f32 %v10214_v55, %v3082_v45  ;;  %vm10637_vm14 = vcmp.lt.f32.partialorder %v3084_v1, 0.0004427343 }
 0x419   : > { %6865 = vmatpush1.bf16.msra.mxu1 %v13917_v63  ;;  %v3220_v22 = vmul.f32 0.01, %v3140_v50  ;;  %v3156_v49 = vand.u32 2147483647, %v10398_v15  ;;  %v3080_v14 = vmul.f32 0.6931472, %v7403_v25  ;;  %7412 = vlog2.f32 %v3024_v62 }
 0x41a   : > { %v2955_v37 = vmul.f32 -0.5, %v10408_v44  ;;  %v2970_v41 = vadd.f32 1.0, %v10416_v39  ;;  %vm13922_vm9 = vcmp.gt.f32.partialorder %v13921_v5, 20.0  ;;  %v3154_v43 = vadd.f32 1.0, %v3153_v57  ;;  %v13931_v50 = vld [vmem:[#allocation16_spill] sm:$0xff] }
 0x41b   : > { %v3244_v40 = vsel %vm13922_vm9, %v13920_v53, %v3212_v52  ;;  %v3252_v55 = vsel %vm2804_vm7, %v13923_v8, %v3220_v22  ;;  %v2958_v56 = vand.u32 2147483647, %v10408_v44  ;;  %v3086_v60 = vsel %vm10637_vm14, %v3083_v48, %v3080_v14  ;;  %v13932_v62 = vld [vmem:[#allocation12_spill] sm:$0xff]  ;;  %v10690_v22 = vld [vmem:[%s13299_s7 + $0x8] sm:$0xff] }
 0x41c   : > { %v6858_v0 = vpack.c.bf16 %v3252_v55, %v3244_v40  ;;  %v3027_v9 = vmul.f32 -0.5, %v10435_v35  ;;  %7414 = vlog2.f32 %v2970_v41  ;;  %v3030_v33 = vand.u32 2147483647, %v10435_v35  ;;  %v13935_v14 = vld [vmem:[#allocation28_spill] sm:$0xff] }
 0x41d   : > { %v7405_v36 = vpop.eup %7404  ;;  %v2956_v3 = vadd.f32 1.0, %v2955_v37  ;;  %v2973_v30 = vmul.f32 -0.5, %v10416_v39  ;;  %v3042_v45 = vadd.f32 1.0, %v10452_v17  ;;  %v3096_v7 = vadd.f32 1.0, %v10513_v42 }
 0x41e   : > { %6859 = vmatprep.subr.bf16.mxu0 %v6858_v0  ;;  %v3152_v4 = vmul.f32 0.6931472, %v7405_v36  ;;  %v3155_v20 = vmul.f32 %v10398_v15, %v3154_v43  ;;  %v3214_v1 = vmul.f32 0.01, %v3086_v60  ;;  %v13925_v32 = vpack.c.bf16 %v10335_v46, %v10298_v28 }
 0x41f   : > { %v10667_v21 = vpop.eup %7406  ;;  %vm3157_vm7 = vcmp.lt.f32.partialorder %v3156_v49, 0.0004427343  ;;  %vm10669_vm10 = vcmp.lt.f32.partialorder %v2958_v56, 0.0004427343  ;;  %v3028_v23 = vadd.f32 1.0, %v3027_v9  ;;  %7416 = vlog2.f32 %v3042_v45 }
 0x420   : > { %6861 = vmatpush1.bf16.msra.mxu0 %v13925_v32  ;;  %v3158_v12 = vsel %vm3157_vm7, %v3155_v20, %v3152_v4  ;;  %vm10673_vm13 = vcmp.lt.f32.partialorder %v3030_v33, 0.0004427343  ;;  %7418 = vlog2.f32 %v3096_v7  ;;  %v3168_v28 = vadd.f32 1.0, %v10550_v58 }
 0x421   : > { %v7409_v15 = vpop.eup %7408  ;;  %v3222_v10 = vmul.f32 0.01, %v3158_v12  ;;  %vm13930_vm15 = vcmask 261120   ;;  %v2957_v52 = vmul.f32 %v10408_v44, %v2956_v3  ;;  %v2974_v57 = vadd.f32 1.0, %v2973_v30  ;;  %v13936_v44 = vld [vmem:[#allocation19_spill] sm:$0xff] }
 0x422   : > { %v10678_v46 = vpop.eup %7410  ;;  %v2954_v47 = vmul.f32 0.6931472, %v7409_v15  ;;  %vm13933_vm2 = vcmp.gt.f32.partialorder %v13932_v62, 20.0  ;;  %v13934_v63 = vmov 0.0   ;;  %v2976_v48 = vand.u32 2147483647, %v10416_v39  ;;  %vm13938_vm11 = vmmov %vm13930_vm15 }
 0x423   : > { %6720 = vmatmul.mubr.msk.f32.vlgmr.msra.gmra.mrb[48].mxu0 %vm13930_vm15, %v10665_v2  ;;  %v3246_v25 = vsel %vm13933_vm2, %v13931_v50, %v3214_v1  ;;  %v3045_v6 = vmul.f32 -0.5, %v10452_v17  ;;  %7420 = vlog2.f32 %v3168_v28  ;;  %v7413_v49 = vpop.eup %7412  ;;  %vm13937_vm1 = vcmp.gt.f32.partialorder %v13936_v44, 20.0  ;;  %v10717_v3 = vld [vmem:[%s13299_s7 + $0x10] sm:$0xff]  ;;  %vm13948_vm14 = vmmov %vm13938_vm11 }
 0x424   : > { %3359 = vmatprep.mubr.f32.mxu0 %v13934_v63  ;;  %v3254_v37 = vsel %vm13937_vm1, %v13935_v14, %v3222_v10  ;;  %v2960_v41 = vsel %vm10669_vm10, %v2957_v52, %v2954_v47  ;;  %v3099_v53 = vmul.f32 -0.5, %v10513_v42  ;;  %v3114_v5 = vadd.f32 1.0, %v10667_v21  ;;  %vm13949_vm9 = vmmov %vm13938_vm11 }
 0x425   : > { %v6866_v40 = vpack.c.bf16 %v3254_v37, %v3246_v25  ;;  %v3026_v8 = vmul.f32 0.6931472, %v7413_v49  ;;  %v3029_v24 = vmul.f32 %v10435_v35, %v3028_v23  ;;  %v3048_v55 = vand.u32 2147483647, %v10452_v17  ;;  %v13944_v23 = vld [vmem:[#allocation20_spill] sm:$0xff]  ;;  %vm13951_vm10 = vmmov %vm13949_vm9 }
 0x426   : > { %v7415_v43 = vpop.eup %7414  ;;  %v3200_v56 = vmul.f32 0.01, %v2960_v41  ;;  %v2975_v0 = vmul.f32 %v10416_v39, %v2974_v57  ;;  %v3171_v60 = vmul.f32 -0.5, %v10550_v58  ;;  %7422 = vlog2.f32 %v3114_v5  ;;  %v13953_v5 = vld [vmem:[#allocation35_spill] sm:$0xff] }
 0x427   : > { %6721 = vmatmul.mubr.msk.f32.gmra.mrb[50].mxu0 %vm13938_vm11, %v10690_v22  ;;  %6867 = vmatprep.subr.bf16.mxu1 %v6866_v40  ;;  %v3032_v9 = vsel %vm10673_vm13, %v3029_v24, %v3026_v8  ;;  %v2972_v33 = vmul.f32 0.6931472, %v7415_v43  ;;  %vm10709_vm4 = vcmp.lt.f32.partialorder %v2976_v48, 0.0004427343  ;;  %v3046_v35 = vadd.f32 1.0, %v3045_v6  ;;  %v13955_v8 = vld [vmem:[#allocation31_spill] sm:$0xff]  ;;  %vm13958_vm11 = vmmov %vm13949_vm9 }
 0x428   : > { %3365 = vmatprep.mubr.f32.mxu0 %v13934_v63  ;;  %v13941_v39 = vpack.c.bf16 %v10357_v54, %v10349_v19  ;;  %v3208_v30 = vmul.f32 0.01, %v3032_v9  ;;  %v3100_v45 = vadd.f32 1.0, %v3099_v53  ;;  %v3117_v7 = vmul.f32 -0.5, %v10667_v21  ;;  %v13946_v54 = vld [vmem:[#allocation27_spill] sm:$0xff]  ;;  %v13952_v53 = vld [vmem:[#allocation33_spill] sm:$0xff] }
 0x429   : > { %v3186_v4 = vadd.f32 1.0, %v10678_v46  ;;  %v2978_v20 = vsel %vm10709_vm4, %v2975_v0, %v2972_v33  ;;  %vm10726_vm12 = vcmp.lt.f32.partialorder %v3048_v55, 0.0004427343  ;;  %v3102_v32 = vand.u32 2147483647, %v10513_v42  ;;  %v7417_v16 = vpop.eup %7416  ;;  %v13956_v24 = vld [vmem:[#allocation26_spill] sm:$0xff] }
 0x42a   : > { %6869 = vmatpush1.bf16.msra.mxu1 %v13941_v39  ;;  %vm13945_vm3 = vcmp.gt.f32.partialorder %v10239_v29, 20.0  ;;  %vm13947_vm8 = vcmp.gt.f32.partialorder %v13946_v54, 20.0  ;;  %v3172_v12 = vadd.f32 1.0, %v3171_v60  ;;  %v7419_v51 = vpop.eup %7418  ;;  %v3044_v10 = vmul.f32 0.6931472, %v7417_v16  ;;  %v13959_v9 = vld [vmem:[#allocation32_spill] sm:$0xff] }
 0x42b   : > { %v3232_v19 = vsel %vm13945_vm3, %v13944_v23, %v3200_v56  ;;  %v3240_v15 = vsel %vm13947_vm8, %v10276_v34, %v3208_v30  ;;  %6722 = vmatmul.mubr.msk.f32.gmra.mrb[52].mxu0 %vm13948_vm14, %v10717_v3  ;;  %7424 = vlog2.f32 %v3186_v4  ;;  %v3047_v47 = vmul.f32 %v10452_v17, %v3046_v35  ;;  %v13960_v33 = vld [vmem:[#allocation36_spill] sm:$0xff]  ;;  %v13962_v35 = vld [vmem:[#allocation23_spill] sm:$0xff]  ;;  %v13966_v54 = vld [vmem:[#allocation38_spill] sm:$0xff] }
 0x42c   : > { %v6870_v28 = vpack.c.bf16 %v3240_v15, %v3232_v19  ;;  %v3174_v29 = vand.u32 2147483647, %v10550_v58  ;;  %3519 = vmatprep.mubr.f32.mxu0 %v13934_v63  ;;  %v3202_v34 = vmul.f32 0.01, %v2978_v20  ;;  %v3098_v52 = vmul.f32 0.6931472, %v7419_v51 }
 0x42d   : > { %6723 = vmatmul.mubr.msk.f32.vlgmr.msra.gmra.mrb[48].mxu1 %vm13949_vm9, %v10665_v2  ;;  %v3101_v57 = vmul.f32 %v10513_v42, %v3100_v45  ;;  %v3118_v50 = vadd.f32 1.0, %v3117_v7  ;;  %v7421_v62 = vpop.eup %7420  ;;  %v3050_v25 = vsel %vm10726_vm12, %v3047_v47, %v3044_v10  ;;  %vm3103_vm7 = vcmp.lt.f32.partialorder %v3102_v32, 0.0004427343  ;;  %v13963_v45 = vld [vmem:[#allocation41_spill] sm:$0xff]  ;;  %v13964_v7 = vld [vmem:[#allocation40_spill] sm:$0xff]  ;;  %v4011_v47 = vld [vmem:[%s13302_s10 + $0x10] sm:$0xff] }
 0x42e   : > { %3442 = vmatprep.mubr.f32.mxu1 %v13934_v63  ;;  %6871 = vmatprep.subr.bf16.mxu0 %v6870_v28  ;;  %v3120_v48 = vand.u32 2147483647, %v10667_v21  ;;  %v3189_v17 = vmul.f32 -0.5, %v10678_v46  ;;  %v3210_v6 = vmul.f32 0.01, %v3050_v25  ;;  %v13950_v49 = vpack.c.bf16 %v10496_v38, %v10468_v11  ;;  %v7778_v19 = vld [vmem:[%s8008_s22 + $0x8] sm:$0xff] }
 0x42f   : > { %v3104_v14 = vsel %vm3103_vm7, %v3101_v57, %v3098_v52  ;;  %v3170_v44 = vmul.f32 0.6931472, %v7421_v62  ;;  %v3173_v42 = vmul.f32 %v10550_v58, %v3172_v12  ;;  %vm3175_vm13 = vcmp.lt.f32.partialorder %v3174_v29, 0.0004427343  ;;  %v13968_v51 = vld [vmem:[#allocation37_spill] sm:$0xff]  ;;  %v4012_v29 = vld [vmem:[%s13302_s10 + $0x18] sm:$0xff] }
 0x430   : > { %6873 = vmatpush1.bf16.msra.mxu0 %v13950_v49  ;;  %v3216_v37 = vmul.f32 0.01, %v3104_v14  ;;  %v7423_v41 = vpop.eup %7422  ;;  %vm13954_vm15 = vcmp.gt.f32.partialorder %v13953_v5, 20.0  ;;  %vm13957_vm2 = vcmp.gt.f32.partialorder %v13956_v24, 20.0  ;;  %v3119_v38 = vmul.f32 %v10667_v21, %v3118_v50 }
 0x431   : > { %6724 = vmatmul.mubr.msk.f32.gmra.mrb[50].mxu1 %vm13951_vm10, %v10690_v22  ;;  %v3234_v40 = vsel %vm13954_vm15, %v13952_v53, %v3202_v34  ;;  %v3242_v55 = vsel %vm13957_vm2, %v13955_v8, %v3210_v6  ;;  %v3176_v11 = vsel %vm3175_vm13, %v3173_v42, %v3170_v44  ;;  %v3116_v56 = vmul.f32 0.6931472, %v7423_v41  ;;  %v10860_v34 = vpop.permute.xlu0 %3267 }
 0x432   : > { %3448 = vmatprep.mubr.f32.mxu1 %v13934_v63  ;;  %v6878_v58 = vpack.c.bf16 %v3242_v55, %v3234_v40  ;;  %v3224_v43 = vmul.f32 0.01, %v3176_v11  ;;  %v3190_v0 = vadd.f32 1.0, %v3189_v17  ;;  %vm3121_vm1 = vcmp.lt.f32.partialorder %v3120_v48, 0.0004427343  ;;  %v10871_v48 = vpop.permute.xlu1 %3272 }
 0x433   : > { %v3192_v60 = vand.u32 2147483647, %v10678_v46  ;;  %vm13961_vm4 = vcmp.gt.f32.partialorder %v13960_v33, 20.0  ;;  %v3122_v39 = vsel %vm3121_vm1, %v3119_v38, %v3116_v56  ;;  %v13965_v4 = vpack.c.bf16 %v13963_v45, %v13964_v7 }
 0x434   : > { %6879 = vmatprep.subr.bf16.mxu1 %v6878_v58  ;;  %v3248_v36 = vsel %vm13961_vm4, %v13959_v9, %v3216_v37  ;;  %v3256_v21 = vsel %vm2808_vm5, %v13962_v35, %v3224_v43  ;;  %v3191_v32 = vmul.f32 %v10678_v46, %v3190_v0  ;;  %v3218_v16 = vmul.f32 0.01, %v3122_v39  ;;  %vm13970_vm5 = vmmov %vm13949_vm9 }
 0x435   : > { %6725 = vmatmul.mubr.msk.f32.gmra.mrb[52].mxu1 %vm13958_vm11, %v10717_v3  ;;  %v7425_v30 = vpop.eup %7424  ;;  %v6874_v20 = vpack.c.bf16 %v3256_v21, %v3248_v36  ;;  %vm3193_vm12 = vcmp.lt.f32.partialorder %v3192_v60, 0.0004427343  ;;  %vm13976_vm9 = vcmask 64512   ;;  %v10893_v5 = vpop.permute.xlu0 %3277 }
 0x436   : > { %6881 = vmatpush1.bf16.msra.mxu1 %v13965_v4  ;;  %3602 = vmatprep.mubr.f32.mxu1 %v13934_v63  ;;  %v3188_v1 = vmul.f32 0.6931472, %v7425_v30  ;;  %v3250_v12 = vsel %vm2802_vm6, %v13966_v54, %v3218_v16  ;;  %vm13971_vm6 = vmmov %vm13970_vm5 }
 0x437   : > { %6875 = vmatprep.subr.bf16.mxu0 %v6874_v20  ;;  %vm13977_vm7 = vmmov %vm13976_vm9 }
 0x438   : > { %v3194_v23 = vsel %vm3193_vm12, %v3191_v32, %v3188_v1  ;;  %6877 = vmatpush1.bf16.msra.mxu0 %v6876_v13  ;;  %v7781_v13 = vld [vmem:[%s8008_s22 + $0x18] sm:$0xff]  ;;  %vm13978_vm10 = vmmov %vm13977_vm7 }
 0x439   : > { %v3226_v31 = vmul.f32 0.01, %v3194_v23  ;;  %4029 = vmatprep.subr.mxu0 %v7778_v19  ;;  %vm13979_vm13 = vmmov %vm13977_vm7 }
 0x43a   : > { %vm13980_vm15 = vmmov %vm13977_vm7 }
 0x43b   : > { %v3258_v46 = vsel %vm2810_vm0, %v13968_v51, %v3226_v31  ;;  %6726 = vmatmul.mubr.msk.f32.vlgmr.msra.gmra.mrb[54].mxu0 %vm13970_vm5, %v10665_v2  ;;  %vm13972_vm0 = vmmov %vm13970_vm5 }
 0x43c   : > { %v6882_v10 = vpack.c.bf16 %v3258_v46, %v3250_v12  ;;  %3525 = vmatprep.mubr.f32.mxu0 %v13934_v63  ;;  %4030 = vmatpush1.msra.mxu0 %v7779_v18  ;;  %vm13973_vm3 = vmmov %vm13972_vm0 }
 0x43d   : > { %4207 = vmatprep.subr.mxu0 %v7780_v27  ;;  %vm13974_vm8 = vmmov %vm13972_vm0 }
 0x43e   : > { %6883 = vmatprep.subr.bf16.mxu1 %v6882_v10  ;;  %vm13975_vm14 = vmmov %vm13972_vm0 }
 0x43f   : > { %6885 = vmatpush1.bf16.msra.mxu1 %v6884_v26  ;;  %6727 = vmatmul.mubr.msk.f32.gmra.mrb[56].mxu0 %vm13971_vm6, %v10690_v22  ;;  %v4009_v26 = vld [vmem:[%s13302_s10] sm:$0xff]  ;;  %vm13981_vm2 = vmmov %vm13977_vm7 }
 0x440   : > { %3531 = vmatprep.mubr.f32.mxu0 %v13934_v63  ;;  %4118 = vmatprep.subr.mxu1 %v7781_v13  ;;  %vm13982_vm1 = vmmov %vm13981_vm2 }
 0x441   : > { %vm13983_vm11 = vmmov %vm13982_vm1 }
 0x442   : > { %6729 = vmatmul.mubr.msk.f32.vlgmr.msra.gmra.mrb[54].mxu1 %vm13972_vm0, %v10665_v2  ;;  %v7784_v2 = vld [vmem:[%s8008_s22 + $0x20] sm:$0xff]  ;;  %vm13984_vm4 = vmmov %vm13982_vm1 }
 0x443   : > { %3608 = vmatprep.mubr.f32.mxu1 %v13934_v63  ;;  %6728 = vmatmul.mubr.msk.f32.gmra.mrb[58].mxu0 %vm13973_vm3, %v10717_v3  ;;  %vm13985_vm12 = vmmov %vm13982_vm1 }
 0x444   : > { %4093 = vmatprep.mubr.f32.mxu0 %v13934_v63  ;;  %4119 = vmatpush1.msra.mxu1 %v7782_v59  ;;  %vm13986_vm5 = vmmov %vm13982_vm1 }
 0x445   : > { %4296 = vmatprep.subr.mxu1 %v7783_v61  ;;  %vm13987_vm6 = vmmov %vm13982_vm1 }
 0x446   : > { %6730 = vmatmul.mubr.msk.f32.gmra.mrb[56].mxu1 %vm13974_vm8, %v10690_v22  ;;  %v7785_v22 = vld [vmem:[%s8008_s22 + $0x30] sm:$0xff]  ;;  %vm13988_vm0 = vmmov %vm13982_vm1  ;;  %s6606_s22 = sshll.u32 %s517_s19, 4  ;;  %s13252_s22 = int_to_ptr.vmem [resolvable:$true] %s6606_s22 }
 0x447   : > { %3614 = vmatprep.mubr.f32.mxu1 %v13934_v63  ;;  %6732 = vmatmul.mubr.msk.f32.vlgmr.msra.gmra.mrb[60].mxu0 %vm13976_vm9, %v4009_v26  ;;  %vm13989_vm3 = vmmov %vm13988_vm0  ;;  %s7786_s27 = scalar_lea.vmem %s13252_s22, 128  ;;  %p7793_p0 = scmp.lt.s32.totalorder %s13252_s22, %s7791_s23 }
 0x448   : > { %4099 = vmatprep.mubr.f32.mxu0 %v13934_v63  ;;  %4208 = vmatpush1.msra.mxu0 %v7784_v2  ;;  %vm13990_vm8 = vmmov %vm13988_vm0  ;;  %p7787_p11 = scmp.ne.s32.totalorder %s13252_s22, %s7786_s27  ;;  %p7794_p1 = scmp.lt.s32.totalorder %s7792_s25, %s7786_s27 }
 0x44a   : > { %6731 = vmatmul.mubr.msk.f32.gmra.mrb[58].mxu1 %vm13975_vm14, %v10717_v3  ;;  %v4010_v3 = vld [vmem:[%s13302_s10 + $0x8] sm:$0xff]  ;;  %vm13991_vm14 = vmmov %vm13988_vm0  ;;  %p7788_p12 = pnand %p7787_p11, %p7980_p5  ;;  %p7795_p2 = por %p7794_p1, %p7793_p0 }
 0x44b   : > { %4182 = vmatprep.mubr.f32.mxu1 %v13934_v63  ;;  %6733 = vmatmul.mubr.msk.f32.gmra.mrb[62].mxu0 %vm13978_vm10, %v4010_v3 }
 0x44c   : > { %4105 = vmatprep.mubr.f32.mxu0 %v13934_v63  ;;  %p7789_p13 = pneg %p7788_p12 }
 0x44e   : > { %6736 = vmatmul.mubr.msk.f32.vlgmr.msra.gmra.mrb[60].mxu1 %vm13977_vm7, %v4009_v26  ;;  %p7796_p3 = pnand %p7795_p2, %p7789_p13 }
 0x44f   : > { %4188 = vmatprep.mubr.f32.mxu1 %v13934_v63  ;;  %4297 = vmatpush1.msra.mxu1 %v7785_v22 }
 0x450   : > { %6734 = vmatmul.mubr.msk.f32.gmra.mrb[64].mxu0 %vm13980_vm15, %v4011_v47 }
 0x451   : > { %4111 = vmatprep.mubr.f32.mxu0 %v13934_v63 }
 0x452   : > { %6737 = vmatmul.mubr.msk.f32.gmra.mrb[62].mxu1 %vm13979_vm13, %v4010_v3 }
 0x453   : > { %4194 = vmatprep.mubr.f32.mxu1 %v13934_v63 }
 0x454   : > { %6735 = vmatmul.mubr.msk.f32.gmra.mrb[66].mxu0 %vm13982_vm1, %v4012_v29 }
 0x455   : > { %4271 = vmatprep.mubr.f32.mxu0 %v13934_v63 }
 0x456   : > { %6738 = vmatmul.mubr.msk.f32.gmra.mrb[64].mxu1 %vm13981_vm2, %v4011_v47 }
 0x457   : > { %4200 = vmatprep.mubr.f32.mxu1 %v13934_v63 }
 0x458   : > { %6740 = vmatmul.mubr.msk.f32.vlgmr.msra.gmra.mrb[68].mxu0 %vm13984_vm4, %v4009_v26 }
 0x459   : > { %4277 = vmatprep.mubr.f32.mxu0 %v13934_v63 }
 0x45a   : > { %6739 = vmatmul.mubr.msk.f32.gmra.mrb[66].mxu1 %vm13983_vm11, %v4012_v29 }
 0x45b   : > { %4360 = vmatprep.mubr.f32.mxu1 %v13934_v63 }
 0x45c   : > { %6741 = vmatmul.mubr.msk.f32.gmra.mrb[70].mxu0 %vm13986_vm5, %v4010_v3 }
 0x45d   : > { %4283 = vmatprep.mubr.f32.mxu0 %v13934_v63 }
 0x45e   : > { %6744 = vmatmul.mubr.msk.f32.vlgmr.msra.gmra.mrb[68].mxu1 %vm13985_vm12, %v4009_v26 }
 0x45f   : > { %4366 = vmatprep.mubr.f32.mxu1 %v13934_v63 }
 0x460   : > { %6742 = vmatmul.mubr.msk.f32.gmra.mrb[72].mxu0 %vm13988_vm0, %v4011_v47 }
 0x461   : > { %4289 = vmatprep.mubr.f32.mxu0 %v13934_v63 }
 0x462   : > { %6745 = vmatmul.mubr.msk.f32.gmra.mrb[70].mxu1 %vm13987_vm6, %v4010_v3 }
 0x463   : > { %4372 = vmatprep.mubr.f32.mxu1 %v13934_v63 }
 0x464   : > { %6743 = vmatmul.mubr.msk.f32.gmra.mrb[74].mxu0 %vm13990_vm8, %v4012_v29 }
 0x465   : > { %4462 = vmatprep.mubr.f32.mxu0 %v13934_v63 }
 0x466   : > { %6746 = vmatmul.mubr.msk.f32.gmra.mrb[72].mxu1 %vm13989_vm3, %v4011_v47 }
 0x467   : > { %4378 = vmatprep.mubr.f32.mxu1 %v13934_v63 }
 0x46a   : > { %6747 = vmatmul.mubr.msk.f32.gmra.mrb[74].mxu1 %vm13991_vm14, %v4012_v29 }
 0x46b   : > { %4551 = vmatprep.mubr.f32.mxu1 %v13934_v63 }
 0x4f6   : > { %v3355_v52 = vpop.f32.mrb[48].mxu0 }
 0x4f7   : > { %v10863_v57 = vadd.f32 %v3355_v52, %v10860_v34  ;;  %v3357_v50 = vpop.f32.mrb[49].mxu0 }
 0x4f8   : > { %v10866_v62 = vadd.f32 %v3357_v50, %v10860_v34 }
 0x4f9   : > { %v10869_v25 = vmul.f32 100.0, %v10863_v57 }
 0x4fa   : > { %v10874_v17 = vmul.f32 100.0, %v10866_v62  ;;  %v3361_v6 = vpop.f32.mrb[50].mxu0 }
 0x4fb   : > { %vm3645_vm9 = vcmp.gt.f32.partialorder %v10869_v25, 20.0  ;;  %v10878_v49 = vadd.f32 %v3361_v6, %v10871_v48  ;;  %v3363_v14 = vpop.f32.mrb[51].mxu0 }
 0x4fc   : > { %v3669_v44 = vsel %vm3645_vm9, 0.0, %v10869_v25  ;;  %vm3646_vm7 = vcmp.gt.f32.partialorder %v10874_v17, 20.0  ;;  %v10885_v42 = vadd.f32 %v3363_v14, %v10871_v48 }
 0x4fd   : > { %v3693_v37 = vmul.f32 1.442695, %v3669_v44  ;;  %v3670_v41 = vsel %vm3646_vm7, 0.0, %v10874_v17  ;;  %v10891_v53 = vmul.f32 100.0, %v10878_v49 }
 0x4fe   : > { %v10896_v40 = vmul.f32 100.0, %v10885_v42  ;;  %v3367_v8 = vpop.f32.mrb[52].mxu0  ;;  %v3695_v58 = vmul.f32 1.442695, %v3670_v41 }
 0x4ff   : > { %7426 = vpow2.f32 %v3693_v37  ;;  %vm3653_vm10 = vcmp.gt.f32.partialorder %v10891_v53, 20.0  ;;  %v10900_v55 = vadd.f32 %v3367_v8, %v10893_v5  ;;  %v3369_v11 = vpop.f32.mrb[53].mxu0 }
 0x500   : > { %v3438_v24 = vpop.f32.mrb[48].mxu1  ;;  %v3677_v56 = vsel %vm3653_vm10, 0.0, %v10891_v53  ;;  %vm3654_vm13 = vcmp.gt.f32.partialorder %v10896_v40, 20.0  ;;  %v10963_v59 = vadd.f32 %v3369_v11, %v10893_v5 }
 0x501   : > { %13992 = vst [vmem:[#allocation29_spill] sm:$0xff] %v10900_v55  ;;  %v10903_v38 = vadd.f32 %v3438_v24, %v10860_v34  ;;  %v3440_v43 = vpop.f32.mrb[49].mxu1  ;;  %v3709_v60 = vmul.f32 1.442695, %v3677_v56  ;;  %v10913_v9 = vmul.f32 100.0, %v10900_v55  ;;  %v3678_v39 = vsel %vm3654_vm13, 0.0, %v10896_v40 }
 0x502   : > { %v10909_v0 = vadd.f32 %v3440_v43, %v10860_v34  ;;  %v3711_v1 = vmul.f32 1.442695, %v3678_v39  ;;  %v10972_v6 = vmul.f32 100.0, %v10963_v59 }
 0x503   : > { %13993 = vst [vmem:[#allocation25_spill] sm:$0xff] %v10913_v9  ;;  %v10916_v33 = vmul.f32 100.0, %v10903_v38  ;;  %7428 = vpow2.f32 %v3709_v60  ;;  %vm13447_vm2 = vcmp.gt.f32.partialorder %v10913_v9, 20.0 }
 0x504   : > { %v10919_v36 = vmul.f32 100.0, %v10909_v0  ;;  %v3444_v35 = vpop.f32.mrb[50].mxu1  ;;  %7430 = vpow2.f32 %v3695_v58  ;;  %v3685_v16 = vsel %vm13447_vm2, 0.0, %v10913_v9 }
 0x505   : > { %vm3647_vm15 = vcmp.gt.f32.partialorder %v10916_v33, 20.0  ;;  %v10923_v21 = vadd.f32 %v3444_v35, %v10871_v48  ;;  %v3446_v30 = vpop.f32.mrb[51].mxu1  ;;  %v3725_v46 = vmul.f32 1.442695, %v3685_v16 }
 0x506   : > { %v3671_v45 = vsel %vm3647_vm15, 0.0, %v10916_v33  ;;  %vm3648_vm1 = vcmp.gt.f32.partialorder %v10919_v36, 20.0  ;;  %v10934_v7 = vadd.f32 %v3446_v30, %v10871_v48 }
 0x507   : > { %v3697_v4 = vmul.f32 1.442695, %v3671_v45  ;;  %v10937_v20 = vmul.f32 100.0, %v10923_v21  ;;  %v3672_v31 = vsel %vm3648_vm1, 0.0, %v10919_v36 }
 0x508   : > { %v10940_v32 = vmul.f32 100.0, %v10934_v7  ;;  %v3450_v23 = vpop.f32.mrb[52].mxu1  ;;  %v3699_v18 = vmul.f32 1.442695, %v3672_v31 }
 0x509   : > { %7432 = vpow2.f32 %v3697_v4  ;;  %vm3655_vm11 = vcmp.gt.f32.partialorder %v10937_v20, 20.0  ;;  %v10950_v19 = vadd.f32 %v3450_v23, %v10893_v5  ;;  %v3452_v54 = vpop.f32.mrb[53].mxu1  ;;  %v7427_v15 = vpop.eup %7426 }
 0x50a   : > { %v3679_v12 = vsel %vm3655_vm11, 0.0, %v10937_v20  ;;  %vm3656_vm4 = vcmp.gt.f32.partialorder %v10940_v32, 20.0  ;;  %v3741_v51 = vadd.f32 1.0, %v7427_v15  ;;  %v3744_v10 = vmul.f32 -0.5, %v7427_v15 }
 0x50b   : > { %13994 = vst [vmem:[#allocation11_spill] sm:$0xff] %v10950_v19  ;;  %v3713_v28 = vmul.f32 1.442695, %v3679_v12  ;;  %7434 = vpow2.f32 %v3711_v1  ;;  %v3680_v27 = vsel %vm3656_vm4, 0.0, %v10940_v32  ;;  %v10960_v13 = vmul.f32 100.0, %v10950_v19 }
 0x50c   : > { %7436 = vlog2.f32 %v3741_v51  ;;  %v3747_v26 = vand.u32 2147483647, %v7427_v15  ;;  %v3745_v47 = vadd.f32 1.0, %v3744_v10  ;;  %v3715_v29 = vmul.f32 1.442695, %v3680_v27 }
 0x50d   : > { %13995 = vst [vmem:[#allocation21_spill] sm:$0xff] %v10960_v13  ;;  %v7429_v61 = vpop.eup %7428  ;;  %7438 = vpow2.f32 %v3713_v28  ;;  %vm13443_vm12 = vcmp.gt.f32.partialorder %v10960_v13, 20.0  ;;  %v10987_v11 = vadd.f32 %v3452_v54, %v10893_v5 }
 0x50e   : > { %v3813_v2 = vadd.f32 1.0, %v7429_v61  ;;  %7440 = vpow2.f32 %v3725_v46  ;;  %v3521_v22 = vpop.f32.mrb[54].mxu0  ;;  %v10965_v3 = vpop.eup %7430  ;;  %v3816_v14 = vmul.f32 -0.5, %v7429_v61  ;;  %v3819_v44 = vand.u32 2147483647, %v7429_v61 }
 0x50f   : > { %7442 = vpow2.f32 %v3699_v18  ;;  %v10968_v52 = vadd.f32 %v3521_v22, %v10860_v34  ;;  %v3523_v50 = vpop.f32.mrb[55].mxu0  ;;  %vm10982_vm5 = vcmp.lt.f32.partialorder %v3747_v26, 0.0004427343  ;;  %v3750_v43 = vadd.f32 1.0, %v10965_v3 }
 0x510   : > { %7444 = vlog2.f32 %v3813_v2  ;;  %v10978_v41 = vadd.f32 %v3523_v50, %v10860_v34  ;;  %v10991_v56 = vmul.f32 -0.5, %v10965_v3  ;;  %v3746_v60 = vmul.f32 %v7427_v15, %v3745_v47 }
 0x511   : > { %v10975_v37 = vmul.f32 100.0, %v10968_v52  ;;  %7446 = vpow2.f32 %v3715_v29  ;;  %v3687_v30 = vsel %vm13443_vm12, 0.0, %v10960_v13  ;;  %v3817_v23 = vadd.f32 1.0, %v3816_v14 }
 0x512   : > { %v3527_v58 = vpop.f32.mrb[56].mxu0  ;;  %v11002_v4 = vmul.f32 100.0, %v10978_v41  ;;  %vm11009_vm0 = vcmp.lt.f32.partialorder %v3819_v44, 0.0004427343  ;;  %v3729_v22 = vmul.f32 1.442695, %v3687_v30 }
 0x513   : > { %v10980_v8 = vpop.eup %7432  ;;  %vm3649_vm6 = vcmp.gt.f32.partialorder %v10975_v37, 20.0  ;;  %v3529_v39 = vpop.f32.mrb[57].mxu0  ;;  %v11005_v1 = vadd.f32 %v3527_v58, %v10871_v48 }
 0x514   : > { %v3759_v35 = vadd.f32 1.0, %v10980_v8  ;;  %v3673_v45 = vsel %vm3649_vm6, 0.0, %v10975_v37  ;;  %v3762_v51 = vmul.f32 -0.5, %v10980_v8  ;;  %v11021_v18 = vadd.f32 %v3529_v39, %v10871_v48 }
 0x515   : > { %v11007_v16 = vpop.eup %7434  ;;  %v3701_v54 = vmul.f32 1.442695, %v3673_v45  ;;  %v3604_v15 = vpop.f32.mrb[54].mxu1  ;;  %v11018_v10 = vmul.f32 100.0, %v11005_v1  ;;  %vm3650_vm3 = vcmp.gt.f32.partialorder %v11002_v4, 20.0  ;;  %v3818_v39 = vmul.f32 %v7429_v61, %v3817_v23 }
 0x516   : > { %7448 = vlog2.f32 %v3759_v35  ;;  %v7437_v12 = vpop.eup %7436  ;;  %v11015_v28 = vadd.f32 %v3604_v15, %v10860_v34  ;;  %v3606_v46 = vpop.f32.mrb[55].mxu1  ;;  %v3765_v50 = vand.u32 2147483647, %v10980_v8  ;;  %v3763_v15 = vadd.f32 1.0, %v3762_v51 }
 0x517   : > { %v11023_v27 = vpop.f32.mrb[58].mxu0  ;;  %v11025_v26 = vpop.eup %7438  ;;  %v3743_v2 = vmul.f32 0.6931472, %v7437_v12  ;;  %7450 = vpow2.f32 %v3701_v54  ;;  %v11042_v30 = vadd.f32 %v3606_v46, %v10860_v34  ;;  %vm3657_vm8 = vcmp.gt.f32.partialorder %v11018_v10, 20.0 }
 0x518   : > { %v11028_v47 = vpop.f32.mrb[59].mxu0  ;;  %v11030_v29 = vpop.eup %7440  ;;  %v3831_v14 = vadd.f32 1.0, %v11025_v26  ;;  %v11035_v44 = vmul.f32 100.0, %v11015_v28  ;;  %7452 = vlog2.f32 %v3750_v43  ;;  %v3674_v12 = vsel %vm3650_vm3, 0.0, %v11002_v4 }
 0x519   : > { %v11037_v58 = vpop.eup %7442  ;;  %v3749_v35 = vsel %vm10982_vm5, %v3746_v60, %v3743_v2  ;;  %14000 = vst [vmem:[#allocation24_spill] sm:$0xff] %v11042_v30  ;;  %v3610_v45 = vpop.f32.mrb[56].mxu1  ;;  %v11049_v43 = vmul.f32 100.0, %v11021_v18  ;;  %v11053_v34 = vmul.f32 100.0, %v11042_v30  ;;  %vm11055_vm5 = vcmp.lt.f32.partialorder %v3765_v50, 0.0004427343 }
 0x51a   : > { %v7445_v54 = vpop.eup %7444  ;;  %7454 = vlog2.f32 %v3831_v14  ;;  %v3612_v63 = vpop.f32.mrb[57].mxu1  ;;  %v3957_v24 = vmul.f32 0.01, %v3749_v35  ;;  %vm3651_vm14 = vcmp.gt.f32.partialorder %v11035_v44, 20.0  ;;  %v3834_v23 = vmul.f32 -0.5, %v11025_v26 }
 0x51b   : > { %v3815_v60 = vmul.f32 0.6931472, %v7445_v54  ;;  %14001 = vst [vmem:[#allocation13_spill] sm:$0xff] %v11053_v34  ;;  %v3675_v51 = vsel %vm3651_vm14, 0.0, %v11035_v44  ;;  %v3681_v46 = vsel %vm3657_vm8, 0.0, %v11018_v10  ;;  %v11066_v2 = vpop.eup %7446  ;;  %vm3652_vm12 = vcmp.gt.f32.partialorder %v11053_v34, 20.0 }
 0x51c   : > { %v3705_v35 = vmul.f32 1.442695, %v3675_v51  ;;  %v3717_v50 = vmul.f32 1.442695, %v3681_v46  ;;  %v3703_v13 = vmul.f32 1.442695, %v3674_v12  ;;  %v11072_v19 = vadd.f32 %v3610_v45, %v10871_v48 }
 0x51d   : > { %v3821_v14 = vsel %vm11009_vm0, %v3818_v39, %v3815_v60  ;;  %v3616_v54 = vpop.f32.mrb[58].mxu1  ;;  %vm3658_vm2 = vcmp.gt.f32.partialorder %v11049_v43, 20.0  ;;  %v11080_v31 = vsel %vm3645_vm9, %v10863_v57, %v3957_v24  ;;  %v3676_v39 = vsel %vm3652_vm12, 0.0, %v11053_v34 }
 0x51e   : > { %v3965_v30 = vmul.f32 0.01, %v3821_v14  ;;  %v11075_v9 = vpop.f32.mrb[59].mxu1  ;;  %7456 = vpow2.f32 %v3705_v35  ;;  %v11086_v12 = vadd.f32 %v3612_v63, %v10871_v48  ;;  %v11094_v51 = vmul.f32 100.0, %v11072_v19 }
 0x51f   : > { %7458 = vpow2.f32 %v3717_v50  ;;  %v3764_v25 = vmul.f32 %v10980_v8, %v3763_v15  ;;  %v3835_v46 = vadd.f32 1.0, %v3834_v23  ;;  %v3682_v63 = vsel %vm3658_vm2, 0.0, %v11049_v43 }
 0x520   : > { %v7449_v55 = vpop.eup %7448  ;;  %14004 = vst [vmem:[#allocation30_spill] sm:$0xff] %v11086_v12  ;;  %v11091_v60 = vsel %vm3653_vm10, %v10878_v49, %v3965_v30  ;;  %v3837_v53 = vand.u32 2147483647, %v11025_v26  ;;  %7460 = vpow2.f32 %v3729_v22  ;;  %vm3659_vm9 = vcmp.gt.f32.partialorder %v11094_v51, 20.0 }
 0x521   : > { %v3761_v45 = vmul.f32 0.6931472, %v7449_v55  ;;  %v7451_v57 = vpop.eup %7450  ;;  %v3707_v55 = vmul.f32 1.442695, %v3676_v39  ;;  %7462 = vpow2.f32 %v3703_v13  ;;  %v3822_v8 = vadd.f32 1.0, %v11007_v16 }
 0x522   : > { %v7453_v48 = vpop.eup %7452  ;;  %v3777_v49 = vadd.f32 1.0, %v7451_v57  ;;  %v3683_v23 = vsel %vm3659_vm9, 0.0, %v11094_v51  ;;  %v3719_v14 = vmul.f32 1.442695, %v3682_v63  ;;  %v11111_v35 = vmul.f32 100.0, %v11086_v12 }
 0x523   : > { %v3767_v30 = vsel %vm11055_vm5, %v3764_v25, %v3761_v45  ;;  %v3836_v50 = vmul.f32 %v11025_v26, %v3835_v46  ;;  %v3780_v61 = vmul.f32 -0.5, %v7451_v57  ;;  %v3721_v39 = vmul.f32 1.442695, %v3683_v23 }
 0x524   : > { %v7455_v15 = vpop.eup %7454  ;;  %7464 = vlog2.f32 %v3777_v49  ;;  %14005 = vst [vmem:[#allocation17_spill] sm:$0xff] %v11111_v35  ;;  %v3959_v13 = vmul.f32 0.01, %v3767_v30  ;;  %vm3838_vm10 = vcmp.lt.f32.partialorder %v3837_v53, 0.0004427343  ;;  %v11116_v45 = vadd.f32 %v11023_v27, %v10893_v5 }
 0x525   : > { %v3833_v22 = vmul.f32 0.6931472, %v7455_v15  ;;  %7466 = vpow2.f32 %v3707_v55  ;;  %v11119_v49 = vmul.f32 100.0, %v10987_v11  ;;  %v3756_v63 = vand.u32 2147483647, %v10965_v3 }
 0x526   : > { %14006 = vst [vmem:[#allocation15_spill] sm:$0xff] %v11116_v45  ;;  %7468 = vpow2.f32 %v3721_v39  ;;  %vm13458_vm0 = vcmp.gt.f32.partialorder %v11111_v35, 20.0  ;;  %v11124_v26 = vmul.f32 100.0, %v11116_v45  ;;  %v3781_v53 = vadd.f32 1.0, %v3780_v61 }
 0x527   : > { %v3839_v25 = vsel %vm3838_vm10, %v3836_v50, %v3833_v22  ;;  %7470 = vpow2.f32 %v3719_v14  ;;  %v3783_v55 = vand.u32 2147483647, %v7451_v57  ;;  %v3754_v27 = vadd.f32 1.0, %v10991_v56 }
 0x528   : > { %v3967_v24 = vmul.f32 0.01, %v3839_v25  ;;  %14007 = vst [vmem:[#allocation14_spill] sm:$0xff] %v11124_v26  ;;  %v7457_v46 = vpop.eup %7456  ;;  %7472 = vlog2.f32 %v3822_v8  ;;  %v11130_v15 = vsel %vm3647_vm15, %v10903_v38, %v3959_v13  ;;  %v11138_v22 = vadd.f32 %v3616_v54, %v10893_v5 }
 0x529   : > { %v7459_v30 = vpop.eup %7458  ;;  %v3795_v14 = vadd.f32 1.0, %v7457_v46  ;;  %v3684_v8 = vsel %vm13458_vm0, 0.0, %v11111_v35  ;;  %v3752_v33 = vmul.f32 0.6931472, %v7453_v48  ;;  %v3798_v61 = vmul.f32 -0.5, %v7457_v46 }
 0x52a   : > { %v11135_v23 = vsel %vm3655_vm11, %v10923_v21, %v3967_v24  ;;  %14008 = vst [vmem:[#allocation18_spill] sm:$0xff] %v11138_v22  ;;  %v3849_v56 = vadd.f32 1.0, %v7459_v30  ;;  %v11145_v38 = vpop.eup %7460  ;;  %v3852_v20 = vmul.f32 -0.5, %v7459_v30  ;;  %vm13455_vm15 = vcmp.gt.f32.partialorder %v11124_v26, 20.0 }
 0x52b   : > { %7474 = vlog2.f32 %v3795_v14  ;;  %v11148_v21 = vpop.eup %7462  ;;  %vm11150_vm11 = vcmp.lt.f32.partialorder %v3783_v55, 0.0004427343  ;;  %v3755_v24 = vmul.f32 %v10965_v3, %v3754_v27  ;;  %vm11155_vm5 = vcmp.lt.f32.partialorder %v3756_v63, 0.0004427343 }
 0x52c   : > { %7476 = vlog2.f32 %v3849_v56  ;;  %v3782_v13 = vmul.f32 %v7451_v57, %v3781_v53  ;;  %v3723_v25 = vmul.f32 1.442695, %v3684_v8  ;;  %v11160_v14 = vmul.f32 100.0, %v11138_v22 }
 0x52d   : > { %v11164_v50 = vadd.f32 %v11028_v47, %v10893_v5  ;;  %vm3662_vm10 = vcmp.gt.f32.partialorder %v10972_v6, 20.0  ;;  %v3855_v56 = vand.u32 2147483647, %v7459_v30  ;;  %v3689_v3 = vsel %vm13455_vm15, 0.0, %v11124_v26 }
 0x52e   : > { %v7465_v48 = vpop.eup %7464  ;;  %v3825_v63 = vmul.f32 -0.5, %v11007_v16  ;;  %v3799_v57 = vadd.f32 1.0, %v3798_v61  ;;  %v3801_v53 = vand.u32 2147483647, %v7457_v46  ;;  %v3853_v8 = vadd.f32 1.0, %v3852_v20 }
 0x52f   : > { %14013 = vst [vmem:[#allocation22_spill] sm:$0xff] %v11164_v50  ;;  %v3779_v55 = vmul.f32 0.6931472, %v7465_v48  ;;  %v11171_v27 = vpop.eup %7466  ;;  %v3758_v22 = vsel %vm11155_vm5, %v3755_v24, %v3752_v33  ;;  %v11181_v45 = vadd.f32 %v11075_v9, %v10893_v5  ;;  %v3768_v35 = vadd.f32 1.0, %v11037_v58 }
 0x530   : > { %v11175_v47 = vpop.eup %7468  ;;  %v3826_v26 = vadd.f32 1.0, %v3825_v63  ;;  %v3733_v20 = vmul.f32 1.442695, %v3689_v3  ;;  %vm3667_vm15 = vcmp.gt.f32.partialorder %v11160_v14, 20.0  ;;  %v3828_v33 = vand.u32 2147483647, %v11007_v16 }
 0x531   : > { %v3785_v48 = vsel %vm11150_vm11, %v3782_v13, %v3779_v55  ;;  %v11184_v12 = vpop.eup %7470  ;;  %v3867_v61 = vadd.f32 1.0, %v11175_v47  ;;  %vm11189_vm5 = vcmp.lt.f32.partialorder %v3855_v56, 0.0004427343  ;;  %7478 = vpow2.f32 %v3723_v25 }
 0x532   : > { %v7473_v24 = vpop.eup %7472  ;;  %v11194_v5 = vmul.f32 100.0, %v11164_v50  ;;  %v3958_v9 = vmul.f32 0.01, %v3758_v22  ;;  %v3961_v39 = vmul.f32 0.01, %v3785_v48  ;;  %v3800_v13 = vmul.f32 %v7457_v46, %v3799_v57 }
 0x533   : > { %vm11196_vm11 = vcmp.lt.f32.partialorder %v3801_v53, 0.0004427343  ;;  %v3854_v3 = vmul.f32 %v7459_v30, %v3853_v8  ;;  %7480 = vlog2.f32 %v3867_v61  ;;  %v3691_v56 = vsel %vm3667_vm15, 0.0, %v11160_v14 }
 0x534   : > { %v3824_v63 = vmul.f32 0.6931472, %v7473_v24  ;;  %v3827_v34 = vmul.f32 %v11007_v16, %v3826_v26  ;;  %7482 = vlog2.f32 %v3768_v35  ;;  %v3870_v50 = vmul.f32 -0.5, %v11175_v47 }
 0x535   : > { %v7475_v25 = vpop.eup %7474  ;;  %7484 = vpow2.f32 %v3733_v20  ;;  %vm3829_vm0 = vcmp.lt.f32.partialorder %v3828_v33, 0.0004427343  ;;  %v3840_v46 = vadd.f32 1.0, %v11066_v2  ;;  %v3873_v57 = vand.u32 2147483647, %v11175_v47 }
 0x536   : > { %v7477_v22 = vpop.eup %7476  ;;  %v3830_v30 = vsel %vm3829_vm0, %v3827_v34, %v3824_v63  ;;  %v3982_v53 = vsel %vm3646_vm7, %v10866_v62, %v3958_v9  ;;  %v3771_v8 = vmul.f32 -0.5, %v11037_v58  ;;  %v11214_v16 = vsel %vm3649_vm6, %v10968_v52, %v3961_v39 }
 0x537   : > { %v3851_v35 = vmul.f32 0.6931472, %v7477_v22  ;;  %v3966_v26 = vmul.f32 0.01, %v3830_v30  ;;  %7486 = vlog2.f32 %v3840_v46  ;;  %v3797_v48 = vmul.f32 0.6931472, %v7475_v25 }
 0x538   : > { %v3843_v61 = vmul.f32 -0.5, %v11066_v2  ;;  %v3686_v34 = vsel %vm3662_vm10, 0.0, %v10972_v6  ;;  %vm3664_vm0 = vcmp.gt.f32.partialorder %v11119_v49, 20.0  ;;  %v3871_v17 = vadd.f32 1.0, %v3870_v50 }
 0x539   : > { %v3857_v62 = vsel %vm11189_vm5, %v3854_v3, %v3851_v35  ;;  %v3990_v52 = vsel %vm3654_vm13, %v10885_v42, %v3966_v26  ;;  %v3774_v37 = vand.u32 2147483647, %v11037_v58  ;;  %v3727_v24 = vmul.f32 1.442695, %v3686_v34 }
 0x53a   : > { %v3969_v20 = vmul.f32 0.01, %v3857_v62  ;;  %v6886_v33 = vpack.c.bf16 %v3990_v52, %v3982_v53  ;;  %v3688_v9 = vsel %vm3664_vm0, 0.0, %v11119_v49  ;;  %v3772_v39 = vadd.f32 1.0, %v3771_v8 }
 0x53b   : > { %v3846_v63 = vand.u32 2147483647, %v11066_v2  ;;  %v3731_v25 = vmul.f32 1.442695, %v3688_v9  ;;  %v3885_v54 = vadd.f32 1.0, %v11030_v29  ;;  %v11232_v50 = vpop.eup %7478  ;;  %v3803_v42 = vsel %vm11196_vm11, %v3800_v13, %v3797_v48 }
 0x53c   : > { %v11239_v40 = vsel %vm3657_vm8, %v11005_v1, %v3969_v20  ;;  %6887 = vmatprep.subr.bf16.mxu0 %v6886_v33  ;;  %v3844_v3 = vadd.f32 1.0, %v3843_v61  ;;  %7488 = vpow2.f32 %v3727_v24  ;;  %v3737_v30 = vmul.f32 1.442695, %v3691_v56 }
 0x53d   : > { %v7481_v46 = vpop.eup %7480  ;;  %v6896_v22 = vpack.c.bf16 %v11239_v40, %v11214_v16  ;;  %v14018_v53 = vpack.c.bf16 %v11091_v60, %v11080_v31  ;;  %7490 = vpow2.f32 %v3731_v25  ;;  %v3903_v13 = vadd.f32 1.0, %v11145_v38 }
 0x53e   : > { %v7483_v55 = vpop.eup %7482  ;;  %v3869_v8 = vmul.f32 0.6931472, %v7481_v46  ;;  %v3872_v1 = vmul.f32 %v11175_v47, %v3871_v17  ;;  %vm3874_vm7 = vcmp.lt.f32.partialorder %v3873_v57, 0.0004427343  ;;  %7492 = vlog2.f32 %v3885_v54 }
 0x53f   : > { %6889 = vmatpush1.bf16.msra.mxu0 %v14018_v53  ;;  %v11248_v10 = vpop.eup %7484  ;;  %v3963_v35 = vmul.f32 0.01, %v3803_v42  ;;  %v3770_v26 = vmul.f32 0.6931472, %v7483_v55  ;;  %v3773_v48 = vmul.f32 %v11037_v58, %v3772_v39  ;;  %vm11251_vm13 = vcmp.lt.f32.partialorder %v3774_v37, 0.0004427343 }
 0x540   : > { %v3875_v31 = vsel %vm3874_vm7, %v3872_v1, %v3869_v8  ;;  %v3845_v60 = vmul.f32 %v11066_v2, %v3844_v3  ;;  %vm11256_vm6 = vcmp.lt.f32.partialorder %v3846_v63, 0.0004427343  ;;  %v3786_v47 = vadd.f32 1.0, %v11148_v21 }
 0x541   : > { %v7487_v57 = vpop.eup %7486  ;;  %v3971_v34 = vmul.f32 0.01, %v3875_v31  ;;  %v3776_v62 = vsel %vm11251_vm13, %v3773_v48, %v3770_v26  ;;  %v3888_v58 = vmul.f32 -0.5, %v11030_v29  ;;  %7494 = vlog2.f32 %v3903_v13 }
 0x542   : > { %v3842_v17 = vmul.f32 0.6931472, %v7487_v57  ;;  %v3891_v52 = vand.u32 2147483647, %v11030_v29  ;;  %v3906_v37 = vmul.f32 -0.5, %v11145_v38  ;;  %7496 = vlog2.f32 %v3786_v47 }
 0x543   : > { %v11269_v2 = vsel %vm3651_vm14, %v11015_v28, %v3963_v35  ;;  %v11274_v20 = vsel %vm3659_vm9, %v11072_v19, %v3971_v34  ;;  %v3960_v33 = vmul.f32 0.01, %v3776_v62  ;;  %v3858_v24 = vadd.f32 1.0, %v11184_v12 }
 0x544   : > { %v6900_v9 = vpack.c.bf16 %v11274_v20, %v11269_v2  ;;  %7498 = vpow2.f32 %v3737_v30  ;;  %v3848_v39 = vsel %vm11256_vm6, %v3845_v60, %v3842_v17  ;;  %v3789_v63 = vmul.f32 -0.5, %v11148_v21  ;;  %v4008_v2 = vld [vmem:[%s13301_s9 + $0x18] sm:$0xff] }
 0x545   : > { %v11283_v28 = vmul.f32 100.0, %v11181_v45  ;;  %v3968_v44 = vmul.f32 0.01, %v3848_v39  ;;  %v3889_v25 = vadd.f32 1.0, %v3888_v58  ;;  %7500 = vlog2.f32 %v3858_v24 }
 0x546   : > { %v7489_v19 = vpop.eup %7488  ;;  %vm11285_vm8 = vcmp.lt.f32.partialorder %v3891_v52, 0.0004427343  ;;  %v3907_v54 = vadd.f32 1.0, %v3906_v37  ;;  %v3909_v42 = vand.u32 2147483647, %v11145_v38  ;;  %v3861_v46 = vmul.f32 -0.5, %v11184_v12 }
 0x547   : > { %v3792_v3 = vand.u32 2147483647, %v11148_v21  ;;  %v7491_v30 = vpop.eup %7490  ;;  %v3984_v53 = vsel %vm3648_vm1, %v10909_v0, %v3960_v33  ;;  %v3992_v13 = vsel %vm3656_vm4, %v10934_v7, %v3968_v44  ;;  %v3894_v55 = vadd.f32 1.0, %v7489_v19 }
 0x548   : > { %v3897_v8 = vmul.f32 -0.5, %v7489_v19  ;;  %v7493_v1 = vpop.eup %7492  ;;  %v6890_v35 = vpack.c.bf16 %v3992_v13, %v3984_v53  ;;  %v3912_v26 = vadd.f32 1.0, %v7491_v30  ;;  %v3790_v48 = vadd.f32 1.0, %v3789_v63  ;;  %v14035_v63 = vld [vmem:[#allocation25_spill] sm:$0xff] }
 0x549   : > { %v3804_v56 = vadd.f32 1.0, %v11171_v27  ;;  %7502 = vlog2.f32 %v3894_v55  ;;  %v3915_v31 = vmul.f32 -0.5, %v7491_v30  ;;  %v3890_v60 = vmul.f32 %v11030_v29, %v3889_v25 }
 0x54a   : > { %v3876_v61 = vadd.f32 1.0, %v11232_v50  ;;  %6891 = vmatprep.subr.bf16.mxu1 %v6890_v35  ;;  %v3898_v0 = vadd.f32 1.0, %v3897_v8  ;;  %v3900_v36 = vand.u32 2147483647, %v7489_v19  ;;  %7504 = vlog2.f32 %v3912_v26 }
 0x54b   : > { %v3918_v32 = vand.u32 2147483647, %v7491_v30  ;;  %vm11301_vm1 = vcmp.lt.f32.partialorder %v3909_v42, 0.0004427343  ;;  %v7495_v47 = vpop.eup %7494  ;;  %v14027_v57 = vpack.c.bf16 %v11135_v23, %v11130_v15  ;;  %v3887_v34 = vmul.f32 0.6931472, %v7493_v1 }
 0x54c   : > { %v3908_v62 = vmul.f32 %v11145_v38, %v3907_v54  ;;  %vm11309_vm4 = vcmp.lt.f32.partialorder %v3792_v3, 0.0004427343  ;;  %v3862_v58 = vadd.f32 1.0, %v3861_v46  ;;  %v7497_v17 = vpop.eup %7496  ;;  %v3791_v52 = vmul.f32 %v11148_v21, %v3790_v48 }
 0x54d   : > { %6893 = vmatpush1.bf16.msra.mxu1 %v14027_v57  ;;  %v3864_v37 = vand.u32 2147483647, %v11184_v12  ;;  %7506 = vlog2.f32 %v3804_v56  ;;  %v3807_v33 = vmul.f32 -0.5, %v11171_v27  ;;  %v3916_v24 = vadd.f32 1.0, %v3915_v31 }
 0x54e   : > { %v3788_v39 = vmul.f32 0.6931472, %v7497_v17  ;;  %v3810_v15 = vand.u32 2147483647, %v11171_v27  ;;  %7508 = vlog2.f32 %v3876_v61  ;;  %v11317_v23 = vpop.eup %7498  ;;  %v3899_v38 = vmul.f32 %v7489_v19, %v3898_v0 }
 0x54f   : > { %vm11319_vm14 = vcmp.lt.f32.partialorder %v3900_v36, 0.0004427343  ;;  %vm11323_vm9 = vcmp.lt.f32.partialorder %v3918_v32, 0.0004427343  ;;  %v3905_v21 = vmul.f32 0.6931472, %v7495_v47  ;;  %v7501_v25 = vpop.eup %7500  ;;  %v3893_v54 = vsel %vm11285_vm8, %v3890_v60, %v3887_v34 }
 0x550   : > { %v3794_v42 = vsel %vm11309_vm4, %v3791_v52, %v3788_v39  ;;  %v3863_v3 = vmul.f32 %v11184_v12, %v3862_v58  ;;  %vm3666_vm5 = vcmp.gt.f32.partialorder %v11194_v5, 20.0  ;;  %v3860_v19 = vmul.f32 0.6931472, %v7501_v25 }
 0x551   : > { %vm3865_vm11 = vcmp.lt.f32.partialorder %v3864_v37, 0.0004427343  ;;  %v3879_v46 = vmul.f32 -0.5, %v11232_v50  ;;  %v3690_v53 = vsel %vm3666_vm5, 0.0, %v11194_v5  ;;  %v3917_v13 = vmul.f32 %v7491_v30, %v3916_v24 }
 0x552   : > { %vm4385_vm7 = vcmask 195584   ;;  %v3962_v55 = vmul.f32 0.01, %v3794_v42  ;;  %v3735_v51 = vmul.f32 1.442695, %v3690_v53  ;;  %vm3668_vm13 = vcmp.gt.f32.partialorder %v11283_v28, 20.0 }
 0x553   : > { %v3973_v8 = vmul.f32 0.01, %v3893_v54  ;;  %v3866_v1 = vsel %vm3865_vm11, %v3863_v3, %v3860_v19  ;;  %v3808_v35 = vadd.f32 1.0, %v3807_v33  ;;  %v3692_v12 = vsel %vm3668_vm13, 0.0, %v11283_v28  ;;  %v7503_v26 = vpop.eup %7502  ;;  %v11383_v42 = vld [vmem:[%s13301_s9 + $0x8] sm:$0xff]  ;;  %v14041_v3 = vld [vmem:[#allocation24_spill] sm:$0xff] }
 0x554   : > { %v3911_v48 = vsel %vm11301_vm1, %v3908_v62, %v3905_v21  ;;  %v3970_v56 = vmul.f32 0.01, %v3866_v1  ;;  %7510 = vpow2.f32 %v3735_v51  ;;  %v3739_v31 = vmul.f32 1.442695, %v3692_v12  ;;  %v7505_v30 = vpop.eup %7504  ;;  %v14038_v21 = vld [vmem:[#allocation21_spill] sm:$0xff]  ;;  %v14043_v53 = vld [vmem:[#allocation30_spill] sm:$0xff] }
 0x555   : > { %v3896_v60 = vmul.f32 0.6931472, %v7503_v26  ;;  %v3880_v61 = vadd.f32 1.0, %v3879_v46  ;;  %v3882_v0 = vand.u32 2147483647, %v11232_v50  ;;  %v3921_v36 = vadd.f32 1.0, %v11248_v10 }
 0x556   : > { %v3914_v32 = vmul.f32 0.6931472, %v7505_v30  ;;  %v3986_v47 = vsel %vm3650_vm3, %v10978_v41, %v3962_v55  ;;  %v3994_v7 = vsel %vm3658_vm2, %v11021_v18, %v3970_v56  ;;  %7512 = vpow2.f32 %v3739_v31  ;;  %v11404_v26 = vld [vmem:[%s13301_s9 + $0x10] sm:$0xff] }
 0x557   : > { %v7507_v57 = vpop.eup %7506  ;;  %v3902_v34 = vsel %vm11319_vm14, %v3899_v38, %v3896_v60  ;;  %v3975_v62 = vmul.f32 0.01, %v3911_v48  ;;  %v6894_v29 = vpack.c.bf16 %v3994_v7, %v3986_v47  ;;  %v3809_v58 = vmul.f32 %v11171_v27, %v3808_v35  ;;  %v11364_v27 = vld [vmem:[%s13301_s9] sm:$0xff] }
 0x558   : > { %v7509_v17 = vpop.eup %7508  ;;  %v3974_v52 = vmul.f32 0.01, %v3902_v34  ;;  %v3920_v37 = vsel %vm11323_vm9, %v3917_v13, %v3914_v32  ;;  %v3806_v4 = vmul.f32 0.6931472, %v7507_v57  ;;  %v3939_v41 = vadd.f32 1.0, %v11317_v23  ;;  %v14034_v38 = vld [vmem:[#allocation29_spill] sm:$0xff] }
 0x559   : > { %v3976_v33 = vmul.f32 0.01, %v3920_v37  ;;  %vm3811_vm3 = vcmp.lt.f32.partialorder %v3810_v15, 0.0004427343  ;;  %v3878_v18 = vmul.f32 0.6931472, %v7509_v17  ;;  %v3881_v43 = vmul.f32 %v11232_v50, %v3880_v61 }
 0x55a   : > { %v3998_v24 = vsel %vm3662_vm10, %v10963_v59, %v3974_v52  ;;  %v3812_v39 = vsel %vm3811_vm3, %v3809_v58, %v3806_v4  ;;  %vm3883_vm2 = vcmp.lt.f32.partialorder %v3882_v0, 0.0004427343  ;;  %7514 = vlog2.f32 %v3921_v36  ;;  %v14037_v59 = vld [vmem:[#allocation11_spill] sm:$0xff]  ;;  %v14044_v13 = vld [vmem:[#allocation17_spill] sm:$0xff] }
 0x55b   : > { %4402 = vmatprep.subr.mxu0 %v3998_v24  ;;  %v4000_v15 = vsel %vm3664_vm0, %v10987_v11, %v3976_v33  ;;  %vm14036_vm6 = vcmp.gt.f32.partialorder %v14035_v63, 20.0  ;;  %v3884_v44 = vsel %vm3883_vm2, %v3881_v43, %v3878_v18  ;;  %v3964_v6 = vmul.f32 0.01, %v3812_v39  ;;  %v14048_v39 = vld [vmem:[#allocation22_spill] sm:$0xff] }
 0x55c   : > { %v3997_v50 = vsel %vm14036_vm6, %v14034_v38, %v3973_v8  ;;  %4491 = vmatprep.subr.mxu1 %v4000_v15  ;;  %vm14039_vm10 = vcmp.gt.f32.partialorder %v14038_v21, 20.0  ;;  %v3972_v54 = vmul.f32 0.01, %v3884_v44  ;;  %7516 = vlog2.f32 %v3939_v41  ;;  %v14049_v38 = vld [vmem:[#allocation15_spill] sm:$0xff]  ;;  %v14050_v63 = vld [vmem:[#allocation14_spill] sm:$0xff] }
 0x55d   : > { %4403 = vmatpush1.msra.mxu0 %v3997_v50  ;;  %v3999_v25 = vsel %vm14039_vm10, %v14037_v59, %v3975_v62  ;;  %v14040_v11 = vmov 0.0   ;;  %v3988_v46 = vsel %vm3652_vm12, %v14041_v3, %v3964_v6  ;;  %vm14045_vm0 = vcmp.gt.f32.partialorder %v14044_v13, 20.0  ;;  %v14052_v6 = vld [vmem:[#allocation18_spill] sm:$0xff]  ;;  %v11485_v3 = vpop.permute.xlu0 %4761 }
 0x55e   : > { %4492 = vmatpush1.msra.mxu1 %v3999_v25  ;;  %6748 = vmatmul.mubr.msk.f32.vlgmr.msra.gmra.mrb[60].mxu0 %vm4385_vm7, %v11364_v27  ;;  %v7511_v49 = vpop.eup %7510  ;;  %v3996_v55 = vsel %vm14045_vm0, %v14043_v53, %v3972_v54  ;;  %v3924_v12 = vmul.f32 -0.5, %v11248_v10  ;;  %v3942_v16 = vmul.f32 -0.5, %v11317_v23  ;;  %v3945_v61 = vand.u32 2147483647, %v11317_v23 }
 0x55f   : > { %6752 = vmatmul.mubr.msk.f32.vlgmr.msra.gmra.mrb[60].mxu1 %vm4385_vm7, %v11364_v27  ;;  %4468 = vmatprep.mubr.f32.mxu0 %v14040_v11  ;;  %v6898_v51 = vpack.c.bf16 %v3996_v55, %v3988_v46  ;;  %v3930_v8 = vadd.f32 1.0, %v7511_v49  ;;  %v3936_v0 = vand.u32 2147483647, %v7511_v49  ;;  %vm14051_vm14 = vcmp.gt.f32.partialorder %v14050_v63, 20.0 }
 0x560   : > { %4557 = vmatprep.mubr.f32.mxu1 %v14040_v11  ;;  %6895 = vmatprep.subr.bf16.mxu0 %v6894_v29  ;;  %v7513_v1 = vpop.eup %7512  ;;  %v3925_v48 = vadd.f32 1.0, %v3924_v12  ;;  %v3943_v30 = vadd.f32 1.0, %v3942_v16  ;;  %vm3946_vm8 = vcmp.lt.f32.partialorder %v3945_v61, 0.0004427343 }
 0x561   : > { %6897 = vmatpush1.bf16.msra.mxu0 %v6896_v22  ;;  %6899 = vmatprep.subr.bf16.mxu1 %v6898_v51  ;;  %7518 = vlog2.f32 %v3930_v8  ;;  %v3948_v35 = vadd.f32 1.0, %v7513_v1  ;;  %v3933_v22 = vmul.f32 -0.5, %v7511_v49  ;;  %v3951_v20 = vmul.f32 -0.5, %v7513_v1 }
 0x562   : > { %6749 = vmatmul.mubr.msk.f32.gmra.mrb[62].mxu0 %vm4385_vm7, %v11383_v42  ;;  %6901 = vmatpush1.bf16.msra.mxu1 %v6900_v9  ;;  %v3927_v9 = vand.u32 2147483647, %v11248_v10  ;;  %v3926_v36 = vmul.f32 %v11248_v10, %v3925_v48  ;;  %v3954_v34 = vand.u32 2147483647, %v7513_v1  ;;  %v3944_v29 = vmul.f32 %v11317_v23, %v3943_v30 }
 0x563   : > { %6753 = vmatmul.mubr.msk.f32.gmra.mrb[62].mxu1 %vm4385_vm7, %v11383_v42  ;;  %4474 = vmatprep.mubr.f32.mxu0 %v14040_v11  ;;  %7520 = vlog2.f32 %v3948_v35  ;;  %v3934_v60 = vadd.f32 1.0, %v3933_v22  ;;  %v3952_v47 = vadd.f32 1.0, %v3951_v20  ;;  %vm3937_vm1 = vcmp.lt.f32.partialorder %v3936_v0, 0.0004427343 }
 0x564   : > { %4563 = vmatprep.mubr.f32.mxu1 %v14040_v11  ;;  %v7515_v40 = vpop.eup %7514  ;;  %vm11425_vm12 = vcmp.lt.f32.partialorder %v3927_v9, 0.0004427343  ;;  %vm3955_vm4 = vcmp.lt.f32.partialorder %v3954_v34, 0.0004427343 }
 0x565   : > { %v3923_v31 = vmul.f32 0.6931472, %v7515_v40  ;;  %v3935_v58 = vmul.f32 %v7511_v49, %v3934_v60  ;;  %v3953_v41 = vmul.f32 %v7513_v1, %v3952_v47 }
 0x566   : > { %6750 = vmatmul.mubr.msk.f32.gmra.mrb[64].mxu0 %vm4385_vm7, %v11404_v26  ;;  %v7517_v56 = vpop.eup %7516 }
 0x567   : > { %6754 = vmatmul.mubr.msk.f32.gmra.mrb[64].mxu1 %vm4385_vm7, %v11404_v26  ;;  %4480 = vmatprep.mubr.f32.mxu0 %v14040_v11  ;;  %v3941_v32 = vmul.f32 0.6931472, %v7517_v56  ;;  %v3929_v62 = vsel %vm11425_vm12, %v3926_v36, %v3923_v31 }
 0x568   : > { %4569 = vmatprep.mubr.f32.mxu1 %v14040_v11  ;;  %v3977_v33 = vmul.f32 0.01, %v3929_v62 }
 0x569   : > { %v3947_v52 = vsel %vm3946_vm8, %v3944_v29, %v3941_v32 }
 0x56a   : > { %6751 = vmatmul.mubr.msk.f32.gmra.mrb[66].mxu0 %vm4385_vm7, %v4008_v2  ;;  %v3979_v24 = vmul.f32 0.01, %v3947_v52  ;;  %v4001_v50 = vsel %vm14051_vm14, %v14049_v38, %v3977_v33 }
 0x56b   : > { %6755 = vmatmul.mubr.msk.f32.gmra.mrb[66].mxu1 %vm4385_vm7, %v4008_v2  ;;  %4640 = vmatprep.mubr.f32.mxu0 %v14040_v11  ;;  %v7519_v57 = vpop.eup %7518 }
 0x56c   : > { %4729 = vmatprep.mubr.f32.mxu1 %v14040_v11  ;;  %v3932_v10 = vmul.f32 0.6931472, %v7519_v57  ;;  %v4003_v59 = vsel %vm3667_vm15, %v14052_v6, %v3979_v24 }
 0x56d   : > { %v7521_v17 = vpop.eup %7520 }
 0x56e   : > { %v3938_v37 = vsel %vm3937_vm1, %v3935_v58, %v3932_v10  ;;  %v3950_v4 = vmul.f32 0.6931472, %v7521_v17 }
 0x56f   : > { %v3978_v18 = vmul.f32 0.01, %v3938_v37 }
 0x570   : > { %v3956_v43 = vsel %vm3955_vm4, %v3953_v41, %v3950_v4 }
 0x571   : > { %v4002_v23 = vsel %vm3666_vm5, %v14048_v39, %v3978_v18  ;;  %v3980_v15 = vmul.f32 0.01, %v3956_v43 }
 0x572   : > { %4580 = vmatprep.subr.mxu0 %v4002_v23 }
 0x573   : > { %v4004_v44 = vsel %vm3668_vm13, %v11181_v45, %v3980_v15  ;;  %4581 = vmatpush1.msra.mxu0 %v4001_v50  ;;  %v11468_v45 = vpop.permute.xlu1 %4756  ;;  %v11584_v50 = vpop.permute.xlu0 %4771 }
 0x574   : > { %4669 = vmatprep.subr.mxu1 %v4004_v44  ;;  %6756 = vmatmul.mubr.msk.f32.vlgmr.msra.gmra.mrb[68].mxu0 %vm4385_vm7, %v11364_v27 }
 0x575   : > { %4670 = vmatpush1.msra.mxu1 %v4003_v59  ;;  %4646 = vmatprep.mubr.f32.mxu0 %v14040_v11 }
 0x576   : > { %6760 = vmatmul.mubr.msk.f32.vlgmr.msra.gmra.mrb[68].mxu1 %vm4385_vm7, %v11364_v27 }
 0x577   : > { %4735 = vmatprep.mubr.f32.mxu1 %v14040_v11  ;;  %v11511_v40 = vpop.permute.xlu1 %4766 }
 0x578   : > { %6757 = vmatmul.mubr.msk.f32.gmra.mrb[70].mxu0 %vm4385_vm7, %v11383_v42 }
 0x579   : > { %4652 = vmatprep.mubr.f32.mxu0 %v14040_v11 }
 0x57a   : > { %6761 = vmatmul.mubr.msk.f32.gmra.mrb[70].mxu1 %vm4385_vm7, %v11383_v42 }
 0x57b   : > { %4741 = vmatprep.mubr.f32.mxu1 %v14040_v11 }
 0x57c   : > { %6758 = vmatmul.mubr.msk.f32.gmra.mrb[72].mxu0 %vm4385_vm7, %v11404_v26 }
 0x57d   : > { %4658 = vmatprep.mubr.f32.mxu0 %v14040_v11 }
 0x57e   : > { %6762 = vmatmul.mubr.msk.f32.gmra.mrb[72].mxu1 %vm4385_vm7, %v11404_v26 }
 0x57f   : > { %4747 = vmatprep.mubr.f32.mxu1 %v14040_v11 }
 0x580   : > { %6759 = vmatmul.mubr.msk.f32.gmra.mrb[74].mxu0 %vm4385_vm7, %v4008_v2 }
 0x581   : > { %5422 = vmatprep.mubr.f32.mxu0 %v14040_v11 }
 0x582   : > { %6763 = vmatmul.mubr.msk.f32.gmra.mrb[74].mxu1 %vm4385_vm7, %v4008_v2 }
 0x583   : > { %5511 = vmatprep.mubr.f32.mxu1 %v14040_v11 }
 0x631   : > { %v4464_v14 = vpop.f32.mrb[60].mxu0 }
 0x632   : > { %v11471_v5 = vadd.f32 %v11468_v45, %v4464_v14  ;;  %v4553_v28 = vpop.f32.mrb[60].mxu1  ;;  %v4466_v27 = vpop.f32.mrb[61].mxu0 }
 0x633   : > { %v11474_v21 = vadd.f32 %v11468_v45, %v4553_v28  ;;  %v11477_v25 = vadd.f32 %v11468_v45, %v4466_v27  ;;  %v4555_v54 = vpop.f32.mrb[61].mxu1 }
 0x634   : > { %v11480_v49 = vmul.f32 100.0, %v11471_v5  ;;  %v11483_v42 = vadd.f32 %v11468_v45, %v4555_v54 }
 0x635   : > { %14053 = vst [vmem:[#allocation16_spill] sm:$0xff] %v11477_v25  ;;  %v11488_v19 = vmul.f32 100.0, %v11474_v21  ;;  %v11491_v46 = vmul.f32 100.0, %v11477_v25  ;;  %v4470_v53 = vpop.f32.mrb[62].mxu0 }
 0x636   : > { %14054 = vst [vmem:[#allocation12_spill] sm:$0xff] %v11483_v42  ;;  %vm4838_vm15 = vcmp.gt.f32.partialorder %v11480_v49, 20.0  ;;  %v11495_v13 = vadd.f32 %v11485_v3, %v4470_v53  ;;  %v4559_v55 = vpop.f32.mrb[62].mxu1  ;;  %v4472_v51 = vpop.f32.mrb[63].mxu0  ;;  %v11509_v16 = vmul.f32 100.0, %v11483_v42 }
 0x637   : > { %14055 = vst [vmem:[#allocation28_spill] sm:$0xff] %v11491_v46  ;;  %v4870_v8 = vsel %vm4838_vm15, 0.0, %v11480_v49  ;;  %vm4840_vm9 = vcmp.gt.f32.partialorder %v11488_v19, 20.0  ;;  %vm4839_vm5 = vcmp.gt.f32.partialorder %v11491_v46, 20.0  ;;  %v11503_v1 = vadd.f32 %v11485_v3, %v4559_v55  ;;  %v4561_v35 = vpop.f32.mrb[63].mxu1 }
 0x638   : > { %v4902_v12 = vmul.f32 1.442695, %v4870_v8  ;;  %v4872_v26 = vsel %vm4840_vm9, 0.0, %v11488_v19  ;;  %14056 = vst [vmem:[#allocation19_spill] sm:$0xff] %v11509_v16  ;;  %v11514_v48 = vmul.f32 100.0, %v11495_v13  ;;  %v4871_v56 = vsel %vm4839_vm5, 0.0, %v11491_v46 }
 0x639   : > { %v4906_v22 = vmul.f32 1.442695, %v4872_v26  ;;  %v11520_v2 = vmul.f32 100.0, %v11503_v1  ;;  %v11523_v20 = vadd.f32 %v11485_v3, %v4472_v51  ;;  %v4476_v9 = vpop.f32.mrb[64].mxu0  ;;  %v11527_v30 = vadd.f32 %v11485_v3, %v4561_v35 }
 0x63a   : > { %7522 = vpow2.f32 %v4902_v12  ;;  %v4565_v31 = vpop.f32.mrb[64].mxu1  ;;  %vm4846_vm11 = vcmp.gt.f32.partialorder %v11514_v48, 20.0  ;;  %v11530_v60 = vadd.f32 %v11511_v40, %v4476_v9  ;;  %v4478_v61 = vpop.f32.mrb[65].mxu0  ;;  %vm4841_vm7 = vcmp.gt.f32.partialorder %v11509_v16, 20.0 }
 0x63b   : > { %14057 = vst [vmem:[#allocation20_spill] sm:$0xff] %v11523_v20  ;;  %7524 = vpow2.f32 %v4906_v22  ;;  %14058 = vst [vmem:[#allocation27_spill] sm:$0xff] %v11527_v30  ;;  %v4567_v0 = vpop.f32.mrb[65].mxu1  ;;  %v4878_v36 = vsel %vm4846_vm11, 0.0, %v11514_v48  ;;  %vm4848_vm13 = vcmp.gt.f32.partialorder %v11520_v2, 20.0  ;;  %v11538_v32 = vmul.f32 100.0, %v11523_v20 }
 0x63c   : > { %v4918_v47 = vmul.f32 1.442695, %v4878_v36  ;;  %v4880_v7 = vsel %vm4848_vm13, 0.0, %v11520_v2  ;;  %v11544_v57 = vmul.f32 100.0, %v11527_v30  ;;  %v11547_v29 = vmul.f32 100.0, %v11530_v60 }
 0x63d   : > { %14059 = vst [vmem:[#allocation33_spill] sm:$0xff] %v11538_v32  ;;  %v4482_v34 = vpop.f32.mrb[66].mxu0  ;;  %v4922_v62 = vmul.f32 1.442695, %v4880_v7  ;;  %v11550_v10 = vadd.f32 %v11511_v40, %v4565_v31  ;;  %v4904_v52 = vmul.f32 1.442695, %v4871_v56  ;;  %v11558_v4 = vadd.f32 %v11511_v40, %v4478_v61 }
 0x63e   : > { %14060 = vst [vmem:[#allocation35_spill] sm:$0xff] %v11544_v57  ;;  %v4571_v58 = vpop.f32.mrb[66].mxu1  ;;  %v11552_v17 = vpop.f32.mrb[67].mxu0  ;;  %v4873_v37 = vsel %vm4841_vm7, 0.0, %v11509_v16  ;;  %7526 = vpow2.f32 %v4918_v47  ;;  %vm4847_vm3 = vcmp.gt.f32.partialorder %v11538_v32, 20.0  ;;  %vm13489_vm2 = vcmp.gt.f32.partialorder %v11544_v57, 20.0 }
 0x63f   : > { %14061 = vst [vmem:[#allocation31_spill] sm:$0xff] %v11558_v4  ;;  %v11560_v41 = vpop.f32.mrb[67].mxu1  ;;  %7528 = vpow2.f32 %v4922_v62  ;;  %vm4854_vm6 = vcmp.gt.f32.partialorder %v11547_v29, 20.0  ;;  %v11569_v18 = vmul.f32 100.0, %v11550_v10  ;;  %v11572_v43 = vmul.f32 100.0, %v11558_v4 }
 0x640   : > { %v4886_v33 = vsel %vm4854_vm6, 0.0, %v11547_v29  ;;  %v4908_v24 = vmul.f32 1.442695, %v4873_v37  ;;  %v11575_v23 = vadd.f32 %v11511_v40, %v4567_v0  ;;  %7530 = vpow2.f32 %v4904_v52 }
 0x641   : > { %14062 = vst [vmem:[#allocation26_spill] sm:$0xff] %v11572_v43  ;;  %v4934_v39 = vmul.f32 1.442695, %v4886_v33  ;;  %v4879_v15 = vsel %vm4847_vm3, 0.0, %v11538_v32  ;;  %v4881_v38 = vsel %vm13489_vm2, 0.0, %v11544_v57  ;;  %vm4856_vm10 = vcmp.gt.f32.partialorder %v11569_v18, 20.0 }
 0x642   : > { %14063 = vst [vmem:[#allocation32_spill] sm:$0xff] %v11575_v23  ;;  %v4888_v44 = vsel %vm4856_vm10, 0.0, %v11569_v18  ;;  %vm13468_vm0 = vcmp.gt.f32.partialorder %v11572_v43, 20.0  ;;  %v11591_v28 = vmul.f32 100.0, %v11575_v23  ;;  %v11594_v27 = vadd.f32 %v11584_v50, %v4482_v34 }
 0x643   : > { %7532 = vpow2.f32 %v4934_v39  ;;  %v4938_v14 = vmul.f32 1.442695, %v4888_v44  ;;  %v4920_v53 = vmul.f32 1.442695, %v4879_v15  ;;  %v4924_v55 = vmul.f32 1.442695, %v4881_v38 }
 0x644   : > { %v7523_v63 = vpop.eup %7522  ;;  %14064 = vst [vmem:[#allocation36_spill] sm:$0xff] %v11591_v28  ;;  %7534 = vpow2.f32 %v4908_v24  ;;  %v4887_v35 = vsel %vm13468_vm0, 0.0, %v11572_v43  ;;  %vm13463_vm12 = vcmp.gt.f32.partialorder %v11591_v28, 20.0  ;;  %v11605_v9 = vmul.f32 100.0, %v11594_v27 }
 0x645   : > { %v7525_v6 = vpop.eup %7524  ;;  %v4966_v59 = vadd.f32 1.0, %v7523_v63  ;;  %v4969_v51 = vmul.f32 -0.5, %v7523_v63  ;;  %v4972_v8 = vand.u32 2147483647, %v7523_v63  ;;  %v4936_v36 = vmul.f32 1.442695, %v4887_v35 }
 0x646   : > { %v4984_v54 = vadd.f32 1.0, %v7525_v6  ;;  %v4987_v12 = vmul.f32 -0.5, %v7525_v6  ;;  %v4990_v56 = vand.u32 2147483647, %v7525_v6  ;;  %v11613_v47 = vadd.f32 %v11584_v50, %v4571_v58 }
 0x647   : > { %7536 = vlog2.f32 %v4966_v59  ;;  %v11599_v26 = vpop.f32.mrb[68].mxu0  ;;  %v4970_v34 = vadd.f32 1.0, %v4969_v51  ;;  %vm11617_vm8 = vcmp.lt.f32.partialorder %v4972_v8, 0.0004427343  ;;  %v4889_v24 = vsel %vm13463_vm12, 0.0, %v11591_v28 }
 0x648   : > { %7538 = vlog2.f32 %v4984_v54  ;;  %v11601_v22 = vpop.eup %7526  ;;  %v11607_v31 = vpop.f32.mrb[69].mxu0  ;;  %v4988_v33 = vadd.f32 1.0, %v4987_v12  ;;  %vm4862_vm1 = vcmp.gt.f32.partialorder %v11605_v9, 20.0  ;;  %vm11632_vm4 = vcmp.lt.f32.partialorder %v4990_v56, 0.0004427343 }
 0x649   : > { %7540 = vpow2.f32 %v4938_v14  ;;  %v11609_v61 = vpop.eup %7528  ;;  %v5038_v0 = vadd.f32 1.0, %v11601_v22  ;;  %v11615_v7 = vpop.f32.mrb[68].mxu1  ;;  %v5044_v38 = vand.u32 2147483647, %v11601_v22  ;;  %v4894_v44 = vsel %vm4862_vm1, 0.0, %v11605_v9 }
 0x64a   : > { %7542 = vpow2.f32 %v4920_v53  ;;  %v5056_v52 = vadd.f32 1.0, %v11609_v61  ;;  %v11622_v37 = vpop.f32.mrb[69].mxu1  ;;  %v11630_v39 = vpop.eup %7530  ;;  %v5041_v54 = vmul.f32 -0.5, %v11601_v22  ;;  %v5059_v53 = vmul.f32 -0.5, %v11609_v61 }
 0x64b   : > { %7544 = vpow2.f32 %v4924_v55  ;;  %v11628_v58 = vpop.f32.mrb[70].mxu0  ;;  %v4950_v55 = vmul.f32 1.442695, %v4894_v44  ;;  %v11647_v51 = vmul.f32 100.0, %v11613_v47  ;;  %v5062_v35 = vand.u32 2147483647, %v11609_v61 }
 0x64c   : > { %7546 = vlog2.f32 %v5038_v0  ;;  %v11640_v59 = vpop.f32.mrb[71].mxu0  ;;  %v4940_v56 = vmul.f32 1.442695, %v4889_v24  ;;  %v4971_v11 = vmul.f32 %v7523_v63, %v4970_v34  ;;  %v11660_v44 = vadd.f32 %v11584_v50, %v11552_v17 }
 0x64d   : > { %7548 = vlog2.f32 %v5056_v52  ;;  %v11642_v14 = vpop.eup %7532  ;;  %v11649_v8 = vpop.f32.mrb[70].mxu1  ;;  %vm4864_vm14 = vcmp.gt.f32.partialorder %v11647_v51, 20.0  ;;  %v4989_v43 = vmul.f32 %v7525_v6, %v4988_v33  ;;  %vm11664_vm12 = vcmp.lt.f32.partialorder %v5044_v38, 0.0004427343 }
 0x64e   : > { %v5110_v12 = vadd.f32 1.0, %v11642_v14  ;;  %7550 = vpow2.f32 %v4936_v36  ;;  %v11653_v0 = vpop.f32.mrb[71].mxu1  ;;  %v11655_v52 = vpop.eup %7534  ;;  %14069 = vst [vmem:[#allocation23_spill] sm:$0xff] %v11660_v44  ;;  %v4896_v63 = vsel %vm4864_vm14, 0.0, %v11647_v51  ;;  %v5060_v17 = vadd.f32 1.0, %v5059_v53 }
 0x64f   : > { %7552 = vpow2.f32 %v4950_v55  ;;  %v11662_v28 = vpop.f32.mrb[72].mxu0  ;;  %v5042_v55 = vadd.f32 1.0, %v5041_v54  ;;  %v4954_v57 = vmul.f32 1.442695, %v4896_v63  ;;  %vm11675_vm0 = vcmp.lt.f32.partialorder %v5062_v35, 0.0004427343 }
 0x650   : > { %7554 = vlog2.f32 %v5110_v12  ;;  %v11671_v36 = vpop.f32.mrb[73].mxu0  ;;  %v5113_v33 = vmul.f32 -0.5, %v11642_v14  ;;  %v11688_v53 = vmul.f32 100.0, %v11660_v44  ;;  %v11692_v35 = vadd.f32 %v11584_v50, %v11560_v41 }
 0x651   : > { %v7537_v23 = vpop.eup %7536  ;;  %7556 = vpow2.f32 %v4940_v56  ;;  %v11680_v38 = vpop.f32.mrb[72].mxu1  ;;  %v11705_v62 = vadd.f32 %v11468_v45, %v11599_v26  ;;  %v5043_v32 = vmul.f32 %v11601_v22, %v5042_v55  ;;  %v11716_v26 = vadd.f32 %v11468_v45, %v11615_v7 }
 0x652   : > { %v7539_v34 = vpop.eup %7538  ;;  %v4968_v24 = vmul.f32 0.6931472, %v7537_v23  ;;  %14074 = vst [vmem:[#allocation41_spill] sm:$0xff] %v11692_v35  ;;  %v11694_v63 = vpop.f32.mrb[73].mxu1  ;;  %7558 = vpow2.f32 %v4954_v57  ;;  %v5114_v57 = vadd.f32 1.0, %v5113_v33  ;;  %v11722_v22 = vmul.f32 100.0, %v11692_v35 }
 0x653   : > { %v11673_v30 = vpop.eup %7540  ;;  %v4986_v16 = vmul.f32 0.6931472, %v7539_v34  ;;  %v11696_v34 = vpop.f32.mrb[74].mxu0 }
 0x654   : > { %v11682_v12 = vpop.eup %7542  ;;  %v4974_v23 = vsel %vm11617_vm8, %v4971_v11, %v4968_v24  ;;  %v5128_v54 = vadd.f32 1.0, %v11673_v30  ;;  %v5116_v11 = vand.u32 2147483647, %v11642_v14  ;;  %v11707_v24 = vpop.f32.mrb[75].mxu0  ;;  %v5131_v20 = vmul.f32 -0.5, %v11673_v30 }
 0x655   : > { %v11698_v56 = vpop.eup %7544  ;;  %v4992_v42 = vsel %vm11632_vm4, %v4989_v43, %v4986_v16  ;;  %v5254_v44 = vmul.f32 0.01, %v4974_v23  ;;  %v11711_v46 = vpop.f32.mrb[74].mxu1  ;;  %v5061_v43 = vmul.f32 %v11609_v61, %v5060_v17  ;;  %vm13488_vm8 = vcmp.gt.f32.partialorder %v11688_v53, 20.0 }
 0x656   : > { %14075 = vst [vmem:[#allocation40_spill] sm:$0xff] %v11698_v56  ;;  %v7547_v41 = vpop.eup %7546  ;;  %7560 = vlog2.f32 %v5128_v54  ;;  %v11718_v25 = vpop.f32.mrb[75].mxu1  ;;  %v5256_v56 = vmul.f32 0.01, %v4992_v42  ;;  %vm11728_vm4 = vcmp.lt.f32.partialorder %v5116_v11, 0.0004427343  ;;  %v5115_v48 = vmul.f32 %v11642_v14, %v5114_v57 }
 0x657   : > { %v7549_v15 = vpop.eup %7548  ;;  %v5040_v16 = vmul.f32 0.6931472, %v7547_v41  ;;  %v5134_v7 = vand.u32 2147483647, %v11673_v30  ;;  %v11734_v17 = vmul.f32 100.0, %v11705_v62  ;;  %v11739_v33 = vsel %vm4838_vm15, %v11471_v5, %v5254_v44 }
 0x658   : > { %v5058_v23 = vmul.f32 0.6931472, %v7549_v15  ;;  %v11724_v55 = vpop.eup %7550  ;;  %v4895_v35 = vsel %vm13488_vm8, 0.0, %v11688_v53  ;;  %v11752_v5 = vsel %vm4840_vm9, %v11474_v21, %v5256_v56  ;;  %vm13478_vm15 = vcmp.gt.f32.partialorder %v11722_v22, 20.0 }
 0x659   : > { %14076 = vst [vmem:[#allocation38_spill] sm:$0xff] %v11724_v55  ;;  %v5046_v54 = vsel %vm11664_vm12, %v5043_v32, %v5040_v16  ;;  %v7553_v42 = vpop.eup %7552  ;;  %v5132_v32 = vadd.f32 1.0, %v5131_v20  ;;  %v11747_v55 = vmul.f32 100.0, %v11716_v26  ;;  %vm11777_vm9 = vcmp.lt.f32.partialorder %v5134_v7, 0.0004427343 }
 0x65a   : > { %v5262_v41 = vmul.f32 0.01, %v5046_v54  ;;  %v5064_v4 = vsel %vm11675_vm0, %v5061_v43, %v5058_v23  ;;  %v7555_v11 = vpop.eup %7554  ;;  %v5182_v16 = vadd.f32 1.0, %v7553_v42  ;;  %vm4842_vm0 = vcmp.gt.f32.partialorder %v11734_v17, 20.0 }
 0x65b   : > { %v5264_v15 = vmul.f32 0.01, %v5064_v4  ;;  %v11761_v20 = vpop.eup %7556  ;;  %v5112_v21 = vmul.f32 0.6931472, %v7555_v11  ;;  %v5185_v6 = vmul.f32 -0.5, %v7553_v42  ;;  %v4874_v56 = vsel %vm4842_vm0, 0.0, %v11734_v17 }
 0x65c   : > { %v11757_v49 = vsel %vm4846_vm11, %v11495_v13, %v5262_v41  ;;  %7562 = vlog2.f32 %v5182_v16  ;;  %v7559_v43 = vpop.eup %7558  ;;  %v5133_v23 = vmul.f32 %v11673_v30, %v5132_v32  ;;  %vm4844_vm11 = vcmp.gt.f32.partialorder %v11747_v55, 20.0 }
 0x65d   : > { %v11768_v19 = vsel %vm4848_vm13, %v11503_v1, %v5264_v15  ;;  %v4910_v1 = vmul.f32 1.442695, %v4874_v56  ;;  %v5200_v41 = vadd.f32 1.0, %v7559_v43  ;;  %v11782_v4 = vmul.f32 1.442695, %v4895_v35 }
 0x65e   : > { %v4897_v14 = vsel %vm13478_vm15, 0.0, %v11722_v22  ;;  %v4876_v57 = vsel %vm4844_vm11, 0.0, %v11747_v55  ;;  %v5118_v30 = vsel %vm11728_vm4, %v5115_v48, %v5112_v21  ;;  %v5188_v7 = vand.u32 2147483647, %v7553_v42 }
 0x65f   : > { %7564 = vpow2.f32 %v4910_v1  ;;  %v4914_v32 = vmul.f32 1.442695, %v4876_v57  ;;  %v5186_v11 = vadd.f32 1.0, %v5185_v6  ;;  %v5203_v15 = vmul.f32 -0.5, %v7559_v43 }
 0x660   : > { %v7561_v2 = vpop.eup %7560  ;;  %7566 = vlog2.f32 %v5200_v41  ;;  %v11794_v35 = vadd.f32 %v11468_v45, %v11607_v31  ;;  %v11798_v56 = vadd.f32 %v11468_v45, %v11622_v37  ;;  %v11802_v61 = vadd.f32 %v11485_v3, %v11628_v58 }
 0x661   : > { %v5130_v16 = vmul.f32 0.6931472, %v7561_v2  ;;  %7568 = vpow2.f32 %v4914_v32  ;;  %v5270_v21 = vmul.f32 0.01, %v5118_v30  ;;  %v4956_v48 = vmul.f32 1.442695, %v4897_v14 }
 0x662   : > { %14081 = vst [vmem:[#allocation34_spill] sm:$0xff] %v11798_v56  ;;  %v11805_v6 = vmul.f32 100.0, %v11794_v35  ;;  %v11809_v1 = vadd.f32 %v11485_v3, %v11649_v8  ;;  %vm11811_vm13 = vcmp.lt.f32.partialorder %v5188_v7, 0.0004427343  ;;  %v11816_v45 = vmul.f32 100.0, %v11798_v56 }
 0x663   : > { %v11819_v37 = vmul.f32 100.0, %v11802_v61  ;;  %v11823_v58 = vadd.f32 %v11485_v3, %v11640_v59  ;;  %v5187_v2 = vmul.f32 %v7553_v42, %v5186_v11  ;;  %v5206_v41 = vand.u32 2147483647, %v7559_v43 }
 0x664   : > { %14084 = vst [vmem:[#allocation37_spill] sm:$0xff] %v11816_v45  ;;  %vm13479_vm12 = vcmp.gt.f32.partialorder %v11805_v6, 20.0  ;;  %v11827_v8 = vmul.f32 100.0, %v11809_v1  ;;  %v5136_v57 = vsel %vm11777_vm9, %v5133_v23, %v5130_v16  ;;  %v5204_v30 = vadd.f32 1.0, %v5203_v15 }
 0x665   : > { %14085 = vst [vmem:[#allocation39_spill] sm:$0xff] %v11823_v58  ;;  %vm4850_vm4 = vcmp.gt.f32.partialorder %v11819_v37, 20.0  ;;  %v11833_v7 = vmul.f32 100.0, %v11823_v58  ;;  %v11838_v59 = vsel %vm4854_vm6, %v11530_v60, %v5270_v21  ;;  %v11845_v54 = vadd.f32 %v11485_v3, %v11653_v0 }
 0x666   : > { %v7563_v14 = vpop.eup %7562  ;;  %v4882_v32 = vsel %vm4850_vm4, 0.0, %v11819_v37  ;;  %v4875_v23 = vsel %vm13479_vm12, 0.0, %v11805_v6  ;;  %vm13486_vm9 = vcmp.gt.f32.partialorder %v11816_v45, 20.0  ;;  %vm4852_vm15 = vcmp.gt.f32.partialorder %v11827_v8, 20.0 }
 0x667   : > { %14086 = vst [vmem:[#allocation29_spill] sm:$0xff] %v11833_v7  ;;  %v5184_v42 = vmul.f32 0.6931472, %v7563_v14  ;;  %14087 = vst [vmem:[#allocation25_spill] sm:$0xff] %v11845_v54  ;;  %v4926_v11 = vmul.f32 1.442695, %v4882_v32  ;;  %v5205_v21 = vmul.f32 %v7559_v43, %v5204_v30 }
 0x668   : > { %v5272_v60 = vmul.f32 0.01, %v5136_v57  ;;  %vm11854_vm6 = vcmp.lt.f32.partialorder %v5206_v41, 0.0004427343  ;;  %v4884_v3 = vsel %vm4852_vm15, 0.0, %v11827_v8  ;;  %vm13487_vm12 = vcmp.gt.f32.partialorder %v11833_v7, 20.0 }
 0x669   : > { %v5190_v29 = vsel %vm11811_vm13, %v5187_v2, %v5184_v42  ;;  %v11861_v0 = vpop.eup %7564  ;;  %v4930_v14 = vmul.f32 1.442695, %v4884_v3  ;;  %v4912_v31 = vmul.f32 1.442695, %v4875_v23  ;;  %v4877_v2 = vsel %vm13486_vm9, 0.0, %v11816_v45 }
 0x66a   : > { %v5278_v16 = vmul.f32 0.01, %v5190_v29  ;;  %v7567_v32 = vpop.eup %7566  ;;  %v5002_v57 = vadd.f32 1.0, %v11861_v0  ;;  %7570 = vpow2.f32 %v4926_v11  ;;  %v11876_v30 = vmul.f32 100.0, %v11845_v54 }
 0x66b   : > { %v11868_v41 = vpop.eup %7568  ;;  %v5202_v43 = vmul.f32 0.6931472, %v7567_v32  ;;  %7572 = vpow2.f32 %v4930_v14  ;;  %v4883_v11 = vsel %vm13487_vm12, 0.0, %v11833_v7  ;;  %v11885_v29 = vadd.f32 %v11511_v40, %v11662_v28 }
 0x66c   : > { %v11873_v42 = vsel %vm4862_vm1, %v11594_v27, %v5278_v16  ;;  %14090 = vst [vmem:[#allocation11_spill] sm:$0xff] %v11876_v30  ;;  %7574 = vlog2.f32 %v5002_v57  ;;  %v5020_v9 = vadd.f32 1.0, %v11868_v41  ;;  %v4916_v3 = vmul.f32 1.442695, %v4877_v2 }
 0x66d   : > { %v5208_v27 = vsel %vm11854_vm6, %v5205_v21, %v5202_v43  ;;  %7576 = vpow2.f32 %v11782_v4  ;;  %v11894_v16 = vsel %vm4856_vm10, %v11550_v10, %v5272_v60  ;;  %vm13485_vm1 = vcmp.gt.f32.partialorder %v11876_v30, 20.0 }
 0x66e   : > { %v5280_v14 = vmul.f32 0.01, %v5208_v27  ;;  %7578 = vpow2.f32 %v4956_v48  ;;  %v5005_v28 = vmul.f32 -0.5, %v11861_v0  ;;  %v5023_v32 = vmul.f32 -0.5, %v11868_v41 }
 0x66f   : > { %7580 = vpow2.f32 %v4912_v31  ;;  %v4928_v15 = vmul.f32 1.442695, %v4883_v11  ;;  %v11905_v18 = vmul.f32 100.0, %v11885_v29  ;;  %v11909_v10 = vadd.f32 %v11511_v40, %v11680_v38 }
 0x670   : > { %v11902_v4 = vsel %vm4864_vm14, %v11613_v47, %v5280_v14  ;;  %7582 = vlog2.f32 %v5020_v9  ;;  %v4885_v60 = vsel %vm13485_vm1, 0.0, %v11876_v30  ;;  %v11918_v47 = vadd.f32 %v11511_v40, %v11671_v36 }
 0x671   : > { %7584 = vpow2.f32 %v4916_v3  ;;  %v5008_v51 = vand.u32 2147483647, %v11861_v0  ;;  %vm4858_vm10 = vcmp.gt.f32.partialorder %v11905_v18, 20.0  ;;  %v11923_v21 = vmul.f32 100.0, %v11909_v10 }
 0x672   : > { %14091 = vst [vmem:[#allocation21_spill] sm:$0xff] %v11918_v47  ;;  %v11927_v38 = vadd.f32 %v11584_v50, %v11696_v34  ;;  %v5006_v57 = vadd.f32 1.0, %v5005_v28  ;;  %v5026_v31 = vand.u32 2147483647, %v11868_v41  ;;  %7586 = vpow2.f32 %v4928_v15 }
 0x673   : > { %v4890_v36 = vsel %vm4858_vm10, 0.0, %v11905_v18  ;;  %v5024_v43 = vadd.f32 1.0, %v5023_v32  ;;  %v4932_v11 = vmul.f32 1.442695, %v4885_v60  ;;  %vm4860_vm14 = vcmp.gt.f32.partialorder %v11923_v21, 20.0  ;;  %v14136_v18 = vld [vmem:[#allocation12_spill] sm:$0xff] }
 0x674   : > { %v7571_v2 = vpop.eup %7570  ;;  %v4942_v27 = vmul.f32 1.442695, %v4890_v36  ;;  %v4892_v34 = vsel %vm4860_vm14, 0.0, %v11923_v21  ;;  %v11938_v14 = vmul.f32 100.0, %v11918_v47  ;;  %v11942_v28 = vadd.f32 %v11511_v40, %v11694_v63 }
 0x675   : > { %v7573_v9 = vpop.eup %7572  ;;  %v5074_v3 = vadd.f32 1.0, %v7571_v2  ;;  %v11945_v32 = vmul.f32 100.0, %v11927_v38  ;;  %v11949_v60 = vadd.f32 %v11584_v50, %v11711_v46  ;;  %v5077_v23 = vmul.f32 -0.5, %v7571_v2 }
 0x676   : > { %14092 = vst [vmem:[#allocation24_spill] sm:$0xff] %v11938_v14  ;;  %14093 = vst [vmem:[#allocation13_spill] sm:$0xff] %v11942_v28  ;;  %v7575_v15 = vpop.eup %7574  ;;  %v5092_v48 = vadd.f32 1.0, %v7573_v9  ;;  %7588 = vpow2.f32 %v4942_v27  ;;  %v5080_v13 = vand.u32 2147483647, %v7571_v2  ;;  %v5095_v44 = vmul.f32 -0.5, %v7573_v9 }
 0x677   : > { %v11951_v36 = vpop.eup %7576  ;;  %7590 = vlog2.f32 %v5074_v3  ;;  %v5004_v40 = vmul.f32 0.6931472, %v7575_v15  ;;  %v5098_v63 = vand.u32 2147483647, %v7573_v9  ;;  %v4946_v30 = vmul.f32 1.442695, %v4892_v34 }
 0x678   : > { %v11953_v47 = vpop.eup %7578  ;;  %7592 = vlog2.f32 %v5092_v48  ;;  %v5007_v54 = vmul.f32 %v11861_v0, %v5006_v57  ;;  %vm11958_vm13 = vcmp.lt.f32.partialorder %v5008_v51, 0.0004427343  ;;  %v11963_v46 = vmul.f32 100.0, %v11942_v28 }
 0x679   : > { %v11955_v27 = vpop.eup %7580  ;;  %7594 = vpow2.f32 %v4932_v11  ;;  %v5025_v56 = vmul.f32 %v11868_v41, %v5024_v43  ;;  %vm11966_vm6 = vcmp.lt.f32.partialorder %v5026_v31, 0.0004427343  ;;  %v11972_v48 = vadd.f32 %v11584_v50, %v11707_v24 }
 0x67a   : > { %14096 = vst [vmem:[#allocation30_spill] sm:$0xff] %v11963_v46  ;;  %v7583_v3 = vpop.eup %7582  ;;  %7596 = vpow2.f32 %v4946_v30  ;;  %v5078_v51 = vadd.f32 1.0, %v5077_v23  ;;  %vm4859_vm1 = vcmp.gt.f32.partialorder %v11938_v14, 20.0  ;;  %vm4866_vm9 = vcmp.gt.f32.partialorder %v11945_v32, 20.0 }
 0x67b   : > { %14099 = vst [vmem:[#allocation17_spill] sm:$0xff] %v11972_v48  ;;  %v11974_v0 = vpop.eup %7584  ;;  %v11979_v57 = vmul.f32 100.0, %v11949_v60  ;;  %v5010_v41 = vsel %vm11958_vm13, %v5007_v54, %v5004_v40  ;;  %vm11983_vm12 = vcmp.lt.f32.partialorder %v5080_v13, 0.0004427343  ;;  %v5096_v30 = vadd.f32 1.0, %v5095_v44 }
 0x67c   : > { %vm11987_vm8 = vcmp.lt.f32.partialorder %v5098_v63, 0.0004427343  ;;  %v11991_v23 = vpop.eup %7586  ;;  %v5022_v43 = vmul.f32 0.6931472, %v7583_v3  ;;  %vm4861_vm2 = vcmp.gt.f32.partialorder %v11963_v46, 20.0  ;;  %v4898_v11 = vsel %vm4866_vm9, 0.0, %v11945_v32 }
 0x67d   : > { %vm4868_vm13 = vcmp.gt.f32.partialorder %v11979_v57, 20.0  ;;  %v4891_v13 = vsel %vm4859_vm1, 0.0, %v11938_v14  ;;  %v4958_v44 = vmul.f32 1.442695, %v4898_v11  ;;  %v12006_v54 = vadd.f32 %v11584_v50, %v11718_v25 }
 0x67e   : > { %v4900_v45 = vsel %vm4868_vm13, 0.0, %v11979_v57  ;;  %v5258_v34 = vmul.f32 0.01, %v5010_v41  ;;  %v5079_v40 = vmul.f32 %v7571_v2, %v5078_v51  ;;  %v12009_v3 = vmul.f32 100.0, %v11972_v48 }
 0x67f   : > { %14104 = vst [vmem:[#allocation22_spill] sm:$0xff] %v12006_v54  ;;  %v4962_v63 = vmul.f32 1.442695, %v4900_v45  ;;  %v5097_v7 = vmul.f32 %v7573_v9, %v5096_v30  ;;  %v4893_v11 = vsel %vm4861_vm2, 0.0, %v11963_v46  ;;  %7598 = vpow2.f32 %v4958_v44 }
 0x680   : > { %14105 = vst [vmem:[#allocation15_spill] sm:$0xff] %v12009_v3  ;;  %v12011_v28 = vpop.eup %7588  ;;  %v4975_v14 = vadd.f32 1.0, %v11630_v39  ;;  %v5028_v25 = vsel %vm11966_vm6, %v5025_v56, %v5022_v43  ;;  %v4944_v2 = vmul.f32 1.442695, %v4891_v13  ;;  %v12022_v9 = vmul.f32 100.0, %v12006_v54 }
 0x681   : > { %v7591_v58 = vpop.eup %7590  ;;  %v5146_v50 = vadd.f32 1.0, %v12011_v28  ;;  %7600 = vpow2.f32 %v4962_v63  ;;  %v5149_v45 = vmul.f32 -0.5, %v12011_v28  ;;  %v12029_v44 = vsel %vm4842_vm0, %v11705_v62, %v5258_v34 }
 0x682   : > { %v7593_v51 = vpop.eup %7592  ;;  %v5076_v41 = vmul.f32 0.6931472, %v7591_v58  ;;  %14106 = vst [vmem:[#allocation14_spill] sm:$0xff] %v12022_v9  ;;  %7602 = vlog2.f32 %v4975_v14  ;;  %vm4867_vm6 = vcmp.gt.f32.partialorder %v12009_v3, 20.0  ;;  %v5260_v58 = vmul.f32 0.01, %v5028_v25 }
 0x683   : > { %v12024_v30 = vpop.eup %7594  ;;  %v5094_v56 = vmul.f32 0.6931472, %v7593_v51  ;;  %7604 = vlog2.f32 %v5146_v50  ;;  %v4948_v13 = vmul.f32 1.442695, %v4893_v11  ;;  %v4978_v14 = vmul.f32 -0.5, %v11630_v39 }
 0x684   : > { %v12032_v15 = vpop.eup %7596  ;;  %v5082_v43 = vsel %vm11983_vm12, %v5079_v40, %v5076_v41  ;;  %7606 = vpow2.f32 %v4944_v2  ;;  %v5150_v34 = vadd.f32 1.0, %v5149_v45  ;;  %v4899_v50 = vsel %vm4867_vm6, 0.0, %v12009_v3 }
 0x685   : > { %v5266_v63 = vmul.f32 0.01, %v5082_v43  ;;  %v5100_v54 = vsel %vm11987_vm8, %v5097_v7, %v5094_v56  ;;  %v5164_v62 = vadd.f32 1.0, %v12032_v15  ;;  %vm4869_vm0 = vcmp.gt.f32.partialorder %v12022_v9, 20.0 }
 0x686   : > { %v5268_v17 = vmul.f32 0.01, %v5100_v54  ;;  %v5167_v24 = vmul.f32 -0.5, %v12032_v15  ;;  %v4979_v7 = vadd.f32 1.0, %v4978_v14  ;;  %v12053_v54 = vsel %vm4844_vm11, %v11716_v26, %v5260_v58 }
 0x687   : > { %v12047_v31 = vsel %vm4850_vm4, %v11802_v61, %v5266_v63  ;;  %7608 = vlog2.f32 %v5164_v62  ;;  %14107 = vst [vmem:[#allocation18_spill] sm:$0xff] %v12053_v54  ;;  %v5152_v37 = vand.u32 2147483647, %v12011_v28  ;;  %v12065_v25 = vmul.f32 1.442695, %v4899_v50 }
 0x688   : > { %v12060_v11 = vsel %vm4852_vm15, %v11809_v1, %v5268_v17  ;;  %7610 = vpow2.f32 %v4948_v13  ;;  %v4901_v26 = vsel %vm4869_vm0, 0.0, %v12022_v9  ;;  %v5151_v2 = vmul.f32 %v12011_v28, %v5150_v34 }
 0x689   : > { %14108 = vst [vmem:[#allocation42_spill] sm:$0xff] %v12060_v11  ;;  %v7599_v55 = vpop.eup %7598  ;;  %v5170_v51 = vand.u32 2147483647, %v12032_v15  ;;  %v4981_v1 = vand.u32 2147483647, %v11630_v39  ;;  %v5047_v8 = vadd.f32 1.0, %v11682_v12  ;;  %v4980_v43 = vmul.f32 %v11630_v39, %v4979_v7 }
 0x68a   : > { %v5168_v45 = vadd.f32 1.0, %v5167_v24  ;;  %v5218_v56 = vadd.f32 1.0, %v7599_v55  ;;  %v5221_v58 = vmul.f32 -0.5, %v7599_v55  ;;  %v5050_v63 = vmul.f32 -0.5, %v11682_v12 }
 0x68b   : > { %v7601_v41 = vpop.eup %7600  ;;  %7612 = vlog2.f32 %v5047_v8  ;;  %v4993_v62 = vadd.f32 1.0, %v11655_v52  ;;  %v5224_v17 = vand.u32 2147483647, %v7599_v55  ;;  %vm12077_vm8 = vcmp.lt.f32.partialorder %v4981_v1, 0.0004427343 }
 0x68c   : > { %v7603_v13 = vpop.eup %7602  ;;  %v5236_v14 = vadd.f32 1.0, %v7601_v41  ;;  %7614 = vlog2.f32 %v5218_v56  ;;  %v5239_v34 = vmul.f32 -0.5, %v7601_v41  ;;  %v5242_v40 = vand.u32 2147483647, %v7601_v41 }
 0x68d   : > { %v7605_v28 = vpop.eup %7604  ;;  %v4977_v50 = vmul.f32 0.6931472, %v7603_v13  ;;  %vm12083_vm15 = vcmp.lt.f32.partialorder %v5152_v37, 0.0004427343  ;;  %v5222_v8 = vadd.f32 1.0, %v5221_v58  ;;  %v5051_v58 = vadd.f32 1.0, %v5050_v63 }
 0x68e   : > { %v5148_v61 = vmul.f32 0.6931472, %v7605_v28  ;;  %7616 = vlog2.f32 %v5236_v14  ;;  %v12081_v39 = vpop.eup %7606  ;;  %v12087_v9 = vmul.f32 1.442695, %v4901_v26  ;;  %vm12093_vm11 = vcmp.lt.f32.partialorder %v5170_v51, 0.0004427343 }
 0x68f   : > { %v4983_v56 = vsel %vm12077_vm8, %v4980_v43, %v4977_v50  ;;  %v5053_v14 = vand.u32 2147483647, %v11682_v12  ;;  %7618 = vlog2.f32 %v4993_v62  ;;  %vm12098_vm12 = vcmp.lt.f32.partialorder %v5224_v17, 0.0004427343  ;;  %v14119_v62 = vld [vmem:[#allocation40_spill] sm:$0xff] }
 0x690   : > { %v5154_v13 = vsel %vm12083_vm15, %v5151_v2, %v5148_v61  ;;  %v5240_v26 = vadd.f32 1.0, %v5239_v34  ;;  %v4996_v24 = vmul.f32 -0.5, %v11655_v52  ;;  %v5169_v61 = vmul.f32 %v12032_v15, %v5168_v45  ;;  %v14122_v15 = vld [vmem:[#allocation38_spill] sm:$0xff] }
 0x691   : > { %v7609_v37 = vpop.eup %7608  ;;  %vm12106_vm4 = vcmp.lt.f32.partialorder %v5242_v40, 0.0004427343  ;;  %v5255_v51 = vmul.f32 0.01, %v4983_v56  ;;  %v5065_v7 = vadd.f32 1.0, %v14119_v62  ;;  %v5223_v46 = vmul.f32 %v7599_v55, %v5222_v8 }
 0x692   : > { %v12103_v43 = vpop.eup %7610  ;;  %v5166_v50 = vmul.f32 0.6931472, %v7609_v37  ;;  %v5274_v17 = vmul.f32 0.01, %v5154_v13  ;;  %v4999_v3 = vand.u32 2147483647, %v11655_v52  ;;  %v5241_v56 = vmul.f32 %v7601_v41, %v5240_v26 }
 0x693   : > { %v5068_v63 = vmul.f32 -0.5, %v14119_v62  ;;  %vm12113_vm8 = vcmp.lt.f32.partialorder %v5053_v14, 0.0004427343  ;;  %v4997_v37 = vadd.f32 1.0, %v4996_v24  ;;  %7620 = vlog2.f32 %v5065_v7  ;;  %v14123_v13 = vld [vmem:[#allocation16_spill] sm:$0xff] }
 0x694   : > { %v5119_v40 = vadd.f32 1.0, %v14122_v15  ;;  %v5172_v45 = vsel %vm12093_vm11, %v5169_v61, %v5166_v50  ;;  %v5052_v48 = vmul.f32 %v11682_v12, %v5051_v58  ;;  %v5071_v55 = vand.u32 2147483647, %v14119_v62 }
 0x695   : > { %v7613_v8 = vpop.eup %7612  ;;  %v5287_v14 = vsel %vm4839_vm5, %v14123_v13, %v5255_v51  ;;  %v5122_v11 = vmul.f32 -0.5, %v14122_v15  ;;  %v5191_v24 = vadd.f32 1.0, %v11951_v36  ;;  %v12130_v1 = vsel %vm4858_vm10, %v11885_v29, %v5274_v17  ;;  %v14129_v13 = vld [vmem:[#allocation20_spill] sm:$0xff] }
 0x696   : > { %7622 = vlog2.f32 %v5119_v40  ;;  %v7615_v7 = vpop.eup %7614  ;;  %v5049_v41 = vmul.f32 0.6931472, %v7613_v8  ;;  %vm12132_vm15 = vcmp.lt.f32.partialorder %v4999_v3, 0.0004427343  ;;  %v5069_v26 = vadd.f32 1.0, %v5068_v63 }
 0x697   : > { %v5276_v54 = vmul.f32 0.01, %v5172_v45  ;;  %v5220_v50 = vmul.f32 0.6931472, %v7615_v7  ;;  %v4998_v61 = vmul.f32 %v11655_v52, %v4997_v37  ;;  %7624 = vlog2.f32 %v5191_v24 }
 0x698   : > { %v7617_v58 = vpop.eup %7616  ;;  %v5055_v40 = vsel %vm12113_vm8, %v5052_v48, %v5049_v41  ;;  %vm12139_vm5 = vcmp.lt.f32.partialorder %v5071_v55, 0.0004427343  ;;  %v5125_v29 = vand.u32 2147483647, %v14122_v15  ;;  %v5123_v45 = vadd.f32 1.0, %v5122_v11 }
 0x699   : > { %v5238_v51 = vmul.f32 0.6931472, %v7617_v58  ;;  %v7619_v3 = vpop.eup %7618  ;;  %v5226_v17 = vsel %vm12098_vm12, %v5223_v46, %v5220_v50  ;;  %v5263_v63 = vmul.f32 0.01, %v5055_v40  ;;  %v5137_v8 = vadd.f32 1.0, %v11761_v20 }
 0x69a   : > { %v5282_v52 = vmul.f32 0.01, %v5226_v17  ;;  %v4995_v34 = vmul.f32 0.6931472, %v7619_v3  ;;  %v5194_v48 = vmul.f32 -0.5, %v11951_v36  ;;  %v5070_v2 = vmul.f32 %v14119_v62, %v5069_v26 }
 0x69b   : > { %v5244_v37 = vsel %vm12106_vm4, %v5241_v56, %v5238_v51  ;;  %v5295_v7 = vsel %vm4847_vm3, %v14129_v13, %v5263_v63  ;;  %v5197_v41 = vand.u32 2147483647, %v11951_v36  ;;  %7626 = vlog2.f32 %v5137_v8 }
 0x69c   : > { %v5284_v55 = vmul.f32 0.01, %v5244_v37  ;;  %v12157_v46 = vsel %vm4866_vm9, %v11927_v38, %v5282_v52  ;;  %v6902_v11 = vpack.c.bf16 %v5295_v7, %v5287_v14  ;;  %v5001_v28 = vsel %vm12132_vm15, %v4998_v61, %v4995_v34  ;;  %v14138_v37 = vld [vmem:[#allocation27_spill] sm:$0xff] }
 0x69d   : > { %v7621_v56 = vpop.eup %7620  ;;  %v12165_v58 = vsel %vm4860_vm14, %v11909_v10, %v5276_v54  ;;  %v6924_v50 = vpack.c.bf16 %v12157_v46, %v12130_v1  ;;  %v5140_v32 = vmul.f32 -0.5, %v11761_v20  ;;  %v5195_v12 = vadd.f32 1.0, %v5194_v48  ;;  %v14139_v34 = vld [vmem:[#allocation35_spill] sm:$0xff]  ;;  %v12407_v1 = vpop.permute.xlu1 %5328 }
 0x69e   : > { %v12172_v38 = vsel %vm4868_vm13, %v11949_v60, %v5284_v55  ;;  %6903 = vmatprep.subr.bf16.mxu0 %v6902_v11  ;;  %v5067_v62 = vmul.f32 0.6931472, %v7621_v56  ;;  %v5209_v21 = vadd.f32 1.0, %v11953_v47  ;;  %v5257_v26 = vmul.f32 0.01, %v5001_v28 }
 0x69f   : > { %v6932_v14 = vpack.c.bf16 %v12172_v38, %v12165_v58  ;;  %v14131_v54 = vpack.c.bf16 %v11757_v49, %v11739_v33  ;;  %v5124_v57 = vmul.f32 %v14122_v15, %v5123_v45  ;;  %vm12182_vm3 = vcmp.lt.f32.partialorder %v5125_v29, 0.0004427343 }
 0x6a0   : > { %v7623_v10 = vpop.eup %7622  ;;  %vm12186_vm9 = vcmp.lt.f32.partialorder %v5197_v41, 0.0004427343  ;;  %v5073_v51 = vsel %vm12139_vm5, %v5070_v2, %v5067_v62  ;;  %7628 = vlog2.f32 %v5209_v21  ;;  %v5011_v3 = vadd.f32 1.0, %v11955_v27  ;;  %v14144_v21 = vld [vmem:[#allocation31_spill] sm:$0xff] }
 0x6a1   : > { %6905 = vmatpush1.bf16.msra.mxu0 %v14131_v54  ;;  %v5121_v40 = vmul.f32 0.6931472, %v7623_v10  ;;  %v7625_v17 = vpop.eup %7624  ;;  %7630 = vpow2.f32 %v12065_v25  ;;  %v5265_v33 = vmul.f32 0.01, %v5073_v51  ;;  %v5141_v49 = vadd.f32 1.0, %v5140_v32 }
 0x6a2   : > { %v5143_v15 = vand.u32 2147483647, %v11761_v20  ;;  %v5193_v63 = vmul.f32 0.6931472, %v7625_v17  ;;  %v5196_v45 = vmul.f32 %v11951_v36, %v5195_v12  ;;  %7632 = vlog2.f32 %v5011_v3 }
 0x6a3   : > { %v5127_v29 = vsel %vm12182_vm3, %v5124_v57, %v5121_v40  ;;  %v5289_v52 = vsel %vm4841_vm7, %v14136_v18, %v5257_v26  ;;  %vm14140_vm10 = vcmp.gt.f32.partialorder %v14139_v34, 20.0  ;;  %v5212_v55 = vmul.f32 -0.5, %v11953_v47  ;;  %v12233_v40 = vld [vmem:[%s13304_s12] sm:$0xff] }
 0x6a4   : > { %v5297_v48 = vsel %vm14140_vm10, %v14138_v37, %v5265_v33  ;;  %v5271_v25 = vmul.f32 0.01, %v5127_v29  ;;  %v5199_v24 = vsel %vm12186_vm9, %v5196_v45, %v5193_v63  ;;  %v5014_v7 = vmul.f32 -0.5, %v11955_v27 }
 0x6a5   : > { %v6910_v13 = vpack.c.bf16 %v5297_v48, %v5289_v52  ;;  %v5083_v36 = vadd.f32 1.0, %v11991_v23  ;;  %v7627_v41 = vpop.eup %7626  ;;  %7634 = vpow2.f32 %v12087_v9  ;;  %v5279_v11 = vmul.f32 0.01, %v5199_v24  ;;  %v14145_v9 = vld [vmem:[#allocation26_spill] sm:$0xff] }
 0x6a6   : > { %v5142_v28 = vmul.f32 %v11761_v20, %v5141_v49  ;;  %vm12211_vm7 = vcmp.lt.f32.partialorder %v5143_v15, 0.0004427343  ;;  %v5139_v56 = vmul.f32 0.6931472, %v7627_v41  ;;  %v5215_v32 = vand.u32 2147483647, %v11953_v47 }
 0x6a7   : > { %6911 = vmatprep.subr.bf16.mxu1 %v6910_v13  ;;  %7636 = vlog2.f32 %v5083_v36  ;;  %v5029_v62 = vadd.f32 1.0, %v11974_v0  ;;  %v14143_v12 = vpack.c.bf16 %v11768_v19, %v11752_v5  ;;  %vm14146_vm14 = vcmp.gt.f32.partialorder %v14145_v9, 20.0  ;;  %v14147_v20 = vld [vmem:[#allocation23_spill] sm:$0xff]  ;;  %v14154_v13 = vld [vmem:[#allocation36_spill] sm:$0xff]  ;;  %v12263_v36 = vld [vmem:[%s13304_s12 + $0x8] sm:$0xff] }
 0x6a8   : > { %v5303_v10 = vsel %vm14146_vm14, %v14144_v21, %v5271_v25  ;;  %vm14148_vm13 = vcmp.gt.f32.partialorder %v11688_v53, 20.0  ;;  %v5213_v54 = vadd.f32 1.0, %v5212_v55  ;;  %v5017_v57 = vand.u32 2147483647, %v11955_v27 }
 0x6a9   : > { %6913 = vmatpush1.bf16.msra.mxu1 %v14143_v12  ;;  %v5311_v26 = vsel %vm14148_vm13, %v14147_v20, %v5279_v11  ;;  %v5145_v61 = vsel %vm12211_vm7, %v5142_v28, %v5139_v56  ;;  %v5015_v51 = vadd.f32 1.0, %v5014_v7  ;;  %7638 = vlog2.f32 %v5029_v62  ;;  %v14159_v56 = vld [vmem:[#allocation41_spill] sm:$0xff] }
 0x6aa   : > { %v6906_v60 = vpack.c.bf16 %v5311_v26, %v5303_v10  ;;  %v5086_v5 = vmul.f32 -0.5, %v11991_v23  ;;  %v7629_v19 = vpop.eup %7628  ;;  %v5032_v53 = vmul.f32 -0.5, %v11974_v0  ;;  %v5101_v3 = vadd.f32 1.0, %v12024_v30 }
 0x6ab   : > { %v5155_v17 = vadd.f32 1.0, %v12081_v39  ;;  %v12238_v33 = vpop.eup %7630  ;;  %v5211_v49 = vmul.f32 0.6931472, %v7629_v19  ;;  %v5214_v15 = vmul.f32 %v11953_v47, %v5213_v54  ;;  %v5273_v29 = vmul.f32 0.01, %v5145_v61 }
 0x6ac   : > { %6907 = vmatprep.subr.bf16.mxu0 %v6906_v60  ;;  %v14149_v63 = vpack.c.bf16 %v11873_v42, %v11838_v59  ;;  %v5089_v45 = vand.u32 2147483647, %v11991_v23  ;;  %v7633_v18 = vpop.eup %7632  ;;  %vm5216_vm11 = vcmp.lt.f32.partialorder %v5215_v32, 0.0004427343  ;;  %v5016_v8 = vmul.f32 %v11955_v27, %v5015_v51  ;;  %v14153_v27 = vld [vmem:[#allocation32_spill] sm:$0xff] }
 0x6ad   : > { %vm12246_vm12 = vcmp.lt.f32.partialorder %v5017_v57, 0.0004427343  ;;  %7640 = vlog2.f32 %v5101_v3  ;;  %v5217_v37 = vsel %vm5216_vm11, %v5214_v15, %v5211_v49  ;;  %v5013_v34 = vmul.f32 0.6931472, %v7633_v18 }
 0x6ae   : > { %6909 = vmatpush1.bf16.msra.mxu0 %v14149_v63  ;;  %v5087_v48 = vadd.f32 1.0, %v5086_v5  ;;  %7642 = vlog2.f32 %v5155_v17  ;;  %v5281_v47 = vmul.f32 0.01, %v5217_v37  ;;  %vm14152_vm4 = vcmask 261120   ;;  %v14167_v63 = vld [vmem:[#allocation29_spill] sm:$0xff] }
 0x6af   : > { %v5033_v59 = vadd.f32 1.0, %v5032_v53  ;;  %v5104_v42 = vmul.f32 -0.5, %v12024_v30  ;;  %v5227_v25 = vadd.f32 1.0, %v12238_v33  ;;  %v12254_v55 = vpop.eup %7634  ;;  %vm14155_vm8 = vcmp.gt.f32.partialorder %v14154_v13, 20.0  ;;  %vm14161_vm3 = vmmov %vm14152_vm4  ;;  %v14188_v53 = vld [vmem:[#allocation21_spill] sm:$0xff] }
 0x6b0   : > { %v5305_v24 = vsel %vm14155_vm8, %v14153_v27, %v5273_v29  ;;  %v14156_v7 = vmov 0.0   ;;  %v5019_v41 = vsel %vm12246_vm12, %v5016_v8, %v5013_v34  ;;  %vm12267_vm15 = vcmp.lt.f32.partialorder %v5089_v45, 0.0004427343  ;;  %vm14171_vm13 = vmmov %vm14161_vm3  ;;  %v14193_v8 = vld [vmem:[#allocation13_spill] sm:$0xff]  ;;  %v12436_v27 = vpop.permute.xlu1 %5338 }
 0x6b1   : > { %6764 = vmatmul.mubr.msk.f32.vlgmr.msra.gmra.mrb[76].mxu0 %vm14152_vm4, %v12233_v40  ;;  %v5035_v28 = vand.u32 2147483647, %v11974_v0  ;;  %v7637_v2 = vpop.eup %7636  ;;  %vm14160_vm5 = vcmp.gt.f32.partialorder %v11722_v22, 20.0  ;;  %v5158_v62 = vmul.f32 -0.5, %v12081_v39  ;;  %7644 = vlog2.f32 %v5227_v25  ;;  %vm14172_vm11 = vmmov %vm14161_vm3 }
 0x6b2   : > { %5428 = vmatprep.mubr.f32.mxu0 %v14156_v7  ;;  %v5313_v32 = vsel %vm14160_vm5, %v14159_v56, %v5281_v47  ;;  %v5173_v12 = vadd.f32 1.0, %v12103_v43  ;;  %v5085_v9 = vmul.f32 0.6931472, %v7637_v2  ;;  %v5088_v10 = vmul.f32 %v11991_v23, %v5087_v48  ;;  %v12288_v23 = vld [vmem:[%s13304_s12 + $0x10] sm:$0xff]  ;;  %v12324_v48 = vld [vmem:[%s13304_s12 + $0x18] sm:$0xff]  ;;  %vm14176_vm4 = vmmov %vm14161_vm3 }
 0x6b3   : > { %v6914_v21 = vpack.c.bf16 %v5313_v32, %v5305_v24  ;;  %v5107_v20 = vand.u32 2147483647, %v12024_v30  ;;  %v7639_v26 = vpop.eup %7638  ;;  %v5259_v54 = vmul.f32 0.01, %v5019_v41  ;;  %v5034_v57 = vmul.f32 %v11974_v0, %v5033_v59  ;;  %vm14177_vm8 = vmmov %vm14161_vm3 }
 0x6b4   : > { %v5105_v22 = vadd.f32 1.0, %v5104_v42  ;;  %7646 = vlog2.f32 %v5173_v12  ;;  %v5091_v60 = vsel %vm12267_vm15, %v5088_v10, %v5085_v9  ;;  %v5031_v61 = vmul.f32 0.6931472, %v7639_v26  ;;  %v14182_v9 = vld [vmem:[#allocation11_spill] sm:$0xff] }
 0x6b5   : > { %6765 = vmatmul.mubr.msk.f32.gmra.mrb[78].mxu0 %vm14161_vm3, %v12263_v36  ;;  %6915 = vmatprep.subr.bf16.mxu1 %v6914_v21  ;;  %v5230_v51 = vmul.f32 -0.5, %v12238_v33  ;;  %v5245_v5 = vadd.f32 1.0, %v12254_v55  ;;  %v14162_v0 = vpack.c.bf16 %v11902_v4, %v11894_v16  ;;  %v5267_v19 = vmul.f32 0.01, %v5091_v60  ;;  %v14166_v4 = vld [vmem:[#allocation39_spill] sm:$0xff]  ;;  %v14181_v21 = vld [vmem:[#allocation25_spill] sm:$0xff] }
 0x6b6   : > { %5434 = vmatprep.mubr.f32.mxu0 %v14156_v7  ;;  %vm12295_vm9 = vcmp.lt.f32.partialorder %v5035_v28, 0.0004427343  ;;  %v5159_v3 = vadd.f32 1.0, %v5158_v62  ;;  %v5161_v49 = vand.u32 2147483647, %v12081_v39  ;;  %v5176_v15 = vmul.f32 -0.5, %v12103_v43 }
 0x6b7   : > { %6917 = vmatpush1.bf16.msra.mxu1 %v14162_v0  ;;  %v5037_v17 = vsel %vm12295_vm9, %v5034_v57, %v5031_v61  ;;  %7648 = vlog2.f32 %v5245_v5  ;;  %v7641_v29 = vpop.eup %7640  ;;  %vm14165_vm10 = vcmp.gt.f32.partialorder %v11805_v6, 20.0  ;;  %vm14168_vm7 = vcmp.gt.f32.partialorder %v14167_v63, 20.0  ;;  %v14185_v5 = vld [vmem:[#allocation42_spill] sm:$0xff] }
 0x6b8   : > { %v5291_v16 = vsel %vm14165_vm10, %v11794_v35, %v5259_v54  ;;  %v5299_v45 = vsel %vm14168_vm7, %v14166_v4, %v5267_v19  ;;  %v5106_v18 = vmul.f32 %v12024_v30, %v5105_v22  ;;  %vm12310_vm14 = vcmp.lt.f32.partialorder %v5107_v20, 0.0004427343  ;;  %v7643_v52 = vpop.eup %7642  ;;  %vm14184_vm10 = vmmov %vm14176_vm4  ;;  %v14186_v0 = vld [vmem:[#allocation18_spill] sm:$0xff] }
 0x6b9   : > { %6766 = vmatmul.mubr.msk.f32.gmra.mrb[80].mxu0 %vm14171_vm13, %v12288_v23  ;;  %v6918_v37 = vpack.c.bf16 %v5299_v45, %v5291_v16  ;;  %v5103_v6 = vmul.f32 0.6931472, %v7641_v29  ;;  %v5231_v35 = vadd.f32 1.0, %v5230_v51  ;;  %v5233_v34 = vand.u32 2147483647, %v12238_v33 }
 0x6ba   : > { %6768 = vmatmul.mubr.msk.f32.vlgmr.msra.gmra.mrb[76].mxu1 %vm14172_vm11, %v12233_v40  ;;  %5440 = vmatprep.mubr.f32.mxu0 %v14156_v7  ;;  %v5261_v30 = vmul.f32 0.01, %v5037_v17  ;;  %v5157_v47 = vmul.f32 0.6931472, %v7643_v52  ;;  %v5160_v59 = vmul.f32 %v12081_v39, %v5159_v3  ;;  %v5248_v42 = vmul.f32 -0.5, %v12254_v55 }
 0x6bb   : > { %5517 = vmatprep.mubr.f32.mxu1 %v14156_v7  ;;  %6919 = vmatprep.subr.bf16.mxu0 %v6918_v37  ;;  %v5109_v25 = vsel %vm12310_vm14, %v5106_v18, %v5103_v6  ;;  %vm12330_vm12 = vcmp.lt.f32.partialorder %v5161_v49, 0.0004427343  ;;  %v5177_v13 = vadd.f32 1.0, %v5176_v15  ;;  %v7645_v24 = vpop.eup %7644  ;;  %v14175_v11 = vpack.c.bf16 %v12047_v31, %v12029_v44  ;;  %v14178_v44 = vld [vmem:[#allocation34_spill] sm:$0xff]  ;;  %v14179_v31 = vld [vmem:[#allocation37_spill] sm:$0xff]  ;;  %vm14192_vm14 = vmmov %vm14176_vm4 }
 0x6bc   : > { %v5269_v41 = vmul.f32 0.01, %v5109_v25  ;;  %v5163_v39 = vsel %vm12330_vm12, %v5160_v59, %v5157_v47  ;;  %v5179_v28 = vand.u32 2147483647, %v12103_v43  ;;  %v5229_v2 = vmul.f32 0.6931472, %v7645_v24 }
 0x6bd   : > { %6921 = vmatpush1.bf16.msra.mxu0 %v14175_v11  ;;  %v5232_v56 = vmul.f32 %v12238_v33, %v5231_v35  ;;  %vm5234_vm15 = vcmp.lt.f32.partialorder %v5233_v34, 0.0004427343  ;;  %v5251_v32 = vand.u32 2147483647, %v12254_v55  ;;  %vm14180_vm5 = vcmp.gt.f32.partialorder %v14179_v31, 20.0  ;;  %v14190_v49 = vld [vmem:[#allocation17_spill] sm:$0xff] }
 0x6be   : > { %6769 = vmatmul.mubr.msk.f32.gmra.mrb[78].mxu1 %vm14176_vm4, %v12263_v36  ;;  %6767 = vmatmul.mubr.msk.f32.gmra.mrb[82].mxu0 %vm14177_vm8, %v12324_v48  ;;  %v7647_v62 = vpop.eup %7646  ;;  %v5293_v12 = vsel %vm14180_vm5, %v14178_v44, %v5261_v30  ;;  %vm14183_vm3 = vcmp.gt.f32.partialorder %v14182_v9, 20.0  ;;  %v5275_v20 = vmul.f32 0.01, %v5163_v39  ;;  %v5249_v26 = vadd.f32 1.0, %v5248_v42 }
 0x6bf   : > { %v5301_v10 = vsel %vm14183_vm3, %v14181_v21, %v5269_v41  ;;  %5523 = vmatprep.mubr.f32.mxu1 %v14156_v7  ;;  %5600 = vmatprep.mubr.f32.mxu0 %v14156_v7  ;;  %v5235_v33 = vsel %vm5234_vm15, %v5232_v56, %v5229_v2  ;;  %v5175_v57 = vmul.f32 0.6931472, %v7647_v62  ;;  %v5178_v22 = vmul.f32 %v12103_v43, %v5177_v13 }
 0x6c0   : > { %v6926_v54 = vpack.c.bf16 %v5301_v10, %v5293_v12  ;;  %v5283_v60 = vmul.f32 0.01, %v5235_v33  ;;  %vm5180_vm9 = vcmp.lt.f32.partialorder %v5179_v28, 0.0004427343  ;;  %v14187_v19 = vpack.c.bf16 %v14185_v5, %v14186_v0 }
 0x6c1   : > { %v7649_v61 = vpop.eup %7648  ;;  %v5181_v51 = vsel %vm5180_vm9, %v5178_v22, %v5175_v57  ;;  %v5307_v17 = vsel %vm4859_vm1, %v14188_v53, %v5275_v20  ;;  %v5250_v16 = vmul.f32 %v12254_v55, %v5249_v26  ;;  %vm5252_vm7 = vcmp.lt.f32.partialorder %v5251_v32, 0.0004427343  ;;  %v14195_v55 = vld [vmem:[#allocation22_spill] sm:$0xff]  ;;  %vm14197_vm1 = vmmov %vm14176_vm4 }
 0x6c2   : > { %6927 = vmatprep.subr.bf16.mxu1 %v6926_v54  ;;  %6770 = vmatmul.mubr.msk.f32.gmra.mrb[80].mxu1 %vm14184_vm10, %v12288_v23  ;;  %v5315_v15 = vsel %vm4867_vm6, %v14190_v49, %v5283_v60  ;;  %v5247_v29 = vmul.f32 0.6931472, %v7649_v61  ;;  %v5277_v63 = vmul.f32 0.01, %v5181_v51  ;;  %vm14198_vm6 = vmmov %vm14197_vm1 }
 0x6c3   : > { %6929 = vmatpush1.bf16.msra.mxu1 %v14187_v19  ;;  %5529 = vmatprep.mubr.f32.mxu1 %v14156_v7  ;;  %v6922_v4 = vpack.c.bf16 %v5315_v15, %v5307_v17 }
 0x6c4   : > { %v5253_v45 = vsel %vm5252_vm7, %v5250_v16, %v5247_v29  ;;  %v5309_v37 = vsel %vm4861_vm2, %v14193_v8, %v5277_v63  ;;  %vm14199_vm2 = vmmov %vm14197_vm1 }
 0x6c5   : > { %6923 = vmatprep.subr.bf16.mxu0 %v6922_v4  ;;  %v5285_v18 = vmul.f32 0.01, %v5253_v45 }
 0x6c6   : > { %6771 = vmatmul.mubr.msk.f32.gmra.mrb[82].mxu1 %vm14192_vm14, %v12324_v48  ;;  %6925 = vmatpush1.bf16.msra.mxu0 %v6924_v50 }
 0x6c7   : > { %5689 = vmatprep.mubr.f32.mxu1 %v14156_v7  ;;  %v5317_v35 = vsel %vm4869_vm0, %v14195_v55, %v5285_v18  ;;  %vm14200_vm0 = vmmov %vm14197_vm1 }
 0x6c8   : > { %v6930_v34 = vpack.c.bf16 %v5317_v35, %v5309_v37  ;;  %vm14201_vm13 = vmmov %vm14200_vm0 }
 0x6c9   : > { %6772 = vmatmul.mubr.msk.f32.vlgmr.msra.gmra.mrb[84].mxu0 %vm14197_vm1, %v12233_v40  ;;  %vm14202_vm11 = vmmov %vm14200_vm0 }
 0x6ca   : > { %6931 = vmatprep.subr.bf16.mxu1 %v6930_v34  ;;  %5606 = vmatprep.mubr.f32.mxu0 %v14156_v7  ;;  %vm14203_vm12 = vmmov %vm14200_vm0 }
 0x6cb   : > { %6933 = vmatpush1.bf16.msra.mxu1 %v6932_v14  ;;  %vm14204_vm4 = vmmov %vm14200_vm0 }
 0x6cd   : > { %6773 = vmatmul.mubr.msk.f32.gmra.mrb[86].mxu0 %vm14198_vm6, %v12263_v36 }
 0x6ce   : > { %6776 = vmatmul.mubr.msk.f32.vlgmr.msra.gmra.mrb[84].mxu1 %vm14199_vm2, %v12233_v40  ;;  %5612 = vmatprep.mubr.f32.mxu0 %v14156_v7  ;;  %v12418_v40 = vpop.permute.xlu0 %5333 }
 0x6cf   : > { %5695 = vmatprep.mubr.f32.mxu1 %v14156_v7 }
 0x6d1   : > { %6774 = vmatmul.mubr.msk.f32.gmra.mrb[88].mxu0 %vm14200_vm0, %v12288_v23 }
 0x6d2   : > { %6777 = vmatmul.mubr.msk.f32.gmra.mrb[86].mxu1 %vm14201_vm13, %v12263_v36  ;;  %5618 = vmatprep.mubr.f32.mxu0 %v14156_v7  ;;  %v12500_v49 = vpop.permute.xlu0 %5343 }
 0x6d3   : > { %5701 = vmatprep.mubr.f32.mxu1 %v14156_v7 }
 0x6d5   : > { %6775 = vmatmul.mubr.msk.f32.gmra.mrb[90].mxu0 %vm14202_vm11, %v12324_v48 }
 0x6d6   : > { %6778 = vmatmul.mubr.msk.f32.gmra.mrb[88].mxu1 %vm14203_vm12, %v12288_v23  ;;  %6304 = vmatprep.mubr.f32.mxu0 %v14156_v7 }
 0x6d7   : > { %5707 = vmatprep.mubr.f32.mxu1 %v14156_v7 }
 0x6da   : > { %6779 = vmatmul.mubr.msk.f32.gmra.mrb[90].mxu1 %vm14204_vm4, %v12324_v48 }
 0x6db   : > { %6375 = vmatprep.mubr.f32.mxu1 %v14156_v7 }
 0x784   : > { %v5424_v46 = vpop.f32.mrb[76].mxu0 }
 0x785   : > { %v12410_v58 = vadd.f32 %v5424_v46, %v12407_v1  ;;  %v5426_v50 = vpop.f32.mrb[77].mxu0 }
 0x786   : > { %v12413_v38 = vadd.f32 %v5426_v50, %v12407_v1 }
 0x787   : > { %v12416_v14 = vmul.f32 100.0, %v12410_v58 }
 0x788   : > { %v12421_v36 = vmul.f32 100.0, %v12413_v38  ;;  %v5430_v23 = vpop.f32.mrb[78].mxu0 }
 0x789   : > { %vm5746_vm8 = vcmp.gt.f32.partialorder %v12416_v14, 20.0  ;;  %v12425_v30 = vadd.f32 %v5430_v23, %v12418_v40  ;;  %v5432_v48 = vpop.f32.mrb[79].mxu0 }
 0x78a   : > { %v5778_v47 = vsel %vm5746_vm8, 0.0, %v12416_v14  ;;  %v12431_v59 = vadd.f32 %v5432_v48, %v12418_v40  ;;  %vm5747_vm15 = vcmp.gt.f32.partialorder %v12421_v36, 20.0 }
 0x78b   : > { %v5810_v42 = vmul.f32 1.442695, %v5778_v47  ;;  %v12434_v25 = vmul.f32 100.0, %v12425_v30  ;;  %v5779_v12 = vsel %vm5747_vm15, 0.0, %v12421_v36 }
 0x78c   : > { %14205 = vst [vmem:[#allocation40_spill] sm:$0xff] %v12431_v59  ;;  %v5436_v13 = vpop.f32.mrb[80].mxu0  ;;  %v12441_v41 = vmul.f32 100.0, %v12431_v59  ;;  %v5812_v5 = vmul.f32 1.442695, %v5779_v12 }
 0x78d   : > { %7650 = vpow2.f32 %v5810_v42  ;;  %v5513_v24 = vpop.f32.mrb[76].mxu1  ;;  %vm5754_vm5 = vcmp.gt.f32.partialorder %v12434_v25, 20.0  ;;  %v12444_v11 = vadd.f32 %v5436_v13, %v12436_v27  ;;  %v5438_v39 = vpop.f32.mrb[81].mxu0 }
 0x78e   : > { %14206 = vst [vmem:[#allocation38_spill] sm:$0xff] %v12441_v41  ;;  %v12447_v28 = vadd.f32 %v5513_v24, %v12407_v1  ;;  %v5515_v2 = vpop.f32.mrb[77].mxu1  ;;  %v5786_v56 = vsel %vm5754_vm5, 0.0, %v12434_v25  ;;  %vm5755_vm3 = vcmp.gt.f32.partialorder %v12441_v41, 20.0  ;;  %v12477_v33 = vadd.f32 %v5438_v39, %v12436_v27 }
 0x78f   : > { %v12453_v32 = vadd.f32 %v5515_v2, %v12407_v1  ;;  %v5826_v62 = vmul.f32 1.442695, %v5786_v56  ;;  %v12456_v44 = vmul.f32 100.0, %v12444_v11  ;;  %v5787_v53 = vsel %vm5755_vm3, 0.0, %v12441_v41 }
 0x790   : > { %v12459_v31 = vmul.f32 100.0, %v12447_v28  ;;  %14209 = vst [vmem:[#allocation20_spill] sm:$0xff] %v12477_v33  ;;  %v12507_v15 = vmul.f32 100.0, %v12477_v33  ;;  %v5828_v8 = vmul.f32 1.442695, %v5787_v53 }
 0x791   : > { %14207 = vst [vmem:[#allocation16_spill] sm:$0xff] %v12453_v32  ;;  %v12465_v21 = vmul.f32 100.0, %v12453_v32  ;;  %7652 = vpow2.f32 %v5826_v62  ;;  %v5519_v9 = vpop.f32.mrb[78].mxu1  ;;  %vm5762_vm9 = vcmp.gt.f32.partialorder %v12456_v44, 20.0  ;;  %v5442_v10 = vpop.f32.mrb[82].mxu0 }
 0x792   : > { %vm5748_vm10 = vcmp.gt.f32.partialorder %v12459_v31, 20.0  ;;  %v12471_v20 = vadd.f32 %v5519_v9, %v12418_v40  ;;  %v5521_v26 = vpop.f32.mrb[79].mxu1  ;;  %v5794_v54 = vsel %vm5762_vm9, 0.0, %v12456_v44  ;;  %v12479_v57 = vpop.f32.mrb[83].mxu0  ;;  %14212 = vst [vmem:[#allocation19_spill] sm:$0xff] %v12507_v15  ;;  %v12514_v63 = vadd.f32 %v5442_v10, %v12500_v49 }
 0x793   : > { %14208 = vst [vmem:[#allocation28_spill] sm:$0xff] %v12465_v21  ;;  %v5780_v22 = vsel %vm5748_vm10, 0.0, %v12459_v31  ;;  %vm13532_vm7 = vcmp.gt.f32.partialorder %v12465_v21, 20.0  ;;  %v12486_v60 = vadd.f32 %v5521_v26, %v12418_v40  ;;  %v5842_v61 = vmul.f32 1.442695, %v5794_v54 }
 0x794   : > { %v5814_v51 = vmul.f32 1.442695, %v5780_v22  ;;  %v12489_v0 = vmul.f32 100.0, %v12471_v20  ;;  %v5781_v19 = vsel %vm13532_vm7, 0.0, %v12465_v21  ;;  %vm13510_vm6 = vcmp.gt.f32.partialorder %v12507_v15, 20.0 }
 0x795   : > { %14210 = vst [vmem:[#allocation33_spill] sm:$0xff] %v12486_v60  ;;  %v12498_v3 = vmul.f32 100.0, %v12486_v60  ;;  %7654 = vpow2.f32 %v5842_v61  ;;  %v5525_v17 = vpop.f32.mrb[80].mxu1  ;;  %v5816_v52 = vmul.f32 1.442695, %v5781_v19  ;;  %v12531_v47 = vmul.f32 100.0, %v12514_v63 }
 0x796   : > { %7656 = vpow2.f32 %v5814_v51  ;;  %vm5756_vm14 = vcmp.gt.f32.partialorder %v12489_v0, 20.0  ;;  %v12504_v43 = vadd.f32 %v5525_v17, %v12436_v27  ;;  %v5527_v29 = vpop.f32.mrb[81].mxu1  ;;  %v5795_v12 = vsel %vm13510_vm6, 0.0, %v12507_v15 }
 0x797   : > { %14211 = vst [vmem:[#allocation12_spill] sm:$0xff] %v12498_v3  ;;  %v7651_v16 = vpop.eup %7650  ;;  %v5788_v4 = vsel %vm5756_vm14, 0.0, %v12489_v0  ;;  %vm13511_vm1 = vcmp.gt.f32.partialorder %v12498_v3, 20.0  ;;  %7658 = vpow2.f32 %v5812_v5  ;;  %v12523_v6 = vadd.f32 %v5527_v29, %v12436_v27 }
 0x798   : > { %v5874_v45 = vadd.f32 1.0, %v7651_v16  ;;  %v5830_v18 = vmul.f32 1.442695, %v5788_v4  ;;  %v5789_v37 = vsel %vm13511_vm1, 0.0, %v12498_v3  ;;  %v12520_v55 = vmul.f32 100.0, %v12504_v43 }
 0x799   : > { %14213 = vst [vmem:[#allocation27_spill] sm:$0xff] %v12523_v6  ;;  %v5531_v35 = vpop.f32.mrb[82].mxu1  ;;  %v5877_v34 = vmul.f32 -0.5, %v7651_v16  ;;  %v5832_v46 = vmul.f32 1.442695, %v5789_v37  ;;  %v12528_v48 = vmul.f32 100.0, %v12523_v6 }
 0x79a   : > { %7660 = vlog2.f32 %v5874_v45  ;;  %v5533_v50 = vpop.f32.mrb[83].mxu1  ;;  %vm5764_vm2 = vcmp.gt.f32.partialorder %v12520_v55, 20.0  ;;  %v5880_v24 = vand.u32 2147483647, %v7651_v16  ;;  %vm5770_vm0 = vcmp.gt.f32.partialorder %v12531_v47, 20.0 }
 0x79b   : > { %v7653_v23 = vpop.eup %7652  ;;  %7662 = vpow2.f32 %v5830_v18  ;;  %14214 = vst [vmem:[#allocation35_spill] sm:$0xff] %v12528_v48  ;;  %v5796_v39 = vsel %vm5764_vm2, 0.0, %v12520_v55  ;;  %v5878_v56 = vadd.f32 1.0, %v5877_v34  ;;  %vm13509_vm13 = vcmp.gt.f32.partialorder %v12528_v48, 20.0 }
 0x79c   : > { %v5946_v42 = vadd.f32 1.0, %v7653_v23  ;;  %v5949_v13 = vmul.f32 -0.5, %v7653_v23  ;;  %7664 = vpow2.f32 %v5828_v8  ;;  %v12537_v2 = vpop.f32.mrb[84].mxu0  ;;  %v5846_v62 = vmul.f32 1.442695, %v5796_v39 }
 0x79d   : > { %7666 = vpow2.f32 %v5816_v52  ;;  %v12542_v9 = vpop.f32.mrb[85].mxu0  ;;  %v5952_v26 = vand.u32 2147483647, %v7653_v23  ;;  %v5802_v51 = vsel %vm5770_vm0, 0.0, %v12531_v47  ;;  %v12551_v5 = vadd.f32 %v5531_v35, %v12500_v49 }
 0x79e   : > { %7668 = vlog2.f32 %v5946_v42  ;;  %v5950_v22 = vadd.f32 1.0, %v5949_v13  ;;  %vm12553_vm11 = vcmp.lt.f32.partialorder %v5880_v24, 0.0004427343  ;;  %v5844_v17 = vmul.f32 1.442695, %v5795_v12 }
 0x79f   : > { %v7655_v10 = vpop.eup %7654  ;;  %7670 = vpow2.f32 %v5832_v46  ;;  %v5879_v45 = vmul.f32 %v7651_v16, %v5878_v56  ;;  %vm12565_vm12 = vcmp.lt.f32.partialorder %v5952_v26, 0.0004427343  ;;  %v5797_v35 = vsel %vm13509_vm13, 0.0, %v12528_v48 }
 0x7a0   : > { %v12545_v54 = vpop.eup %7656  ;;  %v6018_v61 = vadd.f32 1.0, %v7655_v10  ;;  %7672 = vpow2.f32 %v5846_v62  ;;  %v12558_v29 = vpop.f32.mrb[86].mxu0  ;;  %v6021_v8 = vmul.f32 -0.5, %v7655_v10  ;;  %v5858_v34 = vmul.f32 1.442695, %v5802_v51 }
 0x7a1   : > { %v5892_v53 = vadd.f32 1.0, %v12545_v54  ;;  %v12560_v4 = vpop.eup %7658  ;;  %v5895_v18 = vmul.f32 -0.5, %v12545_v54  ;;  %v12563_v52 = vpop.f32.mrb[84].mxu1  ;;  %v5951_v16 = vmul.f32 %v7653_v23, %v5950_v22  ;;  %v6024_v13 = vand.u32 2147483647, %v7655_v10 }
 0x7a2   : > { %7674 = vlog2.f32 %v6018_v61  ;;  %v12572_v46 = vpop.f32.mrb[85].mxu1  ;;  %v12575_v24 = vmul.f32 100.0, %v12551_v5  ;;  %v12579_v39 = vadd.f32 %v12479_v57, %v12500_v49  ;;  %v12581_v56 = vpop.f32.mrb[87].mxu0  ;;  %v5898_v26 = vand.u32 2147483647, %v12545_v54 }
 0x7a3   : > { %7676 = vlog2.f32 %v5892_v53  ;;  %v12587_v61 = vadd.f32 %v5533_v50, %v12500_v49  ;;  %v5896_v51 = vadd.f32 1.0, %v5895_v18  ;;  %v6022_v57 = vadd.f32 1.0, %v6021_v8 }
 0x7a4   : > { %v7661_v42 = vpop.eup %7660  ;;  %14219 = vst [vmem:[#allocation31_spill] sm:$0xff] %v12579_v39  ;;  %7678 = vpow2.f32 %v5858_v34  ;;  %v12589_v23 = vpop.f32.mrb[88].mxu0  ;;  %vm5772_vm4 = vcmp.gt.f32.partialorder %v12575_v24, 20.0  ;;  %vm12623_vm1 = vcmp.lt.f32.partialorder %v5898_v26, 0.0004427343  ;;  %v12751_v44 = vadd.f32 %v12558_v29, %v12418_v40 }
 0x7a5   : > { %v12583_v62 = vpop.eup %7662  ;;  %v5876_v12 = vmul.f32 0.6931472, %v7661_v42  ;;  %14220 = vst [vmem:[#allocation26_spill] sm:$0xff] %v12587_v61  ;;  %v12595_v7 = vpop.f32.mrb[86].mxu1  ;;  %v5804_v50 = vsel %vm5772_vm4, 0.0, %v12575_v24  ;;  %v12605_v42 = vmul.f32 100.0, %v12579_v39 }
 0x7a6   : > { %v12591_v22 = vpop.eup %7664  ;;  %v5964_v53 = vadd.f32 1.0, %v12583_v62  ;;  %v12608_v18 = vmul.f32 100.0, %v12587_v61  ;;  %v12610_v8 = vpop.f32.mrb[87].mxu1  ;;  %v5967_v19 = vmul.f32 -0.5, %v12583_v62  ;;  %v5862_v60 = vmul.f32 1.442695, %v5804_v50 }
 0x7a7   : > { %v12597_v48 = vpop.eup %7666  ;;  %v5882_v34 = vsel %vm12553_vm11, %v5879_v45, %v5876_v12  ;;  %14221 = vst [vmem:[#allocation23_spill] sm:$0xff] %v12605_v42  ;;  %v12612_v6 = vpop.f32.mrb[89].mxu0  ;;  %vm12615_vm11 = vcmp.lt.f32.partialorder %v6024_v13, 0.0004427343  ;;  %v5848_v12 = vmul.f32 1.442695, %v5797_v35  ;;  %v5897_v50 = vmul.f32 %v12545_v54, %v5896_v51 }
 0x7a8   : > { %14222 = vst [vmem:[#allocation32_spill] sm:$0xff] %v12608_v18  ;;  %v7669_v15 = vpop.eup %7668  ;;  %v6162_v33 = vmul.f32 0.01, %v5882_v34  ;;  %7680 = vlog2.f32 %v5964_v53  ;;  %vm13530_vm13 = vcmp.gt.f32.partialorder %v12605_v42, 20.0  ;;  %vm13529_vm6 = vcmp.gt.f32.partialorder %v12608_v18, 20.0  ;;  %v12632_v35 = vpop.f32.mrb[90].mxu0 }
 0x7a9   : > { %v12619_v3 = vpop.eup %7670  ;;  %v5948_v39 = vmul.f32 0.6931472, %v7669_v15  ;;  %v6023_v53 = vmul.f32 %v7655_v10, %v6022_v57  ;;  %7682 = vpow2.f32 %v5844_v17  ;;  %v5803_v13 = vsel %vm13530_vm13, 0.0, %v12605_v42  ;;  %v12630_v34 = vpop.f32.mrb[88].mxu1 }
 0x7aa   : > { %v12634_v15 = vpop.eup %7672  ;;  %v5970_v21 = vand.u32 2147483647, %v12583_v62  ;;  %7684 = vpow2.f32 %v5862_v60  ;;  %v12640_v10 = vpop.f32.mrb[89].mxu1  ;;  %v5968_v32 = vadd.f32 1.0, %v5967_v19  ;;  %v5805_v59 = vsel %vm13529_vm6, 0.0, %v12608_v18 }
 0x7ab   : > { %v5954_v26 = vsel %vm12565_vm12, %v5951_v16, %v5948_v39  ;;  %v12642_v17 = vpop.f32.mrb[91].mxu0  ;;  %v6036_v41 = vadd.f32 1.0, %v12634_v15  ;;  %v12651_v37 = vsel %vm5746_vm8, %v12410_v58, %v6162_v33  ;;  %v5860_v16 = vmul.f32 1.442695, %v5803_v13 }
 0x7ac   : > { %v7675_v57 = vpop.eup %7674  ;;  %v6170_v42 = vmul.f32 0.01, %v5954_v26  ;;  %14227 = vst [vmem:[#allocation36_spill] sm:$0xff] %v12651_v37  ;;  %v12655_v39 = vadd.f32 %v12537_v2, %v12407_v1  ;;  %v12664_v26 = vadd.f32 %v12563_v52, %v12407_v1  ;;  %v6039_v2 = vmul.f32 -0.5, %v12634_v15 }
 0x7ad   : > { %v7677_v54 = vpop.eup %7676  ;;  %v6020_v60 = vmul.f32 0.6931472, %v7675_v57  ;;  %7686 = vlog2.f32 %v6036_v41  ;;  %v12666_v14 = vpop.f32.mrb[90].mxu1  ;;  %v5864_v13 = vmul.f32 1.442695, %v5805_v59  ;;  %v5969_v25 = vmul.f32 %v12583_v62, %v5968_v32 }
 0x7ae   : > { %v5894_v51 = vmul.f32 0.6931472, %v7677_v54  ;;  %v12660_v19 = vsel %vm5754_vm5, %v12425_v30, %v6170_v42  ;;  %v7679_v58 = vpop.eup %7678  ;;  %7688 = vpow2.f32 %v5848_v12  ;;  %v12671_v57 = vpop.f32.mrb[91].mxu1  ;;  %vm12676_vm8 = vcmp.lt.f32.partialorder %v5970_v21, 0.0004427343 }
 0x7af   : > { %v6090_v52 = vadd.f32 1.0, %v7679_v58  ;;  %v6026_v42 = vsel %vm12615_vm11, %v6023_v53, %v6020_v60  ;;  %v6042_v54 = vand.u32 2147483647, %v12634_v15  ;;  %7690 = vpow2.f32 %v5860_v16 }
 0x7b0   : > { %v5900_v30 = vsel %vm12623_vm1, %v5897_v50, %v5894_v51  ;;  %v12684_v59 = vmul.f32 100.0, %v12655_v39  ;;  %v12687_v61 = vmul.f32 100.0, %v12664_v26  ;;  %v12691_v32 = vadd.f32 %v12542_v9, %v12407_v1 }
 0x7b1   : > { %v6164_v33 = vmul.f32 0.01, %v5900_v30  ;;  %7692 = vlog2.f32 %v6090_v52  ;;  %v6040_v62 = vadd.f32 1.0, %v6039_v2  ;;  %v6093_v45 = vmul.f32 -0.5, %v7679_v58 }
 0x7b2   : > { %v7681_v12 = vpop.eup %7680  ;;  %14230 = vst [vmem:[#allocation41_spill] sm:$0xff] %v12691_v32  ;;  %7694 = vpow2.f32 %v5864_v13  ;;  %v6178_v50 = vmul.f32 0.01, %v6026_v42  ;;  %vm5750_vm5 = vcmp.gt.f32.partialorder %v12684_v59, 20.0  ;;  %vm5752_vm1 = vcmp.gt.f32.partialorder %v12687_v61, 20.0 }
 0x7b3   : > { %v5966_v21 = vmul.f32 0.6931472, %v7681_v12  ;;  %v12693_v53 = vpop.eup %7682  ;;  %v12698_v60 = vmul.f32 100.0, %v12691_v32  ;;  %v6096_v9 = vand.u32 2147483647, %v7679_v58  ;;  %v5782_v2 = vsel %vm5750_vm5, 0.0, %v12684_v59 }
 0x7b4   : > { %v7685_v16 = vpop.eup %7684  ;;  %v5784_v13 = vsel %vm5752_vm1, 0.0, %v12687_v61  ;;  %v12711_v30 = vsel %vm5748_vm10, %v12447_v28, %v6164_v33  ;;  %v12715_v41 = vadd.f32 %v12572_v46, %v12407_v1  ;;  %v6041_v46 = vmul.f32 %v12634_v15, %v6040_v62 }
 0x7b5   : > { %14231 = vst [vmem:[#allocation39_spill] sm:$0xff] %v12698_v60  ;;  %v5972_v51 = vsel %vm12676_vm8, %v5969_v25, %v5966_v21  ;;  %v6108_v42 = vadd.f32 1.0, %v7685_v16  ;;  %v6094_v25 = vadd.f32 1.0, %v6093_v45  ;;  %v6111_v12 = vmul.f32 -0.5, %v7685_v16 }
 0x7b6   : > { %v6172_v52 = vmul.f32 0.01, %v5972_v51  ;;  %14232 = vst [vmem:[#allocation29_spill] sm:$0xff] %v12715_v41  ;;  %v5818_v21 = vmul.f32 1.442695, %v5782_v2  ;;  %vm13521_vm10 = vcmp.gt.f32.partialorder %v12698_v60, 20.0 }
 0x7b7   : > { %v5822_v32 = vmul.f32 1.442695, %v5784_v13  ;;  %v7687_v18 = vpop.eup %7686  ;;  %7696 = vlog2.f32 %v6108_v42  ;;  %v6114_v31 = vand.u32 2147483647, %v7685_v16  ;;  %vm12728_vm12 = vcmp.lt.f32.partialorder %v6042_v54, 0.0004427343 }
 0x7b8   : > { %v12720_v37 = vsel %vm5756_vm14, %v12471_v20, %v6172_v52  ;;  %v12723_v28 = vpop.eup %7688  ;;  %7698 = vpow2.f32 %v5818_v21  ;;  %v12735_v20 = vsel %vm5762_vm9, %v12444_v11, %v6178_v50  ;;  %v6038_v0 = vmul.f32 0.6931472, %v7687_v18 }
 0x7b9   : > { %7700 = vpow2.f32 %v5822_v32  ;;  %v12738_v45 = vmul.f32 100.0, %v12715_v41  ;;  %v12740_v51 = vpop.eup %7690  ;;  %vm12742_vm14 = vcmp.lt.f32.partialorder %v6096_v9, 0.0004427343  ;;  %v5783_v15 = vsel %vm13521_vm10, 0.0, %v12698_v60 }
 0x7ba   : > { %v12755_v11 = vadd.f32 %v12595_v7, %v12418_v40  ;;  %v6095_v54 = vmul.f32 %v7679_v58, %v6094_v25  ;;  %v6112_v32 = vadd.f32 1.0, %v6111_v12  ;;  %vm12757_vm9 = vcmp.lt.f32.partialorder %v6114_v31, 0.0004427343 }
 0x7bb   : > { %14235 = vst [vmem:[#allocation34_spill] sm:$0xff] %v12738_v45  ;;  %v7693_v18 = vpop.eup %7692  ;;  %v12763_v50 = vadd.f32 %v12581_v56, %v12418_v40  ;;  %v12768_v29 = vmul.f32 100.0, %v12751_v44  ;;  %v12775_v58 = vadd.f32 %v12610_v8, %v12418_v40  ;;  %v6044_v52 = vsel %vm12728_vm12, %v6041_v46, %v6038_v0 }
 0x7bc   : > { %v12765_v9 = vpop.eup %7694  ;;  %v6092_v13 = vmul.f32 0.6931472, %v7693_v18  ;;  %v12771_v7 = vmul.f32 100.0, %v12755_v11  ;;  %v5820_v42 = vmul.f32 1.442695, %v5783_v15  ;;  %vm13526_vm11 = vcmp.gt.f32.partialorder %v12738_v45, 20.0 }
 0x7bd   : > { %14240 = vst [vmem:[#allocation37_spill] sm:$0xff] %v12763_v50  ;;  %14241 = vst [vmem:[#allocation25_spill] sm:$0xff] %v12775_v58  ;;  %v12781_v56 = vmul.f32 100.0, %v12763_v50  ;;  %vm5758_vm8 = vcmp.gt.f32.partialorder %v12768_v29, 20.0  ;;  %v12789_v40 = vadd.f32 %v12589_v23, %v12436_v27  ;;  %v12798_v31 = vmul.f32 100.0, %v12775_v58 }
 0x7be   : > { %v6098_v25 = vsel %vm12742_vm14, %v6095_v54, %v6092_v13  ;;  %vm5760_vm10 = vcmp.gt.f32.partialorder %v12771_v7, 20.0  ;;  %v5790_v12 = vsel %vm5758_vm8, 0.0, %v12768_v29  ;;  %v6113_v46 = vmul.f32 %v7685_v16, %v6112_v32 }
 0x7bf   : > { %14242 = vst [vmem:[#allocation11_spill] sm:$0xff] %v12781_v56  ;;  %v6186_v8 = vmul.f32 0.01, %v6098_v25  ;;  %v5792_v21 = vsel %vm5760_vm10, 0.0, %v12771_v7  ;;  %14243 = vst [vmem:[#allocation42_spill] sm:$0xff] %v12798_v31  ;;  %vm13527_vm12 = vcmp.gt.f32.partialorder %v12781_v56, 20.0  ;;  %7702 = vpow2.f32 %v5820_v42 }
 0x7c0   : > { %v5834_v33 = vmul.f32 1.442695, %v5790_v12  ;;  %v5838_v0 = vmul.f32 1.442695, %v5792_v21  ;;  %v6180_v23 = vmul.f32 0.01, %v6044_v52 }
 0x7c1   : > { %v7697_v2 = vpop.eup %7696  ;;  %v12804_v15 = vsel %vm5770_vm0, %v12514_v63, %v6186_v8  ;;  %v5785_v18 = vsel %vm13526_vm11, 0.0, %v12738_v45  ;;  %v12812_v13 = vmul.f32 100.0, %v12789_v40  ;;  %v5791_v63 = vsel %vm13527_vm12, 0.0, %v12781_v56 }
 0x7c2   : > { %v7699_v54 = vpop.eup %7698  ;;  %v6110_v32 = vmul.f32 0.6931472, %v7697_v2  ;;  %7704 = vpow2.f32 %v5834_v33  ;;  %vm13524_vm0 = vcmp.gt.f32.partialorder %v12798_v31, 20.0  ;;  %v12823_v21 = vsel %vm5764_vm2, %v12504_v43, %v6180_v23 }
 0x7c3   : > { %v7701_v52 = vpop.eup %7700  ;;  %v5910_v25 = vadd.f32 1.0, %v7699_v54  ;;  %7706 = vpow2.f32 %v5838_v0  ;;  %v5913_v42 = vmul.f32 -0.5, %v7699_v54  ;;  %14244 = vst [vmem:[#allocation18_spill] sm:$0xff] %v12823_v21  ;;  %v5824_v0 = vmul.f32 1.442695, %v5785_v18 }
 0x7c4   : > { %v6116_v47 = vsel %vm12757_vm9, %v6113_v46, %v6110_v32  ;;  %v5928_v8 = vadd.f32 1.0, %v7701_v52  ;;  %v5931_v12 = vmul.f32 -0.5, %v7701_v52  ;;  %v5836_v2 = vmul.f32 1.442695, %v5791_v63 }
 0x7c5   : > { %v6188_v33 = vmul.f32 0.01, %v6116_v47  ;;  %7708 = vlog2.f32 %v5910_v25  ;;  %v5793_v16 = vsel %vm13524_vm0, 0.0, %v12798_v31  ;;  %vm5766_vm14 = vcmp.gt.f32.partialorder %v12812_v13, 20.0 }
 0x7c6   : > { %7710 = vlog2.f32 %v5928_v8  ;;  %v5916_v46 = vand.u32 2147483647, %v7699_v54  ;;  %v5934_v55 = vand.u32 2147483647, %v7701_v52  ;;  %v5798_v43 = vsel %vm5766_vm14, 0.0, %v12812_v13 }
 0x7c7   : > { %v12832_v62 = vsel %vm5772_vm4, %v12551_v5, %v6188_v33  ;;  %v5914_v18 = vadd.f32 1.0, %v5913_v42  ;;  %v5932_v32 = vadd.f32 1.0, %v5931_v12  ;;  %v5850_v25 = vmul.f32 1.442695, %v5798_v43 }
 0x7c8   : > { %7712 = vpow2.f32 %v5824_v0  ;;  %v12841_v63 = vadd.f32 %v12630_v34, %v12436_v27  ;;  %v5840_v24 = vmul.f32 1.442695, %v5793_v16  ;;  %v12845_v5 = vadd.f32 %v12612_v6, %v12436_v27 }
 0x7c9   : > { %7714 = vpow2.f32 %v5850_v25  ;;  %v12849_v47 = vadd.f32 %v12640_v10, %v12436_v27  ;;  %v12851_v8 = vpop.eup %7702  ;;  %vm12853_vm2 = vcmp.lt.f32.partialorder %v5916_v46, 0.0004427343  ;;  %vm12857_vm4 = vcmp.lt.f32.partialorder %v5934_v55, 0.0004427343 }
 0x7ca   : > { %14245 = vst [vmem:[#allocation21_spill] sm:$0xff] %v12845_v5  ;;  %v12862_v34 = vmul.f32 100.0, %v12841_v63  ;;  %v12866_v6 = vadd.f32 %v12632_v35, %v12500_v49  ;;  %v5915_v27 = vmul.f32 %v7699_v54, %v5914_v18  ;;  %v5933_v10 = vmul.f32 %v7701_v52, %v5932_v32 }
 0x7cb   : > { %14246 = vst [vmem:[#allocation24_spill] sm:$0xff] %v12849_v47  ;;  %7716 = vpow2.f32 %v5836_v2  ;;  %v12870_v33 = vadd.f32 %v12666_v14, %v12500_v49  ;;  %v12875_v55 = vadd.f32 %v12642_v17, %v12500_v49  ;;  %v12879_v35 = vadd.f32 %v12671_v57, %v12500_v49 }
 0x7cc   : > { %v7705_v16 = vpop.eup %7704  ;;  %vm5768_vm9 = vcmp.gt.f32.partialorder %v12862_v34, 20.0  ;;  %v12885_v14 = vmul.f32 100.0, %v12845_v5  ;;  %v12888_v52 = vmul.f32 100.0, %v12849_v47  ;;  %v12891_v32 = vmul.f32 100.0, %v12866_v6 }
 0x7cd   : > { %v7707_v0 = vpop.eup %7706  ;;  %v5982_v46 = vadd.f32 1.0, %v7705_v16  ;;  %14251 = vst [vmem:[#allocation17_spill] sm:$0xff] %v12875_v55  ;;  %14252 = vst [vmem:[#allocation15_spill] sm:$0xff] %v12879_v35  ;;  %v5800_v54 = vsel %vm5768_vm9, 0.0, %v12862_v34  ;;  %v5985_v18 = vmul.f32 -0.5, %v7705_v16  ;;  %v12894_v23 = vmul.f32 100.0, %v12870_v33 }
 0x7ce   : > { %v6000_v43 = vadd.f32 1.0, %v7707_v0  ;;  %14253 = vst [vmem:[#allocation13_spill] sm:$0xff] %v12885_v14  ;;  %14254 = vst [vmem:[#allocation30_spill] sm:$0xff] %v12888_v52  ;;  %v5854_v17 = vmul.f32 1.442695, %v5800_v54  ;;  %v6003_v5 = vmul.f32 -0.5, %v7707_v0 }
 0x7cf   : > { %v7709_v2 = vpop.eup %7708  ;;  %7718 = vlog2.f32 %v5982_v46  ;;  %v5988_v25 = vand.u32 2147483647, %v7705_v16  ;;  %v6006_v31 = vand.u32 2147483647, %v7707_v0  ;;  %vm5767_vm0 = vcmp.gt.f32.partialorder %v12885_v14, 20.0 }
 0x7d0   : > { %v7711_v49 = vpop.eup %7710  ;;  %v5912_v57 = vmul.f32 0.6931472, %v7709_v2  ;;  %7720 = vlog2.f32 %v6000_v43  ;;  %v12898_v46 = vmul.f32 100.0, %v12875_v55  ;;  %v12901_v54 = vmul.f32 100.0, %v12879_v35 }
 0x7d1   : > { %v5930_v1 = vmul.f32 0.6931472, %v7711_v49  ;;  %7722 = vpow2.f32 %v5854_v17  ;;  %v5986_v2 = vadd.f32 1.0, %v5985_v18  ;;  %vm5769_vm11 = vcmp.gt.f32.partialorder %v12888_v52, 20.0 }
 0x7d2   : > { %7724 = vpow2.f32 %v5840_v24  ;;  %14255 = vst [vmem:[#allocation22_spill] sm:$0xff] %v12901_v54  ;;  %v12903_v47 = vpop.eup %7712  ;;  %v5918_v43 = vsel %vm12853_vm2, %v5915_v27, %v5912_v57  ;;  %v5883_v49 = vadd.f32 1.0, %v12560_v4  ;;  %vm12911_vm12 = vcmp.lt.f32.partialorder %v5988_v25, 0.0004427343 }
 0x7d3   : > { %v7715_v17 = vpop.eup %7714  ;;  %v5936_v24 = vsel %vm12857_vm4, %v5933_v10, %v5930_v1  ;;  %vm5774_vm6 = vcmp.gt.f32.partialorder %v12891_v32, 20.0  ;;  %vm5776_vm13 = vcmp.gt.f32.partialorder %v12894_v23, 20.0  ;;  %v6004_v35 = vadd.f32 1.0, %v6003_v5 }
 0x7d4   : > { %vm12917_vm7 = vcmp.lt.f32.partialorder %v6006_v31, 0.0004427343  ;;  %v6054_v27 = vadd.f32 1.0, %v7715_v17  ;;  %v5799_v18 = vsel %vm5767_vm0, 0.0, %v12885_v14  ;;  %v6166_v1 = vmul.f32 0.01, %v5918_v43 }
 0x7d5   : > { %v12924_v12 = vpop.eup %7716  ;;  %v5801_v10 = vsel %vm5769_vm11, 0.0, %v12888_v52  ;;  %v5806_v5 = vsel %vm5774_vm6, 0.0, %v12891_v32  ;;  %v5808_v31 = vsel %vm5776_vm13, 0.0, %v12894_v23  ;;  %v6168_v57 = vmul.f32 0.01, %v5936_v24 }
 0x7d6   : > { %v5987_v25 = vmul.f32 %v7705_v16, %v5986_v2  ;;  %7726 = vlog2.f32 %v6054_v27  ;;  %v5866_v58 = vmul.f32 1.442695, %v5806_v5  ;;  %v6057_v14 = vmul.f32 -0.5, %v7715_v17 }
 0x7d7   : > { %v5852_v45 = vmul.f32 1.442695, %v5799_v18  ;;  %v5870_v41 = vmul.f32 1.442695, %v5808_v31  ;;  %vm5775_vm2 = vcmp.gt.f32.partialorder %v12898_v46, 20.0  ;;  %v6005_v56 = vmul.f32 %v7707_v0, %v6004_v35 }
 0x7d8   : > { %v6060_v52 = vand.u32 2147483647, %v7715_v17  ;;  %v5856_v50 = vmul.f32 1.442695, %v5801_v10  ;;  %7728 = vpow2.f32 %v5866_v58  ;;  %v12939_v21 = vsel %vm5750_vm5, %v12655_v39, %v6166_v1 }
 0x7d9   : > { %v7719_v43 = vpop.eup %7718  ;;  %7730 = vpow2.f32 %v5870_v41  ;;  %v5807_v16 = vsel %vm5775_vm2, 0.0, %v12898_v46  ;;  %v12947_v0 = vsel %vm5752_vm1, %v12664_v26, %v6168_v57  ;;  %vm5777_vm4 = vcmp.gt.f32.partialorder %v12901_v54, 20.0 }
 0x7da   : > { %v7721_v60 = vpop.eup %7720  ;;  %v5984_v24 = vmul.f32 0.6931472, %v7719_v43  ;;  %7732 = vlog2.f32 %v5883_v49  ;;  %v6058_v59 = vadd.f32 1.0, %v6057_v14  ;;  %vm12956_vm5 = vcmp.lt.f32.partialorder %v6060_v52, 0.0004427343 }
 0x7db   : > { %v7723_v2 = vpop.eup %7722  ;;  %v6002_v35 = vmul.f32 0.6931472, %v7721_v60  ;;  %7734 = vpow2.f32 %v5852_v45  ;;  %v5868_v26 = vmul.f32 1.442695, %v5807_v16  ;;  %v5809_v49 = vsel %vm5777_vm4, 0.0, %v12901_v54 }
 0x7dc   : > { %v12950_v58 = vpop.eup %7724  ;;  %v5990_v39 = vsel %vm12911_vm12, %v5987_v25, %v5984_v24  ;;  %v6072_v41 = vadd.f32 1.0, %v7723_v2  ;;  %v5886_v55 = vmul.f32 -0.5, %v12560_v4  ;;  %v6075_v14 = vmul.f32 -0.5, %v7723_v2 }
 0x7dd   : > { %v6174_v27 = vmul.f32 0.01, %v5990_v39  ;;  %v6008_v18 = vsel %vm12917_vm7, %v6005_v56, %v6002_v35  ;;  %v6078_v56 = vand.u32 2147483647, %v7723_v2  ;;  %v6059_v1 = vmul.f32 %v7715_v17, %v6058_v59 }
 0x7de   : > { %v6176_v60 = vmul.f32 0.01, %v6008_v18  ;;  %7736 = vlog2.f32 %v6072_v41  ;;  %v5955_v10 = vadd.f32 1.0, %v12591_v22  ;;  %v5901_v31 = vadd.f32 1.0, %v12597_v48 }
 0x7df   : > { %v12967_v45 = vsel %vm5758_vm8, %v12751_v44, %v6174_v27  ;;  %7738 = vpow2.f32 %v5856_v50  ;;  %v5872_v44 = vmul.f32 1.442695, %v5809_v49  ;;  %v5887_v57 = vadd.f32 1.0, %v5886_v55 }
 0x7e0   : > { %v12974_v42 = vsel %vm5760_vm10, %v12755_v11, %v6176_v60  ;;  %v7727_v5 = vpop.eup %7726  ;;  %7740 = vpow2.f32 %v5868_v26  ;;  %v5889_v25 = vand.u32 2147483647, %v12560_v4  ;;  %v6076_v7 = vadd.f32 1.0, %v6075_v14 }
 0x7e1   : > { %v6056_v50 = vmul.f32 0.6931472, %v7727_v5  ;;  %7742 = vlog2.f32 %v5955_v10  ;;  %vm12981_vm7 = vcmp.lt.f32.partialorder %v6078_v56, 0.0004427343  ;;  %v5958_v17 = vmul.f32 -0.5, %v12591_v22 }
 0x7e2   : > { %v7729_v43 = vpop.eup %7728  ;;  %7744 = vlog2.f32 %v5901_v31  ;;  %v5961_v59 = vand.u32 2147483647, %v12591_v22  ;;  %v5904_v26 = vmul.f32 -0.5, %v12597_v48  ;;  %v5973_v60 = vadd.f32 1.0, %v12619_v3 }
 0x7e3   : > { %v7731_v24 = vpop.eup %7730  ;;  %v6062_v16 = vsel %vm12956_vm5, %v6059_v1, %v6056_v50  ;;  %v6126_v35 = vadd.f32 1.0, %v7729_v43  ;;  %v6129_v39 = vmul.f32 -0.5, %v7729_v43  ;;  %v6132_v27 = vand.u32 2147483647, %v7729_v43 }
 0x7e4   : > { %v7733_v41 = vpop.eup %7732  ;;  %v6144_v18 = vadd.f32 1.0, %v7731_v24  ;;  %v6182_v55 = vmul.f32 0.01, %v6062_v16  ;;  %v6147_v14 = vmul.f32 -0.5, %v7731_v24  ;;  %v6150_v61 = vand.u32 2147483647, %v7731_v24 }
 0x7e5   : > { %v12991_v49 = vpop.eup %7734  ;;  %7746 = vlog2.f32 %v6126_v35  ;;  %v5885_v56 = vmul.f32 0.6931472, %v7733_v41  ;;  %v6130_v10 = vadd.f32 1.0, %v6129_v39  ;;  %v5888_v1 = vmul.f32 %v12560_v4, %v5887_v57 }
 0x7e6   : > { %7748 = vlog2.f32 %v6144_v18  ;;  %v6077_v31 = vmul.f32 %v7723_v2, %v6076_v7  ;;  %vm12994_vm1 = vcmp.lt.f32.partialorder %v5889_v25, 0.0004427343  ;;  %v5959_v29 = vadd.f32 1.0, %v5958_v17 }
 0x7e7   : > { %7750 = vpow2.f32 %v5872_v44  ;;  %v5891_v16 = vsel %vm12994_vm1, %v5888_v1, %v5885_v56  ;;  %vm13002_vm10 = vcmp.lt.f32.partialorder %v5961_v59, 0.0004427343  ;;  %v5907_v4 = vand.u32 2147483647, %v12597_v48 }
 0x7e8   : > { %v7737_v5 = vpop.eup %7736  ;;  %v13010_v2 = vsel %vm5766_vm14, %v12789_v40, %v6182_v55  ;;  %vm13012_vm8 = vcmp.lt.f32.partialorder %v6132_v27, 0.0004427343  ;;  %v6148_v57 = vadd.f32 1.0, %v6147_v14  ;;  %v5905_v25 = vadd.f32 1.0, %v5904_v26 }
 0x7e9   : > { %v12998_v52 = vpop.eup %7738  ;;  %v6074_v54 = vmul.f32 0.6931472, %v7737_v5  ;;  %7752 = vlog2.f32 %v5973_v60  ;;  %v6131_v39 = vmul.f32 %v7729_v43, %v6130_v10  ;;  %vm13020_vm12 = vcmp.lt.f32.partialorder %v6150_v61, 0.0004427343 }
 0x7ea   : > { %v13016_v7 = vpop.eup %7740  ;;  %v5976_v40 = vmul.f32 -0.5, %v12619_v3  ;;  %v6027_v13 = vadd.f32 1.0, %v12693_v53  ;;  %v5960_v27 = vmul.f32 %v12591_v22, %v5959_v29  ;;  %v6163_v18 = vmul.f32 0.01, %v5891_v16 }
 0x7eb   : > { %v6080_v17 = vsel %vm12981_vm7, %v6077_v31, %v6074_v54  ;;  %v7743_v41 = vpop.eup %7742  ;;  %v5979_v26 = vand.u32 2147483647, %v12619_v3  ;;  %v6099_v60 = vadd.f32 1.0, %v12740_v51  ;;  %v6030_v43 = vmul.f32 -0.5, %v12693_v53 }
 0x7ec   : > { %v7745_v55 = vpop.eup %7744  ;;  %v6184_v11 = vmul.f32 0.01, %v6080_v17  ;;  %v5957_v54 = vmul.f32 0.6931472, %v7743_v41  ;;  %7754 = vlog2.f32 %v6027_v13  ;;  %v6149_v14 = vmul.f32 %v7731_v24, %v6148_v57  ;;  %v14285_v57 = vld [vmem:[#allocation33_spill] sm:$0xff] }
 0x7ed   : > { %v5906_v56 = vmul.f32 %v12597_v48, %v5905_v25  ;;  %vm13031_vm14 = vcmp.lt.f32.partialorder %v5907_v4, 0.0004427343  ;;  %7756 = vlog2.f32 %v6099_v60  ;;  %v5903_v29 = vmul.f32 0.6931472, %v7745_v55 }
 0x7ee   : > { %v5963_v22 = vsel %vm13002_vm10, %v5960_v27, %v5957_v54  ;;  %v5977_v61 = vadd.f32 1.0, %v5976_v40  ;;  %v6102_v1 = vmul.f32 -0.5, %v12740_v51  ;;  %v6195_v24 = vsel %vm5747_vm15, %v12413_v38, %v6163_v18  ;;  %v14276_v38 = vld [vmem:[#allocation40_spill] sm:$0xff] }
 0x7ef   : > { %v7747_v5 = vpop.eup %7746  ;;  %v6171_v31 = vmul.f32 0.01, %v5963_v22  ;;  %v6033_v48 = vand.u32 2147483647, %v12693_v53  ;;  %v6045_v50 = vadd.f32 1.0, %v12723_v28  ;;  %v13046_v35 = vsel %vm5768_vm9, %v12841_v63, %v6184_v11 }
 0x7f0   : > { %v7749_v16 = vpop.eup %7748  ;;  %v6128_v4 = vmul.f32 0.6931472, %v7747_v5  ;;  %vm13048_vm5 = vcmp.lt.f32.partialorder %v5979_v26, 0.0004427343  ;;  %v6031_v25 = vadd.f32 1.0, %v6030_v43  ;;  %v6103_v41 = vadd.f32 1.0, %v6102_v1 }
 0x7f1   : > { %v13052_v17 = vpop.eup %7750  ;;  %v6146_v36 = vmul.f32 0.6931472, %v7749_v16  ;;  %v6203_v13 = vsel %vm5755_vm3, %v14276_v38, %v6171_v31  ;;  %7758 = vlog2.f32 %v6045_v50  ;;  %v5909_v27 = vsel %vm13031_vm14, %v5906_v56, %v5903_v29  ;;  %v14283_v16 = vld [vmem:[#allocation28_spill] sm:$0xff] }
 0x7f2   : > { %v6134_v34 = vsel %vm13012_vm8, %v6131_v39, %v6128_v4  ;;  %v6934_v63 = vpack.c.bf16 %v6203_v13, %v6195_v24  ;;  %v5978_v18 = vmul.f32 %v12619_v3, %v5977_v61  ;;  %vm13064_vm15 = vcmp.lt.f32.partialorder %v6033_v48, 0.0004427343 }
 0x7f3   : > { %v7753_v26 = vpop.eup %7752  ;;  %v6190_v60 = vmul.f32 0.01, %v6134_v34  ;;  %v6152_v55 = vsel %vm13020_vm12, %v6149_v14, %v6146_v36  ;;  %v6048_v54 = vmul.f32 -0.5, %v12723_v28  ;;  %v6032_v39 = vmul.f32 %v12693_v53, %v6031_v25  ;;  %v14280_v14 = vld [vmem:[#allocation36_spill] sm:$0xff] }
 0x7f4   : > { %v6192_v43 = vmul.f32 0.01, %v6152_v55  ;;  %6935 = vmatprep.subr.bf16.mxu0 %v6934_v63  ;;  %v5975_v44 = vmul.f32 0.6931472, %v7753_v26  ;;  %v6117_v56 = vadd.f32 1.0, %v12765_v9  ;;  %v14281_v10 = vpack.c.bf16 %v12660_v19, %v14280_v14  ;;  %v14286_v25 = vld [vmem:[#allocation12_spill] sm:$0xff] }
 0x7f5   : > { %v13074_v3 = vsel %vm5774_vm6, %v12866_v6, %v6190_v60  ;;  %v6165_v59 = vmul.f32 0.01, %v5909_v27  ;;  %v6104_v22 = vmul.f32 %v12740_v51, %v6103_v41  ;;  %v6105_v29 = vand.u32 2147483647, %v12740_v51  ;;  %v14288_v60 = vld [vmem:[#allocation20_spill] sm:$0xff]  ;;  %v14289_v55 = vld [vmem:[#allocation19_spill] sm:$0xff] }
 0x7f6   : > { %6937 = vmatpush1.bf16.msra.mxu0 %v14281_v10  ;;  %v7755_v61 = vpop.eup %7754  ;;  %v6956_v53 = vpack.c.bf16 %v13074_v3, %v13010_v2  ;;  %v13086_v1 = vsel %vm5776_vm13, %v12870_v33, %v6192_v43  ;;  %v5981_v6 = vsel %vm13048_vm5, %v5978_v18, %v5975_v44  ;;  %7760 = vlog2.f32 %v6117_v56  ;;  %v14282_v33 = vld [vmem:[#allocation16_spill] sm:$0xff]  ;;  %v14295_v56 = vld [vmem:[#allocation23_spill] sm:$0xff] }
 0x7f7   : > { %v7757_v32 = vpop.eup %7756  ;;  %v6964_v19 = vpack.c.bf16 %v13086_v1, %v13046_v35  ;;  %v6173_v5 = vmul.f32 0.01, %v5981_v6  ;;  %v6029_v31 = vmul.f32 0.6931472, %v7755_v61  ;;  %v6049_v51 = vadd.f32 1.0, %v6048_v54 }
 0x7f8   : > { %v6101_v24 = vmul.f32 0.6931472, %v7757_v32  ;;  %v6051_v48 = vand.u32 2147483647, %v12723_v28  ;;  %v6120_v50 = vmul.f32 -0.5, %v12765_v9  ;;  %v5919_v23 = vadd.f32 1.0, %v12851_v8 }
 0x7f9   : > { %vm14284_vm3 = vcmp.gt.f32.partialorder %v14283_v16, 20.0  ;;  %vm14287_vm6 = vcmp.gt.f32.partialorder %v14286_v25, 20.0  ;;  %v6035_v38 = vsel %vm13064_vm15, %v6032_v39, %v6029_v31  ;;  %vm6106_vm13 = vcmp.lt.f32.partialorder %v6105_v29, 0.0004427343  ;;  %v14318_v25 = vld [vmem:[#allocation37_spill] sm:$0xff] }
 0x7fa   : > { %v6197_v4 = vsel %vm14284_vm3, %v14282_v33, %v6165_v59  ;;  %v6205_v36 = vsel %vm14287_vm6, %v14285_v57, %v6173_v5  ;;  %v6107_v13 = vsel %vm6106_vm13, %v6104_v22, %v6101_v24  ;;  %v6179_v41 = vmul.f32 0.01, %v6035_v38  ;;  %v13129_v5 = vld [vmem:[%s13306_s14] sm:$0x1] }
 0x7fb   : > { %v6942_v40 = vpack.c.bf16 %v6205_v36, %v6197_v4  ;;  %7762 = vlog2.f32 %v5919_v23  ;;  %v7759_v34 = vpop.eup %7758  ;;  %v6187_v63 = vmul.f32 0.01, %v6107_v13  ;;  %v6050_v27 = vmul.f32 %v12723_v28, %v6049_v51  ;;  %v14294_v28 = vld [vmem:[#allocation31_spill] sm:$0xff] }
 0x7fc   : > { %v5922_v18 = vmul.f32 -0.5, %v12851_v8  ;;  %v5991_v26 = vadd.f32 1.0, %v12924_v12  ;;  %vm14290_vm9 = vcmp.gt.f32.partialorder %v14289_v55, 20.0  ;;  %v6047_v11 = vmul.f32 0.6931472, %v7759_v34 }
 0x7fd   : > { %6943 = vmatprep.subr.bf16.mxu1 %v6942_v40  ;;  %v6211_v54 = vsel %vm14290_vm9, %v14288_v60, %v6179_v41  ;;  %vm13109_vm7 = vcmp.lt.f32.partialorder %v6051_v48, 0.0004427343  ;;  %v6121_v44 = vadd.f32 1.0, %v6120_v50  ;;  %v14293_v39 = vpack.c.bf16 %v12720_v37, %v12711_v30  ;;  %v14303_v40 = vld [vmem:[#allocation27_spill] sm:$0xff] }
 0x7fe   : > { %vm14296_vm1 = vcmp.gt.f32.partialorder %v14295_v56, 20.0  ;;  %7764 = vlog2.f32 %v5991_v26  ;;  %v5994_v14 = vmul.f32 -0.5, %v12924_v12  ;;  %v5937_v10 = vadd.f32 1.0, %v12903_v47  ;;  %v14308_v26 = vld [vmem:[#allocation32_spill] sm:$0xff] }
 0x7ff   : > { %6945 = vmatpush1.bf16.msra.mxu1 %v14293_v39  ;;  %v6219_v59 = vsel %vm14296_vm1, %v14294_v28, %v6187_v63  ;;  %v6053_v29 = vsel %vm13109_vm7, %v6050_v27, %v6047_v11  ;;  %v6123_v61 = vand.u32 2147483647, %v12765_v9  ;;  %v5923_v6 = vadd.f32 1.0, %v5922_v18  ;;  %v14307_v18 = vld [vmem:[#allocation26_spill] sm:$0xff] }
 0x800   : > { %v6938_v22 = vpack.c.bf16 %v6219_v59, %v6211_v54  ;;  %v5925_v32 = vand.u32 2147483647, %v12851_v8  ;;  %v5997_v37 = vand.u32 2147483647, %v12924_v12  ;;  %7766 = vlog2.f32 %v5937_v10  ;;  %v7761_v30 = vpop.eup %7760 }
 0x801   : > { %v6009_v31 = vadd.f32 1.0, %v12950_v58  ;;  %v6119_v51 = vmul.f32 0.6931472, %v7761_v30  ;;  %v6122_v24 = vmul.f32 %v12765_v9, %v6121_v44  ;;  %v6181_v48 = vmul.f32 0.01, %v6053_v29  ;;  %v14319_v9 = vld [vmem:[#allocation11_spill] sm:$0xff] }
 0x802   : > { %6939 = vmatprep.subr.bf16.mxu0 %v6938_v22  ;;  %v14297_v50 = vpack.c.bf16 %v12804_v15, %v12735_v20  ;;  %v5995_v23 = vadd.f32 1.0, %v5994_v14  ;;  %vm6124_vm10 = vcmp.lt.f32.partialorder %v6123_v61, 0.0004427343  ;;  %v5940_v33 = vmul.f32 -0.5, %v12903_v47  ;;  %v14312_v61 = vld [vmem:[#allocation18_spill] sm:$0xff] }
 0x803   : > { %7768 = vlog2.f32 %v6009_v31  ;;  %v6063_v16 = vadd.f32 1.0, %v12991_v49  ;;  %v6125_v4 = vsel %vm6124_vm10, %v6122_v24, %v6119_v51  ;;  %v5924_v57 = vmul.f32 %v12851_v8, %v5923_v6  ;;  %v14304_v8 = vld [vmem:[#allocation35_spill] sm:$0xff] }
 0x804   : > { %6941 = vmatpush1.bf16.msra.mxu0 %v14297_v50  ;;  %vm13139_vm8 = vcmp.lt.f32.partialorder %v5925_v32, 0.0004427343  ;;  %vm13143_vm12 = vcmp.lt.f32.partialorder %v5997_v37, 0.0004427343  ;;  %v6189_v15 = vmul.f32 0.01, %v6125_v4  ;;  %v5996_v34 = vmul.f32 %v12924_v12, %v5995_v23 }
 0x805   : > { %v7763_v20 = vpop.eup %7762  ;;  %vm14302_vm14 = vcmask 261120   ;;  %v6012_v36 = vmul.f32 -0.5, %v12950_v58  ;;  %7770 = vlog2.f32 %v6063_v16  ;;  %v6135_v38 = vadd.f32 1.0, %v13016_v7  ;;  %v14316_v4 = vld [vmem:[#allocation39_spill] sm:$0xff] }
 0x806   : > { %vm14305_vm5 = vcmp.gt.f32.partialorder %v14304_v8, 20.0  ;;  %v5921_v41 = vmul.f32 0.6931472, %v7763_v20  ;;  %v5943_v63 = vand.u32 2147483647, %v12903_v47  ;;  %v14306_v27 = vmov 0.0   ;;  %vm14314_vm6 = vmmov %vm14302_vm14 }
 0x807   : > { %6780 = vmatmul.mubr.msk.f32.vlgmr.msra.gmra.mrb[92].mxu0 %vm14302_vm14, %v13129_v5  ;;  %v6213_v13 = vsel %vm14305_vm5, %v14303_v40, %v6181_v48  ;;  %vm14309_vm15 = vcmp.gt.f32.partialorder %v14308_v26, 20.0  ;;  %v5941_v55 = vadd.f32 1.0, %v5940_v33  ;;  %7772 = vlog2.f32 %v6135_v38 }
 0x808   : > { %6446 = vmatprep.mubr.f32.mxu0 %v14306_v27  ;;  %v6221_v60 = vsel %vm14309_vm15, %v14307_v18, %v6189_v15  ;;  %v6081_v54 = vadd.f32 1.0, %v12998_v52  ;;  %v7765_v11 = vpop.eup %7764  ;;  %v5927_v44 = vsel %vm13139_vm8, %v5924_v57, %v5921_v41  ;;  %v6015_v39 = vand.u32 2147483647, %v12950_v58 }
 0x809   : > { %v6946_v43 = vpack.c.bf16 %v6221_v60, %v6213_v13  ;;  %v6066_v12 = vmul.f32 -0.5, %v12991_v49  ;;  %v5993_v28 = vmul.f32 0.6931472, %v7765_v11  ;;  %v6013_v56 = vadd.f32 1.0, %v6012_v36 }
 0x80a   : > { %v6138_v59 = vmul.f32 -0.5, %v13016_v7  ;;  %7774 = vlog2.f32 %v6081_v54  ;;  %v7767_v14 = vpop.eup %7766  ;;  %v6167_v10 = vmul.f32 0.01, %v5927_v44  ;;  %vm13166_vm3 = vcmp.lt.f32.partialorder %v5943_v63, 0.0004427343 }
 0x80b   : > { %6947 = vmatprep.subr.bf16.mxu1 %v6946_v43  ;;  %v6153_v29 = vadd.f32 1.0, %v13052_v17  ;;  %v14313_v6 = vpack.c.bf16 %v12832_v62, %v14312_v61  ;;  %v5999_v32 = vsel %vm13143_vm12, %v5996_v34, %v5993_v28  ;;  %v5939_v37 = vmul.f32 0.6931472, %v7767_v14 }
 0x80c   : > { %v5942_v30 = vmul.f32 %v12903_v47, %v5941_v55  ;;  %v6069_v31 = vand.u32 2147483647, %v12991_v49  ;;  %v6175_v51 = vmul.f32 0.01, %v5999_v32  ;;  %v6067_v24 = vadd.f32 1.0, %v6066_v12  ;;  %v14315_v47 = vld [vmem:[#allocation41_spill] sm:$0xff] }
 0x80d   : > { %6949 = vmatpush1.bf16.msra.mxu1 %v14313_v6  ;;  %v6084_v48 = vmul.f32 -0.5, %v12998_v52  ;;  %7776 = vlog2.f32 %v6153_v29  ;;  %v7769_v50 = vpop.eup %7768  ;;  %v6014_v62 = vmul.f32 %v12950_v58, %v6013_v56  ;;  %v6139_v33 = vadd.f32 1.0, %v6138_v59  ;;  %v14327_v12 = vld [vmem:[#allocation34_spill] sm:$0xff]  ;;  %v14329_v56 = vld [vmem:[#allocation25_spill] sm:$0xff] }
 0x80e   : > { %v5945_v23 = vsel %vm13166_vm3, %v5942_v30, %v5939_v37  ;;  %v6141_v16 = vand.u32 2147483647, %v13016_v7  ;;  %vm14317_vm13 = vcmp.gt.f32.partialorder %v14316_v4, 20.0  ;;  %vm14320_vm9 = vcmp.gt.f32.partialorder %v14319_v9, 20.0  ;;  %v14330_v59 = vld [vmem:[#allocation42_spill] sm:$0xff]  ;;  %v14333_v30 = vld [vmem:[#allocation21_spill] sm:$0xff] }
 0x80f   : > { %v6199_v57 = vsel %vm14317_vm13, %v14315_v47, %v6167_v10  ;;  %v6207_v20 = vsel %vm14320_vm9, %v14318_v25, %v6175_v51  ;;  %v6011_v15 = vmul.f32 0.6931472, %v7769_v50  ;;  %v6156_v36 = vmul.f32 -0.5, %v13052_v17  ;;  %v7771_v38 = vpop.eup %7770  ;;  %v14338_v4 = vld [vmem:[#allocation15_spill] sm:$0xff] }
 0x810   : > { %6781 = vmatmul.mubr.msk.f32.vlgmr.msra.gmra.mrb[92].mxu1 %vm14314_vm6, %v13129_v5  ;;  %v6950_v40 = vpack.c.bf16 %v6207_v20, %v6199_v57  ;;  %vm6016_vm7 = vcmp.lt.f32.partialorder %v6015_v39, 0.0004427343  ;;  %v6169_v58 = vmul.f32 0.01, %v5945_v23  ;;  %vm13192_vm1 = vcmp.lt.f32.partialorder %v6069_v31, 0.0004427343 }
 0x811   : > { %6517 = vmatprep.mubr.f32.mxu1 %v14306_v27  ;;  %v6017_v13 = vsel %vm6016_vm7, %v6014_v62, %v6011_v15  ;;  %v6065_v41 = vmul.f32 0.6931472, %v7771_v38  ;;  %v6068_v34 = vmul.f32 %v12991_v49, %v6067_v24  ;;  %v6085_v63 = vadd.f32 1.0, %v6084_v48  ;;  %v7773_v18 = vpop.eup %7772  ;;  %v14326_v39 = vld [vmem:[#allocation29_spill] sm:$0xff] }
 0x812   : > { %6951 = vmatprep.subr.bf16.mxu0 %v6950_v40  ;;  %v6177_v26 = vmul.f32 0.01, %v6017_v13  ;;  %vm13198_vm10 = vcmp.lt.f32.partialorder %v6141_v16, 0.0004427343  ;;  %v6087_v55 = vand.u32 2147483647, %v12998_v52  ;;  %v14325_v54 = vpack.c.bf16 %v12967_v45, %v12939_v21 }
 0x813   : > { %v6071_v27 = vsel %vm13192_vm1, %v6068_v34, %v6065_v41  ;;  %v6137_v11 = vmul.f32 0.6931472, %v7773_v18  ;;  %v6140_v49 = vmul.f32 %v13016_v7, %v6139_v33  ;;  %v6157_v43 = vadd.f32 1.0, %v6156_v36  ;;  %v14335_v24 = vld [vmem:[#allocation17_spill] sm:$0xff] }
 0x814   : > { %6953 = vmatpush1.bf16.msra.mxu0 %v14325_v54  ;;  %v7775_v44 = vpop.eup %7774  ;;  %vm14328_vm8 = vcmp.gt.f32.partialorder %v14327_v12, 20.0  ;;  %vm14331_vm12 = vcmp.gt.f32.partialorder %v14330_v59, 20.0  ;;  %v6183_v10 = vmul.f32 0.01, %v6071_v27  ;;  %v6159_v21 = vand.u32 2147483647, %v13052_v17 }
 0x815   : > { %v6201_v28 = vsel %vm14328_vm8, %v14326_v39, %v6169_v58  ;;  %v6209_v14 = vsel %vm14331_vm12, %v14329_v56, %v6177_v26  ;;  %v6143_v22 = vsel %vm13198_vm10, %v6140_v49, %v6137_v11  ;;  %v6083_v29 = vmul.f32 0.6931472, %v7775_v44 }
 0x816   : > { %v6958_v45 = vpack.c.bf16 %v6209_v14, %v6201_v28  ;;  %v6086_v7 = vmul.f32 %v12998_v52, %v6085_v63  ;;  %v6191_v61 = vmul.f32 0.01, %v6143_v22  ;;  %vm6088_vm14 = vcmp.lt.f32.partialorder %v6087_v55, 0.0004427343 }
 0x817   : > { %v7777_v6 = vpop.eup %7776  ;;  %v14332_v37 = vpack.c.bf16 %v12974_v42, %v12947_v0  ;;  %v6215_v51 = vsel %vm5767_vm0, %v14333_v30, %v6183_v10  ;;  %v6158_v52 = vmul.f32 %v13052_v17, %v6157_v43  ;;  %vm6160_vm5 = vcmp.lt.f32.partialorder %v6159_v21, 0.0004427343  ;;  %v14336_v0 = vld [vmem:[#allocation24_spill] sm:$0xff]  ;;  %vm14340_vm0 = vmmov %vm14314_vm6 }
 0x818   : > { %6959 = vmatprep.subr.bf16.mxu1 %v6958_v45  ;;  %v6089_v32 = vsel %vm6088_vm14, %v6086_v7, %v6083_v29  ;;  %v6223_v48 = vsel %vm5775_vm2, %v14335_v24, %v6191_v61  ;;  %v6155_v50 = vmul.f32 0.6931472, %v7777_v6  ;;  %vm14341_vm2 = vmmov %vm14340_vm0  ;;  %v6233_v2 = vlaneseq }
 0x819   : > { %6961 = vmatpush1.bf16.msra.mxu1 %v14332_v37  ;;  %v6954_v23 = vpack.c.bf16 %v6223_v48, %v6215_v51  ;;  %v6185_v62 = vmul.f32 0.01, %v6089_v32  ;;  %v7852_v40 = vmov 1966171168  }
 0x81a   : > { %v6161_v33 = vsel %vm6160_vm5, %v6158_v52, %v6155_v50  ;;  %v6234_v17 = vshrl.u32 %v6233_v2, 7  ;;  %v6545_v58 = vunpack.c.l.s4 %v7852_v40 }
 0x81b   : > { %6955 = vmatprep.subr.bf16.mxu0 %v6954_v23  ;;  %v6193_v16 = vmul.f32 0.01, %v6161_v33  ;;  %v6217_v47 = vsel %vm5769_vm11, %v14336_v0, %v6185_v62 }
 0x81c   : > { %6957 = vmatpush1.bf16.msra.mxu0 %v6956_v53  ;;  %v6235_v3 = vsub.s32 0, %v6234_v17  ;;  %v6231_v53 = vpop.permute.xlu1 %6230  ;;  %v6546_v34 = vunpack.c.0.s8 %v6545_v58 }
 0x81d   : > { %v6225_v57 = vsel %vm5777_vm4, %v14338_v4, %v6193_v16 }
 0x81e   : > { %v6962_v25 = vpack.c.bf16 %v6225_v57, %v6217_v47  ;;  %v6236_v9 = vrot.slane %v6231_v53, %v6235_v3  ;;  %v6549_v63 = vsub.s32 %v6546_v34, %v6234_v17 }
 0x81f   : > { %6782 = vmatmul.mubr.msk.f32.vlgmr.msra.gmra.mrb[94].mxu0 %vm14340_vm0, %v13129_v5 }
 0x820   : > { %6963 = vmatprep.subr.bf16.mxu1 %v6962_v25 }
 0x821   : > { %6965 = vmatpush1.bf16.msra.mxu1 %v6964_v19 }
 0x824   : > { %6783 = vmatmul.mubr.msk.f32.vlgmr.msra.gmra.mrb[94].mxu1 %vm14341_vm2, %v13129_v5 }
 0x8da   : > { %v6306_v20 = vpop.f32.mrb[92].mxu0 }
 0x8db   : > { %v6307_v15 = vadd.f32 %v6306_v20, %v6236_v9  ;;  %v6308_v36 = vpop.f32.mrb[93].mxu0 }
 0x8dc   : > { %v6309_v38 = vadd.f32 %v6308_v36, %v6236_v9 }
 0x8dd   : > { %v6524_v8 = vand.u32 2147483647, %v6307_v15 }
 0x8de   : > { %v6525_v13 = vand.u32 2147483647, %v6309_v38 }
 0x8e0   : > { %v6540_v41 = vcombine.low %v6524_v8, %v6525_v13 }
 0x8e2   : > { %v6550_v60 = vrot.slane %v6540_v41, %v6549_v63 }
 0x8e3   : > { %v6377_v35 = vpop.f32.mrb[92].mxu1 }
 0x8e4   : > { %v6378_v1 = vadd.f32 %v6377_v35, %v6236_v9  ;;  %v6379_v19 = vpop.f32.mrb[93].mxu1 }
 0x8e5   : > { %v6380_v5 = vadd.f32 %v6379_v19, %v6236_v9 }
 0x8e6   : > { %v6526_v18 = vand.u32 2147483647, %v6378_v1 }
 0x8e7   : > { %v6527_v26 = vand.u32 2147483647, %v6380_v5 }
 0x8e9   : > { %v6541_v55 = vcombine.low %v6526_v18, %v6527_v26 }
 0x8eb   : > { %v6557_v54 = vrot.slane %v6541_v55, %v6549_v63 }
 0x8ed   : > { %v6572_v27 = vcombine.low %v6550_v60, %v6557_v54 }
 0x8ef   : > { %v6580_v6 = vrot.slane %v6572_v27, %v6549_v63 }
 0x8f2   : > { %v6448_v11 = vpop.f32.mrb[94].mxu0 }
 0x8f3   : > { %v6449_v49 = vadd.f32 %v6448_v11, %v6236_v9  ;;  %v6450_v43 = vpop.f32.mrb[95].mxu0 }
 0x8f4   : > { %v6451_v44 = vadd.f32 %v6450_v43, %v6236_v9 }
 0x8f5   : > { %v6528_v39 = vand.u32 2147483647, %v6449_v49 }
 0x8f6   : > { %v6529_v12 = vand.u32 2147483647, %v6451_v44 }
 0x8f7   : > { %v6519_v28 = vpop.f32.mrb[94].mxu1 }
 0x8f8   : > { %v6520_v56 = vadd.f32 %v6519_v28, %v6236_v9  ;;  %v6542_v59 = vcombine.low %v6528_v39, %v6529_v12  ;;  %v6521_v14 = vpop.f32.mrb[95].mxu1 }
 0x8f9   : > { %v6522_v10 = vadd.f32 %v6521_v14, %v6236_v9 }
 0x8fa   : > { %v6530_v21 = vand.u32 2147483647, %v6520_v56  ;;  %v6564_v22 = vrot.slane %v6542_v59, %v6549_v63 }
 0x8fb   : > { %v6531_v45 = vand.u32 2147483647, %v6522_v10 }
 0x8fd   : > { %v6543_v29 = vcombine.low %v6530_v21, %v6531_v45 }
 0x8ff   : > { %v6571_v7 = vrot.slane %v6543_v29, %v6549_v63 }
 0x901   : > { %v6573_v61 = vcombine.low %v6564_v22, %v6571_v7 }
 0x903   : > { %v6587_v32 = vrot.slane %v6573_v61, %v6549_v63 }
 0x905   : > { %v6588_v37 = vcombine.low %v6580_v6, %v6587_v32 }
 0x907   : > { %6590 = vst [vmem:[%s517_s19] sm:$0xff] %v6588_v37 }
 0x908   : > { %7799 = shalt.err (!%p7796_p3)
}
 0x909   : > { %s7800_s28 = scalar_lea.hbm %s13250_s20, 128  ;;  %s7804_s19 = scalar_lea.hbm %s13308_s16, 256 }
 0x90a   : > { %p7801_p4 = scmp.ne.s32.totalorder %s13250_s20, %s7800_s28  ;;  %p7805_p9 = scmp.lt.u32.totalorder %s13250_s20, %s13308_s16 }
 0x90b   : > { %p7806_p10 = scmp.lt.u32.totalorder %s7804_s19, %s7800_s28  ;;  %p7808_p12 = scmp.lt.u32.totalorder %s7800_s28, %s13250_s20 }
 0x90c   : > { %p7802_p7 = pnand %p7801_p4, %p7980_p5 }
 0x90d   : > { %p7807_p11 = por %p7806_p10, %p7805_p9 }
 0x90e   : > { %p7803_p8 = pneg %p7802_p7 }
 0x90f   : > { %p7809_p13 = por %p7808_p12, %p7807_p11 }
 0x911   : > { %p7810_p0 = pnand %p7809_p13, %p7803_p8 }
 0x913   : > { %7813 = shalt.err (!%p7810_p0)
}
 0x914   : > { %6998 = dma.vmem_to_hbm [thread:$0]  (%p7980_p5), %s13252_s22, 128, %s13250_s20, %s6592_s21  }
 0x915 PF: > { %s14342_s27 = sld [smem:[#allocation6_spill]]  ;;  %p7004_p1 = scmp.ge.s32.totalorder %s7848_s26, 2 }
 0x917   : > { %p7001_p2 = pnand %p7004_p1, %p7984_p6 }
 0x91b   : > { %s6618_s23 = sand.u32 1, %s14342_s27  }
 0x91c   : > { %s6619_s25 = scalar_lea.sflag [#allocation4], %s6618_s23 }
 0x91d   : > { %7831 = dma.done.wait (!%p7001_p2), %s6619_s25, 128  }
 0x91e   : > { %7833 = vsyncadd (!%p7001_p2), %s6619_s25, 4294967168  ;;  %s14344_s26 = sld [smem:[#allocation8_spill]]  ;;  %s14345_s28 = sld [smem:[#allocation7_spill]] }
 0x91f   : > { %s14346_s25 = sld [smem:[#allocation9_spill]]  ;;  %s14347_s23 = smov %s7840_s24 }
 0x924   : > { %p28_p3 = scmp.ge.s32.totalorder %s14344_s26, 4   ;;  %s14348_s24 = smov %s14345_s28 }
 0x926   :  { %30 = sbr.rel (!%p28_p3) target bundleno = 6 (0x6), region = 119 }
 0x92d   :  { %6624 = vsyncpa [#allocation4], 1 }
 0x92e   :  { %6626 = vsyncpa [#allocation4 + $0x1], 1 }

</bundles_post_ra>
